<compile_context>
chip_gen: v5e
topology: v5e:2x2
jax: 0.10.0
libtpu: 0.0.40
codegen_flags: <defaults>
</compile_context>

<pallas_src>
import functools

import jax
import jax.numpy as jnp
from jax.experimental import pallas as pl
from jax.experimental.pallas import tpu as pltpu

NUM_CLASSES = 13


def _round_up(x, m):
    return (x + m - 1) // m * m


def _pick_tm(M, cap=1024):
    """Largest tile (<= cap, multiple of 8) that divides M exactly; else pad."""
    for cand in (1024, 512, 256, 128, 64, 32, 16, 8):
        if cand <= cap and M % cand == 0:
            return cand
    return max(8, min(cap, _round_up(M, 8)))


# ---------------------------------------------------------------------------
# Fused matmul + bias + activation:
#   out[m, n] = act( a[m, :] @ b[:, n] + bias[n] )
# Single-step contraction (no reduction grid axis): the whole K (= kh*kw*Cin
# after the tap fold) is consumed by one jnp.dot so the MXU accumulates
# internally (MRB on v7x) and no VMEM f32 scratch round trip is needed.
# Grid = (M tiles, N tiles), both "parallel".
# ---------------------------------------------------------------------------
def _mm_bias_act_kernel(a_ref, b_ref, bias_ref, o_ref, *, act):
    acc = jnp.dot(a_ref[...], b_ref[...], preferred_element_type=jnp.float32)
    acc = acc + bias_ref[...]
    if act == "silu":
        acc = acc * jax.nn.sigmoid(acc)
    o_ref[...] = acc.astype(o_ref.dtype)


def matmul_bias_act(a, b, bias, *, act="none", out_dtype=jnp.bfloat16,
                    tm_cap=1024, tn_cap=256):
    """a: (M, K); b: (K, N); bias: (N,) -> (Mp, Np) padded output (caller
    slices / carries the padding)."""
    M, K = a.shape
    Kb, N = b.shape
    assert K == Kb

    Kp = _round_up(K, 16)                      # bf16 sublane packing
    tn = min(tn_cap, _round_up(N, 128))        # lane-dense output stores
    Np = _round_up(N, tn)
    tm = _pick_tm(M, tm_cap)
    Mp = _round_up(M, tm)

    # Megacore (v7x has 2 TCs): try to keep >= 2 parallel tiles.
    gm, gn = Mp // tm, Np // tn
    if gm * gn < 2 and tm >= 16 and M % (tm // 2) == 0:
        tm //= 2
        Mp = _round_up(M, tm)
        gm = Mp // tm

    a = a.astype(jnp.bfloat16)
    if (Mp, Kp) != (M, K):
        a = jnp.pad(a, ((0, Mp - M), (0, Kp - K)))
    b = b.astype(jnp.bfloat16)
    if (Kp, Np) != (K, N):
        b = jnp.pad(b, ((0, Kp - K), (0, Np - N)))
    bias_p = bias.astype(jnp.float32)
    if Np != N:
        bias_p = jnp.pad(bias_p, (0, Np - N))
    bias_p = bias_p.reshape(1, Np)

    out_itemsize = jnp.dtype(out_dtype).itemsize
    cost = pl.CostEstimate(
        flops=int(2 * Mp * Np * Kp),
        transcendentals=int(Mp * Np) if act == "silu" else 0,
        # A is re-read once per N tile, B once per M tile.
        bytes_accessed=int(Mp * Kp * 2 * gn + Kp * Np * 2 * gm
                           + Np * 4 * gm + Mp * Np * out_itemsize),
    )

    out = pl.pallas_call(
        functools.partial(_mm_bias_act_kernel, act=act),
        out_shape=jax.ShapeDtypeStruct((Mp, Np), out_dtype),
        grid=(gm, gn),
        in_specs=[
            pl.BlockSpec((tm, Kp), lambda i, j: (i, 0)),
            pl.BlockSpec((Kp, tn), lambda i, j: (0, j)),
            pl.BlockSpec((1, tn), lambda i, j: (0, j)),
        ],
        out_specs=pl.BlockSpec((tm, tn), lambda i, j: (i, j)),
        compiler_params=pltpu.CompilerParams(
            dimension_semantics=("parallel", "parallel"),
            vmem_limit_bytes=32 * 1024 * 1024,
        ),
        cost_estimate=cost,
    )(a, b, bias_p)
    return out  # (Mp, Np), channel-padded; caller keeps / slices as needed.


# ---------------------------------------------------------------------------
# Conv2d: taps are folded into the contraction dim (K = kh*kw*Cin) and the
# im2col buffer is produced by ONE fused XLA gather (slice of padded channels
# + spatial pad + strided slices + concat + bf16 cast), then fed to the fused
# matmul.  Output keeps lane-padded channels; the next layer's channel slice
# fuses into its own tap gather.
# ---------------------------------------------------------------------------
def conv2d(x_nhwc, cin, w, b, *, stride, act, pad_value=0.0,
           out_dtype=jnp.bfloat16):
    kh, kw, wc, cout = w.shape
    assert wc == cin
    Nb, H, W_, Cp = x_nhwc.shape
    assert Cp >= cin
    x = x_nhwc if Cp == cin else x_nhwc[..., :cin]   # fuses into gather below

    pad = (kh - 1) // 2
    Hout = (H + 2 * pad - kh) // stride + 1
    Wout = (W_ + 2 * pad - kw) // stride + 1
    if pad > 0:
        xp = jnp.pad(x, ((0, 0), (pad, pad), (pad, pad), (0, 0)),
                     constant_values=pad_value)
    else:
        xp = x

    M = Nb * Hout * Wout
    taps = []
    for i in range(kh):
        for j in range(kw):
            taps.append(
                xp[:, i:i + stride * Hout:stride,
                      j:j + stride * Wout:stride, :].reshape(M, cin))
    a = taps[0] if len(taps) == 1 else jnp.concatenate(taps, axis=-1)
    bmat = w.reshape(kh * kw * cin, cout)            # (kh*kw*Cin, Cout)

    out = matmul_bias_act(a, bmat, b, act=act, out_dtype=out_dtype)
    if out.shape[0] != M:
        out = out[:M]
    out = out.reshape(Nb, Hout, Wout, out.shape[-1])  # channels stay padded
    return out, cout


# ---------------------------------------------------------------------------
# Bilinear upsample (align_corners=False, PyTorch semantics).
# One grid step per image: all 13 class planes computed as Wh @ F @ Ww^T with
# bf16 MXU dots, f32 accumulation, lane-dense W output.
# ---------------------------------------------------------------------------
def bilinear_matrix(out_size, in_size):
    if in_size == 1:
        return jnp.ones((out_size, 1), jnp.float32)
    scale = in_size / out_size
    dst = jnp.arange(out_size, dtype=jnp.float32)
    src = jnp.clip((dst + 0.5) * scale - 0.5, 0.0, in_size - 1.0)
    i0 = jnp.floor(src).astype(jnp.int32)
    i1 = jnp.minimum(i0 + 1, in_size - 1)
    w1 = src - i0.astype(jnp.float32)
    w0 = 1.0 - w1
    Wm = jnp.zeros((out_size, in_size), jnp.float32)
    Wm = Wm.at[jnp.arange(out_size), i0].add(w0)
    Wm = Wm.at[jnp.arange(out_size), i1].add(w1)
    return Wm


def _bilinear_kernel(f_ref, wh_ref, wwt_ref, o_ref, *, n_planes):
    wh = wh_ref[...]          # (H, hfp)   bf16
    wwt = wwt_ref[...]        # (wfp, W)   bf16
    for c in range(n_planes):                         # static unroll (13)
        t = jnp.dot(f_ref[0, c], wwt,
                    preferred_element_type=jnp.float32)        # (hfp, W)
        o_ref[0, c] = jnp.dot(wh, t.astype(jnp.bfloat16),
                              preferred_element_type=jnp.float32)


def bilinear_upsample(x_nchw, H, W):
    Nb, C, hf, wf = x_nchw.shape
    hfp = _round_up(hf, 8)
    wfp = _round_up(wf, 8)

    f = x_nchw.astype(jnp.bfloat16)
    if (hfp, wfp) != (hf, wf):
        f = jnp.pad(f, ((0, 0), (0, 0), (0, hfp - hf), (0, wfp - wf)))
    wh = jnp.pad(bilinear_matrix(H, hf),
                 ((0, 0), (0, hfp - hf))).astype(jnp.bfloat16)     # (H, hfp)
    wwt = jnp.pad(bilinear_matrix(W, wf).T,
                  ((0, wfp - wf), (0, 0))).astype(jnp.bfloat16)    # (wfp, W)

    out = pl.pallas_call(
        functools.partial(_bilinear_kernel, n_planes=C),
        out_shape=jax.ShapeDtypeStruct((Nb, C, H, W), jnp.float32),
        grid=(Nb,),
        in_specs=[
            pl.BlockSpec((1, C, hfp, wfp), lambda n: (n, 0, 0, 0)),
            pl.BlockSpec((H, hfp), lambda n: (0, 0)),
            pl.BlockSpec((wfp, W), lambda n: (0, 0)),
        ],
        out_specs=pl.BlockSpec((1, C, H, W), lambda n: (n, 0, 0, 0)),
        compiler_params=pltpu.CompilerParams(
            dimension_semantics=("parallel",),
            vmem_limit_bytes=48 * 1024 * 1024,   # (13, H, W) f32 out block x2
        ),
    )(f, wh, wwt)
    return out


# ---------------------------------------------------------------------------
# Model: reduced EfficientNetV2-S "features" stand-in + 1x1 classifier
# (kernel_size, stride, Cin, Cout); stride-32 total, 1280 output channels.
# ---------------------------------------------------------------------------
STAGES = [
    (3, 2, 3, 24),      # stem
    (3, 2, 24, 48),
    (3, 2, 48, 64),
    (3, 2, 64, 160),
    (3, 2, 160, 256),
    (1, 1, 256, 1280),  # head 1x1
]


def init_params(key):
    params = {"features": []}
    for (k, _s, cin, cout) in STAGES:
        key, k1, k2 = jax.random.split(key, 3)
        scale = 1.0 / (k * k * cin) ** 0.5
        w = jax.random.normal(k1, (k, k, cin, cout), jnp.float32) * scale
        b = jax.random.normal(k2, (cout,), jnp.float32) * 0.01
        params["features"].append((w, b))
    key, k1, k2 = jax.random.split(key, 3)
    params["classif_w"] = (
        jax.random.normal(k1, (1280, NUM_CLASSES), jnp.float32) / 1280 ** 0.5
    )
    params["classif_b"] = jax.random.normal(k2, (NUM_CLASSES,), jnp.float32) * 0.01
    return params


def just_efficientnet_forward(x_nchw, params):
    N, C, H, W = x_nchw.shape
    x = x_nchw.astype(jnp.float32).transpose(0, 2, 3, 1)   # NCHW -> NHWC (raw)

    # Fold (x/255 - 0.5)/0.25 = x/63.75 - 2 exactly into the stem conv:
    #   w' = w / 63.75 ; b' = b - 2 * sum(w) ; raw pad value 127.5 <-> norm 0.
    w0, b0 = params["features"][0]
    w0f = w0 * (1.0 / 63.75)
    b0f = b0 - 2.0 * jnp.sum(w0, axis=(0, 1, 2))
    _k0, s0, ci0, _co0 = STAGES[0]
    x, cur_c = conv2d(x, ci0, w0f, b0f, stride=s0, act="silu", pad_value=127.5)

    for (_k, s, _ci, _co), (w, b) in zip(STAGES[1:], params["features"][1:]):
        x, cur_c = conv2d(x, cur_c, w, b, stride=s, act="silu", pad_value=0.0)

    # 1x1 classifier conv (lane-dense 128-wide output, sliced back to 13).
    n, hf, wf, cp = x.shape
    a = (x if cp == cur_c else x[..., :cur_c]).reshape(n * hf * wf, cur_c)
    M = n * hf * wf
    logits = matmul_bias_act(a, params["classif_w"], params["classif_b"],
                             act="none", out_dtype=jnp.float32)
    logits = logits[:M, :NUM_CLASSES].reshape(n, hf, wf, NUM_CLASSES)
    logits = logits.transpose(0, 3, 1, 2)                   # (N, 13, hf, wf)

    out = bilinear_upsample(logits, H, W)                   # (N, 13, H, W)
    return out


if __name__ == "__main__":
    key = jax.random.PRNGKey(0)
    kx, kp = jax.random.split(key)
    x = jax.random.uniform(kx, (2, 3, 64, 64), jnp.float32, 0.0, 255.0)
    params = init_params(kp)

    fwd = jax.jit(just_efficientnet_forward)
    out = fwd(x, params)
    out = jax.block_until_ready(out)

    assert out.shape == (2, NUM_CLASSES, 64, 64), out.shape
    assert out.dtype == jnp.float32
    assert bool(jnp.all(jnp.isfinite(out)))
    print("KERNEL_OK")
</pallas_src>

<mosaic_0001>
module attributes {stable_mosaic.version = 11 : i64} {
  func.func @_mm_bias_act_kernel(%arg0: i32, %arg1: i32, %arg2: memref<1024x32xbf16, #tpu.memory_space<vmem>>, %arg3: memref<32x128xbf16, #tpu.memory_space<vmem>>, %arg4: memref<1x128xf32, #tpu.memory_space<vmem>>, %arg5: memref<1024x128xbf16, #tpu.memory_space<vmem>>) attributes {dimension_semantics = [#tpu.dimension_semantics<parallel>, #tpu.dimension_semantics<parallel>], iteration_bounds = array<i64: 2, 1>, scalar_prefetch = 0 : i64, scratch_operands = 0 : i64, tpu.core_type = #tpu.core_type<tc>, window_params = [{transform_indices = @transform_0, window_bounds = array<i64: 1024, 32>}, {transform_indices = @transform_1, window_bounds = array<i64: 32, 128>}, {transform_indices = @transform_2, window_bounds = array<i64: 1, 128>}, {transform_indices = @transform_3, window_bounds = array<i64: 1024, 128>}]} {
    %c0 = arith.constant 0 : index
    %c0_0 = arith.constant 0 : index
    %0 = vector.load %arg2[%c0, %c0_0] : memref<1024x32xbf16, #tpu.memory_space<vmem>>, vector<1024x32xbf16>
    %c0_1 = arith.constant 0 : index
    %c0_2 = arith.constant 0 : index
    %1 = vector.load %arg3[%c0_1, %c0_2] : memref<32x128xbf16, #tpu.memory_space<vmem>>, vector<32x128xbf16>
    %cst = arith.constant dense<0.000000e+00> : vector<1024x128xf32>
    %2 = tpu.matmul %0, %1, %cst {dimension_numbers = #tpu.dot_dimension_numbers<[1], [0], [0], [1], [0, 0, 1, 1], [], []>} : vector<1024x32xbf16>, vector<32x128xbf16>, vector<1024x128xf32> -> vector<1024x128xf32>
    %c0_3 = arith.constant 0 : index
    %c0_4 = arith.constant 0 : index
    %3 = vector.load %arg4[%c0_3, %c0_4] : memref<1x128xf32, #tpu.memory_space<vmem>>, vector<1x128xf32>
    %4 = vector.broadcast %3 : vector<1x128xf32> to vector<1024x128xf32>
    %5 = arith.addf %2, %4 : vector<1024x128xf32>
    %6 = arith.negf %5 : vector<1024x128xf32>
    %7 = math.exp %6 : vector<1024x128xf32>
    %cst_5 = arith.constant 1.000000e+00 : f32
    %8 = vector.broadcast %cst_5 : f32 to vector<1024x128xf32>
    %9 = arith.addf %8, %7 : vector<1024x128xf32>
    %10 = arith.divf %8, %9 : vector<1024x128xf32>
    %11 = arith.mulf %5, %10 : vector<1024x128xf32>
    %12 = arith.truncf %11 : vector<1024x128xf32> to vector<1024x128xbf16>
    %c0_6 = arith.constant 0 : index
    %c0_7 = arith.constant 0 : index
    %13 = vector.load %arg5[%c0_6, %c0_7] : memref<1024x128xbf16, #tpu.memory_space<vmem>>, vector<1024x128xbf16>
    tpu.vector_store %arg5[%c0_6, %c0_7], %12 {strides = array<i32>} : memref<1024x128xbf16, #tpu.memory_space<vmem>>, vector<1024x128xbf16>,
    return
  }
  func.func @transform_0(%arg0: i32, %arg1: i32) -> (i32, i32) {
    %c0_i32 = arith.constant 0 : i32
    %c0_i32_0 = arith.constant 0 : i32
    return %arg0, %c0_i32 : i32, i32
  }
  func.func @transform_1(%arg0: i32, %arg1: i32) -> (i32, i32) {
    %c0_i32 = arith.constant 0 : i32
    %c0_i32_0 = arith.constant 0 : i32
    return %c0_i32, %arg1 : i32, i32
  }
  func.func @transform_2(%arg0: i32, %arg1: i32) -> (i32, i32) {
    %c0_i32 = arith.constant 0 : i32
    %c0_i32_0 = arith.constant 0 : i32
    return %c0_i32, %arg1 : i32, i32
  }
  func.func @transform_3(%arg0: i32, %arg1: i32) -> (i32, i32) {
    %c0_i32 = arith.constant 0 : i32
    return %arg0, %arg1 : i32, i32
  }
}

module attributes {stable_mosaic.version = 11 : i64} {
  func.func @_mm_bias_act_kernel(%arg0: i32, %arg1: i32, %arg2: memref<256x224xbf16, #tpu.memory_space<vmem>>, %arg3: memref<224x128xbf16, #tpu.memory_space<vmem>>, %arg4: memref<1x128xf32, #tpu.memory_space<vmem>>, %arg5: memref<256x128xbf16, #tpu.memory_space<vmem>>) attributes {dimension_semantics = [#tpu.dimension_semantics<parallel>, #tpu.dimension_semantics<parallel>], iteration_bounds = array<i64: 2, 1>, scalar_prefetch = 0 : i64, scratch_operands = 0 : i64, tpu.core_type = #tpu.core_type<tc>, window_params = [{transform_indices = @transform_0, window_bounds = array<i64: 256, 224>}, {transform_indices = @transform_1, window_bounds = array<i64: 224, 128>}, {transform_indices = @transform_2, window_bounds = array<i64: 1, 128>}, {transform_indices = @transform_3, window_bounds = array<i64: 256, 128>}]} {
    %c0 = arith.constant 0 : index
    %c0_0 = arith.constant 0 : index
    %0 = vector.load %arg2[%c0, %c0_0] : memref<256x224xbf16, #tpu.memory_space<vmem>>, vector<256x224xbf16>
    %c0_1 = arith.constant 0 : index
    %c0_2 = arith.constant 0 : index
    %1 = vector.load %arg3[%c0_1, %c0_2] : memref<224x128xbf16, #tpu.memory_space<vmem>>, vector<224x128xbf16>
    %cst = arith.constant dense<0.000000e+00> : vector<256x128xf32>
    %2 = tpu.matmul %0, %1, %cst {dimension_numbers = #tpu.dot_dimension_numbers<[1], [0], [0], [1], [0, 0, 1, 1], [], []>} : vector<256x224xbf16>, vector<224x128xbf16>, vector<256x128xf32> -> vector<256x128xf32>
    %c0_3 = arith.constant 0 : index
    %c0_4 = arith.constant 0 : index
    %3 = vector.load %arg4[%c0_3, %c0_4] : memref<1x128xf32, #tpu.memory_space<vmem>>, vector<1x128xf32>
    %4 = vector.broadcast %3 : vector<1x128xf32> to vector<256x128xf32>
    %5 = arith.addf %2, %4 : vector<256x128xf32>
    %6 = arith.negf %5 : vector<256x128xf32>
    %7 = math.exp %6 : vector<256x128xf32>
    %cst_5 = arith.constant 1.000000e+00 : f32
    %8 = vector.broadcast %cst_5 : f32 to vector<256x128xf32>
    %9 = arith.addf %8, %7 : vector<256x128xf32>
    %10 = arith.divf %8, %9 : vector<256x128xf32>
    %11 = arith.mulf %5, %10 : vector<256x128xf32>
    %12 = arith.truncf %11 : vector<256x128xf32> to vector<256x128xbf16>
    %c0_6 = arith.constant 0 : index
    %c0_7 = arith.constant 0 : index
    %13 = vector.load %arg5[%c0_6, %c0_7] : memref<256x128xbf16, #tpu.memory_space<vmem>>, vector<256x128xbf16>
    tpu.vector_store %arg5[%c0_6, %c0_7], %12 {strides = array<i32>} : memref<256x128xbf16, #tpu.memory_space<vmem>>, vector<256x128xbf16>,
    return
  }
  func.func @transform_0(%arg0: i32, %arg1: i32) -> (i32, i32) {
    %c0_i32 = arith.constant 0 : i32
    %c0_i32_0 = arith.constant 0 : i32
    return %arg0, %c0_i32 : i32, i32
  }
  func.func @transform_1(%arg0: i32, %arg1: i32) -> (i32, i32) {
    %c0_i32 = arith.constant 0 : i32
    %c0_i32_0 = arith.constant 0 : i32
    return %c0_i32, %arg1 : i32, i32
  }
  func.func @transform_2(%arg0: i32, %arg1: i32) -> (i32, i32) {
    %c0_i32 = arith.constant 0 : i32
    %c0_i32_0 = arith.constant 0 : i32
    return %c0_i32, %arg1 : i32, i32
  }
  func.func @transform_3(%arg0: i32, %arg1: i32) -> (i32, i32) {
    %c0_i32 = arith.constant 0 : i32
    return %arg0, %arg1 : i32, i32
  }
}

module attributes {stable_mosaic.version = 11 : i64} {
  func.func @_mm_bias_act_kernel(%arg0: i32, %arg1: i32, %arg2: memref<64x432xbf16, #tpu.memory_space<vmem>>, %arg3: memref<432x128xbf16, #tpu.memory_space<vmem>>, %arg4: memref<1x128xf32, #tpu.memory_space<vmem>>, %arg5: memref<64x128xbf16, #tpu.memory_space<vmem>>) attributes {dimension_semantics = [#tpu.dimension_semantics<parallel>, #tpu.dimension_semantics<parallel>], iteration_bounds = array<i64: 2, 1>, scalar_prefetch = 0 : i64, scratch_operands = 0 : i64, tpu.core_type = #tpu.core_type<tc>, window_params = [{transform_indices = @transform_0, window_bounds = array<i64: 64, 432>}, {transform_indices = @transform_1, window_bounds = array<i64: 432, 128>}, {transform_indices = @transform_2, window_bounds = array<i64: 1, 128>}, {transform_indices = @transform_3, window_bounds = array<i64: 64, 128>}]} {
    %c0 = arith.constant 0 : index
    %c0_0 = arith.constant 0 : index
    %0 = vector.load %arg2[%c0, %c0_0] : memref<64x432xbf16, #tpu.memory_space<vmem>>, vector<64x432xbf16>
    %c0_1 = arith.constant 0 : index
    %c0_2 = arith.constant 0 : index
    %1 = vector.load %arg3[%c0_1, %c0_2] : memref<432x128xbf16, #tpu.memory_space<vmem>>, vector<432x128xbf16>
    %cst = arith.constant dense<0.000000e+00> : vector<64x128xf32>
    %2 = tpu.matmul %0, %1, %cst {dimension_numbers = #tpu.dot_dimension_numbers<[1], [0], [0], [1], [0, 0, 1, 1], [], []>} : vector<64x432xbf16>, vector<432x128xbf16>, vector<64x128xf32> -> vector<64x128xf32>
    %c0_3 = arith.constant 0 : index
    %c0_4 = arith.constant 0 : index
    %3 = vector.load %arg4[%c0_3, %c0_4] : memref<1x128xf32, #tpu.memory_space<vmem>>, vector<1x128xf32>
    %4 = vector.broadcast %3 : vector<1x128xf32> to vector<64x128xf32>
    %5 = arith.addf %2, %4 : vector<64x128xf32>
    %6 = arith.negf %5 : vector<64x128xf32>
    %7 = math.exp %6 : vector<64x128xf32>
    %cst_5 = arith.constant 1.000000e+00 : f32
    %8 = vector.broadcast %cst_5 : f32 to vector<64x128xf32>
    %9 = arith.addf %8, %7 : vector<64x128xf32>
    %10 = arith.divf %8, %9 : vector<64x128xf32>
    %11 = arith.mulf %5, %10 : vector<64x128xf32>
    %12 = arith.truncf %11 : vector<64x128xf32> to vector<64x128xbf16>
    %c0_6 = arith.constant 0 : index
    %c0_7 = arith.constant 0 : index
    %13 = vector.load %arg5[%c0_6, %c0_7] : memref<64x128xbf16, #tpu.memory_space<vmem>>, vector<64x128xbf16>
    tpu.vector_store %arg5[%c0_6, %c0_7], %12 {strides = array<i32>} : memref<64x128xbf16, #tpu.memory_space<vmem>>, vector<64x128xbf16>,
    return
  }
  func.func @transform_0(%arg0: i32, %arg1: i32) -> (i32, i32) {
    %c0_i32 = arith.constant 0 : i32
    %c0_i32_0 = arith.constant 0 : i32
    return %arg0, %c0_i32 : i32, i32
  }
  func.func @transform_1(%arg0: i32, %arg1: i32) -> (i32, i32) {
    %c0_i32 = arith.constant 0 : i32
    %c0_i32_0 = arith.constant 0 : i32
    return %c0_i32, %arg1 : i32, i32
  }
  func.func @transform_2(%arg0: i32, %arg1: i32) -> (i32, i32) {
    %c0_i32 = arith.constant 0 : i32
    %c0_i32_0 = arith.constant 0 : i32
    return %c0_i32, %arg1 : i32, i32
  }
  func.func @transform_3(%arg0: i32, %arg1: i32) -> (i32, i32) {
    %c0_i32 = arith.constant 0 : i32
    return %arg0, %arg1 : i32, i32
  }
}

module attributes {stable_mosaic.version = 11 : i64} {
  func.func @_mm_bias_act_kernel(%arg0: i32, %arg1: i32, %arg2: memref<16x576xbf16, #tpu.memory_space<vmem>>, %arg3: memref<576x256xbf16, #tpu.memory_space<vmem>>, %arg4: memref<1x256xf32, #tpu.memory_space<vmem>>, %arg5: memref<16x256xbf16, #tpu.memory_space<vmem>>) attributes {dimension_semantics = [#tpu.dimension_semantics<parallel>, #tpu.dimension_semantics<parallel>], iteration_bounds = array<i64: 2, 1>, scalar_prefetch = 0 : i64, scratch_operands = 0 : i64, tpu.core_type = #tpu.core_type<tc>, window_params = [{transform_indices = @transform_0, window_bounds = array<i64: 16, 576>}, {transform_indices = @transform_1, window_bounds = array<i64: 576, 256>}, {transform_indices = @transform_2, window_bounds = array<i64: 1, 256>}, {transform_indices = @transform_3, window_bounds = array<i64: 16, 256>}]} {
    %c0 = arith.constant 0 : index
    %c0_0 = arith.constant 0 : index
    %0 = vector.load %arg2[%c0, %c0_0] : memref<16x576xbf16, #tpu.memory_space<vmem>>, vector<16x576xbf16>
    %c0_1 = arith.constant 0 : index
    %c0_2 = arith.constant 0 : index
    %1 = vector.load %arg3[%c0_1, %c0_2] : memref<576x256xbf16, #tpu.memory_space<vmem>>, vector<576x256xbf16>
    %cst = arith.constant dense<0.000000e+00> : vector<16x256xf32>
    %2 = tpu.matmul %0, %1, %cst {dimension_numbers = #tpu.dot_dimension_numbers<[1], [0], [0], [1], [0, 0, 1, 1], [], []>} : vector<16x576xbf16>, vector<576x256xbf16>, vector<16x256xf32> -> vector<16x256xf32>
    %c0_3 = arith.constant 0 : index
    %c0_4 = arith.constant 0 : index
    %3 = vector.load %arg4[%c0_3, %c0_4] : memref<1x256xf32, #tpu.memory_space<vmem>>, vector<1x256xf32>
    %4 = vector.broadcast %3 : vector<1x256xf32> to vector<16x256xf32>
    %5 = arith.addf %2, %4 : vector<16x256xf32>
    %6 = arith.negf %5 : vector<16x256xf32>
    %7 = math.exp %6 : vector<16x256xf32>
    %cst_5 = arith.constant 1.000000e+00 : f32
    %8 = vector.broadcast %cst_5 : f32 to vector<16x256xf32>
    %9 = arith.addf %8, %7 : vector<16x256xf32>
    %10 = arith.divf %8, %9 : vector<16x256xf32>
    %11 = arith.mulf %5, %10 : vector<16x256xf32>
    %12 = arith.truncf %11 : vector<16x256xf32> to vector<16x256xbf16>
    %c0_6 = arith.constant 0 : index
    %c0_7 = arith.constant 0 : index
    %13 = vector.load %arg5[%c0_6, %c0_7] : memref<16x256xbf16, #tpu.memory_space<vmem>>, vector<16x256xbf16>
    tpu.vector_store %arg5[%c0_6, %c0_7], %12 {strides = array<i32>} : memref<16x256xbf16, #tpu.memory_space<vmem>>, vector<16x256xbf16>,
    return
  }
  func.func @transform_0(%arg0: i32, %arg1: i32) -> (i32, i32) {
    %c0_i32 = arith.constant 0 : i32
    %c0_i32_0 = arith.constant 0 : i32
    return %arg0, %c0_i32 : i32, i32
  }
  func.func @transform_1(%arg0: i32, %arg1: i32) -> (i32, i32) {
    %c0_i32 = arith.constant 0 : i32
    %c0_i32_0 = arith.constant 0 : i32
    return %c0_i32, %arg1 : i32, i32
  }
  func.func @transform_2(%arg0: i32, %arg1: i32) -> (i32, i32) {
    %c0_i32 = arith.constant 0 : i32
    %c0_i32_0 = arith.constant 0 : i32
    return %c0_i32, %arg1 : i32, i32
  }
  func.func @transform_3(%arg0: i32, %arg1: i32) -> (i32, i32) {
    %c0_i32 = arith.constant 0 : i32
    return %arg0, %arg1 : i32, i32
  }
}

module attributes {stable_mosaic.version = 11 : i64} {
  func.func @_mm_bias_act_kernel(%arg0: i32, %arg1: i32, %arg2: memref<8x1440xbf16, #tpu.memory_space<vmem>>, %arg3: memref<1440x256xbf16, #tpu.memory_space<vmem>>, %arg4: memref<1x256xf32, #tpu.memory_space<vmem>>, %arg5: memref<8x256xbf16, #tpu.memory_space<vmem>>) attributes {dimension_semantics = [#tpu.dimension_semantics<parallel>, #tpu.dimension_semantics<parallel>], iteration_bounds = array<i64: 1, 1>, scalar_prefetch = 0 : i64, scratch_operands = 0 : i64, tpu.core_type = #tpu.core_type<tc>, window_params = [{transform_indices = @transform_0, window_bounds = array<i64: 8, 1440>}, {transform_indices = @transform_1, window_bounds = array<i64: 1440, 256>}, {transform_indices = @transform_2, window_bounds = array<i64: 1, 256>}, {transform_indices = @transform_3, window_bounds = array<i64: 8, 256>}]} {
    %c0 = arith.constant 0 : index
    %c0_0 = arith.constant 0 : index
    %0 = vector.load %arg2[%c0, %c0_0] : memref<8x1440xbf16, #tpu.memory_space<vmem>>, vector<8x1440xbf16>
    %c0_1 = arith.constant 0 : index
    %c0_2 = arith.constant 0 : index
    %1 = vector.load %arg3[%c0_1, %c0_2] : memref<1440x256xbf16, #tpu.memory_space<vmem>>, vector<1440x256xbf16>
    %cst = arith.constant dense<0.000000e+00> : vector<8x256xf32>
    %2 = tpu.matmul %0, %1, %cst {dimension_numbers = #tpu.dot_dimension_numbers<[1], [0], [0], [1], [0, 0, 1, 1], [], []>} : vector<8x1440xbf16>, vector<1440x256xbf16>, vector<8x256xf32> -> vector<8x256xf32>
    %c0_3 = arith.constant 0 : index
    %c0_4 = arith.constant 0 : index
    %3 = vector.load %arg4[%c0_3, %c0_4] : memref<1x256xf32, #tpu.memory_space<vmem>>, vector<1x256xf32>
    %4 = vector.broadcast %3 : vector<1x256xf32> to vector<8x256xf32>
    %5 = arith.addf %2, %4 : vector<8x256xf32>
    %6 = arith.negf %5 : vector<8x256xf32>
    %7 = math.exp %6 : vector<8x256xf32>
    %cst_5 = arith.constant 1.000000e+00 : f32
    %8 = vector.broadcast %cst_5 : f32 to vector<8x256xf32>
    %9 = arith.addf %8, %7 : vector<8x256xf32>
    %10 = arith.divf %8, %9 : vector<8x256xf32>
    %11 = arith.mulf %5, %10 : vector<8x256xf32>
    %12 = arith.truncf %11 : vector<8x256xf32> to vector<8x256xbf16>
    %c0_6 = arith.constant 0 : index
    %c0_7 = arith.constant 0 : index
    %13 = vector.load %arg5[%c0_6, %c0_7] : memref<8x256xbf16, #tpu.memory_space<vmem>>, vector<8x256xbf16>
    tpu.vector_store %arg5[%c0_6, %c0_7], %12 {strides = array<i32>} : memref<8x256xbf16, #tpu.memory_space<vmem>>, vector<8x256xbf16>,
    return
  }
  func.func @transform_0(%arg0: i32, %arg1: i32) -> (i32, i32) {
    %c0_i32 = arith.constant 0 : i32
    %c0_i32_0 = arith.constant 0 : i32
    return %arg0, %c0_i32 : i32, i32
  }
  func.func @transform_1(%arg0: i32, %arg1: i32) -> (i32, i32) {
    %c0_i32 = arith.constant 0 : i32
    %c0_i32_0 = arith.constant 0 : i32
    return %c0_i32, %arg1 : i32, i32
  }
  func.func @transform_2(%arg0: i32, %arg1: i32) -> (i32, i32) {
    %c0_i32 = arith.constant 0 : i32
    %c0_i32_0 = arith.constant 0 : i32
    return %c0_i32, %arg1 : i32, i32
  }
  func.func @transform_3(%arg0: i32, %arg1: i32) -> (i32, i32) {
    %c0_i32 = arith.constant 0 : i32
    return %arg0, %arg1 : i32, i32
  }
}

module attributes {stable_mosaic.version = 11 : i64} {
  func.func @_mm_bias_act_kernel(%arg0: i32, %arg1: i32, %arg2: memref<8x256xbf16, #tpu.memory_space<vmem>>, %arg3: memref<256x256xbf16, #tpu.memory_space<vmem>>, %arg4: memref<1x256xf32, #tpu.memory_space<vmem>>, %arg5: memref<8x256xbf16, #tpu.memory_space<vmem>>) attributes {dimension_semantics = [#tpu.dimension_semantics<parallel>, #tpu.dimension_semantics<parallel>], iteration_bounds = array<i64: 1, 5>, scalar_prefetch = 0 : i64, scratch_operands = 0 : i64, tpu.core_type = #tpu.core_type<tc>, window_params = [{transform_indices = @transform_0, window_bounds = array<i64: 8, 256>}, {transform_indices = @transform_1, window_bounds = array<i64: 256, 256>}, {transform_indices = @transform_2, window_bounds = array<i64: 1, 256>}, {transform_indices = @transform_3, window_bounds = array<i64: 8, 256>}]} {
    %c0 = arith.constant 0 : index
    %c0_0 = arith.constant 0 : index
    %0 = vector.load %arg2[%c0, %c0_0] : memref<8x256xbf16, #tpu.memory_space<vmem>>, vector<8x256xbf16>
    %c0_1 = arith.constant 0 : index
    %c0_2 = arith.constant 0 : index
    %1 = vector.load %arg3[%c0_1, %c0_2] : memref<256x256xbf16, #tpu.memory_space<vmem>>, vector<256x256xbf16>
    %cst = arith.constant dense<0.000000e+00> : vector<8x256xf32>
    %2 = tpu.matmul %0, %1, %cst {dimension_numbers = #tpu.dot_dimension_numbers<[1], [0], [0], [1], [0, 0, 1, 1], [], []>} : vector<8x256xbf16>, vector<256x256xbf16>, vector<8x256xf32> -> vector<8x256xf32>
    %c0_3 = arith.constant 0 : index
    %c0_4 = arith.constant 0 : index
    %3 = vector.load %arg4[%c0_3, %c0_4] : memref<1x256xf32, #tpu.memory_space<vmem>>, vector<1x256xf32>
    %4 = vector.broadcast %3 : vector<1x256xf32> to vector<8x256xf32>
    %5 = arith.addf %2, %4 : vector<8x256xf32>
    %6 = arith.negf %5 : vector<8x256xf32>
    %7 = math.exp %6 : vector<8x256xf32>
    %cst_5 = arith.constant 1.000000e+00 : f32
    %8 = vector.broadcast %cst_5 : f32 to vector<8x256xf32>
    %9 = arith.addf %8, %7 : vector<8x256xf32>
    %10 = arith.divf %8, %9 : vector<8x256xf32>
    %11 = arith.mulf %5, %10 : vector<8x256xf32>
    %12 = arith.truncf %11 : vector<8x256xf32> to vector<8x256xbf16>
    %c0_6 = arith.constant 0 : index
    %c0_7 = arith.constant 0 : index
    %13 = vector.load %arg5[%c0_6, %c0_7] : memref<8x256xbf16, #tpu.memory_space<vmem>>, vector<8x256xbf16>
    tpu.vector_store %arg5[%c0_6, %c0_7], %12 {strides = array<i32>} : memref<8x256xbf16, #tpu.memory_space<vmem>>, vector<8x256xbf16>,
    return
  }
  func.func @transform_0(%arg0: i32, %arg1: i32) -> (i32, i32) {
    %c0_i32 = arith.constant 0 : i32
    %c0_i32_0 = arith.constant 0 : i32
    return %arg0, %c0_i32 : i32, i32
  }
  func.func @transform_1(%arg0: i32, %arg1: i32) -> (i32, i32) {
    %c0_i32 = arith.constant 0 : i32
    %c0_i32_0 = arith.constant 0 : i32
    return %c0_i32, %arg1 : i32, i32
  }
  func.func @transform_2(%arg0: i32, %arg1: i32) -> (i32, i32) {
    %c0_i32 = arith.constant 0 : i32
    %c0_i32_0 = arith.constant 0 : i32
    return %c0_i32, %arg1 : i32, i32
  }
  func.func @transform_3(%arg0: i32, %arg1: i32) -> (i32, i32) {
    %c0_i32 = arith.constant 0 : i32
    return %arg0, %arg1 : i32, i32
  }
}

module attributes {stable_mosaic.version = 11 : i64} {
  func.func @_mm_bias_act_kernel(%arg0: i32, %arg1: i32, %arg2: memref<8x1280xbf16, #tpu.memory_space<vmem>>, %arg3: memref<1280x128xbf16, #tpu.memory_space<vmem>>, %arg4: memref<1x128xf32, #tpu.memory_space<vmem>>, %arg5: memref<8x128xf32, #tpu.memory_space<vmem>>) attributes {dimension_semantics = [#tpu.dimension_semantics<parallel>, #tpu.dimension_semantics<parallel>], iteration_bounds = array<i64: 1, 1>, scalar_prefetch = 0 : i64, scratch_operands = 0 : i64, tpu.core_type = #tpu.core_type<tc>, window_params = [{transform_indices = @transform_0, window_bounds = array<i64: 8, 1280>}, {transform_indices = @transform_1, window_bounds = array<i64: 1280, 128>}, {transform_indices = @transform_2, window_bounds = array<i64: 1, 128>}, {transform_indices = @transform_3, window_bounds = array<i64: 8, 128>}]} {
    %c0 = arith.constant 0 : index
    %c0_0 = arith.constant 0 : index
    %0 = vector.load %arg2[%c0, %c0_0] : memref<8x1280xbf16, #tpu.memory_space<vmem>>, vector<8x1280xbf16>
    %c0_1 = arith.constant 0 : index
    %c0_2 = arith.constant 0 : index
    %1 = vector.load %arg3[%c0_1, %c0_2] : memref<1280x128xbf16, #tpu.memory_space<vmem>>, vector<1280x128xbf16>
    %cst = arith.constant dense<0.000000e+00> : vector<8x128xf32>
    %2 = tpu.matmul %0, %1, %cst {dimension_numbers = #tpu.dot_dimension_numbers<[1], [0], [0], [1], [0, 0, 1, 1], [], []>} : vector<8x1280xbf16>, vector<1280x128xbf16>, vector<8x128xf32> -> vector<8x128xf32>
    %c0_3 = arith.constant 0 : index
    %c0_4 = arith.constant 0 : index
    %3 = vector.load %arg4[%c0_3, %c0_4] : memref<1x128xf32, #tpu.memory_space<vmem>>, vector<1x128xf32>
    %4 = vector.broadcast %3 : vector<1x128xf32> to vector<8x128xf32>
    %5 = arith.addf %2, %4 : vector<8x128xf32>
    %c0_5 = arith.constant 0 : index
    %c0_6 = arith.constant 0 : index
    %6 = vector.load %arg5[%c0_5, %c0_6] : memref<8x128xf32, #tpu.memory_space<vmem>>, vector<8x128xf32>
    tpu.vector_store %arg5[%c0_5, %c0_6], %5 {strides = array<i32>} : memref<8x128xf32, #tpu.memory_space<vmem>>, vector<8x128xf32>,
    return
  }
  func.func @transform_0(%arg0: i32, %arg1: i32) -> (i32, i32) {
    %c0_i32 = arith.constant 0 : i32
    %c0_i32_0 = arith.constant 0 : i32
    return %arg0, %c0_i32 : i32, i32
  }
  func.func @transform_1(%arg0: i32, %arg1: i32) -> (i32, i32) {
    %c0_i32 = arith.constant 0 : i32
    %c0_i32_0 = arith.constant 0 : i32
    return %c0_i32, %arg1 : i32, i32
  }
  func.func @transform_2(%arg0: i32, %arg1: i32) -> (i32, i32) {
    %c0_i32 = arith.constant 0 : i32
    %c0_i32_0 = arith.constant 0 : i32
    return %c0_i32, %arg1 : i32, i32
  }
  func.func @transform_3(%arg0: i32, %arg1: i32) -> (i32, i32) {
    %c0_i32 = arith.constant 0 : i32
    return %arg0, %arg1 : i32, i32
  }
}

module attributes {stable_mosaic.version = 11 : i64} {
  func.func @_bilinear_kernel(%arg0: i32, %arg1: memref<1x13x8x8xbf16, #tpu.memory_space<vmem>>, %arg2: memref<64x8xbf16, #tpu.memory_space<vmem>>, %arg3: memref<8x64xbf16, #tpu.memory_space<vmem>>, %arg4: memref<1x13x64x64xf32, #tpu.memory_space<vmem>>) attributes {dimension_semantics = [#tpu.dimension_semantics<parallel>], iteration_bounds = array<i64: 2>, scalar_prefetch = 0 : i64, scratch_operands = 0 : i64, tpu.core_type = #tpu.core_type<tc>, window_params = [{transform_indices = @transform_0, window_bounds = array<i64: 1, 13, 8, 8>}, {pipeline_mode = #tpu.pipeline_mode<synchronous>, transform_indices = @transform_1, window_bounds = array<i64: 64, 8>}, {pipeline_mode = #tpu.pipeline_mode<synchronous>, transform_indices = @transform_2, window_bounds = array<i64: 8, 64>}, {transform_indices = @transform_3, window_bounds = array<i64: 1, 13, 64, 64>}]} {
    %c0 = arith.constant 0 : index
    %c0_0 = arith.constant 0 : index
    %0 = vector.load %arg2[%c0, %c0_0] : memref<64x8xbf16, #tpu.memory_space<vmem>>, vector<64x8xbf16>
    %c0_1 = arith.constant 0 : index
    %c0_2 = arith.constant 0 : index
    %1 = vector.load %arg3[%c0_1, %c0_2] : memref<8x64xbf16, #tpu.memory_space<vmem>>, vector<8x64xbf16>
    %c0_3 = arith.constant 0 : index
    %c0_4 = arith.constant 0 : index
    %c0_5 = arith.constant 0 : index
    %c0_6 = arith.constant 0 : index
    %2 = vector.load %arg1[%c0_3, %c0_4, %c0_5, %c0_6] : memref<1x13x8x8xbf16, #tpu.memory_space<vmem>>, vector<1x1x8x8xbf16>
    %3 = vector.shape_cast %2 : vector<1x1x8x8xbf16> to vector<8x8xbf16>
    %cst = arith.constant dense<0.000000e+00> : vector<8x64xf32>
    %4 = tpu.matmul %3, %1, %cst {dimension_numbers = #tpu.dot_dimension_numbers<[1], [0], [0], [1], [0, 0, 1, 1], [], []>} : vector<8x8xbf16>, vector<8x64xbf16>, vector<8x64xf32> -> vector<8x64xf32>
    %5 = arith.truncf %4 : vector<8x64xf32> to vector<8x64xbf16>
    %cst_7 = arith.constant dense<0.000000e+00> : vector<64x64xf32>
    %6 = tpu.matmul %0, %5, %cst_7 {dimension_numbers = #tpu.dot_dimension_numbers<[1], [0], [0], [1], [0, 0, 1, 1], [], []>} : vector<64x8xbf16>, vector<8x64xbf16>, vector<64x64xf32> -> vector<64x64xf32>
    %c0_8 = arith.constant 0 : index
    %c0_9 = arith.constant 0 : index
    %c0_10 = arith.constant 0 : index
    %c0_11 = arith.constant 0 : index
    %7 = vector.load %arg4[%c0_8, %c0_9, %c0_10, %c0_11] : memref<1x13x64x64xf32, #tpu.memory_space<vmem>>, vector<1x1x64x64xf32>
    %8 = vector.shape_cast %7 : vector<1x1x64x64xf32> to vector<64x64xf32>
    %9 = vector.shape_cast %6 : vector<64x64xf32> to vector<1x1x64x64xf32>
    tpu.vector_store %arg4[%c0_8, %c0_9, %c0_10, %c0_11], %9 {strides = array<i32>} : memref<1x13x64x64xf32, #tpu.memory_space<vmem>>, vector<1x1x64x64xf32>,
    %c0_12 = arith.constant 0 : index
    %c1 = arith.constant 1 : index
    %c0_13 = arith.constant 0 : index
    %c0_14 = arith.constant 0 : index
    %10 = vector.load %arg1[%c0_12, %c1, %c0_13, %c0_14] : memref<1x13x8x8xbf16, #tpu.memory_space<vmem>>, vector<1x1x8x8xbf16>
    %11 = vector.shape_cast %10 : vector<1x1x8x8xbf16> to vector<8x8xbf16>
    %cst_15 = arith.constant dense<0.000000e+00> : vector<8x64xf32>
    %12 = tpu.matmul %11, %1, %cst_15 {dimension_numbers = #tpu.dot_dimension_numbers<[1], [0], [0], [1], [0, 0, 1, 1], [], []>} : vector<8x8xbf16>, vector<8x64xbf16>, vector<8x64xf32> -> vector<8x64xf32>
    %13 = arith.truncf %12 : vector<8x64xf32> to vector<8x64xbf16>
    %cst_16 = arith.constant dense<0.000000e+00> : vector<64x64xf32>
    %14 = tpu.matmul %0, %13, %cst_16 {dimension_numbers = #tpu.dot_dimension_numbers<[1], [0], [0], [1], [0, 0, 1, 1], [], []>} : vector<64x8xbf16>, vector<8x64xbf16>, vector<64x64xf32> -> vector<64x64xf32>
    %c0_17 = arith.constant 0 : index
    %c1_18 = arith.constant 1 : index
    %c0_19 = arith.constant 0 : index
    %c0_20 = arith.constant 0 : index
    %15 = vector.load %arg4[%c0_17, %c1_18, %c0_19, %c0_20] : memref<1x13x64x64xf32, #tpu.memory_space<vmem>>, vector<1x1x64x64xf32>
    %16 = vector.shape_cast %15 : vector<1x1x64x64xf32> to vector<64x64xf32>
    %17 = vector.shape_cast %14 : vector<64x64xf32> to vector<1x1x64x64xf32>
    tpu.vector_store %arg4[%c0_17, %c1_18, %c0_19, %c0_20], %17 {strides = array<i32>} : memref<1x13x64x64xf32, #tpu.memory_space<vmem>>, vector<1x1x64x64xf32>,
    %c0_21 = arith.constant 0 : index
    %c2 = arith.constant 2 : index
    %c0_22 = arith.constant 0 : index
    %c0_23 = arith.constant 0 : index
    %18 = vector.load %arg1[%c0_21, %c2, %c0_22, %c0_23] : memref<1x13x8x8xbf16, #tpu.memory_space<vmem>>, vector<1x1x8x8xbf16>
    %19 = vector.shape_cast %18 : vector<1x1x8x8xbf16> to vector<8x8xbf16>
    %cst_24 = arith.constant dense<0.000000e+00> : vector<8x64xf32>
    %20 = tpu.matmul %19, %1, %cst_24 {dimension_numbers = #tpu.dot_dimension_numbers<[1], [0], [0], [1], [0, 0, 1, 1], [], []>} : vector<8x8xbf16>, vector<8x64xbf16>, vector<8x64xf32> -> vector<8x64xf32>
    %21 = arith.truncf %20 : vector<8x64xf32> to vector<8x64xbf16>
    %cst_25 = arith.constant dense<0.000000e+00> : vector<64x64xf32>
    %22 = tpu.matmul %0, %21, %cst_25 {dimension_numbers = #tpu.dot_dimension_numbers<[1], [0], [0], [1], [0, 0, 1, 1], [], []>} : vector<64x8xbf16>, vector<8x64xbf16>, vector<64x64xf32> -> vector<64x64xf32>
    %c0_26 = arith.constant 0 : index
    %c2_27 = arith.constant 2 : index
    %c0_28 = arith.constant 0 : index
    %c0_29 = arith.constant 0 : index
    %23 = vector.load %arg4[%c0_26, %c2_27, %c0_28, %c0_29] : memref<1x13x64x64xf32, #tpu.memory_space<vmem>>, vector<1x1x64x64xf32>
    %24 = vector.shape_cast %23 : vector<1x1x64x64xf32> to vector<64x64xf32>
    %25 = vector.shape_cast %22 : vector<64x64xf32> to vector<1x1x64x64xf32>
    tpu.vector_store %arg4[%c0_26, %c2_27, %c0_28, %c0_29], %25 {strides = array<i32>} : memref<1x13x64x64xf32, #tpu.memory_space<vmem>>, vector<1x1x64x64xf32>,
    %c0_30 = arith.constant 0 : index
    %c3 = arith.constant 3 : index
    %c0_31 = arith.constant 0 : index
    %c0_32 = arith.constant 0 : index
    %26 = vector.load %arg1[%c0_30, %c3, %c0_31, %c0_32] : memref<1x13x8x8xbf16, #tpu.memory_space<vmem>>, vector<1x1x8x8xbf16>
    %27 = vector.shape_cast %26 : vector<1x1x8x8xbf16> to vector<8x8xbf16>
    %cst_33 = arith.constant dense<0.000000e+00> : vector<8x64xf32>
    %28 = tpu.matmul %27, %1, %cst_33 {dimension_numbers = #tpu.dot_dimension_numbers<[1], [0], [0], [1], [0, 0, 1, 1], [], []>} : vector<8x8xbf16>, vector<8x64xbf16>, vector<8x64xf32> -> vector<8x64xf32>
    %29 = arith.truncf %28 : vector<8x64xf32> to vector<8x64xbf16>
    %cst_34 = arith.constant dense<0.000000e+00> : vector<64x64xf32>
    %30 = tpu.matmul %0, %29, %cst_34 {dimension_numbers = #tpu.dot_dimension_numbers<[1], [0], [0], [1], [0, 0, 1, 1], [], []>} : vector<64x8xbf16>, vector<8x64xbf16>, vector<64x64xf32> -> vector<64x64xf32>
    %c0_35 = arith.constant 0 : index
    %c3_36 = arith.constant 3 : index
    %c0_37 = arith.constant 0 : index
    %c0_38 = arith.constant 0 : index
    %31 = vector.load %arg4[%c0_35, %c3_36, %c0_37, %c0_38] : memref<1x13x64x64xf32, #tpu.memory_space<vmem>>, vector<1x1x64x64xf32>
    %32 = vector.shape_cast %31 : vector<1x1x64x64xf32> to vector<64x64xf32>
    %33 = vector.shape_cast %30 : vector<64x64xf32> to vector<1x1x64x64xf32>
    tpu.vector_store %arg4[%c0_35, %c3_36, %c0_37, %c0_38], %33 {strides = array<i32>} : memref<1x13x64x64xf32, #tpu.memory_space<vmem>>, vector<1x1x64x64xf32>,
    %c0_39 = arith.constant 0 : index
    %c4 = arith.constant 4 : index
    %c0_40 = arith.constant 0 : index
    %c0_41 = arith.constant 0 : index
    %34 = vector.load %arg1[%c0_39, %c4, %c0_40, %c0_41] : memref<1x13x8x8xbf16, #tpu.memory_space<vmem>>, vector<1x1x8x8xbf16>
    %35 = vector.shape_cast %34 : vector<1x1x8x8xbf16> to vector<8x8xbf16>
    %cst_42 = arith.constant dense<0.000000e+00> : vector<8x64xf32>
    %36 = tpu.matmul %35, %1, %cst_42 {dimension_numbers = #tpu.dot_dimension_numbers<[1], [0], [0], [1], [0, 0, 1, 1], [], []>} : vector<8x8xbf16>, vector<8x64xbf16>, vector<8x64xf32> -> vector<8x64xf32>
    %37 = arith.truncf %36 : vector<8x64xf32> to vector<8x64xbf16>
    %cst_43 = arith.constant dense<0.000000e+00> : vector<64x64xf32>
    %38 = tpu.matmul %0, %37, %cst_43 {dimension_numbers = #tpu.dot_dimension_numbers<[1], [0], [0], [1], [0, 0, 1, 1], [], []>} : vector<64x8xbf16>, vector<8x64xbf16>, vector<64x64xf32> -> vector<64x64xf32>
    %c0_44 = arith.constant 0 : index
    %c4_45 = arith.constant 4 : index
    %c0_46 = arith.constant 0 : index
    %c0_47 = arith.constant 0 : index
    %39 = vector.load %arg4[%c0_44, %c4_45, %c0_46, %c0_47] : memref<1x13x64x64xf32, #tpu.memory_space<vmem>>, vector<1x1x64x64xf32>
    %40 = vector.shape_cast %39 : vector<1x1x64x64xf32> to vector<64x64xf32>
    %41 = vector.shape_cast %38 : vector<64x64xf32> to vector<1x1x64x64xf32>
    tpu.vector_store %arg4[%c0_44, %c4_45, %c0_46, %c0_47], %41 {strides = array<i32>} : memref<1x13x64x64xf32, #tpu.memory_space<vmem>>, vector<1x1x64x64xf32>,
    %c0_48 = arith.constant 0 : index
    %c5 = arith.constant 5 : index
    %c0_49 = arith.constant 0 : index
    %c0_50 = arith.constant 0 : index
    %42 = vector.load %arg1[%c0_48, %c5, %c0_49, %c0_50] : memref<1x13x8x8xbf16, #tpu.memory_space<vmem>>, vector<1x1x8x8xbf16>
    %43 = vector.shape_cast %42 : vector<1x1x8x8xbf16> to vector<8x8xbf16>
    %cst_51 = arith.constant dense<0.000000e+00> : vector<8x64xf32>
    %44 = tpu.matmul %43, %1, %cst_51 {dimension_numbers = #tpu.dot_dimension_numbers<[1], [0], [0], [1], [0, 0, 1, 1], [], []>} : vector<8x8xbf16>, vector<8x64xbf16>, vector<8x64xf32> -> vector<8x64xf32>
    %45 = arith.truncf %44 : vector<8x64xf32> to vector<8x64xbf16>
    %cst_52 = arith.constant dense<0.000000e+00> : vector<64x64xf32>
    %46 = tpu.matmul %0, %45, %cst_52 {dimension_numbers = #tpu.dot_dimension_numbers<[1], [0], [0], [1], [0, 0, 1, 1], [], []>} : vector<64x8xbf16>, vector<8x64xbf16>, vector<64x64xf32> -> vector<64x64xf32>
    %c0_53 = arith.constant 0 : index
    %c5_54 = arith.constant 5 : index
    %c0_55 = arith.constant 0 : index
    %c0_56 = arith.constant 0 : index
    %47 = vector.load %arg4[%c0_53, %c5_54, %c0_55, %c0_56] : memref<1x13x64x64xf32, #tpu.memory_space<vmem>>, vector<1x1x64x64xf32>
    %48 = vector.shape_cast %47 : vector<1x1x64x64xf32> to vector<64x64xf32>
    %49 = vector.shape_cast %46 : vector<64x64xf32> to vector<1x1x64x64xf32>
    tpu.vector_store %arg4[%c0_53, %c5_54, %c0_55, %c0_56], %49 {strides = array<i32>} : memref<1x13x64x64xf32, #tpu.memory_space<vmem>>, vector<1x1x64x64xf32>,
    %c0_57 = arith.constant 0 : index
    %c6 = arith.constant 6 : index
    %c0_58 = arith.constant 0 : index
    %c0_59 = arith.constant 0 : index
    %50 = vector.load %arg1[%c0_57, %c6, %c0_58, %c0_59] : memref<1x13x8x8xbf16, #tpu.memory_space<vmem>>, vector<1x1x8x8xbf16>
    %51 = vector.shape_cast %50 : vector<1x1x8x8xbf16> to vector<8x8xbf16>
    %cst_60 = arith.constant dense<0.000000e+00> : vector<8x64xf32>
    %52 = tpu.matmul %51, %1, %cst_60 {dimension_numbers = #tpu.dot_dimension_numbers<[1], [0], [0], [1], [0, 0, 1, 1], [], []>} : vector<8x8xbf16>, vector<8x64xbf16>, vector<8x64xf32> -> vector<8x64xf32>
    %53 = arith.truncf %52 : vector<8x64xf32> to vector<8x64xbf16>
    %cst_61 = arith.constant dense<0.000000e+00> : vector<64x64xf32>
    %54 = tpu.matmul %0, %53, %cst_61 {dimension_numbers = #tpu.dot_dimension_numbers<[1], [0], [0], [1], [0, 0, 1, 1], [], []>} : vector<64x8xbf16>, vector<8x64xbf16>, vector<64x64xf32> -> vector<64x64xf32>
    %c0_62 = arith.constant 0 : index
    %c6_63 = arith.constant 6 : index
    %c0_64 = arith.constant 0 : index
    %c0_65 = arith.constant 0 : index
    %55 = vector.load %arg4[%c0_62, %c6_63, %c0_64, %c0_65] : memref<1x13x64x64xf32, #tpu.memory_space<vmem>>, vector<1x1x64x64xf32>
    %56 = vector.shape_cast %55 : vector<1x1x64x64xf32> to vector<64x64xf32>
    %57 = vector.shape_cast %54 : vector<64x64xf32> to vector<1x1x64x64xf32>
    tpu.vector_store %arg4[%c0_62, %c6_63, %c0_64, %c0_65], %57 {strides = array<i32>} : memref<1x13x64x64xf32, #tpu.memory_space<vmem>>, vector<1x1x64x64xf32>,
    %c0_66 = arith.constant 0 : index
    %c7 = arith.constant 7 : index
    %c0_67 = arith.constant 0 : index
    %c0_68 = arith.constant 0 : index
    %58 = vector.load %arg1[%c0_66, %c7, %c0_67, %c0_68] : memref<1x13x8x8xbf16, #tpu.memory_space<vmem>>, vector<1x1x8x8xbf16>
    %59 = vector.shape_cast %58 : vector<1x1x8x8xbf16> to vector<8x8xbf16>
    %cst_69 = arith.constant dense<0.000000e+00> : vector<8x64xf32>
    %60 = tpu.matmul %59, %1, %cst_69 {dimension_numbers = #tpu.dot_dimension_numbers<[1], [0], [0], [1], [0, 0, 1, 1], [], []>} : vector<8x8xbf16>, vector<8x64xbf16>, vector<8x64xf32> -> vector<8x64xf32>
    %61 = arith.truncf %60 : vector<8x64xf32> to vector<8x64xbf16>
    %cst_70 = arith.constant dense<0.000000e+00> : vector<64x64xf32>
    %62 = tpu.matmul %0, %61, %cst_70 {dimension_numbers = #tpu.dot_dimension_numbers<[1], [0], [0], [1], [0, 0, 1, 1], [], []>} : vector<64x8xbf16>, vector<8x64xbf16>, vector<64x64xf32> -> vector<64x64xf32>
    %c0_71 = arith.constant 0 : index
    %c7_72 = arith.constant 7 : index
    %c0_73 = arith.constant 0 : index
    %c0_74 = arith.constant 0 : index
    %63 = vector.load %arg4[%c0_71, %c7_72, %c0_73, %c0_74] : memref<1x13x64x64xf32, #tpu.memory_space<vmem>>, vector<1x1x64x64xf32>
    %64 = vector.shape_cast %63 : vector<1x1x64x64xf32> to vector<64x64xf32>
    %65 = vector.shape_cast %62 : vector<64x64xf32> to vector<1x1x64x64xf32>
    tpu.vector_store %arg4[%c0_71, %c7_72, %c0_73, %c0_74], %65 {strides = array<i32>} : memref<1x13x64x64xf32, #tpu.memory_space<vmem>>, vector<1x1x64x64xf32>,
    %c0_75 = arith.constant 0 : index
    %c8 = arith.constant 8 : index
    %c0_76 = arith.constant 0 : index
    %c0_77 = arith.constant 0 : index
    %66 = vector.load %arg1[%c0_75, %c8, %c0_76, %c0_77] : memref<1x13x8x8xbf16, #tpu.memory_space<vmem>>, vector<1x1x8x8xbf16>
    %67 = vector.shape_cast %66 : vector<1x1x8x8xbf16> to vector<8x8xbf16>
    %cst_78 = arith.constant dense<0.000000e+00> : vector<8x64xf32>
    %68 = tpu.matmul %67, %1, %cst_78 {dimension_numbers = #tpu.dot_dimension_numbers<[1], [0], [0], [1], [0, 0, 1, 1], [], []>} : vector<8x8xbf16>, vector<8x64xbf16>, vector<8x64xf32> -> vector<8x64xf32>
    %69 = arith.truncf %68 : vector<8x64xf32> to vector<8x64xbf16>
    %cst_79 = arith.constant dense<0.000000e+00> : vector<64x64xf32>
    %70 = tpu.matmul %0, %69, %cst_79 {dimension_numbers = #tpu.dot_dimension_numbers<[1], [0], [0], [1], [0, 0, 1, 1], [], []>} : vector<64x8xbf16>, vector<8x64xbf16>, vector<64x64xf32> -> vector<64x64xf32>
    %c0_80 = arith.constant 0 : index
    %c8_81 = arith.constant 8 : index
    %c0_82 = arith.constant 0 : index
    %c0_83 = arith.constant 0 : index
    %71 = vector.load %arg4[%c0_80, %c8_81, %c0_82, %c0_83] : memref<1x13x64x64xf32, #tpu.memory_space<vmem>>, vector<1x1x64x64xf32>
    %72 = vector.shape_cast %71 : vector<1x1x64x64xf32> to vector<64x64xf32>
    %73 = vector.shape_cast %70 : vector<64x64xf32> to vector<1x1x64x64xf32>
    tpu.vector_store %arg4[%c0_80, %c8_81, %c0_82, %c0_83], %73 {strides = array<i32>} : memref<1x13x64x64xf32, #tpu.memory_space<vmem>>, vector<1x1x64x64xf32>,
    %c0_84 = arith.constant 0 : index
    %c9 = arith.constant 9 : index
    %c0_85 = arith.constant 0 : index
    %c0_86 = arith.constant 0 : index
    %74 = vector.load %arg1[%c0_84, %c9, %c0_85, %c0_86] : memref<1x13x8x8xbf16, #tpu.memory_space<vmem>>, vector<1x1x8x8xbf16>
    %75 = vector.shape_cast %74 : vector<1x1x8x8xbf16> to vector<8x8xbf16>
    %cst_87 = arith.constant dense<0.000000e+00> : vector<8x64xf32>
    %76 = tpu.matmul %75, %1, %cst_87 {dimension_numbers = #tpu.dot_dimension_numbers<[1], [0], [0], [1], [0, 0, 1, 1], [], []>} : vector<8x8xbf16>, vector<8x64xbf16>, vector<8x64xf32> -> vector<8x64xf32>
    %77 = arith.truncf %76 : vector<8x64xf32> to vector<8x64xbf16>
    %cst_88 = arith.constant dense<0.000000e+00> : vector<64x64xf32>
    %78 = tpu.matmul %0, %77, %cst_88 {dimension_numbers = #tpu.dot_dimension_numbers<[1], [0], [0], [1], [0, 0, 1, 1], [], []>} : vector<64x8xbf16>, vector<8x64xbf16>, vector<64x64xf32> -> vector<64x64xf32>
    %c0_89 = arith.constant 0 : index
    %c9_90 = arith.constant 9 : index
    %c0_91 = arith.constant 0 : index
    %c0_92 = arith.constant 0 : index
    %79 = vector.load %arg4[%c0_89, %c9_90, %c0_91, %c0_92] : memref<1x13x64x64xf32, #tpu.memory_space<vmem>>, vector<1x1x64x64xf32>
    %80 = vector.shape_cast %79 : vector<1x1x64x64xf32> to vector<64x64xf32>
    %81 = vector.shape_cast %78 : vector<64x64xf32> to vector<1x1x64x64xf32>
    tpu.vector_store %arg4[%c0_89, %c9_90, %c0_91, %c0_92], %81 {strides = array<i32>} : memref<1x13x64x64xf32, #tpu.memory_space<vmem>>, vector<1x1x64x64xf32>,
    %c0_93 = arith.constant 0 : index
    %c10 = arith.constant 10 : index
    %c0_94 = arith.constant 0 : index
    %c0_95 = arith.constant 0 : index
    %82 = vector.load %arg1[%c0_93, %c10, %c0_94, %c0_95] : memref<1x13x8x8xbf16, #tpu.memory_space<vmem>>, vector<1x1x8x8xbf16>
    %83 = vector.shape_cast %82 : vector<1x1x8x8xbf16> to vector<8x8xbf16>
    %cst_96 = arith.constant dense<0.000000e+00> : vector<8x64xf32>
    %84 = tpu.matmul %83, %1, %cst_96 {dimension_numbers = #tpu.dot_dimension_numbers<[1], [0], [0], [1], [0, 0, 1, 1], [], []>} : vector<8x8xbf16>, vector<8x64xbf16>, vector<8x64xf32> -> vector<8x64xf32>
    %85 = arith.truncf %84 : vector<8x64xf32> to vector<8x64xbf16>
    %cst_97 = arith.constant dense<0.000000e+00> : vector<64x64xf32>
    %86 = tpu.matmul %0, %85, %cst_97 {dimension_numbers = #tpu.dot_dimension_numbers<[1], [0], [0], [1], [0, 0, 1, 1], [], []>} : vector<64x8xbf16>, vector<8x64xbf16>, vector<64x64xf32> -> vector<64x64xf32>
    %c0_98 = arith.constant 0 : index
    %c10_99 = arith.constant 10 : index
    %c0_100 = arith.constant 0 : index
    %c0_101 = arith.constant 0 : index
    %87 = vector.load %arg4[%c0_98, %c10_99, %c0_100, %c0_101] : memref<1x13x64x64xf32, #tpu.memory_space<vmem>>, vector<1x1x64x64xf32>
    %88 = vector.shape_cast %87 : vector<1x1x64x64xf32> to vector<64x64xf32>
    %89 = vector.shape_cast %86 : vector<64x64xf32> to vector<1x1x64x64xf32>
    tpu.vector_store %arg4[%c0_98, %c10_99, %c0_100, %c0_101], %89 {strides = array<i32>} : memref<1x13x64x64xf32, #tpu.memory_space<vmem>>, vector<1x1x64x64xf32>,
    %c0_102 = arith.constant 0 : index
    %c11 = arith.constant 11 : index
    %c0_103 = arith.constant 0 : index
    %c0_104 = arith.constant 0 : index
    %90 = vector.load %arg1[%c0_102, %c11, %c0_103, %c0_104] : memref<1x13x8x8xbf16, #tpu.memory_space<vmem>>, vector<1x1x8x8xbf16>
    %91 = vector.shape_cast %90 : vector<1x1x8x8xbf16> to vector<8x8xbf16>
    %cst_105 = arith.constant dense<0.000000e+00> : vector<8x64xf32>
    %92 = tpu.matmul %91, %1, %cst_105 {dimension_numbers = #tpu.dot_dimension_numbers<[1], [0], [0], [1], [0, 0, 1, 1], [], []>} : vector<8x8xbf16>, vector<8x64xbf16>, vector<8x64xf32> -> vector<8x64xf32>
    %93 = arith.truncf %92 : vector<8x64xf32> to vector<8x64xbf16>
    %cst_106 = arith.constant dense<0.000000e+00> : vector<64x64xf32>
    %94 = tpu.matmul %0, %93, %cst_106 {dimension_numbers = #tpu.dot_dimension_numbers<[1], [0], [0], [1], [0, 0, 1, 1], [], []>} : vector<64x8xbf16>, vector<8x64xbf16>, vector<64x64xf32> -> vector<64x64xf32>
    %c0_107 = arith.constant 0 : index
    %c11_108 = arith.constant 11 : index
    %c0_109 = arith.constant 0 : index
    %c0_110 = arith.constant 0 : index
    %95 = vector.load %arg4[%c0_107, %c11_108, %c0_109, %c0_110] : memref<1x13x64x64xf32, #tpu.memory_space<vmem>>, vector<1x1x64x64xf32>
    %96 = vector.shape_cast %95 : vector<1x1x64x64xf32> to vector<64x64xf32>
    %97 = vector.shape_cast %94 : vector<64x64xf32> to vector<1x1x64x64xf32>
    tpu.vector_store %arg4[%c0_107, %c11_108, %c0_109, %c0_110], %97 {strides = array<i32>} : memref<1x13x64x64xf32, #tpu.memory_space<vmem>>, vector<1x1x64x64xf32>,
    %c0_111 = arith.constant 0 : index
    %c12 = arith.constant 12 : index
    %c0_112 = arith.constant 0 : index
    %c0_113 = arith.constant 0 : index
    %98 = vector.load %arg1[%c0_111, %c12, %c0_112, %c0_113] : memref<1x13x8x8xbf16, #tpu.memory_space<vmem>>, vector<1x1x8x8xbf16>
    %99 = vector.shape_cast %98 : vector<1x1x8x8xbf16> to vector<8x8xbf16>
    %cst_114 = arith.constant dense<0.000000e+00> : vector<8x64xf32>
    %100 = tpu.matmul %99, %1, %cst_114 {dimension_numbers = #tpu.dot_dimension_numbers<[1], [0], [0], [1], [0, 0, 1, 1], [], []>} : vector<8x8xbf16>, vector<8x64xbf16>, vector<8x64xf32> -> vector<8x64xf32>
    %101 = arith.truncf %100 : vector<8x64xf32> to vector<8x64xbf16>
    %cst_115 = arith.constant dense<0.000000e+00> : vector<64x64xf32>
    %102 = tpu.matmul %0, %101, %cst_115 {dimension_numbers = #tpu.dot_dimension_numbers<[1], [0], [0], [1], [0, 0, 1, 1], [], []>} : vector<64x8xbf16>, vector<8x64xbf16>, vector<64x64xf32> -> vector<64x64xf32>
    %c0_116 = arith.constant 0 : index
    %c12_117 = arith.constant 12 : index
    %c0_118 = arith.constant 0 : index
    %c0_119 = arith.constant 0 : index
    %103 = vector.load %arg4[%c0_116, %c12_117, %c0_118, %c0_119] : memref<1x13x64x64xf32, #tpu.memory_space<vmem>>, vector<1x1x64x64xf32>
    %104 = vector.shape_cast %103 : vector<1x1x64x64xf32> to vector<64x64xf32>
    %105 = vector.shape_cast %102 : vector<64x64xf32> to vector<1x1x64x64xf32>
    tpu.vector_store %arg4[%c0_116, %c12_117, %c0_118, %c0_119], %105 {strides = array<i32>} : memref<1x13x64x64xf32, #tpu.memory_space<vmem>>, vector<1x1x64x64xf32>,
    return
  }
  func.func @transform_0(%arg0: i32) -> (i32, i32, i32, i32) {
    %c0_i32 = arith.constant 0 : i32
    %c0_i32_0 = arith.constant 0 : i32
    %c0_i32_1 = arith.constant 0 : i32
    %c0_i32_2 = arith.constant 0 : i32
    return %arg0, %c0_i32, %c0_i32_0, %c0_i32_1 : i32, i32, i32, i32
  }
  func.func @transform_1(%arg0: i32) -> (i32, i32) {
    %c0_i32 = arith.constant 0 : i32
    %c0_i32_0 = arith.constant 0 : i32
    %c0_i32_1 = arith.constant 0 : i32
    return %c0_i32, %c0_i32_0 : i32, i32
  }
  func.func @transform_2(%arg0: i32) -> (i32, i32) {
    %c0_i32 = arith.constant 0 : i32
    %c0_i32_0 = arith.constant 0 : i32
    %c0_i32_1 = arith.constant 0 : i32
    return %c0_i32, %c0_i32_0 : i32, i32
  }
  func.func @transform_3(%arg0: i32) -> (i32, i32, i32, i32) {
    %c0_i32 = arith.constant 0 : i32
    %c0_i32_0 = arith.constant 0 : i32
    %c0_i32_1 = arith.constant 0 : i32
    %c0_i32_2 = arith.constant 0 : i32
    return %arg0, %c0_i32, %c0_i32_0, %c0_i32_1 : i32, i32, i32, i32
  }
}

</mosaic_0001>

<bundles_post_ra>
// kernel: just_efficientnet_forward.9
= control target key start
LH: loop header
LB: loop body
LE: loop exit
PB: predicated region body
PF: predicated region fallthrough
CT: control target
= control target key end

     0   :  { %s2154_s12 = smov 0   ;;  %s2156_s13 = smov 0   ;;  %s3164_s0 = inlined_call_operand.vmem [shape: bf16[512,224], index: 0, kind: input, shape index: {}]   ;;  %s3165_s1 = inlined_call_operand.vmem [shape: bf16[224,128], index: 1, kind: input, shape index: {}]   ;;  %s3166_s2 = inlined_call_operand.vmem [shape: f32[1,128], index: 2, kind: input, shape index: {}]   ;;  %s3167_s3 = inlined_call_operand.vmem [shape: bf16[512,128], index: 3, kind: output, shape index: {}]  }
   0x1   :  { %s2158_s14 = smov 0  }
   0x2 LB: > { %s25_s15 = sadd.s32 1, %s2128_s13  ;;  %p1560_p0 = scmp.ge.s32.totalorder %s2132_s14, 1  ;;  %s2132_s14 = sphi %s2158_s14, %s13_s14   ;;  %s2128_s13 = sphi %s2156_s13, %s3249_s13   ;;  %s2124_s12 = sphi %s2154_s12, %s3248_s12  }
   0x3   : > { %p27_p1 = scmp.ge.s32.totalorder %s25_s15, 2  ;;  %p170_p2 = scmp.lt.s32.totalorder %s2132_s14, 3 }
   0x5   : > { %s3251_s15 = smov (%p27_p1, %s25_s15), 0  ;;  %p171_p3 = pnand %p1560_p0, %p170_p2 }
   0x6   : > { %s1561_s22 = sshll.u32 (!%p171_p3), %s2124_s12, 5 }
   0x7   : > { %174 = sbr.rel (%p171_p3) target bundleno = 355 (0x163), region = 32  ;;  %p206_p4 = scmp.lt.s32.totalorder (!%p171_p3), %s1561_s22, 63 }
   0xc   : > { %v1840_v0 = vld [vmem:[%s3165_s1 + $0x38] sm:$0xff]  ;;  %v1846_v1 = vld [vmem:[%s3165_s1 + $0x68] sm:$0xff]  ;;  %v1839_v2 = vld [vmem:[%s3165_s1 + $0x30] sm:$0xff]  ;;  %s3253_s22 = smov (!%p206_p4, %s1561_s22), 63  ;;  %vm521_vm0 = vcmask 785408  }
   0xd   : > { %570 = vmatpush.bf16.msra.mxu0 %v1840_v0  ;;  %1942 = vmatpush.bf16.msra.mxu2 %v1840_v0  ;;  %v1845_v3 = vld [vmem:[%s3165_s1 + $0x60] sm:$0xff]  ;;  %v1838_v4 = vld [vmem:[%s3165_s1 + $0x28] sm:$0xff]  ;;  %v1844_v5 = vld [vmem:[%s3165_s1 + $0x58] sm:$0xff]  ;;  %s1800_s6 = sshll.u32 %s3253_s22, 3  ;;  %s1565_s28 = sshll.u32 %s3253_s22, 2 }
   0xe   : > { %661 = vmatpush.bf16.msra.mxu1 %v1846_v1  ;;  %1950 = vmatpush.bf16.msra.mxu3 %v1846_v1  ;;  %v1837_v6 = vld [vmem:[%s3165_s1 + $0x20] sm:$0xff]  ;;  %v1843_v7 = vld [vmem:[%s3165_s1 + $0x50] sm:$0xff]  ;;  %v1836_v8 = vld [vmem:[%s3165_s1 + $0x18] sm:$0xff]  ;;  %s2208_s16 = scalar_lea.vmem %s3164_s0, %s1800_s6  ;;  %s2365_s30 = scalar_lea.vmem %s3167_s3, %s1565_s28 }
   0xf   : > { %v1842_v9 = vld [vmem:[%s3165_s1 + $0x48] sm:$0xff]  ;;  %v1835_v10 = vld [vmem:[%s3165_s1 + $0x10] sm:$0xff]  ;;  %v1841_v11 = vld [vmem:[%s3165_s1 + $0x40] sm:$0xff] }
  0x10   : > { %v1801_v12 = vld [vmem:[%s2208_s16 + $0x4] sm:$0xf]  ;;  %v1570_v13 = vld [vmem:[%s2208_s16 + $0x8] sm:$0xf0]  ;;  %v1819_v14 = vld [vmem:[%s2208_s16 + $0x94] sm:$0xf] }
  0x11   : > { %571 = vmatpush.bf16.msra.mxu0 %v1839_v2  ;;  %1943 = vmatpush.bf16.msra.mxu2 %v1839_v2  ;;  %v1642_v15 = vld [vmem:[%s2208_s16 + $0x98] sm:$0xf0]  ;;  %v1573_v16 = vor.u32 %v1801_v12, %v1570_v13  ;;  %v1834_v17 = vld [vmem:[%s3165_s1 + $0x8] sm:$0xff]  ;;  %v1833_v19 = vld [vmem:[%s3165_s1] sm:$0xff] }
  0x12   : > { %662 = vmatpush.bf16.msra.mxu1 %v1845_v3  ;;  %1951 = vmatpush.bf16.msra.mxu3 %v1845_v3  ;;  %v1645_v18 = vor.u32 %v1819_v14, %v1642_v15  ;;  %v1568_v20 = vld [vmem:[%s2208_s16] sm:$0xf]  ;;  %v1802_v21 = vld [vmem:[%s2208_s16 + $0x4] sm:$0xf0]  ;;  %v1803_v26 = vld [vmem:[%s2208_s16 + $0x14] sm:$0xf] }
  0x13   : > { %v1632_v22 = vld [vmem:[%s2208_s16 + $0x80] sm:$0xf]  ;;  %v1818_v23 = vld [vmem:[%s2208_s16 + $0x84] sm:$0xf0]  ;;  %v1569_v24 = vor.u32 %v1802_v21, %v1568_v20  ;;  %v1578_v27 = vld [vmem:[%s2208_s16 + $0x18] sm:$0xf0] }
  0x14   : > { %v1633_v25 = vor.u32 %v1818_v23, %v1632_v22  ;;  %v1821_v28 = vld [vmem:[%s2208_s16 + $0xa4] sm:$0xf]  ;;  %v1650_v29 = vld [vmem:[%s2208_s16 + $0xa8] sm:$0xf0]  ;;  %v1581_v30 = vor.u32 %v1803_v26, %v1578_v27  ;;  %v1576_v32 = vld [vmem:[%s2208_s16 + $0x10] sm:$0xf] }
  0x15   : > { %572 = vmatpush.bf16.msra.mxu0 %v1838_v4  ;;  %1944 = vmatpush.bf16.msra.mxu2 %v1838_v4  ;;  %v1653_v31 = vor.u32 %v1821_v28, %v1650_v29  ;;  %v1804_v33 = vld [vmem:[%s2208_s16 + $0x14] sm:$0xf0]  ;;  %v1640_v34 = vld [vmem:[%s2208_s16 + $0x90] sm:$0xf]  ;;  %v1805_v38 = vld [vmem:[%s2208_s16 + $0x24] sm:$0xf] }
  0x16   : > { %663 = vmatpush.bf16.msra.mxu1 %v1844_v5  ;;  %1952 = vmatpush.bf16.msra.mxu3 %v1844_v5  ;;  %v1820_v35 = vld [vmem:[%s2208_s16 + $0x94] sm:$0xf0]  ;;  %v1577_v36 = vor.u32 %v1804_v33, %v1576_v32  ;;  %v1586_v39 = vld [vmem:[%s2208_s16 + $0x28] sm:$0xf0]  ;;  %v1823_v40 = vld [vmem:[%s2208_s16 + $0xb4] sm:$0xf] }
  0x17   : > { %v1641_v37 = vor.u32 %v1820_v35, %v1640_v34  ;;  %v1658_v41 = vld [vmem:[%s2208_s16 + $0xb8] sm:$0xf0]  ;;  %v1589_v42 = vor.u32 %v1805_v38, %v1586_v39  ;;  %v1584_v44 = vld [vmem:[%s2208_s16 + $0x20] sm:$0xf]  ;;  %v1806_v45 = vld [vmem:[%s2208_s16 + $0x24] sm:$0xf0] }
  0x18   : > { %v1661_v43 = vor.u32 %v1823_v40, %v1658_v41  ;;  %v1648_v46 = vld [vmem:[%s2208_s16 + $0xa0] sm:$0xf]  ;;  %v1822_v47 = vld [vmem:[%s2208_s16 + $0xa4] sm:$0xf0]  ;;  %v1585_v48 = vor.u32 %v1806_v45, %v1584_v44  ;;  %v1807_v50 = vld [vmem:[%s2208_s16 + $0x34] sm:$0xf] }
  0x19   : > { %573 = vmatpush.bf16.msra.mxu0 %v1837_v6  ;;  %1945 = vmatpush.bf16.msra.mxu2 %v1837_v6  ;;  %v1649_v49 = vor.u32 %v1822_v47, %v1648_v46  ;;  %v1594_v51 = vld [vmem:[%s2208_s16 + $0x38] sm:$0xf0]  ;;  %v1825_v52 = vld [vmem:[%s2208_s16 + $0xc4] sm:$0xf]  ;;  %v1666_v53 = vld [vmem:[%s2208_s16 + $0xc8] sm:$0xf0] }
  0x1a   : > { %664 = vmatpush.bf16.msra.mxu1 %v1843_v7  ;;  %1953 = vmatpush.bf16.msra.mxu3 %v1843_v7  ;;  %v1597_v54 = vor.u32 %v1807_v50, %v1594_v51  ;;  %v1669_v55 = vor.u32 %v1825_v52, %v1666_v53  ;;  %v1592_v56 = vld [vmem:[%s2208_s16 + $0x30] sm:$0xf]  ;;  %v1808_v57 = vld [vmem:[%s2208_s16 + $0x34] sm:$0xf0]  ;;  %v1809_v62 = vld [vmem:[%s2208_s16 + $0x44] sm:$0xf] }
  0x1b   : > { %v1656_v58 = vld [vmem:[%s2208_s16 + $0xb0] sm:$0xf]  ;;  %v1824_v59 = vld [vmem:[%s2208_s16 + $0xb4] sm:$0xf0]  ;;  %v1593_v60 = vor.u32 %v1808_v57, %v1592_v56  ;;  %v1602_v63 = vld [vmem:[%s2208_s16 + $0x48] sm:$0xf0] }
  0x1c   : > { %v1657_v61 = vor.u32 %v1824_v59, %v1656_v58  ;;  %v1827_v0 = vld [vmem:[%s2208_s16 + $0xd4] sm:$0xf]  ;;  %v1674_v1 = vld [vmem:[%s2208_s16 + $0xd8] sm:$0xf0]  ;;  %v1605_v2 = vor.u32 %v1809_v62, %v1602_v63  ;;  %v1600_v4 = vld [vmem:[%s2208_s16 + $0x40] sm:$0xf] }
  0x1d   : > { %574 = vmatpush.bf16.msra.mxu0 %v1836_v8  ;;  %1946 = vmatpush.bf16.msra.mxu2 %v1836_v8  ;;  %v1677_v3 = vor.u32 %v1827_v0, %v1674_v1  ;;  %v1810_v5 = vld [vmem:[%s2208_s16 + $0x44] sm:$0xf0]  ;;  %v1664_v6 = vld [vmem:[%s2208_s16 + $0xc0] sm:$0xf]  ;;  %v1829_v12 = vld [vmem:[%s2208_s16 + $0xe4] sm:$0xf] }
  0x1e   : > { %665 = vmatpush.bf16.msra.mxu1 %v1842_v9  ;;  %1954 = vmatpush.bf16.msra.mxu3 %v1842_v9  ;;  %v1826_v7 = vld [vmem:[%s2208_s16 + $0xc4] sm:$0xf0]  ;;  %v1601_v8 = vor.u32 %v1810_v5, %v1600_v4  ;;  %v1682_v13 = vld [vmem:[%s2208_s16 + $0xe8] sm:$0xf0]  ;;  %v1813_v22 = vld [vmem:[%s2208_s16 + $0x64] sm:$0xf] }
  0x1f   : > { %v1665_v9 = vor.u32 %v1826_v7, %v1664_v6  ;;  %v1685_v15 = vor.u32 %v1829_v12, %v1682_v13  ;;  %v1618_v23 = vld [vmem:[%s2208_s16 + $0x68] sm:$0xf0]  ;;  %v1616_v28 = vld [vmem:[%s2208_s16 + $0x60] sm:$0xf]  ;;  %v1814_v29 = vld [vmem:[%s2208_s16 + $0x64] sm:$0xf0] }
  0x20   : > { %v1621_v26 = vor.u32 %v1813_v22, %v1618_v23  ;;  %v1617_v32 = vor.u32 %v1814_v29, %v1616_v28  ;;  %v1815_v34 = vld [vmem:[%s2208_s16 + $0x74] sm:$0xf]  ;;  %v1626_v35 = vld [vmem:[%s2208_s16 + $0x78] sm:$0xf0]  ;;  %v1816_v38 = vld [vmem:[%s2208_s16 + $0x74] sm:$0xf0] }
  0x21   : > { %575 = vmatpush.bf16.msra.mxu0 %v1835_v10  ;;  %1947 = vmatpush.bf16.msra.mxu2 %v1835_v10  ;;  %v1811_v10 = vld [vmem:[%s2208_s16 + $0x54] sm:$0xf]  ;;  %v1688_v39 = vld [vmem:[%s2208_s16 + $0xf0] sm:$0xf]  ;;  %v1832_v40 = vld [vmem:[%s2208_s16 + $0xf4] sm:$0xf0] }
  0x22   : > { %666 = vmatpush.bf16.msra.mxu1 %v1841_v11  ;;  %1955 = vmatpush.bf16.msra.mxu3 %v1841_v11  ;;  %v1610_v11 = vld [vmem:[%s2208_s16 + $0x58] sm:$0xf0]  ;;  %v1634_v44 = vld [vmem:[%s2208_s16 + $0x88] sm:$0xf0]  ;;  %v2305_v47 = vld [vmem:[%s3166_s2] ss:$0 sm:$0xff] }
  0x23   : > { %v1613_v14 = vor.u32 %v1811_v10, %v1610_v11 }
  0x25   : > { %1750 = vmatmul.msk.bf16.vlgmr.msra.gmra.mxu1 %vm521_vm0, %v1573_v16  ;;  %576 = vmatpush.bf16.msra.mxu0 %v1834_v17  ;;  %v1608_v16 = vld [vmem:[%s2208_s16 + $0x50] sm:$0xf] }
  0x26   : > { %1948 = vmatpush.bf16.msra.mxu2 %v1834_v17  ;;  %1759 = vmatmul.msk.bf16.vlgmr.msra.gmra.mxu3 %vm521_vm0, %v1645_v18  ;;  %v1812_v17 = vld [vmem:[%s2208_s16 + $0x54] sm:$0xf0]  ;;  %v1672_v18 = vld [vmem:[%s2208_s16 + $0xd0] sm:$0xf] }
  0x27   : > { %v1609_v20 = vor.u32 %v1812_v17, %v1608_v16 }
  0x29   : > { %577 = vmatpush.bf16.msra.mxu0 %v1833_v19 }
  0x2a   : > { %1949 = vmatpush.bf16.msra.mxu2 %v1833_v19  ;;  %v1828_v19 = vld [vmem:[%s2208_s16 + $0xd4] sm:$0xf0] }
  0x2b   : > { %v1673_v21 = vor.u32 %v1828_v19, %v1672_v18 }
  0x2c   : > { %578 = vmatmul.bf16.vlgmr.msra.gmra.mxu0 %v1569_v24  ;;  %v1831_v24 = vld [vmem:[%s2208_s16 + $0xf4] sm:$0xf] }
  0x2d   : > { %618 = vmatmul.bf16.vlgmr.msra.gmra.mxu2 %v1633_v25  ;;  %v1690_v25 = vld [vmem:[%s2208_s16 + $0xf8] sm:$0xf0] }
  0x2e   : > { %v1693_v27 = vor.u32 %v1831_v24, %v1690_v25 }
  0x35   : > { %1751 = vmatmul.msk.bf16.gmra.mxu1 %vm521_vm0, %v1581_v30  ;;  %v1680_v30 = vld [vmem:[%s2208_s16 + $0xe0] sm:$0xf] }
  0x36   : > { %1760 = vmatmul.msk.bf16.gmra.mxu3 %vm521_vm0, %v1653_v31  ;;  %v1830_v31 = vld [vmem:[%s2208_s16 + $0xe4] sm:$0xf0] }
  0x37   : > { %v1681_v33 = vor.u32 %v1830_v31, %v1680_v30 }
  0x3c   : > { %583 = vmatmul.bf16.gmra.mxu0 %v1577_v36  ;;  %v1629_v36 = vor.u32 %v1815_v34, %v1626_v35 }
  0x3d   : > { %623 = vmatmul.bf16.gmra.mxu2 %v1641_v37  ;;  %v1624_v37 = vld [vmem:[%s2208_s16 + $0x70] sm:$0xf] }
  0x3e   : > { %v1625_v41 = vor.u32 %v1816_v38, %v1624_v37 }
  0x45   : > { %1752 = vmatmul.msk.bf16.gmra.mxu1 %vm521_vm0, %v1589_v42  ;;  %v1689_v42 = vor.u32 %v1832_v40, %v1688_v39 }
  0x46   : > { %1761 = vmatmul.msk.bf16.gmra.mxu3 %vm521_vm0, %v1661_v43  ;;  %v1817_v43 = vld [vmem:[%s2208_s16 + $0x84] sm:$0xf] }
  0x47   : > { %v1637_v45 = vor.u32 %v1817_v43, %v1634_v44 }
  0x4c   : > { %588 = vmatmul.bf16.gmra.mxu0 %v1585_v48 }
  0x4d   : > { %628 = vmatmul.bf16.gmra.mxu2 %v1649_v49 }
  0x55   : > { %1753 = vmatmul.msk.bf16.gmra.mxu1 %vm521_vm0, %v1597_v54 }
  0x56   : > { %1762 = vmatmul.msk.bf16.gmra.mxu3 %vm521_vm0, %v1669_v55 }
  0x5c   : > { %593 = vmatmul.bf16.gmra.mxu0 %v1593_v60 }
  0x5d   : > { %633 = vmatmul.bf16.gmra.mxu2 %v1657_v61 }
  0x65   : > { %1754 = vmatmul.msk.bf16.gmra.mxu1 %vm521_vm0, %v1605_v2 }
  0x66   : > { %1763 = vmatmul.msk.bf16.gmra.mxu3 %vm521_vm0, %v1677_v3 }
  0x6c   : > { %598 = vmatmul.bf16.gmra.mxu0 %v1601_v8 }
  0x6d   : > { %638 = vmatmul.bf16.gmra.mxu2 %v1665_v9 }
  0x75   : > { %1755 = vmatmul.msk.bf16.gmra.mxu1 %vm521_vm0, %v1613_v14 }
  0x76   : > { %1764 = vmatmul.msk.bf16.gmra.mxu3 %vm521_vm0, %v1685_v15 }
  0x7c   : > { %603 = vmatmul.bf16.gmra.mxu0 %v1609_v20 }
  0x7d   : > { %643 = vmatmul.bf16.gmra.mxu2 %v1673_v21 }
  0x85   : > { %1756 = vmatmul.msk.bf16.gmra.mxu1 %vm521_vm0, %v1621_v26 }
  0x86   : > { %1765 = vmatmul.msk.bf16.gmra.mxu3 %vm521_vm0, %v1693_v27 }
  0x8c   : > { %608 = vmatmul.bf16.gmra.mxu0 %v1617_v32 }
  0x8d   : > { %648 = vmatmul.bf16.gmra.mxu2 %v1681_v33 }
  0x95   : > { %1757 = vmatmul.msk.bf16.gmra.mxu1 %vm521_vm0, %v1629_v36 }
  0x9c   : > { %613 = vmatmul.bf16.gmra.mxu0 %v1625_v41 }
  0x9d   : > { %653 = vmatmul.bf16.gmra.mxu2 %v1689_v42 }
  0xa2   : > { %v668_v46 = vpop.f32.mrf.mxu1 }
  0xa5   : > { %1758 = vmatmul.msk.bf16.gmra.mxu1 %vm521_vm0, %v1637_v45 }
  0xa9   : > { %v579_v48 = vpop.f32.mrf.mxu0  ;;  %v713_v60 = vpop.f32.mrf.mxu3 }
  0xaa   : > { %v580_v49 = vadd.f32 %v2305_v47, %v579_v48  ;;  %v670_v50 = vpop.f32.mrf.mxu1 }
  0xac   : > { %v2308_v51 = vadd.f32 %v668_v46, %v580_v49 }
  0xae   : > { %v1766_v52 = vmul.f32 -1.442695, %v2308_v51 }
  0xb0   : > { %1981 = vpow2.f32 %v1766_v52  ;;  %v2311_v53 = vpop.f32.mrf.mxu2 }
  0xb1   : > { %v581_v54 = vpop.f32.mrf.mxu0  ;;  %v715_v9 = vpop.f32.mrf.mxu3 }
  0xb2   : > { %v582_v55 = vadd.f32 %v2305_v47, %v581_v54  ;;  %v673_v56 = vpop.f32.mrf.mxu1 }
  0xb4   : > { %v2314_v57 = vadd.f32 %v670_v50, %v582_v55 }
  0xb6   : > { %v1982_v58 = vpop.eup %1981  ;;  %v1767_v59 = vmul.f32 -1.442695, %v2314_v57 }
  0xb7   : > { %v844_v61 = vadd.f32 1.0, %v1982_v58 }
  0xb8   : > { %1983 = vpow2.f32 %v1767_v59  ;;  %v2317_v62 = vpop.f32.mrf.mxu2 }
  0xb9   : > { %1985 = vrcp.f32 %v844_v61  ;;  %v584_v63 = vpop.f32.mrf.mxu0  ;;  %v887_v26 = vand.u32 2147483648, %v844_v61  ;;  %vm881_vm2 = vweird.f32 %v844_v61  ;;  %v885_v28 = vand.u32 2147483647, %v844_v61  ;;  %v718_v31 = vpop.f32.mrf.mxu3 }
  0xba   : > { %v585_v0 = vadd.f32 %v2305_v47, %v584_v63  ;;  %v675_v1 = vpop.f32.mrf.mxu1 }
  0xbb   : > { %v888_v39 = vor.u32 1.1754944e-38, %v887_v26  ;;  %vm886_vm5 = vcmp.eq.f32.partialorder %v885_v28, 8.507059e+37 }
  0xbc   : > { %v2320_v2 = vadd.f32 %v673_v56, %v585_v0 }
  0xbe   : > { %v1984_v3 = vpop.eup %1983  ;;  %v1768_v4 = vmul.f32 -1.442695, %v2320_v2 }
  0xbf   : > { %v1986_v5 = vpop.eup %1985  ;;  %v845_v6 = vadd.f32 1.0, %v1984_v3 }
  0xc0   : > { %v877_v7 = vmul.f32 %v1986_v5, %v844_v61  ;;  %1987 = vpow2.f32 %v1768_v4  ;;  %v624_v8 = vpop.f32.mrf.mxu2  ;;  %vm882_vm1 = vweird.f32 %v1986_v5 }
  0xc1   : > { %1989 = vrcp.f32 %v845_v6  ;;  %v586_v10 = vpop.f32.mrf.mxu0  ;;  %v625_v12 = vadd.f32 %v2305_v47, %v624_v8  ;;  %vm2334_vm3 = vmor %vm881_vm2, %vm882_vm1  ;;  %v902_v33 = vand.u32 2147483648, %v845_v6  ;;  %v900_v38 = vand.u32 2147483647, %v845_v6 }
  0xc2   : > { %v878_v11 = vsub.f32 1.0, %v877_v7  ;;  %v587_v13 = vadd.f32 %v2305_v47, %v586_v10  ;;  %v678_v14 = vpop.f32.mrf.mxu1  ;;  %vm896_vm6 = vweird.f32 %v845_v6  ;;  %v720_v7 = vpop.f32.mrf.mxu3 }
  0xc3   : > { %v2325_v16 = vadd.f32 %v713_v60, %v625_v12  ;;  %v903_v46 = vor.u32 1.1754944e-38, %v902_v33  ;;  %vm901_vm8 = vcmp.eq.f32.partialorder %v900_v38, 8.507059e+37 }
  0xc4   : > { %v879_v15 = vmul.f32 %v1986_v5, %v878_v11  ;;  %v2327_v17 = vadd.f32 %v675_v1, %v587_v13 }
  0xc5   : > { %v1784_v19 = vmul.f32 -1.442695, %v2325_v16 }
  0xc6   : > { %v1988_v18 = vpop.eup %1987  ;;  %v1769_v20 = vmul.f32 -1.442695, %v2327_v17  ;;  %v880_v23 = vadd.f32 %v1986_v5, %v879_v15 }
  0xc7   : > { %v1990_v21 = vpop.eup %1989  ;;  %v2331_v22 = vadd.f32 1.0, %v1988_v18  ;;  %1991 = vpow2.f32 %v1784_v19 }
  0xc8   : > { %v892_v24 = vmul.f32 %v1990_v21, %v845_v6  ;;  %v626_v25 = vpop.f32.mrf.mxu2  ;;  %v884_v36 = vsel %vm2334_vm3, %v1986_v5, %v880_v23  ;;  %vm897_vm4 = vweird.f32 %v1990_v21 }
  0xc9   : > { %1993 = vrcp.f32 %v2331_v22  ;;  %v589_v27 = vpop.f32.mrf.mxu0  ;;  %v627_v34 = vadd.f32 %v2305_v47, %v626_v25  ;;  %v889_v45 = vsel %vm886_vm5, %v888_v39, %v884_v36  ;;  %vm898_vm7 = vmor %vm896_vm6, %vm897_vm4  ;;  %v915_v3 = vand.u32 2147483647, %v2331_v22 }
  0xca   : > { %v893_v29 = vsub.f32 1.0, %v892_v24  ;;  %1995 = vpow2.f32 %v1769_v20  ;;  %v680_v30 = vpop.f32.mrf.mxu1  ;;  %v590_v35 = vadd.f32 %v2305_v47, %v589_v27  ;;  %v1356_v60 = vmul.f32 %v889_v45, %v2308_v51 }
  0xcb   : > { %v2342_v40 = vadd.f32 %v715_v9, %v627_v34  ;;  %v917_v6 = vand.u32 2147483648, %v2331_v22  ;;  %vm911_vm9 = vweird.f32 %v2331_v22  ;;  %vm2383_vm11 = vcmp.eq.f32.partialorder %v915_v3, 8.507059e+37 }
  0xcc   : > { %v894_v37 = vmul.f32 %v1990_v21, %v893_v29  ;;  %v2344_v41 = vadd.f32 %v678_v14, %v590_v35 }
  0xcd   : > { %v1992_v42 = vpop.eup %1991  ;;  %v1785_v49 = vmul.f32 -1.442695, %v2342_v40  ;;  %v918_v13 = vor.u32 1.1754944e-38, %v917_v6 }
  0xce   : > { %v895_v43 = vadd.f32 %v1990_v21, %v894_v37  ;;  %v2348_v48 = vadd.f32 1.0, %v1992_v42  ;;  %v1770_v58 = vmul.f32 -1.442695, %v2344_v41 }
  0xcf   : > { %v2346_v44 = vpop.eup %1993 }
  0xd0   : > { %v1996_v50 = vpop.eup %1995  ;;  %v899_v52 = vsel %vm898_vm7, %v1990_v21, %v895_v43  ;;  %v907_v54 = vmul.f32 %v2346_v44, %v2331_v22  ;;  %v629_v55 = vpop.f32.mrf.mxu2  ;;  %1997 = vrcp.f32 %v2348_v48  ;;  %vm912_vm10 = vweird.f32 %v2346_v44 }
  0xd1   : > { %v904_v56 = vsel %vm901_vm8, %v903_v46, %v899_v52  ;;  %v591_v59 = vpop.f32.mrf.mxu0  ;;  %v2358_v0 = vadd.f32 1.0, %v1996_v50  ;;  %1999 = vpow2.f32 %v1785_v49  ;;  %v630_v4 = vadd.f32 %v2305_v47, %v629_v55  ;;  %vm2397_vm13 = vmor %vm911_vm9, %vm912_vm10  ;;  %v2427_v46 = vpop.f32.mrf.mxu3 }
  0xd2   : > { %v1357_v61 = vmul.f32 %v904_v56, %v2314_v57  ;;  %v908_v63 = vsub.f32 1.0, %v907_v54  ;;  %v2360_v1 = vpop.f32.mrf.mxu1  ;;  %v592_v51 = vadd.f32 %v2305_v47, %v591_v59  ;;  %v1155_v15 = vand.u32 2147483647, %v2348_v48 }
  0xd3   : > { %2001 = vrcp.f32 %v2358_v0  ;;  %v2374_v8 = vadd.f32 %v718_v31, %v630_v4  ;;  %vm1151_vm12 = vweird.f32 %v2348_v48  ;;  %v1157_v21 = vand.u32 2147483648, %v2348_v48 }
  0xd4   : > { %v1850_v5 = vpack.c.bf16 %v1357_v61, %v1356_v60  ;;  %v909_v57 = vmul.f32 %v2346_v44, %v908_v63  ;;  %2003 = vpow2.f32 %v1770_v58  ;;  %v2376_v9 = vadd.f32 %v680_v30, %v592_v51 }
  0xd5   : > { %v1786_v18 = vmul.f32 -1.442695, %v2374_v8  ;;  %v930_v29 = vand.u32 2147483647, %v2358_v0  ;;  %vm2414_vm15 = vcmp.eq.f32.partialorder %v1155_v15, 8.507059e+37  ;;  %v932_v38 = vand.u32 2147483648, %v2358_v0 }
  0xd6   : > { %1851 = vst [vmem:[%s2365_s30] sm:$0xff] %v1850_v5   ;;  %v2378_v10 = vpop.eup %1997  ;;  %v910_v11 = vadd.f32 %v2346_v44, %v909_v57  ;;  %v1771_v23 = vmul.f32 -1.442695, %v2376_v9  ;;  %v1158_v45 = vor.u32 1.1754944e-38, %v1157_v21  ;;  %vm926_vm0 = vweird.f32 %v2358_v0 }
  0xd7   : > { %v1147_v14 = vmul.f32 %v2378_v10, %v2348_v48  ;;  %v2000_v20 = vpop.eup %1999  ;;  %2005 = vpow2.f32 %v1786_v18  ;;  %vm1152_vm14 = vweird.f32 %v2378_v10  ;;  %vm2435_vm3 = vcmp.eq.f32.partialorder %v930_v29, 8.507059e+37 }
  0xd8   : > { %v631_v19 = vpop.f32.mrf.mxu2  ;;  %v2402_v30 = vadd.f32 1.0, %v2000_v20  ;;  %v914_v32 = vsel %vm2397_vm13, %v2346_v44, %v910_v11  ;;  %2007 = vpow2.f32 %v1771_v23  ;;  %vm2431_vm1 = vmor %vm1151_vm12, %vm1152_vm14  ;;  %v933_v63 = vor.u32 1.1754944e-38, %v932_v38 }
  0xd9   : > { %v632_v24 = vadd.f32 %v2305_v47, %v631_v19  ;;  %v594_v25 = vpop.f32.mrf.mxu0  ;;  %v2002_v26 = vpop.eup %2001  ;;  %v1148_v28 = vsub.f32 1.0, %v1147_v14  ;;  %v919_v43 = vsel %vm2383_vm11, %v918_v13, %v914_v32 }
  0xda   : > { %v2004_v31 = vpop.eup %2003  ;;  %v922_v33 = vmul.f32 %v2002_v26, %v2358_v0  ;;  %v2410_v22 = vpop.f32.mrf.mxu1  ;;  %2009 = vrcp.f32 %v2402_v30  ;;  %vm927_vm2 = vweird.f32 %v2002_v26  ;;  %v1170_v56 = vand.u32 2147483647, %v2402_v30 }
  0xdb   : > { %v2408_v34 = vadd.f32 %v720_v7, %v632_v24  ;;  %v1149_v35 = vmul.f32 %v2378_v10, %v1148_v28  ;;  %v2420_v39 = vadd.f32 1.0, %v2004_v31  ;;  %v1172_v48 = vand.u32 2147483648, %v2402_v30  ;;  %vm928_vm4 = vmor %vm926_vm0, %vm927_vm2 }
  0xdc   : > { %v923_v37 = vsub.f32 1.0, %v922_v33  ;;  %v1358_v60 = vmul.f32 %v919_v43, %v2320_v2  ;;  %vm1166_vm5 = vweird.f32 %v2402_v30  ;;  %v595_v6 = vadd.f32 %v2305_v47, %v594_v25 }
  0xdd   : > { %v1787_v42 = vmul.f32 -1.442695, %v2408_v34  ;;  %v1150_v44 = vadd.f32 %v2378_v10, %v1149_v35  ;;  %2011 = vrcp.f32 %v2420_v39  ;;  %v2006_v54 = vpop.eup %2005  ;;  %v945_v5 = vand.u32 2147483647, %v2420_v39 }
  0xde   : > { %v924_v50 = vmul.f32 %v2002_v26, %v923_v37  ;;  %v2008_v59 = vpop.eup %2007  ;;  %v2446_v3 = vadd.f32 1.0, %v2006_v54  ;;  %vm2462_vm6 = vcmp.eq.f32.partialorder %v1170_v56, 8.507059e+37  ;;  %v1173_v12 = vor.u32 1.1754944e-38, %v1172_v48 }
  0xdf   : > { %v1154_v55 = vsel %vm2431_vm1, %v2378_v10, %v1150_v44  ;;  %2013 = vpow2.f32 %v1787_v42  ;;  %v2453_v57 = vadd.f32 1.0, %v2008_v59  ;;  %v947_v13 = vand.u32 2147483648, %v2420_v39 }
  0xe0   : > { %v634_v58 = vpop.f32.mrf.mxu2  ;;  %v925_v61 = vadd.f32 %v2002_v26, %v924_v50  ;;  %v2010_v51 = vpop.eup %2009  ;;  %v1159_v2 = vsel %vm2414_vm15, %v1158_v45, %v1154_v55  ;;  %2015 = vrcp.f32 %v2446_v3  ;;  %vm941_vm7 = vweird.f32 %v2420_v39 }
  0xe1   : > { %v596_v4 = vpop.f32.mrf.mxu0  ;;  %v1162_v10 = vmul.f32 %v2010_v51, %v2402_v30  ;;  %2017 = vrcp.f32 %v2453_v57  ;;  %v1374_v21 = vmul.f32 %v1159_v2, %v2325_v16  ;;  %vm2474_vm8 = vcmp.eq.f32.partialorder %v945_v5, 8.507059e+37  ;;  %v725_v16 = vpop.f32.mrf.mxu3 }
  0xe2   : > { %v929_v7 = vsel %vm928_vm4, %v2002_v26, %v925_v61  ;;  %v2470_v19 = vpop.f32.mrf.mxu1  ;;  %v2479_v25 = vadd.f32 %v2360_v1, %v595_v6  ;;  %vm1167_vm9 = vweird.f32 %v2010_v51  ;;  %v1187_v27 = vand.u32 2147483648, %v2446_v3 }
  0xe3   : > { %v934_v0 = vsel %vm2435_vm3, %v933_v63, %v929_v7  ;;  %v2012_v14 = vpop.eup %2011  ;;  %v1163_v18 = vsub.f32 1.0, %v1162_v10  ;;  %v948_v29 = vor.u32 1.1754944e-38, %v947_v13  ;;  %v960_v31 = vand.u32 2147483647, %v2453_v57  ;;  %vm1168_vm12 = vmor %vm1166_vm5, %vm1167_vm9 }
  0xe4   : > { %v1359_v15 = vmul.f32 %v934_v0, %v2327_v17  ;;  %v937_v23 = vmul.f32 %v2012_v14, %v2420_v39  ;;  %vm942_vm10 = vweird.f32 %v2012_v14  ;;  %vm1181_vm11 = vweird.f32 %v2446_v3 }
  0xe5   : > { %v2014_v20 = vpop.eup %2013  ;;  %v1164_v26 = vmul.f32 %v2010_v51, %v1163_v18  ;;  %v1185_v1 = vand.u32 2147483647, %v2446_v3  ;;  %v962_v37 = vand.u32 2147483648, %v2453_v57  ;;  %vm956_vm13 = vweird.f32 %v2453_v57  ;;  %vm943_vm15 = vmor %vm941_vm7, %vm942_vm10 }
  0xe6   : > { %v1855_v17 = vpack.c.bf16 %v1359_v15, %v1358_v60  ;;  %v938_v28 = vsub.f32 1.0, %v937_v23  ;;  %v2483_v32 = vadd.f32 1.0, %v2014_v20  ;;  %v2485_v35 = vpop.eup %2015  ;;  %v1772_v44 = vmul.f32 -1.442695, %v2479_v25 }
  0xe7   : > { %v1165_v36 = vadd.f32 %v2010_v51, %v1164_v26  ;;  %v1177_v43 = vmul.f32 %v2485_v35, %v2446_v3  ;;  %v2018_v45 = vpop.eup %2017  ;;  %v2499_v50 = vor.u32 1.1754944e-38, %v1187_v27  ;;  %v635_v52 = vadd.f32 %v2305_v47, %v634_v58 }
  0xe8   : > { %v636_v33 = vpop.f32.mrf.mxu2  ;;  %1927 = vst [vmem:[%s2365_s30 + $0x8] sm:$0xff] %v1855_v17   ;;  %v939_v42 = vmul.f32 %v2012_v14, %v938_v28  ;;  %2019 = vrcp.f32 %v2483_v32  ;;  %v597_v54 = vadd.f32 %v2305_v47, %v596_v4  ;;  %v952_v48 = vmul.f32 %v2018_v45, %v2453_v57 }
  0xe9   : > { %v599_v38 = vpop.f32.mrf.mxu0  ;;  %v1169_v49 = vsel %vm1168_vm12, %v2010_v51, %v1165_v36  ;;  %v1178_v56 = vsub.f32 1.0, %v1177_v43  ;;  %vm2506_vm14 = vcmp.eq.f32.partialorder %v960_v31, 8.507059e+37  ;;  %vm1182_vm0 = vweird.f32 %v2485_v35  ;;  %v728_v17 = vpop.f32.mrf.mxu3 }
  0xea   : > { %v1174_v30 = vsel %vm2462_vm6, %v1173_v12, %v1169_v49  ;;  %v940_v55 = vadd.f32 %v2012_v14, %v939_v42  ;;  %v963_v58 = vor.u32 1.1754944e-38, %v962_v37  ;;  %v1200_v61 = vand.u32 2147483647, %v2483_v32  ;;  %v690_v7 = vpop.f32.mrf.mxu1  ;;  %vm2541_vm3 = vmor %vm1181_vm11, %vm1182_vm0 }
  0xeb   : > { %v1375_v60 = vmul.f32 %v1174_v30, %v2342_v40  ;;  %v1179_v4 = vmul.f32 %v2485_v35, %v1178_v56  ;;  %v953_v51 = vsub.f32 1.0, %v952_v48  ;;  %2021 = vpow2.f32 %v1772_v44 }
  0xec   : > { %v944_v63 = vsel %vm943_vm15, %v2012_v14, %v940_v55  ;;  %vm2519_vm1 = vcmp.eq.f32.partialorder %v1185_v1, 8.507059e+37  ;;  %v2524_v39 = vadd.f32 %v2427_v46, %v635_v52  ;;  %v2527_v2 = vadd.f32 %v2410_v22, %v597_v54 }
  0xed   : > { %v1895_v5 = vpack.c.bf16 %v1375_v60, %v1374_v21  ;;  %v949_v6 = vsel %vm2474_vm8, %v948_v29, %v944_v63  ;;  %v1180_v0 = vadd.f32 %v2485_v35, %v1179_v4  ;;  %v954_v11 = vmul.f32 %v2018_v45, %v953_v51 }
  0xee   : > { %v2020_v10 = vpop.eup %2019  ;;  %vm957_vm2 = vweird.f32 %v2018_v45  ;;  %v637_v12 = vadd.f32 %v2305_v47, %v636_v33  ;;  %v1202_v15 = vand.u32 2147483648, %v2483_v32  ;;  %v1788_v46 = vmul.f32 -1.442695, %v2524_v39 }
  0xef   : > { %1935 = vst [vmem:[%s2365_s30 + $0x48] sm:$0xff] %v1895_v5   ;;  %v1192_v14 = vmul.f32 %v2020_v10, %v2483_v32  ;;  %v1773_v18 = vmul.f32 -1.442695, %v2527_v2  ;;  %v1360_v22 = vmul.f32 %v949_v6, %v2344_v41  ;;  %v955_v21 = vadd.f32 %v2018_v45, %v954_v11  ;;  %vm958_vm4 = vmor %vm956_vm13, %vm957_vm2 }
  0xf0   : > { %v639_v13 = vpop.f32.mrf.mxu2  ;;  %v2545_v23 = vadd.f32 %v725_v16, %v637_v12  ;;  %v600_v24 = vadd.f32 %v2305_v47, %v599_v38  ;;  %vm1197_vm5 = vweird.f32 %v2020_v10  ;;  %2023 = vpow2.f32 %v1788_v46 }
  0xf1   : > { %v601_v26 = vpop.f32.mrf.mxu0  ;;  %v1193_v41 = vsub.f32 1.0, %v1192_v14  ;;  %v640_v3 = vadd.f32 %v2305_v47, %v639_v13  ;;  %v2022_v27 = vpop.eup %2021  ;;  %v1184_v28 = vsel %vm2541_vm3, %v2485_v35, %v1180_v0  ;;  %v959_v29 = vsel %vm958_vm4, %v2018_v45, %v955_v21 }
  0xf2   : > { %2025 = vpow2.f32 %v1773_v18  ;;  %v1789_v31 = vmul.f32 -1.442695, %v2545_v23  ;;  %v964_v16 = vsel %vm2506_vm14, %v963_v58, %v959_v29  ;;  %v2558_v57 = vadd.f32 1.0, %v2022_v27 }
  0xf3   : > { %v1194_v33 = vmul.f32 %v2020_v10, %v1193_v41  ;;  %v2561_v36 = vadd.f32 %v2470_v19, %v600_v24  ;;  %v1361_v1 = vmul.f32 %v964_v16, %v2376_v9  ;;  %v2564_v37 = vadd.f32 %v728_v17, %v640_v3 }
  0xf4   : > { %2027 = vpow2.f32 %v1789_v31  ;;  %v602_v35 = vadd.f32 %v2305_v47, %v601_v26  ;;  %vm1196_vm6 = vweird.f32 %v2483_v32  ;;  %v1203_v42 = vor.u32 1.1754944e-38, %v1202_v15  ;;  %v2577_v32 = vpop.f32.mrf.mxu1 }
  0xf5   : > { %v1195_v38 = vadd.f32 %v2020_v10, %v1194_v33  ;;  %2029 = vrcp.f32 %v2558_v57  ;;  %v1189_v43 = vsel %vm2519_vm1, %v2499_v50, %v1184_v28  ;;  %v1860_v19 = vpack.c.bf16 %v1361_v1, %v1360_v22  ;;  %vm1198_vm7 = vmor %vm1196_vm6, %vm1197_vm5 }
  0xf6   : > { %v1774_v9 = vmul.f32 -1.442695, %v2561_v36  ;;  %v1790_v44 = vmul.f32 -1.442695, %v2564_v37  ;;  %v2024_v49 = vpop.eup %2023  ;;  %vm1201_vm8 = vcmp.eq.f32.partialorder %v1200_v61, 8.507059e+37  ;;  %v2575_v54 = vadd.f32 %v690_v7, %v602_v35  ;;  %v730_v61 = vpop.f32.mrf.mxu3 }
  0xf7   : > { %v1199_v52 = vsel %vm1198_vm7, %v2020_v10, %v1195_v38  ;;  %1928 = vst [vmem:[%s2365_s30 + $0x10] sm:$0xff] %v1860_v19   ;;  %v2580_v56 = vadd.f32 1.0, %v2024_v49  ;;  %v1376_v50 = vmul.f32 %v1189_v43, %v2374_v8  ;;  %v975_v5 = vand.u32 2147483647, %v2558_v57 }
  0xf8   : > { %v641_v45 = vpop.f32.mrf.mxu2  ;;  %v2026_v30 = vpop.eup %2025  ;;  %v1204_v55 = vsel %vm1201_vm8, %v1203_v42, %v1199_v52  ;;  %2031 = vpow2.f32 %v1774_v9  ;;  %v1775_v58 = vmul.f32 -1.442695, %v2575_v54  ;;  %v977_v8 = vand.u32 2147483648, %v2558_v57 }
  0xf9   : > { %v1377_v48 = vmul.f32 %v1204_v55, %v2408_v34  ;;  %v2584_v59 = vadd.f32 1.0, %v2026_v30  ;;  %2033 = vpow2.f32 %v1790_v44  ;;  %v604_v63 = vpop.f32.mrf.mxu0  ;;  %v642_v6 = vadd.f32 %v2305_v47, %v641_v45 }
  0xfa   : > { %v2028_v60 = vpop.eup %2027  ;;  %2035 = vrcp.f32 %v2580_v56  ;;  %vm971_vm9 = vweird.f32 %v2558_v57  ;;  %v1215_v0 = vand.u32 2147483647, %v2580_v56  ;;  %v1217_v11 = vand.u32 2147483648, %v2580_v56 }
  0xfb   : > { %v2588_v4 = vpop.eup %2029  ;;  %v1900_v51 = vpack.c.bf16 %v1377_v48, %v1376_v50  ;;  %2037 = vrcp.f32 %v2584_v59  ;;  %v2598_v40 = vadd.f32 1.0, %v2028_v60  ;;  %vm2604_vm10 = vcmp.eq.f32.partialorder %v975_v5, 8.507059e+37 }
  0xfc   : > { %v967_v34 = vmul.f32 %v2588_v4, %v2558_v57  ;;  %2039 = vpow2.f32 %v1775_v58  ;;  %v978_v15 = vor.u32 1.1754944e-38, %v977_v8  ;;  %v990_v46 = vand.u32 2147483647, %v2584_v59  ;;  %v2621_v41 = vpop.f32.mrf.mxu1 }
  0xfd   : > { %1936 = vst [vmem:[%s2365_s30 + $0x50] sm:$0xff] %v1900_v51   ;;  %2041 = vrcp.f32 %v2598_v40  ;;  %v2615_v24 = vadd.f32 %v730_v61, %v642_v6  ;;  %vm972_vm11 = vweird.f32 %v2588_v4  ;;  %vm1211_vm12 = vweird.f32 %v2580_v56 }
  0xfe   : > { %v2032_v7 = vpop.eup %2031  ;;  %v968_v10 = vsub.f32 1.0, %v967_v34  ;;  %vm986_vm13 = vweird.f32 %v2584_v59  ;;  %vm2624_vm14 = vcmp.eq.f32.partialorder %v1215_v0, 8.507059e+37  ;;  %v1218_v28 = vor.u32 1.1754944e-38, %v1217_v11  ;;  %vm2634_vm15 = vmor %vm971_vm9, %vm972_vm11  ;;  %v2644_v19 = vpop.f32.mrf.mxu3 }
  0xff   : > { %v2034_v13 = vpop.eup %2033  ;;  %v2611_v20 = vadd.f32 1.0, %v2032_v7  ;;  %v992_v16 = vand.u32 2147483648, %v2584_v59  ;;  %v1230_v33 = vand.u32 2147483647, %v2598_v40  ;;  %vm2638_vm0 = vcmp.eq.f32.partialorder %v990_v46, 8.507059e+37 }
 0x100   : > { %v2602_v12 = vpop.f32.mrf.mxu2  ;;  %v2036_v18 = vpop.eup %2035  ;;  %v969_v22 = vmul.f32 %v2588_v4, %v968_v10  ;;  %v2613_v21 = vadd.f32 1.0, %v2034_v13  ;;  %v1791_v43 = vmul.f32 -1.442695, %v2615_v24  ;;  %v1232_v49 = vand.u32 2147483648, %v2598_v40 }
 0x101   : > { %v2038_v17 = vpop.eup %2037  ;;  %v1207_v26 = vmul.f32 %v2036_v18, %v2580_v56  ;;  %2043 = vrcp.f32 %v2611_v20  ;;  %v2646_v9 = vpop.f32.mrf.mxu0  ;;  %vm1212_vm1 = vweird.f32 %v2036_v18  ;;  %v605_v55 = vadd.f32 %v2305_v47, %v604_v63 }
 0x102   : > { %v970_v3 = vadd.f32 %v2588_v4, %v969_v22  ;;  %v982_v29 = vmul.f32 %v2038_v17, %v2584_v59  ;;  %v2040_v1 = vpop.eup %2039  ;;  %2045 = vrcp.f32 %v2613_v21  ;;  %vm987_vm2 = vweird.f32 %v2038_v17  ;;  %vm2665_vm5 = vmor %vm1211_vm12, %vm1212_vm1 }
 0x103   : > { %v1208_v31 = vsub.f32 1.0, %v1207_v26  ;;  %v2042_v44 = vpop.eup %2041  ;;  %v993_v48 = vor.u32 1.1754944e-38, %v992_v16  ;;  %vm1226_vm3 = vweird.f32 %v2598_v40  ;;  %vm2655_vm4 = vcmp.eq.f32.partialorder %v1230_v33, 8.507059e+37  ;;  %vm988_vm6 = vmor %vm986_vm13, %vm987_vm2 }
 0x104   : > { %v983_v38 = vsub.f32 1.0, %v982_v29  ;;  %v974_v57 = vsel %vm2634_vm15, %v2588_v4, %v970_v3  ;;  %v1222_v30 = vmul.f32 %v2042_v44, %v2598_v40  ;;  %2047 = vpow2.f32 %v1791_v43  ;;  %v2691_v46 = vpop.f32.mrf.mxu1 }
 0x105   : > { %v1209_v45 = vmul.f32 %v2036_v18, %v1208_v31  ;;  %v979_v61 = vsel %vm2604_vm10, %v978_v15, %v974_v57  ;;  %v1233_v34 = vor.u32 1.1754944e-38, %v1232_v49  ;;  %v1005_v6 = vand.u32 2147483647, %v2611_v20 }
 0x106   : > { %v984_v52 = vmul.f32 %v2038_v17, %v983_v38  ;;  %v1223_v51 = vsub.f32 1.0, %v1222_v30  ;;  %v2677_v56 = vadd.f32 1.0, %v2040_v1  ;;  %vm1227_vm7 = vweird.f32 %v2042_v44 }
 0x107   : > { %v1210_v50 = vadd.f32 %v2036_v18, %v1209_v45  ;;  %v2669_v5 = vpop.eup %2043  ;;  %vm1001_vm8 = vweird.f32 %v2611_v20  ;;  %v1362_v13 = vmul.f32 %v979_v61, %v2479_v25  ;;  %v2695_v26 = vadd.f32 %v2577_v32, %v605_v55  ;;  %vm1228_vm9 = vmor %vm1226_vm3, %vm1227_vm7  ;;  %v735_v32 = vpop.f32.mrf.mxu3 }
 0x108   : > { %v2659_v58 = vpop.f32.mrf.mxu2  ;;  %v985_v63 = vadd.f32 %v2038_v17, %v984_v52  ;;  %v2679_v7 = vpop.eup %2045  ;;  %v1224_v0 = vmul.f32 %v2042_v44, %v1223_v51  ;;  %v997_v11 = vmul.f32 %v2669_v5, %v2611_v20  ;;  %v1007_v25 = vand.u32 2147483648, %v2611_v20 }
 0x109   : > { %v1214_v8 = vsel %vm2665_vm5, %v2036_v18, %v1210_v50  ;;  %v1237_v15 = vmul.f32 %v2679_v7, %v2613_v21  ;;  %v1247_v27 = vand.u32 2147483648, %v2613_v21  ;;  %2049 = vrcp.f32 %v2677_v56  ;;  %v609_v33 = vpop.f32.mrf.mxu0 }
 0x10a   : > { %v989_v10 = vsel %vm988_vm6, %v2038_v17, %v985_v63  ;;  %v1219_v59 = vsel %vm2624_vm14, %v1218_v28, %v1214_v8  ;;  %v1225_v22 = vadd.f32 %v2042_v44, %v1224_v0  ;;  %v998_v17 = vsub.f32 1.0, %v997_v11  ;;  %v2048_v28 = vpop.eup %2047 }
 0x10b   : > { %v994_v14 = vsel %vm2638_vm0, %v993_v48, %v989_v10  ;;  %v1238_v3 = vsub.f32 1.0, %v1237_v15  ;;  %v1378_v29 = vmul.f32 %v1219_v59, %v2524_v39  ;;  %vm1002_vm10 = vweird.f32 %v2669_v5 }
 0x10c   : > { %v1363_v18 = vmul.f32 %v994_v14, %v2527_v2  ;;  %v1229_v31 = vsel %vm1228_vm9, %v2042_v44, %v1225_v22  ;;  %v999_v16 = vmul.f32 %v2669_v5, %v998_v17  ;;  %v1020_v1 = vand.u32 2147483647, %v2677_v56  ;;  %vm2727_vm13 = vmor %vm1001_vm8, %vm1002_vm10 }
 0x10d   : > { %v1234_v40 = vsel %vm2655_vm4, %v1233_v34, %v1229_v31  ;;  %v2708_v35 = vadd.f32 1.0, %v2048_v28  ;;  %v1022_v42 = vand.u32 2147483648, %v2677_v56  ;;  %v1776_v43 = vmul.f32 -1.442695, %v2695_v26  ;;  %v700_v34 = vpop.f32.mrf.mxu1 }
 0x10e   : > { %v1865_v2 = vpack.c.bf16 %v1363_v18, %v1362_v13  ;;  %v1379_v38 = vmul.f32 %v1234_v40, %v2545_v23  ;;  %v1000_v39 = vadd.f32 %v2669_v5, %v999_v16  ;;  %vm2715_vm11 = vcmp.eq.f32.partialorder %v1005_v6, 8.507059e+37 }
 0x10f   : > { %v1239_v57 = vmul.f32 %v2679_v7, %v1238_v3  ;;  %vm1241_vm12 = vweird.f32 %v2613_v21  ;;  %2051 = vrcp.f32 %v2708_v35  ;;  %v1008_v23 = vor.u32 1.1754944e-38, %v1007_v25  ;;  %v2050_v30 = vpop.eup %2049  ;;  %v738_v17 = vpop.f32.mrf.mxu3 }
 0x110   : > { %1929 = vst [vmem:[%s2365_s30 + $0x18] sm:$0xff] %v1865_v2   ;;  %v649_v45 = vpop.f32.mrf.mxu2  ;;  %v1905_v49 = vpack.c.bf16 %v1379_v38, %v1378_v29  ;;  %v1245_v52 = vand.u32 2147483647, %v2613_v21  ;;  %2053 = vpow2.f32 %v1776_v43  ;;  %vm1242_vm14 = vweird.f32 %v2679_v7 }
 0x111   : > { %v1248_v50 = vor.u32 1.1754944e-38, %v1247_v27  ;;  %vm1016_vm15 = vweird.f32 %v2677_v56  ;;  %v645_v48 = vadd.f32 %v2305_v47, %v2602_v12  ;;  %v1004_v60 = vsel %vm2727_vm13, %v2669_v5, %v1000_v39  ;;  %v611_v25 = vpop.f32.mrf.mxu0  ;;  %vm2780_vm4 = vmor %vm1241_vm12, %vm1242_vm14 }
 0x112   : > { %1937 = vst [vmem:[%s2365_s30 + $0x58] sm:$0xff] %v1905_v49   ;;  %v1012_v61 = vmul.f32 %v2050_v30, %v2677_v56  ;;  %vm2740_vm0 = vcmp.eq.f32.partialorder %v1020_v1, 8.507059e+37  ;;  %v1023_v4 = vor.u32 1.1754944e-38, %v1022_v42  ;;  %v1240_v63 = vadd.f32 %v2679_v7, %v1239_v57 }
 0x113   : > { %v1260_v51 = vand.u32 2147483647, %v2708_v35  ;;  %v2747_v8 = vadd.f32 %v2644_v19, %v645_v48  ;;  %v607_v12 = vadd.f32 %v2305_v47, %v2646_v9  ;;  %vm2751_vm1 = vcmp.eq.f32.partialorder %v1245_v52, 8.507059e+37 }
 0x114   : > { %v1013_v6 = vsub.f32 1.0, %v1012_v61  ;;  %vm1256_vm2 = vweird.f32 %v2708_v35  ;;  %v647_v10 = vadd.f32 %v2305_v47, %v2659_v58  ;;  %v610_v0 = vadd.f32 %v2305_v47, %v609_v33 }
 0x115   : > { %v650_v11 = vadd.f32 %v2305_v47, %v649_v45  ;;  %v2052_v19 = vpop.eup %2051  ;;  %v1009_v13 = vsel %vm2715_vm11, %v1008_v23, %v1004_v60  ;;  %v1262_v9 = vand.u32 2147483648, %v2708_v35  ;;  %v1792_v59 = vmul.f32 -1.442695, %v2747_v8  ;;  %v703_v49 = vpop.f32.mrf.mxu1 }
 0x116   : > { %v2765_v14 = vadd.f32 %v2621_v41, %v607_v12  ;;  %v2054_v15 = vpop.eup %2053  ;;  %v1014_v18 = vmul.f32 %v2050_v30, %v1013_v6  ;;  %vm1017_vm3 = vweird.f32 %v2050_v30  ;;  %v1252_v58 = vmul.f32 %v2052_v19, %v2708_v35 }
 0x117   : > { %v2768_v22 = vadd.f32 %v735_v32, %v647_v10  ;;  %v2770_v3 = vadd.f32 1.0, %v2054_v15  ;;  %2055 = vpow2.f32 %v1792_v59  ;;  %v2774_v28 = vadd.f32 %v2691_v46, %v610_v0  ;;  %vm1018_vm5 = vmor %vm1016_vm15, %vm1017_vm3  ;;  %v740_v20 = vpop.f32.mrf.mxu3 }
 0x118   : > { %v1777_v27 = vmul.f32 -1.442695, %v2765_v14  ;;  %v1015_v29 = vadd.f32 %v2050_v30, %v1014_v18  ;;  %v1253_v2 = vsub.f32 1.0, %v1252_v58  ;;  %v2785_v16 = vadd.f32 %v738_v17, %v650_v11  ;;  %v651_v46 = vpop.f32.mrf.mxu2 }
 0x119   : > { %v1793_v31 = vmul.f32 -1.442695, %v2768_v22  ;;  %v1244_v32 = vsel %vm2780_vm4, %v2679_v7, %v1240_v63  ;;  %vm1257_vm6 = vweird.f32 %v2052_v19  ;;  %2057 = vrcp.f32 %v2770_v3 }
 0x11a   : > { %v612_v21 = vadd.f32 %v2305_v47, %v611_v25  ;;  %v1019_v33 = vsel %vm1018_vm5, %v2050_v30, %v1015_v29  ;;  %v1254_v40 = vmul.f32 %v2052_v19, %v1253_v2  ;;  %2059 = vpow2.f32 %v1777_v27  ;;  %vm1258_vm8 = vmor %vm1256_vm2, %vm1257_vm6 }
 0x11b   : > { %v1778_v1 = vmul.f32 -1.442695, %v2774_v28  ;;  %v1364_v38 = vmul.f32 %v1009_v13, %v2561_v36  ;;  %v1024_v7 = vsel %vm2740_vm0, %v1023_v4, %v1019_v33  ;;  %vm2799_vm7 = vcmp.eq.f32.partialorder %v1260_v51, 8.507059e+37  ;;  %v614_v4 = vpop.f32.mrf.mxu0 }
 0x11c   : > { %2061 = vpow2.f32 %v1793_v31  ;;  %v1365_v56 = vmul.f32 %v1024_v7, %v2575_v54  ;;  %v1255_v42 = vadd.f32 %v2052_v19, %v1254_v40  ;;  %v1794_v43 = vmul.f32 -1.442695, %v2785_v16 }
 0x11d   : > { %2063 = vpow2.f32 %v1778_v1  ;;  %v2056_v44 = vpop.eup %2055  ;;  %v1249_v57 = vsel %vm2751_vm1, %v1248_v50, %v1244_v32  ;;  %v1263_v36 = vor.u32 1.1754944e-38, %v1262_v9  ;;  %v2810_v45 = vadd.f32 %v700_v34, %v612_v21  ;;  %v2868_v31 = vpop.f32.mrf.mxu1 }
 0x11e   : > { %v652_v23 = vadd.f32 %v2305_v47, %v651_v46  ;;  %v1870_v54 = vpack.c.bf16 %v1365_v56, %v1364_v38  ;;  %v1259_v52 = vsel %vm1258_vm8, %v2052_v19, %v1255_v42  ;;  %v2813_v30 = vadd.f32 1.0, %v2056_v44 }
 0x11f   : > { %2065 = vpow2.f32 %v1794_v43  ;;  %v2815_v55 = vpop.eup %2057  ;;  %v1264_v50 = vsel %vm2799_vm7, %v1263_v36, %v1259_v52  ;;  %v1779_v48 = vmul.f32 -1.442695, %v2810_v45  ;;  %v1380_v60 = vmul.f32 %v1249_v57, %v2564_v37 }
 0x120   : > { %v2060_v35 = vpop.eup %2059  ;;  %1930 = vst [vmem:[%s2365_s30 + $0x20] sm:$0xff] %v1870_v54   ;;  %v1381_v61 = vmul.f32 %v1264_v50, %v2615_v24  ;;  %v1027_v47 = vmul.f32 %v2815_v55, %v2770_v3  ;;  %2067 = vrcp.f32 %v2813_v30  ;;  %v1037_v51 = vand.u32 2147483648, %v2770_v3  ;;  %v2836_v24 = vld [vmem:[%s3166_s2] ss:$0 sm:$0xff]  ;;  %v654_v19 = vpop.f32.mrf.mxu2 }
 0x121   : > { %v2827_v12 = vadd.f32 1.0, %v2060_v35  ;;  %v2829_v34 = vadd.f32 %v740_v20, %v652_v23  ;;  %2069 = vpow2.f32 %v1779_v48  ;;  %v2840_v0 = vadd.f32 %v2836_v24, %v2311_v53 }
 0x122   : > { %v2062_v63 = vpop.eup %2061  ;;  %v1910_v37 = vpack.c.bf16 %v1381_v61, %v1380_v60  ;;  %v1028_v6 = vsub.f32 1.0, %v1027_v47  ;;  %v615_v11 = vadd.f32 %v2836_v24, %v614_v4  ;;  %v2846_v9 = vadd.f32 %v2836_v24, %v2317_v62 }
 0x123   : > { %v2064_v5 = vpop.eup %2063  ;;  %v2831_v10 = vadd.f32 1.0, %v2062_v63  ;;  %2071 = vrcp.f32 %v2827_v12  ;;  %vm1031_vm9 = vweird.f32 %v2770_v3  ;;  %v1035_v59 = vand.u32 2147483647, %v2770_v3 }
 0x124   : > { %1938 = vst [vmem:[%s2365_s30 + $0x60] sm:$0xff] %v1910_v37   ;;  %v1038_v15 = vor.u32 1.1754944e-38, %v1037_v51  ;;  %v1275_v53 = vand.u32 2147483647, %v2813_v30  ;;  %v1277_v18 = vand.u32 2147483648, %v2813_v30  ;;  %v2854_v58 = vadd.f32 1.0, %v2064_v5 }
 0x125   : > { %v2066_v13 = vpop.eup %2065  ;;  %2073 = vrcp.f32 %v2831_v10  ;;  %v1029_v25 = vmul.f32 %v2815_v55, %v1028_v6  ;;  %v1795_v62 = vmul.f32 -1.442695, %v2829_v34  ;;  %v2861_v41 = vadd.f32 %v2836_v24, %v654_v19 }
 0x126   : > { %v2068_v17 = vpop.eup %2067  ;;  %v2857_v27 = vadd.f32 1.0, %v2066_v13  ;;  %vm1032_vm10 = vweird.f32 %v2815_v55  ;;  %vm1271_vm11 = vweird.f32 %v2813_v30  ;;  %v2866_v2 = vadd.f32 %v703_v49, %v615_v11 }
 0x127   : > { %v1267_v29 = vmul.f32 %v2068_v17, %v2813_v30  ;;  %v2070_v32 = vpop.eup %2069  ;;  %vm2870_vm12 = vcmp.eq.f32.partialorder %v1035_v59, 8.507059e+37  ;;  %v1050_v46 = vand.u32 2147483647, %v2827_v12  ;;  %v1052_v33 = vand.u32 2147483648, %v2827_v12  ;;  %vm2901_vm3 = vmor %vm1031_vm9, %vm1032_vm10  ;;  %v708_v59 = vpop.f32.mrf.mxu1 }
 0x128   : > { %v1290_v40 = vand.u32 2147483647, %v2831_v10  ;;  %2075 = vrcp.f32 %v2854_v58  ;;  %vm2878_vm13 = vcmp.eq.f32.partialorder %v1275_v53, 8.507059e+37  ;;  %v1278_v39 = vor.u32 1.1754944e-38, %v1277_v18 }
 0x129   : > { %v2072_v1 = vpop.eup %2071  ;;  %v1268_v38 = vsub.f32 1.0, %v1267_v29  ;;  %2077 = vrcp.f32 %v2857_v27  ;;  %v1030_v42 = vadd.f32 %v2815_v55, %v1029_v25  ;;  %vm1046_vm14 = vweird.f32 %v2827_v12 }
 0x12a   : > { %v1042_v43 = vmul.f32 %v2072_v1, %v2827_v12  ;;  %v1292_v44 = vand.u32 2147483648, %v2831_v10  ;;  %vm1272_vm15 = vweird.f32 %v2068_v17  ;;  %vm1286_vm0 = vweird.f32 %v2831_v10 }
 0x12b   : > { %v2074_v56 = vpop.eup %2073  ;;  %v1269_v57 = vmul.f32 %v2068_v17, %v1268_v38  ;;  %vm2889_vm1 = vcmp.eq.f32.partialorder %v1050_v46, 8.507059e+37  ;;  %v1053_v54 = vor.u32 1.1754944e-38, %v1052_v33  ;;  %vm2893_vm2 = vcmp.eq.f32.partialorder %v1290_v40, 8.507059e+37  ;;  %vm2914_vm4 = vmor %vm1271_vm11, %vm1272_vm15 }
 0x12c   : > { %v1282_v36 = vmul.f32 %v2074_v56, %v2831_v10  ;;  %v1043_v49 = vsub.f32 1.0, %v1042_v43  ;;  %v2905_v60 = vadd.f32 1.0, %v2070_v32  ;;  %2079 = vpow2.f32 %v1795_v62 }
 0x12d   : > { %v1270_v48 = vadd.f32 %v2068_v17, %v1269_v57  ;;  %v1034_v47 = vsel %vm2901_vm3, %v2815_v55, %v1030_v42  ;;  %vm1047_vm5 = vweird.f32 %v2072_v1  ;;  %v1293_v4 = vor.u32 1.1754944e-38, %v1292_v44  ;;  %v616_v44 = vpop.f32.mrf.mxu0 }
 0x12e   : > { %v1283_v35 = vsub.f32 1.0, %v1282_v36  ;;  %v2907_v61 = vpop.eup %2075  ;;  %v1044_v3 = vmul.f32 %v2072_v1, %v1043_v49  ;;  %vm1287_vm6 = vweird.f32 %v2074_v56  ;;  %vm1061_vm7 = vweird.f32 %v2854_v58  ;;  %vm1048_vm8 = vmor %vm1046_vm14, %vm1047_vm5  ;;  %v656_v36 = vpop.f32.mrf.mxu2 }
 0x12f   : > { %v2918_v63 = vpop.eup %2077  ;;  %v1274_v51 = vsel %vm2914_vm4, %v2068_v17, %v1270_v48  ;;  %v1057_v37 = vmul.f32 %v2907_v61, %v2854_v58  ;;  %v1065_v30 = vand.u32 2147483647, %v2854_v58  ;;  %v1039_v11 = vsel %vm2870_vm12, %v1038_v15, %v1034_v47  ;;  %vm1288_vm9 = vmor %vm1286_vm0, %vm1287_vm6  ;;  %v743_v15 = vpop.f32.mrf.mxu3 }
 0x130   : > { %v1284_v5 = vmul.f32 %v2074_v56, %v1283_v35  ;;  %v1045_v55 = vadd.f32 %v2072_v1, %v1044_v3  ;;  %v1297_v6 = vmul.f32 %v2918_v63, %v2857_v27  ;;  %2081 = vrcp.f32 %v2905_v60  ;;  %v710_v3 = vpop.f32.mrf.mxu1 }
 0x131   : > { %v1058_v13 = vsub.f32 1.0, %v1057_v37  ;;  %v1279_v53 = vsel %vm2878_vm13, %v1278_v39, %v1274_v51  ;;  %v1067_v17 = vand.u32 2147483648, %v2854_v58  ;;  %v1780_v25 = vmul.f32 -1.442695, %v2866_v2 }
 0x132   : > { %v1285_v19 = vadd.f32 %v2074_v56, %v1284_v5  ;;  %v1049_v18 = vsel %vm1048_vm8, %v2072_v1, %v1045_v55  ;;  %v2080_v62 = vpop.eup %2079  ;;  %v1298_v21 = vsub.f32 1.0, %v1297_v6  ;;  %v1366_v46 = vmul.f32 %v1039_v11, %v2695_v26 }
 0x133   : > { %v1054_v12 = vsel %vm2889_vm1, %v1053_v54, %v1049_v18  ;;  %v1059_v32 = vmul.f32 %v2907_v61, %v1058_v13  ;;  %vm1062_vm10 = vweird.f32 %v2907_v61  ;;  %v1382_v40 = vmul.f32 %v1279_v53, %v2747_v8 }
 0x134   : > { %v1289_v29 = vsel %vm1288_vm9, %v2074_v56, %v1285_v19  ;;  %v1367_v33 = vmul.f32 %v1054_v12, %v2765_v14  ;;  %v2950_v7 = vadd.f32 1.0, %v2080_v62  ;;  %vm2952_vm11 = vcmp.eq.f32.partialorder %v1065_v30, 8.507059e+37  ;;  %vm2961_vm12 = vmor %vm1061_vm7, %vm1062_vm10 }
 0x135   : > { %v1294_v10 = vsel %vm2893_vm2, %v1293_v4, %v1289_v29  ;;  %v1060_v38 = vadd.f32 %v2907_v61, %v1059_v32  ;;  %2083 = vpow2.f32 %v1780_v25  ;;  %v2957_v26 = vadd.f32 %v743_v15, %v2861_v41 }
 0x136   : > { %v1383_v1 = vmul.f32 %v1294_v10, %v2768_v22  ;;  %v1875_v39 = vpack.c.bf16 %v1367_v33, %v1366_v46  ;;  %v2082_v14 = vpop.eup %2081  ;;  %v1068_v22 = vor.u32 1.1754944e-38, %v1067_v17  ;;  %v1299_v43 = vmul.f32 %v2918_v63, %v1298_v21 }
 0x137   : > { %2085 = vrcp.f32 %v2950_v7  ;;  %v1064_v41 = vsel %vm2961_vm12, %v2907_v61, %v1060_v38  ;;  %vm1301_vm13 = vweird.f32 %v2857_v27  ;;  %v1305_v57 = vand.u32 2147483647, %v2857_v27  ;;  %v745_v37 = vpop.f32.mrf.mxu3 }
 0x138   : > { %v1915_v42 = vpack.c.bf16 %v1383_v1, %v1382_v40  ;;  %1931 = vst [vmem:[%s2365_s30 + $0x28] sm:$0xff] %v1875_v39   ;;  %v1072_v58 = vmul.f32 %v2082_v14, %v2905_v60  ;;  %vm1302_vm14 = vweird.f32 %v2918_v63  ;;  %v1307_v49 = vand.u32 2147483648, %v2857_v27 }
 0x139   : > { %vm1076_vm15 = vweird.f32 %v2905_v60  ;;  %v1080_v23 = vand.u32 2147483647, %v2905_v60  ;;  %v1082_v52 = vand.u32 2147483648, %v2905_v60  ;;  %v1796_v50 = vmul.f32 -1.442695, %v2957_v26  ;;  %vm3005_vm2 = vmor %vm1301_vm13, %vm1302_vm14 }
 0x13a   : > { %1939 = vst [vmem:[%s2365_s30 + $0x68] sm:$0xff] %v1915_v42   ;;  %v1073_v54 = vsub.f32 1.0, %v1072_v58  ;;  %v617_v48 = vadd.f32 %v2836_v24, %v616_v44  ;;  %v1069_v35 = vsel %vm2952_vm11, %v1068_v22, %v1064_v41  ;;  %v1300_v61 = vadd.f32 %v2918_v63, %v1299_v43 }
 0x13b   : > { %v2986_v47 = vadd.f32 %v708_v59, %v2840_v0  ;;  %v657_v20 = vadd.f32 %v2836_v24, %v656_v36  ;;  %v2084_v4 = vpop.eup %2083  ;;  %vm1077_vm0 = vweird.f32 %v2082_v14  ;;  %2087 = vpow2.f32 %v1796_v50 }
 0x13c   : > { %v1074_v51 = vmul.f32 %v2082_v14, %v1073_v54  ;;  %v2990_v5 = vadd.f32 %v2868_v31, %v617_v48  ;;  %vm2992_vm1 = vcmp.eq.f32.partialorder %v1080_v23, 8.507059e+37  ;;  %v2996_v6 = vadd.f32 1.0, %v2084_v4  ;;  %vm1078_vm3 = vmor %vm1076_vm15, %vm1077_vm0 }
 0x13d   : > { %v2086_v55 = vpop.eup %2085  ;;  %v1782_v0 = vmul.f32 -1.442695, %v2986_v47  ;;  %v2999_v11 = vadd.f32 %v745_v37, %v657_v20  ;;  %v3012_v59 = vadd.f32 %v710_v3, %v2846_v9  ;;  %v1368_v53 = vmul.f32 %v1069_v35, %v2774_v28 }
 0x13e   : > { %v1075_v31 = vadd.f32 %v2082_v14, %v1074_v51  ;;  %v1312_v19 = vmul.f32 %v2086_v55, %v2950_v7  ;;  %v1781_v13 = vmul.f32 -1.442695, %v2990_v5  ;;  %v1304_v18 = vsel %vm3005_vm2, %v2918_v63, %v1300_v61 }
 0x13f   : > { %v1083_v27 = vor.u32 1.1754944e-38, %v1082_v52  ;;  %2089 = vrcp.f32 %v2996_v6  ;;  %v1797_v15 = vmul.f32 -1.442695, %v2999_v11  ;;  %v1320_v28 = vand.u32 2147483647, %v2950_v7 }
 0x140   : > { %v1079_v17 = vsel %vm1078_vm3, %v2082_v14, %v1075_v31  ;;  %v1313_v25 = vsub.f32 1.0, %v1312_v19  ;;  %2091 = vpow2.f32 %v1781_v13  ;;  %v1322_v62 = vand.u32 2147483648, %v2950_v7 }
 0x141   : > { %v1084_v9 = vsel %vm2992_vm1, %v1083_v27, %v1079_v17  ;;  %2093 = vpow2.f32 %v1782_v0  ;;  %v2088_v63 = vpop.eup %2087  ;;  %vm1317_vm4 = vweird.f32 %v2086_v55  ;;  %v1783_v29 = vmul.f32 -1.442695, %v3012_v59 }
 0x142   : > { %v1369_v60 = vmul.f32 %v1084_v9, %v2810_v45  ;;  %v1314_v12 = vmul.f32 %v2086_v55, %v1313_v25  ;;  %vm1306_vm5 = vcmp.eq.f32.partialorder %v1305_v57, 8.507059e+37  ;;  %v1308_v32 = vor.u32 1.1754944e-38, %v1307_v49 }
 0x143   : > { %v3029_v21 = vadd.f32 1.0, %v2088_v63  ;;  %2095 = vpow2.f32 %v1797_v15  ;;  %vm1316_vm6 = vweird.f32 %v2950_v7  ;;  %v1323_v45 = vor.u32 1.1754944e-38, %v1322_v62 }
 0x144   : > { %v1880_v46 = vpack.c.bf16 %v1369_v60, %v1368_v53  ;;  %v1315_v33 = vadd.f32 %v2086_v55, %v1314_v12  ;;  %2097 = vpow2.f32 %v1783_v29  ;;  %v1309_v40 = vsel %vm1306_vm5, %v1308_v32, %v1304_v18  ;;  %vm1318_vm7 = vmor %vm1316_vm6, %vm1317_vm4 }
 0x145   : > { %v3032_v10 = vpop.eup %2089  ;;  %2099 = vrcp.f32 %v3029_v21  ;;  %vm1321_vm8 = vcmp.eq.f32.partialorder %v1320_v28, 8.507059e+37  ;;  %v1384_v7 = vmul.f32 %v1309_v40, %v2785_v16  ;;  %v1095_v49 = vand.u32 2147483647, %v2996_v6 }
 0x146   : > { %v2092_v1 = vpop.eup %2091  ;;  %1932 = vst [vmem:[%s2365_s30 + $0x30] sm:$0xff] %v1880_v46   ;;  %v1319_v38 = vsel %vm1318_vm7, %v2086_v55, %v1315_v33  ;;  %v1087_v39 = vmul.f32 %v3032_v10, %v2996_v6  ;;  %v1097_v16 = vand.u32 2147483648, %v2996_v6  ;;  %vm1092_vm9 = vweird.f32 %v3032_v10 }
 0x147   : > { %v2094_v56 = vpop.eup %2093  ;;  %v1324_v14 = vsel %vm1321_vm8, %v1323_v45, %v1319_v38  ;;  %v3038_v42 = vadd.f32 1.0, %v2092_v1  ;;  %vm1091_vm10 = vweird.f32 %v2996_v6  ;;  %v1337_v48 = vand.u32 2147483648, %v3029_v21 }
 0x148   : > { %v1385_v8 = vmul.f32 %v1324_v14, %v2829_v34  ;;  %v1088_v22 = vsub.f32 1.0, %v1087_v39  ;;  %v3042_v43 = vadd.f32 1.0, %v2094_v56  ;;  %v1335_v61 = vand.u32 2147483647, %v3029_v21  ;;  %vm3069_vm11 = vmor %vm1091_vm10, %vm1092_vm9 }
 0x149   : > { %v2096_v44 = vpop.eup %2095  ;;  %2101 = vrcp.f32 %v3038_v42  ;;  %v1110_v20 = vand.u32 2147483647, %v3038_v42  ;;  %v1112_v3 = vand.u32 2147483648, %v3038_v42  ;;  %vm3073_vm12 = vcmp.eq.f32.partialorder %v1095_v49, 8.507059e+37 }
 0x14a   : > { %v2098_v41 = vpop.eup %2097  ;;  %v1920_v57 = vpack.c.bf16 %v1385_v8, %v1384_v7  ;;  %v1089_v58 = vmul.f32 %v3032_v10, %v1088_v22  ;;  %2103 = vrcp.f32 %v3042_v43  ;;  %v3054_v23 = vadd.f32 1.0, %v2096_v44 }
 0x14b   : > { %v3047_v36 = vpop.eup %2099  ;;  %v3058_v52 = vadd.f32 1.0, %v2098_v41  ;;  %v1098_v55 = vor.u32 1.1754944e-38, %v1097_v16  ;;  %vm1331_vm13 = vweird.f32 %v3029_v21  ;;  %v1125_v31 = vand.u32 2147483647, %v3042_v43 }
 0x14c   : > { %1940 = vst [vmem:[%s2365_s30 + $0x70] sm:$0xff] %v1920_v57   ;;  %v1327_v34 = vmul.f32 %v3047_v36, %v3029_v21  ;;  %v1090_v54 = vadd.f32 %v3032_v10, %v1089_v58  ;;  %2105 = vrcp.f32 %v3054_v23  ;;  %v1338_v19 = vor.u32 1.1754944e-38, %v1337_v48 }
 0x14d   : > { %2107 = vrcp.f32 %v3058_v52  ;;  %vm1106_vm14 = vweird.f32 %v3038_v42  ;;  %vm1121_vm15 = vweird.f32 %v3042_v43  ;;  %vm3088_vm0 = vcmp.eq.f32.partialorder %v1335_v61, 8.507059e+37 }
 0x14e   : > { %v1328_v50 = vsub.f32 1.0, %v1327_v34  ;;  %v1094_v6 = vsel %vm3069_vm11, %v3032_v10, %v1090_v54  ;;  %vm3092_vm1 = vcmp.eq.f32.partialorder %v1110_v20, 8.507059e+37  ;;  %v1113_v27 = vor.u32 1.1754944e-38, %v1112_v3 }
 0x14f   : > { %v2102_v35 = vpop.eup %2101  ;;  %v1127_v25 = vand.u32 2147483648, %v3042_v43  ;;  %v1099_v9 = vsel %vm3073_vm12, %v1098_v55, %v1094_v6  ;;  %vm1332_vm2 = vweird.f32 %v3047_v36  ;;  %vm3102_vm4 = vcmp.eq.f32.partialorder %v1125_v31, 8.507059e+37 }
 0x150   : > { %v3067_v4 = vpop.eup %2103  ;;  %v1102_v30 = vmul.f32 %v2102_v35, %v3038_v42  ;;  %v1329_v0 = vmul.f32 %v3047_v36, %v1328_v50  ;;  %vm1107_vm3 = vweird.f32 %v2102_v35  ;;  %v1350_v46 = vand.u32 2147483647, %v3054_v23  ;;  %vm3119_vm7 = vmor %vm1331_vm13, %vm1332_vm2 }
 0x151   : > { %v1117_v24 = vmul.f32 %v3067_v4, %v3042_v43  ;;  %vm1122_vm5 = vweird.f32 %v3067_v4  ;;  %v1370_v10 = vmul.f32 %v1099_v9, %v2866_v2  ;;  %vm1108_vm6 = vmor %vm1106_vm14, %vm1107_vm3  ;;  %v1352_v1 = vand.u32 2147483648, %v3054_v23 }
 0x152   : > { %v1103_v13 = vsub.f32 1.0, %v1102_v30  ;;  %v2106_v15 = vpop.eup %2105  ;;  %v1330_v63 = vadd.f32 %v3047_v36, %v1329_v0  ;;  %v1140_v2 = vand.u32 2147483647, %v3058_v52  ;;  %v1142_v14 = vand.u32 2147483648, %v3058_v52  ;;  %vm3134_vm8 = vmor %vm1121_vm15, %vm1122_vm5 }
 0x153   : > { %v1118_v17 = vsub.f32 1.0, %v1117_v24  ;;  %v2108_v62 = vpop.eup %2107  ;;  %v1342_v29 = vmul.f32 %v2106_v15, %v3054_v23  ;;  %vm1347_vm9 = vweird.f32 %v2106_v15  ;;  %v1128_v57 = vor.u32 1.1754944e-38, %v1127_v25 }
 0x154   : > { %v1104_v28 = vmul.f32 %v2102_v35, %v1103_v13  ;;  %v1132_v33 = vmul.f32 %v2108_v62, %v3058_v52  ;;  %v1334_v42 = vsel %vm3119_vm7, %v3047_v36, %v1330_v63  ;;  %vm1137_vm10 = vweird.f32 %v2108_v62 }
 0x155   : > { %v1119_v60 = vmul.f32 %v3067_v4, %v1118_v17  ;;  %v1343_v45 = vsub.f32 1.0, %v1342_v29  ;;  %vm1346_vm11 = vweird.f32 %v3054_v23  ;;  %v1353_v43 = vor.u32 1.1754944e-38, %v1352_v1 }
 0x156   : > { %v1105_v32 = vadd.f32 %v2102_v35, %v1104_v28  ;;  %v1133_v56 = vsub.f32 1.0, %v1132_v33  ;;  %v1339_v36 = vsel %vm3088_vm0, %v1338_v19, %v1334_v42  ;;  %vm1348_vm12 = vmor %vm1346_vm11, %vm1347_vm9  ;;  %vm1136_vm13 = vweird.f32 %v3058_v52 }
 0x157   : > { %v1120_v40 = vadd.f32 %v3067_v4, %v1119_v60  ;;  %v1344_v8 = vmul.f32 %v2106_v15, %v1343_v45  ;;  %vm1351_vm14 = vcmp.eq.f32.partialorder %v1350_v46, 8.507059e+37  ;;  %vm1138_vm15 = vmor %vm1136_vm13, %vm1137_vm10  ;;  %v1143_v54 = vor.u32 1.1754944e-38, %v1142_v14 }
 0x158   : > { %v1109_v39 = vsel %vm1108_vm6, %v2102_v35, %v1105_v32  ;;  %v1134_v41 = vmul.f32 %v2108_v62, %v1133_v56  ;;  %v1386_v48 = vmul.f32 %v1339_v36, %v2957_v26 }
 0x159   : > { %v1114_v7 = vsel %vm3092_vm1, %v1113_v27, %v1109_v39  ;;  %v1124_v44 = vsel %vm3134_vm8, %v3067_v4, %v1120_v40  ;;  %v1345_v58 = vadd.f32 %v2106_v15, %v1344_v8  ;;  %vm1141_vm1 = vcmp.eq.f32.partialorder %v1140_v2, 8.507059e+37 }
 0x15a   : > { %v1371_v22 = vmul.f32 %v1114_v7, %v2990_v5  ;;  %v1135_v16 = vadd.f32 %v2108_v62, %v1134_v41  ;;  %v1129_v5 = vsel %vm3102_vm4, %v1128_v57, %v1124_v44 }
 0x15b   : > { %v1349_v34 = vsel %vm1348_vm12, %v2106_v15, %v1345_v58  ;;  %v1372_v52 = vmul.f32 %v1129_v5, %v2986_v47 }
 0x15c   : > { %v1885_v49 = vpack.c.bf16 %v1371_v22, %v1370_v10  ;;  %v1354_v23 = vsel %vm1351_vm14, %v1353_v43, %v1349_v34  ;;  %v1139_v50 = vsel %vm1138_vm15, %v2108_v62, %v1135_v16 }
 0x15d   : > { %v1387_v35 = vmul.f32 %v1354_v23, %v2999_v11  ;;  %v1144_v61 = vsel %vm1141_vm1, %v1143_v54, %v1139_v50 }
 0x15e   : > { %1933 = vst [vmem:[%s2365_s30 + $0x38] sm:$0xff] %v1885_v49   ;;  %v1373_v20 = vmul.f32 %v1144_v61, %v3012_v59 }
 0x15f   : > { %v1925_v3 = vpack.c.bf16 %v1387_v35, %v1386_v48 }
 0x160   : > { %v1890_v4 = vpack.c.bf16 %v1373_v20, %v1372_v52 }
 0x161   : > { %1941 = vst [vmem:[%s2365_s30 + $0x78] sm:$0xff] %v1925_v3  }
 0x162   : > { %1934 = vst [vmem:[%s2365_s30 + $0x40] sm:$0xff] %v1890_v4  }
 0x163 PF: > { %s13_s14 = sadd.s32 1, %s2132_s14   ;;  %s3248_s12 = smov %s2128_s13 }
 0x164   : > { %p10_p5 = scmp.ge.s32.totalorder %s13_s14, 4   ;;  %s3249_s13 = smov %s3251_s15 }
 0x166   :  { %12 = sbr.rel (!%p10_p5) target bundleno = 2 (0x2), region = 68 }

// kernel: just_efficientnet_forward.8
= control target key start
LH: loop header
LB: loop body
LE: loop exit
PB: predicated region body
PF: predicated region fallthrough
CT: control target
= control target key end

     0   :  { %s5644_s12 = smov 0   ;;  %s5646_s13 = smov 0   ;;  %s9360_s0 = inlined_call_operand.vmem [shape: bf16[2048,32], index: 0, kind: input, shape index: {}]   ;;  %s9361_s1 = inlined_call_operand.vmem [shape: bf16[32,128], index: 1, kind: input, shape index: {}]   ;;  %s9362_s2 = inlined_call_operand.vmem [shape: f32[1,128], index: 2, kind: input, shape index: {}]   ;;  %s9363_s3 = inlined_call_operand.vmem [shape: bf16[2048,128], index: 3, kind: output, shape index: {}]  }
   0x1   :  { %s5648_s14 = smov 0  }
   0x2 LB: > { %s25_s15 = sadd.s32 1, %s5618_s13  ;;  %p4140_p0 = scmp.ge.s32.totalorder %s5622_s14, 1  ;;  %s5622_s14 = sphi %s5648_s14, %s13_s14   ;;  %s5618_s13 = sphi %s5646_s13, %s9681_s13   ;;  %s5614_s12 = sphi %s5644_s12, %s9680_s12  }
   0x3   : > { %p27_p1 = scmp.ge.s32.totalorder %s25_s15, 2  ;;  %p169_p2 = scmp.lt.s32.totalorder %s5622_s14, 3 }
   0x5   : > { %s9683_s15 = smov (%p27_p1, %s25_s15), 0  ;;  %p170_p3 = pnand %p4140_p0, %p169_p2 }
   0x6   : > { %s4141_s18 = sshll.u32 (!%p170_p3), %s5614_s12, 7 }
   0x7   : > { %173 = sbr.rel (%p170_p3) target bundleno = 754 (0x2f2), region = 32  ;;  %p204_p4 = scmp.lt.s32.totalorder (!%p170_p3), %s4141_s18, 255 }
   0xc   : > { %v4668_v0 = vld [vmem:[%s9361_s1 + $0x8] sm:$0xff]  ;;  %v4667_v1 = vld [vmem:[%s9361_s1] sm:$0xff]  ;;  %s9685_s18 = smov (!%p204_p4, %s4141_s18), 255  ;;  %vm694_vm0 = vcmask 261120  }
   0xd   : > { %893 = vmatpush.bf16.msra.mxu0 %v4668_v0  ;;  %5052 = vmatpush.bf16.msra.mxu1 %v4668_v0  ;;  %s4142_s21 = sshll.u32 %s9685_s18, 2  ;;  %v5745_v34 = vld [vmem:[%s9362_s2] ss:$0 sm:$0xff] }
   0xe   : > { %5053 = vmatpush.bf16.msra.mxu2 %v4668_v0  ;;  %5054 = vmatpush.bf16.msra.mxu3 %v4668_v0  ;;  %s5676_s24 = scalar_lea.vmem %s9360_s0, %s4142_s21  ;;  %s5991_s29 = scalar_lea.vmem %s9363_s3, %s4142_s21 }
   0xf   : > { %v4603_v2 = vld [vmem:[%s5676_s24] sm:$0xff]  ;;  %v4604_v6 = vld [vmem:[%s5676_s24 + $0x8] sm:$0xff]  ;;  %v4605_v10 = vld [vmem:[%s5676_s24 + $0x10] sm:$0xff] }
  0x10   : > { %v4619_v3 = vld [vmem:[%s5676_s24 + $0x80] sm:$0xff]  ;;  %v4620_v7 = vld [vmem:[%s5676_s24 + $0x88] sm:$0xff]  ;;  %v4621_v11 = vld [vmem:[%s5676_s24 + $0x90] sm:$0xff] }
  0x11   : > { %894 = vmatpush.bf16.msra.mxu0 %v4667_v1  ;;  %5055 = vmatpush.bf16.msra.mxu1 %v4667_v1  ;;  %v4635_v4 = vld [vmem:[%s5676_s24 + $0x100] sm:$0xff]  ;;  %v4636_v8 = vld [vmem:[%s5676_s24 + $0x108] sm:$0xff]  ;;  %v4637_v12 = vld [vmem:[%s5676_s24 + $0x110] sm:$0xff] }
  0x12   : > { %5056 = vmatpush.bf16.msra.mxu2 %v4667_v1  ;;  %5057 = vmatpush.bf16.msra.mxu3 %v4667_v1  ;;  %v4651_v5 = vld [vmem:[%s5676_s24 + $0x180] sm:$0xff]  ;;  %v4652_v9 = vld [vmem:[%s5676_s24 + $0x188] sm:$0xff]  ;;  %v4653_v13 = vld [vmem:[%s5676_s24 + $0x190] sm:$0xff] }
  0x13   : > { %v4606_v14 = vld [vmem:[%s5676_s24 + $0x18] sm:$0xff]  ;;  %v4607_v18 = vld [vmem:[%s5676_s24 + $0x20] sm:$0xff]  ;;  %v4608_v22 = vld [vmem:[%s5676_s24 + $0x28] sm:$0xff] }
  0x14   : > { %4409 = vmatmul.msk.bf16.vlgmr.msra.gmra.mxu0 %vm694_vm0, %v4603_v2  ;;  %4425 = vmatmul.msk.bf16.vlgmr.msra.gmra.mxu1 %vm694_vm0, %v4619_v3  ;;  %v4622_v15 = vld [vmem:[%s5676_s24 + $0x98] sm:$0xff]  ;;  %v4623_v19 = vld [vmem:[%s5676_s24 + $0xa0] sm:$0xff]  ;;  %v4624_v23 = vld [vmem:[%s5676_s24 + $0xa8] sm:$0xff] }
  0x15   : > { %4441 = vmatmul.msk.bf16.vlgmr.msra.gmra.mxu2 %vm694_vm0, %v4635_v4  ;;  %4457 = vmatmul.msk.bf16.vlgmr.msra.gmra.mxu3 %vm694_vm0, %v4651_v5  ;;  %v4638_v16 = vld [vmem:[%s5676_s24 + $0x118] sm:$0xff]  ;;  %v4639_v20 = vld [vmem:[%s5676_s24 + $0x120] sm:$0xff]  ;;  %v4640_v24 = vld [vmem:[%s5676_s24 + $0x128] sm:$0xff] }
  0x16   : > { %v4654_v17 = vld [vmem:[%s5676_s24 + $0x198] sm:$0xff]  ;;  %v4655_v21 = vld [vmem:[%s5676_s24 + $0x1a0] sm:$0xff]  ;;  %v4656_v25 = vld [vmem:[%s5676_s24 + $0x1a8] sm:$0xff] }
  0x17   : > { %v4609_v26 = vld [vmem:[%s5676_s24 + $0x30] sm:$0xff]  ;;  %v4610_v30 = vld [vmem:[%s5676_s24 + $0x38] sm:$0xff]  ;;  %v4611_v35 = vld [vmem:[%s5676_s24 + $0x40] sm:$0xff] }
  0x18   : > { %v4625_v27 = vld [vmem:[%s5676_s24 + $0xb0] sm:$0xff]  ;;  %v4626_v31 = vld [vmem:[%s5676_s24 + $0xb8] sm:$0xff]  ;;  %v4627_v36 = vld [vmem:[%s5676_s24 + $0xc0] sm:$0xff] }
  0x19   : > { %v4641_v28 = vld [vmem:[%s5676_s24 + $0x130] sm:$0xff]  ;;  %v4642_v32 = vld [vmem:[%s5676_s24 + $0x138] sm:$0xff]  ;;  %v4643_v39 = vld [vmem:[%s5676_s24 + $0x140] sm:$0xff] }
  0x1a   : > { %v4657_v29 = vld [vmem:[%s5676_s24 + $0x1b0] sm:$0xff]  ;;  %v4658_v33 = vld [vmem:[%s5676_s24 + $0x1b8] sm:$0xff]  ;;  %v4659_v40 = vld [vmem:[%s5676_s24 + $0x1c0] sm:$0xff] }
  0x1b   : > { %v4612_v63 = vld [vmem:[%s5676_s24 + $0x48] sm:$0xff] }
  0x1c   : > { %v4628_v0 = vld [vmem:[%s5676_s24 + $0xc8] sm:$0xff] }
  0x1d   : > { %v4644_v2 = vld [vmem:[%s5676_s24 + $0x148] sm:$0xff] }
  0x1e   : > { %v4660_v3 = vld [vmem:[%s5676_s24 + $0x1c8] sm:$0xff] }
  0x24   : > { %4410 = vmatmul.msk.bf16.gmra.mxu0 %vm694_vm0, %v4604_v6  ;;  %4426 = vmatmul.msk.bf16.gmra.mxu1 %vm694_vm0, %v4620_v7 }
  0x25   : > { %4442 = vmatmul.msk.bf16.gmra.mxu2 %vm694_vm0, %v4636_v8  ;;  %4458 = vmatmul.msk.bf16.gmra.mxu3 %vm694_vm0, %v4652_v9 }
  0x34   : > { %4411 = vmatmul.msk.bf16.gmra.mxu0 %vm694_vm0, %v4605_v10  ;;  %4427 = vmatmul.msk.bf16.gmra.mxu1 %vm694_vm0, %v4621_v11 }
  0x35   : > { %4443 = vmatmul.msk.bf16.gmra.mxu2 %vm694_vm0, %v4637_v12  ;;  %4459 = vmatmul.msk.bf16.gmra.mxu3 %vm694_vm0, %v4653_v13 }
  0x44   : > { %4412 = vmatmul.msk.bf16.gmra.mxu0 %vm694_vm0, %v4606_v14  ;;  %4428 = vmatmul.msk.bf16.gmra.mxu1 %vm694_vm0, %v4622_v15 }
  0x45   : > { %4444 = vmatmul.msk.bf16.gmra.mxu2 %vm694_vm0, %v4638_v16  ;;  %4460 = vmatmul.msk.bf16.gmra.mxu3 %vm694_vm0, %v4654_v17 }
  0x54   : > { %4413 = vmatmul.msk.bf16.gmra.mxu0 %vm694_vm0, %v4607_v18  ;;  %4429 = vmatmul.msk.bf16.gmra.mxu1 %vm694_vm0, %v4623_v19 }
  0x55   : > { %4445 = vmatmul.msk.bf16.gmra.mxu2 %vm694_vm0, %v4639_v20  ;;  %4461 = vmatmul.msk.bf16.gmra.mxu3 %vm694_vm0, %v4655_v21 }
  0x64   : > { %4414 = vmatmul.msk.bf16.gmra.mxu0 %vm694_vm0, %v4608_v22  ;;  %4430 = vmatmul.msk.bf16.gmra.mxu1 %vm694_vm0, %v4624_v23 }
  0x65   : > { %4446 = vmatmul.msk.bf16.gmra.mxu2 %vm694_vm0, %v4640_v24  ;;  %4462 = vmatmul.msk.bf16.gmra.mxu3 %vm694_vm0, %v4656_v25 }
  0x74   : > { %4415 = vmatmul.msk.bf16.gmra.mxu0 %vm694_vm0, %v4609_v26  ;;  %4431 = vmatmul.msk.bf16.gmra.mxu1 %vm694_vm0, %v4625_v27 }
  0x75   : > { %4447 = vmatmul.msk.bf16.gmra.mxu2 %vm694_vm0, %v4641_v28  ;;  %4463 = vmatmul.msk.bf16.gmra.mxu3 %vm694_vm0, %v4657_v29 }
  0x84   : > { %4416 = vmatmul.msk.bf16.gmra.mxu0 %vm694_vm0, %v4610_v30  ;;  %4432 = vmatmul.msk.bf16.gmra.mxu1 %vm694_vm0, %v4626_v31 }
  0x85   : > { %4448 = vmatmul.msk.bf16.gmra.mxu2 %vm694_vm0, %v4642_v32  ;;  %4464 = vmatmul.msk.bf16.gmra.mxu3 %vm694_vm0, %v4658_v33 }
  0x91   : > { %v896_v37 = vpop.f32.mrf.mxu0  ;;  %v976_v38 = vpop.f32.mrf.mxu1 }
  0x92   : > { %v5752_v41 = vadd.f32 %v5745_v34, %v896_v37  ;;  %v5755_v42 = vadd.f32 %v5745_v34, %v976_v38 }
  0x94   : > { %v4473_v43 = vmul.f32 -1.442695, %v5752_v41  ;;  %v4505_v44 = vmul.f32 -1.442695, %v5755_v42  ;;  %4417 = vmatmul.msk.bf16.gmra.mxu0 %vm694_vm0, %v4611_v35  ;;  %4433 = vmatmul.msk.bf16.gmra.mxu1 %vm694_vm0, %v4627_v36 }
  0x95   : > { %4449 = vmatmul.msk.bf16.gmra.mxu2 %vm694_vm0, %v4643_v39  ;;  %4465 = vmatmul.msk.bf16.gmra.mxu3 %vm694_vm0, %v4659_v40 }
  0x96   : > { %5083 = vpow2.f32 %v4473_v43 }
  0x97   : > { %5085 = vpow2.f32 %v4505_v44 }
  0x98   : > { %v1056_v45 = vpop.f32.mrf.mxu2  ;;  %v1136_v46 = vpop.f32.mrf.mxu3 }
  0x99   : > { %v5764_v47 = vadd.f32 %v5745_v34, %v1056_v45  ;;  %v5767_v48 = vadd.f32 %v5745_v34, %v1136_v46  ;;  %v898_v49 = vpop.f32.mrf.mxu0  ;;  %v978_v50 = vpop.f32.mrf.mxu1 }
  0x9a   : > { %v5770_v51 = vadd.f32 %v5745_v34, %v898_v49  ;;  %v5773_v52 = vadd.f32 %v5745_v34, %v978_v50 }
  0x9b   : > { %v4537_v53 = vmul.f32 -1.442695, %v5764_v47  ;;  %v4569_v54 = vmul.f32 -1.442695, %v5767_v48 }
  0x9c   : > { %v5084_v55 = vpop.eup %5083  ;;  %v4474_v58 = vmul.f32 -1.442695, %v5770_v51  ;;  %v4506_v60 = vmul.f32 -1.442695, %v5773_v52 }
  0x9d   : > { %v5086_v56 = vpop.eup %5085  ;;  %v5777_v57 = vadd.f32 1.0, %v5084_v55  ;;  %5087 = vpow2.f32 %v4537_v53 }
  0x9e   : > { %v5780_v59 = vadd.f32 1.0, %v5086_v56  ;;  %5089 = vpow2.f32 %v4569_v54 }
  0x9f   : > { %5091 = vrcp.f32 %v5777_v57  ;;  %v1737_v13 = vand.u32 2147483647, %v5777_v57  ;;  %v1739_v14 = vand.u32 2147483648, %v5777_v57  ;;  %vm1733_vm1 = vweird.f32 %v5777_v57 }
  0xa0   : > { %5093 = vrcp.f32 %v5780_v59  ;;  %v1058_v61 = vpop.f32.mrf.mxu2  ;;  %v1138_v62 = vpop.f32.mrf.mxu3  ;;  %vm2213_vm2 = vweird.f32 %v5780_v59  ;;  %v2217_v22 = vand.u32 2147483647, %v5780_v59  ;;  %v2219_v23 = vand.u32 2147483648, %v5780_v59 }
  0xa1   : > { %5095 = vpow2.f32 %v4474_v58  ;;  %v5788_v1 = vadd.f32 %v5745_v34, %v1058_v61  ;;  %v5793_v5 = vadd.f32 %v5745_v34, %v1138_v62  ;;  %v901_v15 = vpop.f32.mrf.mxu0  ;;  %v981_v16 = vpop.f32.mrf.mxu1  ;;  %vm5828_vm3 = vcmp.eq.f32.partialorder %v1737_v13, 8.507059e+37  ;;  %v4613_v62 = vld [vmem:[%s5676_s24 + $0x50] sm:$0xff] }
  0xa2   : > { %5097 = vpow2.f32 %v4506_v60  ;;  %v5822_v25 = vadd.f32 %v5745_v34, %v901_v15  ;;  %v5825_v26 = vadd.f32 %v5745_v34, %v981_v16  ;;  %v1740_v29 = vor.u32 1.1754944e-38, %v1739_v14 }
  0xa3   : > { %v5088_v4 = vpop.eup %5087  ;;  %v4538_v10 = vmul.f32 -1.442695, %v5788_v1  ;;  %v4570_v19 = vmul.f32 -1.442695, %v5793_v5  ;;  %vm5842_vm5 = vcmp.eq.f32.partialorder %v2217_v22, 8.507059e+37  ;;  %v2220_v40 = vor.u32 1.1754944e-38, %v2219_v23 }
  0xa4   : > { %v5090_v6 = vpop.eup %5089  ;;  %v5795_v7 = vadd.f32 1.0, %v5088_v4  ;;  %4418 = vmatmul.msk.bf16.gmra.mxu0 %vm694_vm0, %v4612_v63  ;;  %4434 = vmatmul.msk.bf16.gmra.mxu1 %vm694_vm0, %v4628_v0  ;;  %v4475_v44 = vmul.f32 -1.442695, %v5822_v25  ;;  %v5853_v45 = vmul.f32 -1.442695, %v5825_v26 }
  0xa5   : > { %v5799_v8 = vpop.eup %5091  ;;  %v5801_v9 = vadd.f32 1.0, %v5090_v6  ;;  %4450 = vmatmul.msk.bf16.gmra.mxu2 %vm694_vm0, %v4644_v2  ;;  %4466 = vmatmul.msk.bf16.gmra.mxu3 %vm694_vm0, %v4660_v3 }
  0xa6   : > { %v5806_v11 = vpop.eup %5093  ;;  %v1729_v12 = vmul.f32 %v5799_v8, %v5777_v57  ;;  %5099 = vrcp.f32 %v5795_v7  ;;  %vm1734_vm4 = vweird.f32 %v5799_v8  ;;  %v2697_v33 = vand.u32 2147483647, %v5795_v7 }
  0xa7   : > { %v5096_v17 = vpop.eup %5095  ;;  %v2209_v18 = vmul.f32 %v5806_v11, %v5780_v59  ;;  %5101 = vrcp.f32 %v5801_v9  ;;  %v2699_v38 = vand.u32 2147483648, %v5795_v7  ;;  %v3179_v39 = vand.u32 2147483648, %v5801_v9  ;;  %vm5865_vm8 = vmor %vm1733_vm1, %vm1734_vm4 }
  0xa8   : > { %v5098_v20 = vpop.eup %5097  ;;  %v1730_v21 = vsub.f32 1.0, %v1729_v12  ;;  %5103 = vpow2.f32 %v4538_v10  ;;  %v5832_v30 = vadd.f32 1.0, %v5096_v17  ;;  %v1061_v46 = vpop.f32.mrf.mxu2  ;;  %vm2214_vm6 = vweird.f32 %v5806_v11 }
  0xa9   : > { %v2210_v24 = vsub.f32 1.0, %v2209_v18  ;;  %v5834_v31 = vadd.f32 1.0, %v5098_v20  ;;  %5105 = vpow2.f32 %v4570_v19  ;;  %vm2693_vm7 = vweird.f32 %v5795_v7  ;;  %vm5890_vm11 = vmor %vm2213_vm2, %vm2214_vm6 }
  0xaa   : > { %v1731_v27 = vmul.f32 %v5799_v8, %v1730_v21  ;;  %5107 = vrcp.f32 %v5832_v30  ;;  %v3177_v58 = vand.u32 2147483647, %v5801_v9  ;;  %v1752_v60 = vand.u32 2147483647, %v5832_v30 }
  0xab   : > { %v2211_v32 = vmul.f32 %v5806_v11, %v2210_v24  ;;  %5109 = vrcp.f32 %v5834_v31  ;;  %vm5876_vm9 = vcmp.eq.f32.partialorder %v2697_v33, 8.507059e+37  ;;  %v2700_v57 = vor.u32 1.1754944e-38, %v2699_v38 }
  0xac   : > { %v5839_v35 = vpop.eup %5099  ;;  %v1732_v36 = vadd.f32 %v5799_v8, %v1731_v27  ;;  %vm3173_vm10 = vweird.f32 %v5801_v9  ;;  %v5881_v63 = vor.u32 1.1754944e-38, %v3179_v39  ;;  %v5884_v0 = vadd.f32 %v5745_v34, %v1061_v46 }
  0xad   : > { %v2689_v43 = vmul.f32 %v5839_v35, %v5795_v7  ;;  %v5855_v49 = vpop.eup %5101  ;;  %v2212_v50 = vadd.f32 %v5806_v11, %v2211_v32  ;;  %vm2694_vm12 = vweird.f32 %v5839_v35  ;;  %vm1748_vm13 = vweird.f32 %v5832_v30 }
  0xae   : > { %v5104_v53 = vpop.eup %5103  ;;  %v3169_v56 = vmul.f32 %v5855_v49, %v5801_v9  ;;  %v1736_v61 = vsel %vm5865_vm8, %v5799_v8, %v1732_v36  ;;  %v1754_v12 = vand.u32 2147483648, %v5832_v30  ;;  %5111 = vpow2.f32 %v4475_v44  ;;  %vm5927_vm1 = vmor %vm2693_vm7, %vm2694_vm12 }
  0xaf   : > { %v2690_v55 = vsub.f32 1.0, %v2689_v43  ;;  %v5106_v2 = vpop.eup %5105  ;;  %v2216_v10 = vsel %vm5890_vm11, %v5806_v11, %v2212_v50  ;;  %v5901_v13 = vadd.f32 1.0, %v5104_v53  ;;  %v1741_v59 = vsel %vm5828_vm3, %v1740_v29, %v1736_v61 }
  0xb0   : > { %v3170_v6 = vsub.f32 1.0, %v3169_v56  ;;  %v5108_v8 = vpop.eup %5107  ;;  %vm5908_vm14 = vcmp.eq.f32.partialorder %v1752_v60, 8.507059e+37  ;;  %vm5912_vm15 = vcmp.eq.f32.partialorder %v3177_v58, 8.507059e+37  ;;  %v2232_v19 = vand.u32 2147483647, %v5834_v31  ;;  %v1141_v56 = vpop.f32.mrf.mxu3 }
  0xb1   : > { %v2691_v4 = vmul.f32 %v5839_v35, %v2690_v55  ;;  %v1744_v16 = vmul.f32 %v5108_v8, %v5832_v30  ;;  %v5110_v18 = vpop.eup %5109  ;;  %v2234_v20 = vand.u32 2147483648, %v5834_v31  ;;  %5113 = vrcp.f32 %v5901_v13 }
  0xb2   : > { %v3171_v15 = vmul.f32 %v5855_v49, %v3170_v6  ;;  %v5919_v21 = vadd.f32 1.0, %v5106_v2  ;;  %v2221_v22 = vsel %vm5842_vm5, %v2220_v40, %v2216_v10  ;;  %v2224_v27 = vmul.f32 %v5110_v18, %v5834_v31  ;;  %v4645_v2 = vld [vmem:[%s5676_s24 + $0x150] sm:$0xff] }
  0xb3   : > { %v2692_v14 = vadd.f32 %v5839_v35, %v2691_v4  ;;  %v1745_v24 = vsub.f32 1.0, %v1744_v16  ;;  %vm2228_vm2 = vweird.f32 %v5834_v31  ;;  %v3648_v28 = vmul.f32 %v1741_v59, %v5752_v41  ;;  %v903_v4 = vpop.f32.mrf.mxu0  ;;  %v4661_v6 = vld [vmem:[%s5676_s24 + $0x1d0] sm:$0xff] }
  0xb4   : > { %v3172_v32 = vadd.f32 %v5855_v49, %v3171_v15  ;;  %vm3174_vm3 = vweird.f32 %v5855_v49  ;;  %vm1749_vm4 = vweird.f32 %v5108_v8  ;;  %v1755_v33 = vor.u32 1.1754944e-38, %v1754_v12  ;;  %v5112_v37 = vpop.eup %5111  ;;  %4419 = vmatmul.msk.bf16.gmra.mxu0 %vm694_vm0, %v4613_v62 }
  0xb5   : > { %v2696_v29 = vsel %vm5927_vm1, %v5839_v35, %v2692_v14  ;;  %v1746_v7 = vmul.f32 %v5108_v8, %v1745_v24  ;;  %v2225_v36 = vsub.f32 1.0, %v2224_v27  ;;  %v5940_v38 = vmul.f32 %v2221_v22, %v5755_v42  ;;  %vm5951_vm6 = vmor %vm3173_vm10, %vm3174_vm3  ;;  %4451 = vmatmul.msk.bf16.gmra.mxu2 %vm694_vm0, %v4645_v2  ;;  %4467 = vmatmul.msk.bf16.gmra.mxu3 %vm694_vm0, %v4661_v6 }
  0xb6   : > { %vm5942_vm5 = vcmp.eq.f32.partialorder %v2232_v19, 8.507059e+37  ;;  %v2235_v41 = vor.u32 1.1754944e-38, %v2234_v20  ;;  %5115 = vrcp.f32 %v5919_v21  ;;  %v2701_v35 = vsel %vm5876_vm9, %v2700_v57, %v2696_v29  ;;  %vm1750_vm8 = vmor %vm1748_vm13, %vm1749_vm4  ;;  %v4629_v57 = vld [vmem:[%s5676_s24 + $0xd0] sm:$0xff]  ;;  %v983_v20 = vpop.f32.mrf.mxu1 }
  0xb7   : > { %v1747_v43 = vadd.f32 %v5108_v8, %v1746_v7  ;;  %v2226_v44 = vmul.f32 %v5110_v18, %v2225_v36  ;;  %vm2229_vm7 = vweird.f32 %v5110_v18  ;;  %v5955_v42 = vpop.eup %5113  ;;  %v3176_v46 = vsel %vm5951_vm6, %v5855_v49, %v3172_v32  ;;  %4435 = vmatmul.msk.bf16.gmra.mxu1 %vm694_vm0, %v4629_v57 }
  0xb8   : > { %vm2708_vm9 = vweird.f32 %v5901_v13  ;;  %v5964_v9 = vadd.f32 1.0, %v5112_v37  ;;  %5117 = vpow2.f32 %v5853_v45  ;;  %v2704_v54 = vmul.f32 %v5955_v42, %v5901_v13  ;;  %vm2230_vm10 = vmor %vm2228_vm2, %vm2229_vm7 }
  0xb9   : > { %v1751_v50 = vsel %vm1750_vm8, %v5108_v8, %v1747_v43  ;;  %v2227_v53 = vadd.f32 %v5110_v18, %v2226_v44  ;;  %v2712_v49 = vand.u32 2147483647, %v5901_v13  ;;  %v5971_v30 = vmul.f32 %v2701_v35, %v5764_v47 }
  0xba   : > { %v1756_v55 = vsel %vm5908_vm14, %v1755_v33, %v1751_v50  ;;  %v2714_v45 = vand.u32 2147483648, %v5901_v13  ;;  %5119 = vrcp.f32 %v5964_v9  ;;  %v3181_v58 = vsel %vm5912_vm15, %v5881_v63, %v3176_v46  ;;  %v1143_v46 = vpop.f32.mrf.mxu3 }
  0xbb   : > { %v3649_v60 = vmul.f32 %v1756_v55, %v5770_v51  ;;  %v2231_v47 = vsel %vm2230_vm10, %v5110_v18, %v2227_v53  ;;  %v2705_v61 = vsub.f32 1.0, %v2704_v54  ;;  %vm2709_vm11 = vweird.f32 %v5955_v42  ;;  %v906_v55 = vpop.f32.mrf.mxu0 }
  0xbc   : > { %v5116_v3 = vpop.eup %5115  ;;  %v2236_v31 = vsel %vm5942_vm5, %v2235_v41, %v2231_v47  ;;  %v3192_v63 = vand.u32 2147483647, %v5919_v21  ;;  %v4539_v51 = vmul.f32 -1.442695, %v5884_v0  ;;  %vm6003_vm12 = vcmp.eq.f32.partialorder %v2712_v49, 8.507059e+37  ;;  %vm2710_vm13 = vmor %vm2708_vm9, %vm2709_vm11 }
  0xbd   : > { %v4672_v8 = vpack.c.bf16 %v3649_v60, %v3648_v28  ;;  %v3681_v10 = vmul.f32 %v2236_v31, %v5773_v52  ;;  %v2706_v12 = vmul.f32 %v5955_v42, %v2705_v61  ;;  %v3184_v59 = vmul.f32 %v5116_v3, %v5919_v21  ;;  %v1063_v28 = vpop.f32.mrf.mxu2 }
  0xbe   : > { %v5118_v14 = vpop.eup %5117  ;;  %v2715_v16 = vor.u32 1.1754944e-38, %v2714_v45  ;;  %v3194_v17 = vand.u32 2147483648, %v5919_v21  ;;  %5121 = vpow2.f32 %v4539_v51  ;;  %vm3188_vm14 = vweird.f32 %v5919_v21  ;;  %v986_v57 = vpop.f32.mrf.mxu1 }
  0xbf   : > { %4673 = vst [vmem:[%s5991_s29] sm:$0xff] %v4672_v8   ;;  %v4752_v52 = vpack.c.bf16 %v3681_v10, %v5940_v38  ;;  %v2707_v18 = vadd.f32 %v5955_v42, %v2706_v12  ;;  %v3185_v11 = vsub.f32 1.0, %v3184_v59  ;;  %v6013_v19 = vadd.f32 1.0, %v5118_v14 }
  0xc0   : > { %v6016_v22 = vpop.eup %5119  ;;  %vm6023_vm15 = vcmp.eq.f32.partialorder %v3192_v63, 8.507059e+37  ;;  %v6028_v24 = vadd.f32 %v5745_v34, %v1141_v56  ;;  %v6031_v27 = vadd.f32 %v5745_v34, %v903_v4  ;;  %vm3189_vm1 = vweird.f32 %v5116_v3 }
  0xc1   : > { %5004 = vst [vmem:[%s5991_s29 + $0x80] sm:$0xff] %v4752_v52   ;;  %v2711_v29 = vsel %vm2710_vm13, %v5955_v42, %v2707_v18  ;;  %v3186_v32 = vmul.f32 %v5116_v3, %v3185_v11  ;;  %v1759_v13 = vmul.f32 %v6016_v22, %v5964_v9  ;;  %v3195_v33 = vor.u32 1.1754944e-38, %v3194_v17  ;;  %vm3190_vm2 = vmor %vm3188_vm14, %vm3189_vm1 }
  0xc2   : > { %v2716_v7 = vsel %vm6003_vm12, %v2715_v16, %v2711_v29  ;;  %5123 = vrcp.f32 %v6013_v19  ;;  %v6041_v36 = vadd.f32 %v5745_v34, %v983_v20  ;;  %v6045_v41 = vadd.f32 %v5745_v34, %v1063_v28 }
  0xc3   : > { %v3713_v37 = vmul.f32 %v2716_v7, %v5788_v1  ;;  %v3187_v38 = vadd.f32 %v5116_v3, %v3186_v32  ;;  %v1760_v39 = vsub.f32 1.0, %v1759_v13  ;;  %v3744_v40 = vmul.f32 %v3181_v58, %v5767_v48  ;;  %v908_v13 = vpop.f32.mrf.mxu0 }
  0xc4   : > { %v5122_v35 = vpop.eup %5121  ;;  %v1767_v43 = vand.u32 2147483647, %v5964_v9  ;;  %v4571_v44 = vmul.f32 -1.442695, %v6028_v24  ;;  %v4476_v42 = vmul.f32 -1.442695, %v6031_v27  ;;  %v6065_v56 = vadd.f32 %v5745_v34, %v1143_v46 }
  0xc5   : > { %v4832_v1 = vpack.c.bf16 %v3713_v37, %v5971_v30  ;;  %v3191_v50 = vsel %vm3190_vm2, %v5116_v3, %v3187_v38  ;;  %v1761_v53 = vmul.f32 %v6016_v22, %v1760_v39  ;;  %v1769_v54 = vand.u32 2147483648, %v5964_v9  ;;  %v1066_v20 = vpop.f32.mrf.mxu2 }
  0xc6   : > { %v3196_v48 = vsel %vm6023_vm15, %v3195_v33, %v3191_v50  ;;  %v6058_v49 = vadd.f32 1.0, %v5122_v35  ;;  %5125 = vpow2.f32 %v4571_v44  ;;  %v4508_v21 = vmul.f32 -1.442695, %v6041_v36  ;;  %v4614_v33 = vld [vmem:[%s5676_s24 + $0x58] sm:$0xff] }
  0xc7   : > { %5020 = vst [vmem:[%s5991_s29 + $0x100] sm:$0xff] %v4832_v1   ;;  %v3745_v45 = vmul.f32 %v3196_v48, %v5793_v5  ;;  %5127 = vpow2.f32 %v4476_v42  ;;  %v4540_v30 = vmul.f32 -1.442695, %v6045_v41  ;;  %v1762_v60 = vadd.f32 %v6016_v22, %v1761_v53  ;;  %4420 = vmatmul.msk.bf16.gmra.mxu0 %vm694_vm0, %v4614_v33 }
  0xc8   : > { %v6067_v58 = vpop.eup %5123  ;;  %vm1763_vm3 = vweird.f32 %v5964_v9  ;;  %vm1764_vm4 = vweird.f32 %v6016_v22  ;;  %5129 = vrcp.f32 %v6058_v49  ;;  %vm6075_vm5 = vcmp.eq.f32.partialorder %v1767_v43, 8.507059e+37 }
  0xc9   : > { %v4912_v47 = vpack.c.bf16 %v3745_v45, %v3744_v40  ;;  %v2239_v5 = vmul.f32 %v6067_v58, %v6013_v19  ;;  %v2247_v62 = vand.u32 2147483647, %v6013_v19  ;;  %5131 = vpow2.f32 %v4508_v21  ;;  %vm6081_vm6 = vmor %vm1763_vm3, %vm1764_vm4 }
  0xca   : > { %v1770_v9 = vor.u32 1.1754944e-38, %v1769_v54  ;;  %5133 = vpow2.f32 %v4540_v30  ;;  %v4572_v31 = vmul.f32 -1.442695, %v6065_v56  ;;  %v1766_v51 = vsel %vm6081_vm6, %v6016_v22, %v1762_v60  ;;  %v1146_v22 = vpop.f32.mrf.mxu3  ;;  %v988_v54 = vpop.f32.mrf.mxu1 }
  0xcb   : > { %5036 = vst [vmem:[%s5991_s29 + $0x180] sm:$0xff] %v4912_v47   ;;  %v2240_v3 = vsub.f32 1.0, %v2239_v5  ;;  %v2249_v4 = vand.u32 2147483648, %v6013_v19  ;;  %v2727_v6 = vand.u32 2147483647, %v6058_v49  ;;  %v6092_v8 = vadd.f32 %v5745_v34, %v906_v55 }
  0xcc   : > { %v5126_v63 = vpop.eup %5125  ;;  %v2729_v59 = vand.u32 2147483648, %v6058_v49  ;;  %5135 = vpow2.f32 %v4572_v31  ;;  %vm2243_vm7 = vweird.f32 %v6013_v19  ;;  %vm2244_vm8 = vweird.f32 %v6067_v58 }
  0xcd   : > { %v5128_v10 = vpop.eup %5127  ;;  %v2241_v12 = vmul.f32 %v6067_v58, %v2240_v3  ;;  %v6096_v14 = vadd.f32 1.0, %v5126_v63  ;;  %vm6100_vm9 = vcmp.eq.f32.partialorder %v2247_v62, 8.507059e+37  ;;  %v1771_v52 = vsel %vm6075_vm5, %v1770_v9, %v1766_v51  ;;  %vm6120_vm10 = vmor %vm2243_vm7, %vm2244_vm8 }
  0xce   : > { %v5130_v15 = vpop.eup %5129  ;;  %v6104_v17 = vadd.f32 1.0, %v5128_v10  ;;  %v2250_v28 = vor.u32 1.1754944e-38, %v2249_v4  ;;  %v4477_v29 = vmul.f32 -1.442695, %v6092_v8  ;;  %v6114_v32 = vadd.f32 %v5745_v34, %v986_v57 }
  0xcf   : > { %v2242_v18 = vadd.f32 %v6067_v58, %v2241_v12  ;;  %v2719_v11 = vmul.f32 %v5130_v15, %v6058_v49  ;;  %5137 = vrcp.f32 %v6096_v14  ;;  %v5132_v23 = vpop.eup %5131  ;;  %vm2723_vm11 = vweird.f32 %v6058_v49 }
  0xd0   : > { %5139 = vrcp.f32 %v6104_v17  ;;  %v5134_v7 = vpop.eup %5133  ;;  %vm6125_vm12 = vcmp.eq.f32.partialorder %v2727_v6, 8.507059e+37  ;;  %v2730_v39 = vor.u32 1.1754944e-38, %v2729_v59  ;;  %v6130_v35 = vmul.f32 %v1771_v52, %v5822_v25 }
  0xd1   : > { %v2720_v37 = vsub.f32 1.0, %v2719_v11  ;;  %v2246_v40 = vsel %vm6120_vm10, %v6067_v58, %v2242_v18  ;;  %v6136_v19 = vadd.f32 %v5745_v34, %v1066_v20  ;;  %v6139_v43 = vadd.f32 %v5745_v34, %v1146_v22 }
  0xd2   : > { %v5136_v44 = vpop.eup %5135  ;;  %vm2724_vm13 = vweird.f32 %v5130_v15  ;;  %v6141_v46 = vadd.f32 1.0, %v5132_v23  ;;  %v6144_v1 = vadd.f32 %v5745_v34, %v908_v13  ;;  %v3209_v25 = vand.u32 2147483648, %v6096_v14 }
  0xd3   : > { %v2721_v42 = vmul.f32 %v5130_v15, %v2720_v37  ;;  %v6147_v50 = vadd.f32 1.0, %v5134_v7  ;;  %5141 = vpow2.f32 %v4477_v29  ;;  %v4509_v53 = vmul.f32 -1.442695, %v6114_v32  ;;  %vm2725_vm14 = vmor %vm2723_vm11, %vm2724_vm13  ;;  %v4630_v37 = vld [vmem:[%s5676_s24 + $0xd8] sm:$0xff] }
  0xd4   : > { %v2251_v21 = vsel %vm6100_vm9, %v2250_v28, %v2246_v40  ;;  %v1782_v45 = vand.u32 2147483647, %v6104_v17  ;;  %5143 = vrcp.f32 %v6141_v46  ;;  %v1784_v60 = vand.u32 2147483648, %v6104_v17  ;;  %4436 = vmatmul.msk.bf16.gmra.mxu1 %vm694_vm0, %v4630_v37 }
  0xd5   : > { %v6150_v48 = vpop.eup %5137  ;;  %v2722_v55 = vadd.f32 %v5130_v15, %v2721_v42  ;;  %5145 = vrcp.f32 %v6147_v50  ;;  %v6162_v47 = vadd.f32 1.0, %v5136_v44  ;;  %v3207_v61 = vand.u32 2147483647, %v6096_v14  ;;  %v4646_v42 = vld [vmem:[%s5676_s24 + $0x158] sm:$0xff] }
  0xd6   : > { %v5140_v30 = vpop.eup %5139  ;;  %v3199_v58 = vmul.f32 %v6150_v48, %v6096_v14  ;;  %v6167_v57 = vadd.f32 %v5745_v34, %v988_v54  ;;  %vm1778_vm15 = vweird.f32 %v6104_v17  ;;  %v2262_v49 = vand.u32 2147483647, %v6141_v46  ;;  %4452 = vmatmul.msk.bf16.gmra.mxu2 %vm694_vm0, %v4646_v42 }
  0xd7   : > { %v2726_v5 = vsel %vm2725_vm14, %v5130_v15, %v2722_v55  ;;  %v1774_v62 = vmul.f32 %v5140_v30, %v6104_v17  ;;  %v2264_v9 = vand.u32 2147483648, %v6141_v46  ;;  %v6173_v3 = vmul.f32 %v2251_v21, %v5825_v26 }
  0xd8   : > { %v3200_v2 = vsub.f32 1.0, %v3199_v58  ;;  %v2731_v31 = vsel %vm6125_vm12, %v2730_v39, %v2726_v5  ;;  %vm3203_vm1 = vweird.f32 %v6096_v14  ;;  %v6178_v63 = vor.u32 1.1754944e-38, %v3209_v25  ;;  %v4662_v25 = vld [vmem:[%s5676_s24 + $0x1d8] sm:$0xff]  ;;  %v1148_v39 = vpop.f32.mrf.mxu3 }
  0xd9   : > { %v1775_v51 = vsub.f32 1.0, %v1774_v62  ;;  %v5142_v4 = vpop.eup %5141  ;;  %vm6180_vm2 = vcmp.eq.f32.partialorder %v1782_v45, 8.507059e+37  ;;  %v1785_v10 = vor.u32 1.1754944e-38, %v1784_v60  ;;  %vm2258_vm3 = vweird.f32 %v6141_v46  ;;  %4468 = vmatmul.msk.bf16.gmra.mxu3 %vm694_vm0, %v4662_v25 }
  0xda   : > { %5147 = vrcp.f32 %v6162_v47  ;;  %v5144_v26 = vpop.eup %5143  ;;  %v3201_v12 = vmul.f32 %v6150_v48, %v3200_v2  ;;  %vm3204_vm4 = vweird.f32 %v6150_v48  ;;  %vm1779_vm5 = vweird.f32 %v5140_v30 }
  0xdb   : > { %v1776_v59 = vmul.f32 %v5140_v30, %v1775_v51  ;;  %v5146_v15 = vpop.eup %5145  ;;  %v6189_v16 = vmul.f32 %v2731_v31, %v5884_v0  ;;  %v2254_v52 = vmul.f32 %v5144_v26, %v6141_v46  ;;  %vm6192_vm6 = vcmp.eq.f32.partialorder %v2262_v49, 8.507059e+37  ;;  %vm6202_vm8 = vmor %vm1778_vm15, %vm1779_vm5 }
  0xdc   : > { %v2265_v11 = vor.u32 1.1754944e-38, %v2264_v9  ;;  %vm2738_vm7 = vweird.f32 %v6147_v50  ;;  %v2734_v22 = vmul.f32 %v5146_v15, %v6147_v50  ;;  %v2742_v23 = vand.u32 2147483647, %v6147_v50  ;;  %vm6234_vm12 = vmor %vm3203_vm1, %vm3204_vm4 }
  0xdd   : > { %v1777_v20 = vadd.f32 %v5140_v30, %v1776_v59  ;;  %v2744_v28 = vand.u32 2147483648, %v6147_v50  ;;  %v2255_v29 = vsub.f32 1.0, %v2254_v52  ;;  %v3222_v13 = vand.u32 2147483647, %v6162_v47 }
  0xde   : > { %v6207_v7 = vadd.f32 1.0, %v5142_v4  ;;  %5149 = vpow2.f32 %v4509_v53  ;;  %v3202_v38 = vadd.f32 %v6150_v48, %v3201_v12  ;;  %vm6212_vm9 = vcmp.eq.f32.partialorder %v3207_v61, 8.507059e+37 }
  0xdf   : > { %v1781_v17 = vsel %vm6202_vm8, %v5140_v30, %v1777_v20  ;;  %v2735_v40 = vsub.f32 1.0, %v2734_v22  ;;  %v4541_v44 = vmul.f32 -1.442695, %v6136_v19  ;;  %v2256_v21 = vmul.f32 %v5144_v26, %v2255_v29  ;;  %v1068_v29 = vpop.f32.mrf.mxu2 }
  0xe0   : > { %v5148_v54 = vpop.eup %5147  ;;  %v1786_v53 = vsel %vm6180_vm2, %v1785_v10, %v1781_v17  ;;  %vm2259_vm10 = vweird.f32 %v5144_v26  ;;  %5151 = vrcp.f32 %v6207_v7  ;;  %vm2739_vm11 = vweird.f32 %v5146_v15 }
  0xe1   : > { %v3651_v55 = vmul.f32 %v1786_v53, %v6031_v27  ;;  %v2736_v45 = vmul.f32 %v5146_v15, %v2735_v40  ;;  %v3214_v30 = vmul.f32 %v5148_v54, %v6162_v47  ;;  %v2257_v60 = vadd.f32 %v5144_v26, %v2256_v21  ;;  %vm2260_vm14 = vmor %vm2258_vm3, %vm2259_vm10 }
  0xe2   : > { %vm6238_vm13 = vcmp.eq.f32.partialorder %v2742_v23, 8.507059e+37  ;;  %v2745_v5 = vor.u32 1.1754944e-38, %v2744_v28  ;;  %v3224_v61 = vand.u32 2147483648, %v6162_v47  ;;  %5153 = vpow2.f32 %v4541_v44  ;;  %vm2740_vm15 = vmor %vm2738_vm7, %vm2739_vm11 }
  0xe3   : > { %v4677_v62 = vpack.c.bf16 %v3651_v55, %v6130_v35  ;;  %v2737_v14 = vadd.f32 %v5146_v15, %v2736_v45  ;;  %v3215_v2 = vsub.f32 1.0, %v3214_v30  ;;  %v3206_v9 = vsel %vm6234_vm12, %v6150_v48, %v3202_v38 }
  0xe4   : > { %v5150_v49 = vpop.eup %5149  ;;  %v2261_v31 = vsel %vm2260_vm14, %v5144_v26, %v2257_v60  ;;  %vm3219_vm1 = vweird.f32 %v5148_v54  ;;  %v4573_v35 = vmul.f32 -1.442695, %v6139_v43  ;;  %v4478_v50 = vmul.f32 -1.442695, %v6144_v1 }
  0xe5   : > { %4989 = vst [vmem:[%s5991_s29 + $0x8] sm:$0xff] %v4677_v62   ;;  %v2266_v46 = vsel %vm6192_vm6, %v2265_v11, %v2261_v31  ;;  %v2741_v51 = vsel %vm2740_vm15, %v5146_v15, %v2737_v14  ;;  %v3216_v4 = vmul.f32 %v5148_v54, %v3215_v2  ;;  %v6257_v6 = vadd.f32 1.0, %v5150_v49 }
  0xe6   : > { %v6259_v10 = vpop.eup %5151  ;;  %v3683_v48 = vmul.f32 %v2266_v46, %v6041_v36  ;;  %v2746_v26 = vsel %vm6238_vm13, %v2745_v5, %v2741_v51  ;;  %5155 = vpow2.f32 %v4573_v35  ;;  %vm3218_vm2 = vweird.f32 %v6162_v47 }
  0xe7   : > { %v3715_v12 = vmul.f32 %v2746_v26, %v6045_v41  ;;  %v3217_v59 = vadd.f32 %v5148_v54, %v3216_v4  ;;  %v1789_v15 = vmul.f32 %v6259_v10, %v6207_v7  ;;  %v3211_v36 = vsel %vm6212_vm9, %v6178_v63, %v3206_v9  ;;  %vm3220_vm3 = vmor %vm3218_vm2, %vm3219_vm1 }
  0xe8   : > { %v4757_v52 = vpack.c.bf16 %v3683_v48, %v6173_v3  ;;  %v3225_v18 = vor.u32 1.1754944e-38, %v3224_v61  ;;  %5157 = vrcp.f32 %v6257_v6  ;;  %v5154_v11 = vpop.eup %5153  ;;  %vm3223_vm4 = vcmp.eq.f32.partialorder %v3222_v13, 8.507059e+37 }
  0xe9   : > { %v4837_v41 = vpack.c.bf16 %v3715_v12, %v6189_v16  ;;  %v3221_v20 = vsel %vm3220_vm3, %v5148_v54, %v3217_v59  ;;  %v1790_v22 = vsub.f32 1.0, %v1789_v15  ;;  %v6279_v28 = vadd.f32 1.0, %v5154_v11  ;;  %v911_v54 = vpop.f32.mrf.mxu0 }
  0xea   : > { %5005 = vst [vmem:[%s5991_s29 + $0x88] sm:$0xff] %v4757_v52   ;;  %v3226_v23 = vsel %vm3223_vm4, %v3225_v18, %v3221_v20  ;;  %5159 = vpow2.f32 %v4478_v50  ;;  %v3746_v3 = vmul.f32 %v3211_v36, %v6028_v24  ;;  %v4510_v0 = vmul.f32 -1.442695, %v6167_v57  ;;  %v991_v50 = vpop.f32.mrf.mxu1 }
  0xeb   : > { %5021 = vst [vmem:[%s5991_s29 + $0x108] sm:$0xff] %v4837_v41   ;;  %v3747_v63 = vmul.f32 %v3226_v23, %v6065_v56  ;;  %v1791_v33 = vmul.f32 %v6259_v10, %v1790_v22  ;;  %5161 = vrcp.f32 %v6279_v28  ;;  %v1797_v24 = vand.u32 2147483647, %v6207_v7 }
  0xec   : > { %v5156_v16 = vpop.eup %5155  ;;  %5163 = vpow2.f32 %v4510_v0  ;;  %v1799_v38 = vand.u32 2147483648, %v6207_v7  ;;  %v6294_v56 = vadd.f32 %v5745_v34, %v1068_v29  ;;  %vm1793_vm5 = vweird.f32 %v6207_v7 }
  0xed   : > { %v4917_v47 = vpack.c.bf16 %v3747_v63, %v3746_v3  ;;  %v6287_v13 = vadd.f32 1.0, %v5156_v16  ;;  %v1792_v44 = vadd.f32 %v6259_v10, %v1791_v33  ;;  %vm1794_vm6 = vweird.f32 %v6259_v10 }
  0xee   : > { %v6289_v37 = vpop.eup %5157  ;;  %v2277_v42 = vand.u32 2147483647, %v6257_v6  ;;  %v2279_v25 = vand.u32 2147483648, %v6257_v6  ;;  %v4542_v55 = vmul.f32 -1.442695, %v6294_v56  ;;  %v6309_v45 = vadd.f32 %v5745_v34, %v1148_v39  ;;  %vm6321_vm9 = vmor %vm1793_vm5, %vm1794_vm6 }
  0xef   : > { %5037 = vst [vmem:[%s5991_s29 + $0x188] sm:$0xff] %v4917_v47   ;;  %v2269_v17 = vmul.f32 %v6289_v37, %v6257_v6  ;;  %5165 = vrcp.f32 %v6287_v13  ;;  %vm6313_vm7 = vcmp.eq.f32.partialorder %v1797_v24, 8.507059e+37  ;;  %v1800_v60 = vor.u32 1.1754944e-38, %v1799_v38 }
  0xf0   : > { %v5160_v40 = vpop.eup %5159  ;;  %vm2273_vm8 = vweird.f32 %v6257_v6  ;;  %v2759_v27 = vand.u32 2147483648, %v6279_v28  ;;  %v6330_v2 = vadd.f32 %v5745_v34, %v911_v54  ;;  %v1796_v49 = vsel %vm6321_vm9, %v6259_v10, %v1792_v44  ;;  %v1151_v54 = vpop.f32.mrf.mxu3 }
  0xf1   : > { %v2270_v53 = vsub.f32 1.0, %v2269_v17  ;;  %v6305_v21 = vadd.f32 1.0, %v5160_v40  ;;  %v6311_v30 = vpop.eup %5161  ;;  %vm6335_vm10 = vcmp.eq.f32.partialorder %v2277_v42, 8.507059e+37  ;;  %v2280_v9 = vor.u32 1.1754944e-38, %v2279_v25  ;;  %v1071_v40 = vpop.f32.mrf.mxu2 }
  0xf2   : > { %v5164_v5 = vpop.eup %5163  ;;  %v2749_v14 = vmul.f32 %v6311_v30, %v6279_v28  ;;  %v2757_v51 = vand.u32 2147483647, %v6279_v28  ;;  %v4574_v4 = vmul.f32 -1.442695, %v6309_v45  ;;  %vm2274_vm11 = vweird.f32 %v6289_v37  ;;  %v993_v6 = vpop.f32.mrf.mxu1 }
  0xf3   : > { %v2271_v62 = vmul.f32 %v6289_v37, %v2270_v53  ;;  %5167 = vrcp.f32 %v6305_v21  ;;  %v6339_v31 = vadd.f32 1.0, %v5164_v5  ;;  %vm2753_vm12 = vweird.f32 %v6279_v28  ;;  %vm6362_vm14 = vmor %vm2273_vm8, %vm2274_vm11 }
  0xf4   : > { %v2750_v46 = vsub.f32 1.0, %v2749_v14  ;;  %5169 = vpow2.f32 %v4542_v55  ;;  %v3239_v26 = vand.u32 2147483648, %v6287_v13  ;;  %v1801_v12 = vsel %vm6313_vm7, %v1800_v60, %v1796_v49 }
  0xf5   : > { %v6341_v35 = vpop.eup %5165  ;;  %v2272_v48 = vadd.f32 %v6289_v37, %v2271_v62  ;;  %v6353_v59 = vor.u32 1.1754944e-38, %v2759_v27  ;;  %5171 = vrcp.f32 %v6339_v31  ;;  %v4479_v15 = vmul.f32 -1.442695, %v6330_v2  ;;  %v6432_v62 = vld [vmem:[%s9362_s2] ss:$0 sm:$0xff] }
  0xf6   : > { %v3229_v10 = vmul.f32 %v6341_v35, %v6287_v13  ;;  %v2751_v36 = vmul.f32 %v6311_v30, %v2750_v46  ;;  %vm3233_vm13 = vweird.f32 %v6287_v13  ;;  %v3237_v18 = vand.u32 2147483647, %v6287_v13 }
  0xf7   : > { %v1812_v20 = vand.u32 2147483647, %v6305_v21  ;;  %v1814_v22 = vand.u32 2147483648, %v6305_v21  ;;  %5173 = vpow2.f32 %v4574_v4  ;;  %v6369_v23 = vadd.f32 %v5745_v34, %v991_v50 }
  0xf8   : > { %v3230_v52 = vsub.f32 1.0, %v3229_v10  ;;  %v6372_v3 = vmul.f32 %v1801_v12, %v6092_v8  ;;  %v2276_v63 = vsel %vm6362_vm14, %v6289_v37, %v2272_v48  ;;  %vm6377_vm15 = vcmp.eq.f32.partialorder %v2757_v51, 8.507059e+37  ;;  %v4631_v48 = vld [vmem:[%s5676_s24 + $0xe0] sm:$0xff] }
  0xf9   : > { %v5168_v11 = vpop.eup %5167  ;;  %v6381_v0 = vor.u32 1.1754944e-38, %v3239_v26  ;;  %vm2754_vm1 = vweird.f32 %v6311_v30  ;;  %5175 = vpow2.f32 %v4479_v15  ;;  %v4511_v8 = vmul.f32 -1.442695, %v6369_v23  ;;  %v4647_v10 = vld [vmem:[%s5676_s24 + $0x160] sm:$0xff]  ;;  %4437 = vmatmul.msk.bf16.gmra.mxu1 %vm694_vm0, %v4631_v48 }
  0xfa   : > { %v1804_v29 = vmul.f32 %v5168_v11, %v6305_v21  ;;  %v5170_v16 = vpop.eup %5169  ;;  %v3231_v34 = vmul.f32 %v6341_v35, %v3230_v52  ;;  %v2752_v33 = vadd.f32 %v6311_v30, %v2751_v36  ;;  %vm1808_vm2 = vweird.f32 %v6305_v21  ;;  %vm6410_vm7 = vmor %vm2753_vm12, %vm2754_vm1  ;;  %v4663_v12 = vld [vmem:[%s5676_s24 + $0x1e0] sm:$0xff]  ;;  %4453 = vmatmul.msk.bf16.gmra.mxu2 %vm694_vm0, %v4647_v10 }
  0xfb   : > { %v6389_v37 = vadd.f32 1.0, %v5170_v16  ;;  %v6391_v24 = vpop.eup %5171  ;;  %v2281_v38 = vsel %vm6335_vm10, %v2280_v9, %v2276_v63  ;;  %vm3234_vm3 = vweird.f32 %v6341_v35  ;;  %vm6396_vm4 = vcmp.eq.f32.partialorder %v1812_v20, 8.507059e+37  ;;  %4469 = vmatmul.msk.bf16.gmra.mxu3 %vm694_vm0, %v4663_v12  ;;  %v913_v63 = vpop.f32.mrf.mxu0 }
  0xfc   : > { %v1805_v47 = vsub.f32 1.0, %v1804_v29  ;;  %v1815_v17 = vor.u32 1.1754944e-38, %v1814_v22  ;;  %vm6400_vm5 = vcmp.eq.f32.partialorder %v3237_v18, 8.507059e+37  ;;  %vm1809_vm6 = vweird.f32 %v5168_v11  ;;  %vm6425_vm9 = vmor %vm3233_vm13, %vm3234_vm3  ;;  %v1073_v12 = vpop.f32.mrf.mxu2 }
  0xfd   : > { %v2284_v25 = vmul.f32 %v6391_v24, %v6339_v31  ;;  %5177 = vpow2.f32 %v4511_v8  ;;  %v5174_v53 = vpop.eup %5173  ;;  %v3232_v58 = vadd.f32 %v6341_v35, %v3231_v34  ;;  %vm2288_vm8 = vweird.f32 %v6339_v31  ;;  %vm1810_vm10 = vmor %vm1808_vm2, %vm1809_vm6 }
  0xfe   : > { %v1806_v42 = vmul.f32 %v5168_v11, %v1805_v47  ;;  %v2292_v60 = vand.u32 2147483647, %v6339_v31  ;;  %5179 = vrcp.f32 %v6389_v37  ;;  %v2756_v27 = vsel %vm6410_vm7, %v6311_v30, %v2752_v33 }
  0xff   : > { %v2285_v61 = vsub.f32 1.0, %v2284_v25  ;;  %v6435_v30 = vadd.f32 %v6432_v62, %v1071_v40  ;;  %v5176_v14 = vpop.eup %5175  ;;  %v3684_v13 = vmul.f32 %v2281_v38, %v6114_v32  ;;  %v2294_v49 = vand.u32 2147483648, %v6339_v31  ;;  %v4615_v32 = vld [vmem:[%s5676_s24 + $0x60] sm:$0xff] }
 0x100   : > { %v1807_v5 = vadd.f32 %v5168_v11, %v1806_v42  ;;  %v6442_v7 = vadd.f32 1.0, %v5174_v53  ;;  %v6445_v9 = vadd.f32 %v6432_v62, %v1151_v54  ;;  %vm2289_vm11 = vweird.f32 %v6391_v24  ;;  %4421 = vmatmul.msk.bf16.gmra.mxu0 %vm694_vm0, %v4615_v32 }
 0x101   : > { %v2286_v51 = vmul.f32 %v6391_v24, %v2285_v61  ;;  %v6449_v4 = vadd.f32 1.0, %v5176_v14  ;;  %v2761_v21 = vsel %vm6377_vm15, %v6353_v59, %v2756_v27  ;;  %v3236_v26 = vsel %vm6425_vm9, %v6341_v35, %v3232_v58  ;;  %vm2290_vm12 = vmor %vm2288_vm8, %vm2289_vm11 }
 0x102   : > { %v1811_v46 = vsel %vm1810_vm10, %v5168_v11, %v1807_v5  ;;  %5181 = vrcp.f32 %v6442_v7  ;;  %v4543_v18 = vmul.f32 -1.442695, %v6435_v30  ;;  %vm2293_vm13 = vcmp.eq.f32.partialorder %v2292_v60, 8.507059e+37 }
 0x103   : > { %v1816_v50 = vsel %vm6396_vm4, %v1815_v17, %v1811_v46  ;;  %v5178_v15 = vpop.eup %5177  ;;  %v2287_v52 = vadd.f32 %v6391_v24, %v2286_v51  ;;  %5183 = vrcp.f32 %v6449_v4  ;;  %v2295_v59 = vor.u32 1.1754944e-38, %v2294_v49 }
 0x104   : > { %v3653_v36 = vmul.f32 %v1816_v50, %v6144_v1  ;;  %v5180_v35 = vpop.eup %5179  ;;  %v2772_v1 = vand.u32 2147483647, %v6389_v37  ;;  %v4575_v11 = vmul.f32 -1.442695, %v6445_v9  ;;  %v6479_v41 = vmul.f32 %v2761_v21, %v6136_v19 }
 0x105   : > { %v2291_v22 = vsel %vm2290_vm12, %v6391_v24, %v2287_v52  ;;  %v2764_v31 = vmul.f32 %v5180_v35, %v6389_v37  ;;  %v3241_v29 = vsel %vm6400_vm5, %v6381_v0, %v3236_v26  ;;  %vm2768_vm14 = vweird.f32 %v6389_v37  ;;  %v1153_v52 = vpop.f32.mrf.mxu3 }
 0x106   : > { %v4682_v20 = vpack.c.bf16 %v3653_v36, %v6372_v3  ;;  %v2296_v16 = vsel %vm2293_vm13, %v2295_v59, %v2291_v22  ;;  %v2774_v34 = vand.u32 2147483648, %v6389_v37  ;;  %v6491_v3 = vadd.f32 1.0, %v5178_v15 }
 0x107   : > { %v3685_v19 = vmul.f32 %v2296_v16, %v6167_v57  ;;  %v2765_v8 = vsub.f32 1.0, %v2764_v31  ;;  %5185 = vpow2.f32 %v4543_v18  ;;  %vm6493_vm15 = vcmp.eq.f32.partialorder %v2772_v1, 8.507059e+37 }
 0x108   : > { %4990 = vst [vmem:[%s5991_s29 + $0x10] sm:$0xff] %v4682_v20   ;;  %v5182_v33 = vpop.eup %5181  ;;  %5187 = vpow2.f32 %v4575_v11  ;;  %v6498_v0 = vadd.f32 %v6432_v62, %v913_v63  ;;  %v6501_v24 = vadd.f32 %v6432_v62, %v993_v6  ;;  %vm2769_vm1 = vweird.f32 %v5180_v35 }
 0x109   : > { %v6503_v38 = vpop.eup %5183  ;;  %v4762_v57 = vpack.c.bf16 %v3685_v19, %v3684_v13  ;;  %v2766_v39 = vmul.f32 %v5180_v35, %v2765_v8  ;;  %v3244_v17 = vmul.f32 %v5182_v33, %v6442_v7  ;;  %v2775_v40 = vor.u32 1.1754944e-38, %v2774_v34  ;;  %vm2770_vm3 = vmor %vm2768_vm14, %vm2769_vm1 }
 0x10a   : > { %vm3248_vm2 = vweird.f32 %v6442_v7  ;;  %v1819_v44 = vmul.f32 %v6503_v38, %v6449_v4  ;;  %5189 = vrcp.f32 %v6491_v3  ;;  %v3252_v54 = vand.u32 2147483647, %v6442_v7 }
 0x10b   : > { %5006 = vst [vmem:[%s5991_s29 + $0x90] sm:$0xff] %v4762_v57   ;;  %v2767_v42 = vadd.f32 %v5180_v35, %v2766_v39  ;;  %v3245_v25 = vsub.f32 1.0, %v3244_v17  ;;  %v3254_v53 = vand.u32 2147483648, %v6442_v7  ;;  %vm1823_vm4 = vweird.f32 %v6449_v4 }
 0x10c   : > { %v1820_v55 = vsub.f32 1.0, %v1819_v44  ;;  %v4480_v58 = vmul.f32 -1.442695, %v6498_v0  ;;  %v4512_v60 = vmul.f32 -1.442695, %v6501_v24  ;;  %vm3249_vm5 = vweird.f32 %v5182_v33 }
 0x10d   : > { %v5186_v27 = vpop.eup %5185  ;;  %v2771_v28 = vsel %vm2770_vm3, %v5180_v35, %v2767_v42  ;;  %v3246_v5 = vmul.f32 %v5182_v33, %v3245_v25  ;;  %v1829_v61 = vand.u32 2147483648, %v6449_v4  ;;  %vm3250_vm6 = vmor %vm3248_vm2, %vm3249_vm5  ;;  %v3255_v10 = vor.u32 1.1754944e-38, %v3254_v53  ;;  %v916_v42 = vpop.f32.mrf.mxu0 }
 0x10e   : > { %v5188_v14 = vpop.eup %5187  ;;  %v2776_v13 = vsel %vm6493_vm15, %v2775_v40, %v2771_v28  ;;  %v1821_v37 = vmul.f32 %v6503_v38, %v1820_v55  ;;  %v6522_v49 = vadd.f32 1.0, %v5186_v27  ;;  %5191 = vpow2.f32 %v4480_v58  ;;  %v996_v58 = vpop.f32.mrf.mxu1 }
 0x10f   : > { %v3717_v46 = vmul.f32 %v2776_v13, %v6294_v56  ;;  %v3247_v51 = vadd.f32 %v5182_v33, %v3246_v5  ;;  %v6525_v32 = vadd.f32 1.0, %v5188_v14  ;;  %5193 = vpow2.f32 %v4512_v60 }
 0x110   : > { %v6527_v48 = vpop.eup %5189  ;;  %v1822_v21 = vadd.f32 %v6503_v38, %v1821_v37  ;;  %vm1824_vm7 = vweird.f32 %v6503_v38  ;;  %5195 = vrcp.f32 %v6522_v49  ;;  %vm3253_vm8 = vcmp.eq.f32.partialorder %v3252_v54, 8.507059e+37 }
 0x111   : > { %v4842_v26 = vpack.c.bf16 %v3717_v46, %v6479_v41  ;;  %v3251_v56 = vsel %vm3250_vm6, %v5182_v33, %v3247_v51  ;;  %v2299_v50 = vmul.f32 %v6527_v48, %v6491_v3  ;;  %v3748_v15 = vmul.f32 %v3241_v29, %v6139_v43  ;;  %vm6543_vm9 = vmor %vm1823_vm4, %vm1824_vm7 }
 0x112   : > { %v3256_v36 = vsel %vm3253_vm8, %v3255_v10, %v3251_v56  ;;  %v1827_v7 = vand.u32 2147483647, %v6449_v4  ;;  %v2307_v1 = vand.u32 2147483647, %v6491_v3  ;;  %5197 = vrcp.f32 %v6525_v32 }
 0x113   : > { %5022 = vst [vmem:[%s5991_s29 + $0x110] sm:$0xff] %v4842_v26   ;;  %v3749_v18 = vmul.f32 %v3256_v36, %v6309_v45  ;;  %v2300_v59 = vsub.f32 1.0, %v2299_v50  ;;  %v1826_v11 = vsel %vm6543_vm9, %v6503_v38, %v1822_v21  ;;  %v1830_v41 = vor.u32 1.1754944e-38, %v1829_v61 }
 0x114   : > { %v5192_v43 = vpop.eup %5191  ;;  %v2309_v45 = vand.u32 2147483648, %v6491_v3  ;;  %v6554_v4 = vadd.f32 %v6432_v62, %v1073_v12  ;;  %v6560_v6 = vadd.f32 %v6432_v62, %v1153_v52  ;;  %vm1828_vm10 = vcmp.eq.f32.partialorder %v1827_v7, 8.507059e+37 }
 0x115   : > { %v5194_v20 = vpop.eup %5193  ;;  %v4922_v22 = vpack.c.bf16 %v3749_v18, %v3748_v15  ;;  %v2301_v31 = vmul.f32 %v6527_v48, %v2300_v59  ;;  %v6557_v63 = vadd.f32 1.0, %v5192_v43  ;;  %vm2303_vm11 = vweird.f32 %v6491_v3 }
 0x116   : > { %v6562_v29 = vpop.eup %5195  ;;  %v2789_v16 = vand.u32 2147483648, %v6522_v49  ;;  %v6566_v34 = vadd.f32 1.0, %v5194_v20  ;;  %v1831_v19 = vsel %vm1828_vm10, %v1830_v41, %v1826_v11  ;;  %vm6569_vm12 = vcmp.eq.f32.partialorder %v2307_v1, 8.507059e+37 }
 0x117   : > { %5038 = vst [vmem:[%s5991_s29 + $0x190] sm:$0xff] %v4922_v22   ;;  %v2779_v33 = vmul.f32 %v6562_v29, %v6522_v49  ;;  %v3269_v47 = vand.u32 2147483648, %v6525_v32  ;;  %vm2304_vm13 = vweird.f32 %v6527_v48  ;;  %v2310_v38 = vor.u32 1.1754944e-38, %v2309_v45 }
 0x118   : > { %5199 = vrcp.f32 %v6557_v63  ;;  %v4544_v57 = vmul.f32 -1.442695, %v6554_v4  ;;  %v6579_v39 = vpop.eup %5197  ;;  %v2302_v17 = vadd.f32 %v6527_v48, %v2301_v31  ;;  %v4576_v44 = vmul.f32 -1.442695, %v6560_v6  ;;  %vm6602_vm2 = vmor %vm2303_vm11, %vm2304_vm13 }
 0x119   : > { %v2780_v40 = vsub.f32 1.0, %v2779_v33  ;;  %5201 = vrcp.f32 %v6566_v34  ;;  %v6585_v25 = vmul.f32 %v1831_v19, %v6330_v2  ;;  %vm2783_vm14 = vweird.f32 %v6522_v49  ;;  %v1076_v2 = vpop.f32.mrf.mxu2 }
 0x11a   : > { %v2787_v54 = vand.u32 2147483647, %v6522_v49  ;;  %v6589_v53 = vor.u32 1.1754944e-38, %v2789_v16  ;;  %v3259_v55 = vmul.f32 %v6579_v39, %v6525_v32  ;;  %vm2784_vm15 = vweird.f32 %v6562_v29 }
 0x11b   : > { %vm3263_vm1 = vweird.f32 %v6525_v32  ;;  %v3267_v60 = vand.u32 2147483647, %v6525_v32  ;;  %v6596_v27 = vor.u32 1.1754944e-38, %v3269_v47  ;;  %v2781_v5 = vmul.f32 %v6562_v29, %v2780_v40  ;;  %vm6647_vm9 = vmor %vm2783_vm14, %vm2784_vm15  ;;  %v4632_v40 = vld [vmem:[%s5676_s24 + $0xe8] sm:$0xff] }
 0x11c   : > { %v3260_v61 = vsub.f32 1.0, %v3259_v55  ;;  %5203 = vpow2.f32 %v4544_v57  ;;  %v6608_v14 = vadd.f32 %v6432_v62, %v916_v42  ;;  %v2306_v13 = vsel %vm6602_vm2, %v6527_v48, %v2302_v17  ;;  %4438 = vmatmul.msk.bf16.gmra.mxu1 %vm694_vm0, %v4632_v40 }
 0x11d   : > { %vm1838_vm3 = vweird.f32 %v6557_v63  ;;  %5205 = vpow2.f32 %v4576_v44  ;;  %v6615_v3 = vadd.f32 %v6432_v62, %v996_v58  ;;  %vm6617_vm4 = vcmp.eq.f32.partialorder %v2787_v54, 8.507059e+37  ;;  %v4648_v44 = vld [vmem:[%s5676_s24 + $0x168] sm:$0xff] }
 0x11e   : > { %v5200_v37 = vpop.eup %5199  ;;  %v3261_v51 = vmul.f32 %v6579_v39, %v3260_v61  ;;  %v1842_v10 = vand.u32 2147483647, %v6557_v63  ;;  %v4481_v21 = vmul.f32 -1.442695, %v6608_v14  ;;  %v6625_v26 = vadd.f32 %v6432_v62, %v1076_v2  ;;  %v4664_v58 = vld [vmem:[%s5676_s24 + $0x1e8] sm:$0xff]  ;;  %4454 = vmatmul.msk.bf16.gmra.mxu2 %vm694_vm0, %v4648_v44 }
 0x11f   : > { %v5202_v48 = vpop.eup %5201  ;;  %v1834_v56 = vmul.f32 %v5200_v37, %v6557_v63  ;;  %v1844_v50 = vand.u32 2147483648, %v6557_v63  ;;  %vm2318_vm5 = vweird.f32 %v6566_v34  ;;  %v4513_v12 = vmul.f32 -1.442695, %v6615_v3  ;;  %v4616_v63 = vld [vmem:[%s5676_s24 + $0x68] sm:$0xff]  ;;  %4470 = vmatmul.msk.bf16.gmra.mxu3 %vm694_vm0, %v4664_v58 }
 0x120   : > { %v2311_v15 = vsel %vm6569_vm12, %v2310_v38, %v2306_v13  ;;  %v2782_v36 = vadd.f32 %v6562_v29, %v2781_v5  ;;  %vm3264_vm6 = vweird.f32 %v6579_v39  ;;  %vm6635_vm7 = vcmp.eq.f32.partialorder %v3267_v60, 8.507059e+37  ;;  %v1156_v38 = vpop.f32.mrf.mxu3  ;;  %4422 = vmatmul.msk.bf16.gmra.mxu0 %vm694_vm0, %v4616_v63 }
 0x121   : > { %v2314_v52 = vmul.f32 %v5202_v48, %v6566_v34  ;;  %v1835_v18 = vsub.f32 1.0, %v1834_v56  ;;  %v2322_v35 = vand.u32 2147483647, %v6566_v34  ;;  %5207 = vpow2.f32 %v4481_v21  ;;  %vm6661_vm10 = vmor %vm3263_vm1, %vm3264_vm6 }
 0x122   : > { %v4545_v59 = vmul.f32 -1.442695, %v6625_v26  ;;  %v5204_v1 = vpop.eup %5203  ;;  %v3262_v43 = vadd.f32 %v6579_v39, %v3261_v51  ;;  %vm1839_vm8 = vweird.f32 %v5200_v37  ;;  %5209 = vpow2.f32 %v4513_v12 }
 0x123   : > { %v2315_v11 = vsub.f32 1.0, %v2314_v52  ;;  %v5206_v41 = vpop.eup %5205  ;;  %v1836_v20 = vmul.f32 %v5200_v37, %v1835_v18  ;;  %v2324_v22 = vand.u32 2147483648, %v6566_v34  ;;  %v6652_v31 = vadd.f32 1.0, %v5204_v1  ;;  %vm6671_vm12 = vmor %vm1838_vm3, %vm1839_vm8 }
 0x124   : > { %5211 = vpow2.f32 %v4545_v59  ;;  %v2786_v16 = vsel %vm6647_vm9, %v6562_v29, %v2782_v36  ;;  %vm2319_vm11 = vweird.f32 %v5202_v48  ;;  %v6665_v8 = vadd.f32 1.0, %v5206_v41 }
 0x125   : > { %v2316_v19 = vmul.f32 %v5202_v48, %v2315_v11  ;;  %v3686_v33 = vmul.f32 %v2311_v15, %v6369_v23  ;;  %v1837_v47 = vadd.f32 %v5200_v37, %v1836_v20  ;;  %vm6675_vm13 = vcmp.eq.f32.partialorder %v1842_v10, 8.507059e+37  ;;  %vm2320_vm14 = vmor %vm2318_vm5, %vm2319_vm11  ;;  %v998_v20 = vpop.f32.mrf.mxu1 }
 0x126   : > { %5213 = vrcp.f32 %v6652_v31  ;;  %v3266_v23 = vsel %vm6661_vm10, %v6579_v39, %v3262_v43  ;;  %v1845_v57 = vor.u32 1.1754944e-38, %v1844_v50  ;;  %v2791_v54 = vsel %vm6617_vm4, %v6589_v53, %v2786_v16  ;;  %v918_v43 = vpop.f32.mrf.mxu0 }
 0x127   : > { %v2317_v17 = vadd.f32 %v5202_v48, %v2316_v19  ;;  %5215 = vrcp.f32 %v6665_v8  ;;  %v5208_v42 = vpop.eup %5207  ;;  %v1841_v55 = vsel %vm6671_vm12, %v5200_v37, %v1837_v47  ;;  %vm2323_vm15 = vcmp.eq.f32.partialorder %v2322_v35, 8.507059e+37  ;;  %v1078_v19 = vpop.f32.mrf.mxu2 }
 0x128   : > { %v2325_v39 = vor.u32 1.1754944e-38, %v2324_v22  ;;  %v5210_v60 = vpop.eup %5209  ;;  %v1846_v2 = vsel %vm6675_vm13, %v1845_v57, %v1841_v55  ;;  %v6698_v5 = vadd.f32 1.0, %v5208_v42  ;;  %v6701_v61 = vadd.f32 %v6432_v62, %v1156_v38 }
 0x129   : > { %v2321_v28 = vsel %vm2320_vm14, %v5202_v48, %v2317_v17  ;;  %v3271_v34 = vsel %vm6635_vm7, %v6596_v27, %v3266_v23  ;;  %v3655_v13 = vmul.f32 %v1846_v2, %v6498_v0  ;;  %v2802_v46 = vand.u32 2147483647, %v6652_v31 }
 0x12a   : > { %v5212_v53 = vpop.eup %5211  ;;  %v2326_v37 = vsel %vm2323_vm15, %v2325_v39, %v2321_v28  ;;  %v2804_v10 = vand.u32 2147483648, %v6652_v31  ;;  %v3282_v21 = vand.u32 2147483647, %v6665_v8  ;;  %5217 = vrcp.f32 %v6698_v5 }
 0x12b   : > { %v3687_v51 = vmul.f32 %v2326_v37, %v6501_v24  ;;  %v4687_v0 = vpack.c.bf16 %v3655_v13, %v6585_v25  ;;  %v3284_v48 = vand.u32 2147483648, %v6665_v8  ;;  %v6718_v56 = vadd.f32 1.0, %v5210_v60  ;;  %v1158_v13 = vpop.f32.mrf.mxu3 }
 0x12c   : > { %v5214_v27 = vpop.eup %5213  ;;  %v6720_v50 = vadd.f32 1.0, %v5212_v53  ;;  %v6723_v15 = vmul.f32 %v2791_v54, %v6435_v30  ;;  %v6726_v24 = vmul.f32 %v3271_v34, %v6445_v9  ;;  %vm2798_vm1 = vweird.f32 %v6652_v31 }
 0x12d   : > { %v5216_v12 = vpop.eup %5215  ;;  %v4767_v36 = vpack.c.bf16 %v3687_v51, %v3686_v33  ;;  %v2794_v7 = vmul.f32 %v5214_v27, %v6652_v31  ;;  %4991 = vst [vmem:[%s5991_s29 + $0x18] sm:$0xff] %v4687_v0   ;;  %5219 = vrcp.f32 %v6718_v56  ;;  %v4577_v52 = vmul.f32 -1.442695, %v6701_v61 }
 0x12e   : > { %v3274_v25 = vmul.f32 %v5216_v12, %v6665_v8  ;;  %vm6735_vm2 = vcmp.eq.f32.partialorder %v2802_v46, 8.507059e+37  ;;  %v2805_v9 = vor.u32 1.1754944e-38, %v2804_v10  ;;  %vm3278_vm3 = vweird.f32 %v6665_v8 }
 0x12f   : > { %5007 = vst [vmem:[%s5991_s29 + $0x98] sm:$0xff] %v4767_v36   ;;  %v2795_v18 = vsub.f32 1.0, %v2794_v7  ;;  %vm6740_vm4 = vcmp.eq.f32.partialorder %v3282_v21, 8.507059e+37  ;;  %v3285_v1 = vor.u32 1.1754944e-38, %v3284_v48  ;;  %5221 = vrcp.f32 %v6720_v50  ;;  %v4649_v7 = vld [vmem:[%s5676_s24 + $0x170] sm:$0xff] }
 0x130   : > { %v3275_v35 = vsub.f32 1.0, %v3274_v25  ;;  %v6745_v11 = vpop.eup %5217  ;;  %vm2799_vm5 = vweird.f32 %v5214_v27  ;;  %vm1853_vm6 = vweird.f32 %v6698_v5  ;;  %v1857_v45 = vand.u32 2147483647, %v6698_v5  ;;  %4455 = vmatmul.msk.bf16.gmra.mxu2 %vm694_vm0, %v4649_v7 }
 0x131   : > { %v2796_v41 = vmul.f32 %v5214_v27, %v2795_v18  ;;  %vm3279_vm7 = vweird.f32 %v5216_v12  ;;  %v1849_v16 = vmul.f32 %v6745_v11, %v6698_v5  ;;  %v1859_v49 = vand.u32 2147483648, %v6698_v5  ;;  %vm2800_vm9 = vmor %vm2798_vm1, %vm2799_vm5 }
 0x132   : > { %v3276_v22 = vmul.f32 %v5216_v12, %v3275_v35  ;;  %vm2333_vm8 = vweird.f32 %v6718_v56  ;;  %5223 = vpow2.f32 %v4577_v52  ;;  %v6754_v47 = vadd.f32 %v6432_v62, %v918_v43  ;;  %vm3280_vm10 = vmor %vm3278_vm3, %vm3279_vm7 }
 0x133   : > { %v2797_v33 = vadd.f32 %v5214_v27, %v2796_v41  ;;  %v6756_v29 = vpop.eup %5219  ;;  %v1850_v38 = vsub.f32 1.0, %v1849_v16  ;;  %v2337_v23 = vand.u32 2147483647, %v6718_v56  ;;  %v6762_v57 = vadd.f32 %v6432_v62, %v998_v20 }
 0x134   : > { %v3277_v32 = vadd.f32 %v5216_v12, %v3276_v22  ;;  %v2329_v63 = vmul.f32 %v6756_v29, %v6718_v56  ;;  %v4482_v40 = vmul.f32 -1.442695, %v6754_v47  ;;  %v6771_v31 = vadd.f32 %v6432_v62, %v1078_v19 }
 0x135   : > { %v2801_v17 = vsel %vm2800_vm9, %v5214_v27, %v2797_v33  ;;  %v6773_v44 = vpop.eup %5221  ;;  %v1851_v55 = vmul.f32 %v6745_v11, %v1850_v38  ;;  %vm6778_vm11 = vcmp.eq.f32.partialorder %v1857_v45, 8.507059e+37  ;;  %v4514_v8 = vmul.f32 -1.442695, %v6762_v57  ;;  %v1001_v33 = vpop.f32.mrf.mxu1 }
 0x136   : > { %v2806_v42 = vsel %vm6735_vm2, %v2805_v9, %v2801_v17  ;;  %v3281_v54 = vsel %vm3280_vm10, %v5216_v12, %v3277_v32  ;;  %v2330_v2 = vsub.f32 1.0, %v2329_v63  ;;  %v2809_v28 = vmul.f32 %v6773_v44, %v6720_v50  ;;  %v1081_v17 = vpop.f32.mrf.mxu2 }
 0x137   : > { %v3719_v58 = vmul.f32 %v2806_v42, %v6554_v4  ;;  %v3286_v60 = vsel %vm6740_vm4, %v3285_v1, %v3281_v54  ;;  %v1852_v34 = vadd.f32 %v6745_v11, %v1851_v55  ;;  %vm1854_vm12 = vweird.f32 %v6745_v11 }
 0x138   : > { %v3751_v53 = vmul.f32 %v3286_v60, %v6560_v6  ;;  %5225 = vpow2.f32 %v4482_v40  ;;  %v5224_v37 = vpop.eup %5223  ;;  %v2331_v46 = vmul.f32 %v6756_v29, %v2330_v2  ;;  %v2810_v51 = vsub.f32 1.0, %v2809_v28  ;;  %vm6801_vm14 = vmor %vm1853_vm6, %vm1854_vm12 }
 0x139   : > { %v4847_v4 = vpack.c.bf16 %v3719_v58, %v6723_v15  ;;  %5227 = vpow2.f32 %v4514_v8  ;;  %vm2334_vm13 = vweird.f32 %v6756_v29  ;;  %v6795_v21 = vadd.f32 1.0, %v5224_v37 }
 0x13a   : > { %v4927_v10 = vpack.c.bf16 %v3751_v53, %v6726_v24  ;;  %v4546_v6 = vmul.f32 -1.442695, %v6771_v31  ;;  %v2332_v0 = vadd.f32 %v6756_v29, %v2331_v46  ;;  %v2339_v48 = vand.u32 2147483648, %v6718_v56  ;;  %v921_v24 = vpop.f32.mrf.mxu0  ;;  %vm6821_vm1 = vmor %vm2333_vm8, %vm2334_vm13 }
 0x13b   : > { %5023 = vst [vmem:[%s5991_s29 + $0x118] sm:$0xff] %v4847_v4   ;;  %v2811_v12 = vmul.f32 %v6773_v44, %v2810_v51  ;;  %v6809_v15 = vadd.f32 %v6432_v62, %v1158_v13  ;;  %v1856_v36 = vsel %vm6801_vm14, %v6745_v11, %v1852_v34  ;;  %v1860_v5 = vor.u32 1.1754944e-38, %v1859_v49 }
 0x13c   : > { %5039 = vst [vmem:[%s5991_s29 + $0x198] sm:$0xff] %v4927_v10   ;;  %vm2814_vm15 = vweird.f32 %v6773_v44  ;;  %5229 = vrcp.f32 %v6795_v21  ;;  %vm2813_vm2 = vweird.f32 %v6720_v50  ;;  %v2819_v52 = vand.u32 2147483648, %v6720_v50 }
 0x13d   : > { %v2812_v25 = vadd.f32 %v6773_v44, %v2811_v12  ;;  %5231 = vpow2.f32 %v4546_v6  ;;  %v2336_v30 = vsel %vm6821_vm1, %v6756_v29, %v2332_v0  ;;  %v2817_v9 = vand.u32 2147483647, %v6720_v50  ;;  %vm6840_vm4 = vmor %vm2813_vm2, %vm2814_vm15 }
 0x13e   : > { %v5226_v18 = vpop.eup %5225  ;;  %v4578_v56 = vmul.f32 -1.442695, %v6809_v15  ;;  %v6834_v35 = vadd.f32 %v6432_v62, %v921_v24  ;;  %v1861_v1 = vsel %vm6778_vm11, %v1860_v5, %v1856_v36  ;;  %vm2338_vm3 = vcmp.eq.f32.partialorder %v2337_v23, 8.507059e+37  ;;  %v4617_v36 = vld [vmem:[%s5676_s24 + $0x70] sm:$0xff] }
 0x13f   : > { %v5228_v59 = vpop.eup %5227  ;;  %v2340_v43 = vor.u32 1.1754944e-38, %v2339_v48  ;;  %v6844_v41 = vadd.f32 1.0, %v5226_v18  ;;  %v2816_v50 = vsel %vm6840_vm4, %v6773_v44, %v2812_v25  ;;  %v2820_v16 = vor.u32 1.1754944e-38, %v2819_v52  ;;  %v4633_v5 = vld [vmem:[%s5676_s24 + $0xf0] sm:$0xff]  ;;  %4423 = vmatmul.msk.bf16.gmra.mxu0 %vm694_vm0, %v4617_v36  ;;  %v1003_v36 = vpop.f32.mrf.mxu1 }
 0x140   : > { %v6849_v45 = vadd.f32 1.0, %v5228_v59  ;;  %5233 = vpow2.f32 %v4578_v56  ;;  %v4483_v20 = vmul.f32 -1.442695, %v6834_v35  ;;  %v3299_v49 = vand.u32 2147483648, %v6795_v21  ;;  %4439 = vmatmul.msk.bf16.gmra.mxu1 %vm694_vm0, %v4633_v5 }
 0x141   : > { %v2341_v22 = vsel %vm2338_vm3, %v2340_v43, %v2336_v30  ;;  %5235 = vrcp.f32 %v6844_v41  ;;  %vm2818_vm5 = vcmp.eq.f32.partialorder %v2817_v9, 8.507059e+37  ;;  %v6858_v32 = vmul.f32 %v1861_v1, %v6608_v14  ;;  %v4665_v9 = vld [vmem:[%s5676_s24 + $0x1f0] sm:$0xff] }
 0x142   : > { %v6854_v19 = vpop.eup %5229  ;;  %5237 = vrcp.f32 %v6849_v45  ;;  %v2821_v38 = vsel %vm2818_vm5, %v2820_v16, %v2816_v50  ;;  %v6863_v63 = vmul.f32 %v2341_v22, %v6615_v3  ;;  %v3297_v40 = vand.u32 2147483647, %v6795_v21  ;;  %4471 = vmatmul.msk.bf16.gmra.mxu3 %vm694_vm0, %v4665_v9 }
 0x143   : > { %v5232_v29 = vpop.eup %5231  ;;  %v3289_v23 = vmul.f32 %v6854_v19, %v6795_v21  ;;  %5239 = vpow2.f32 %v4483_v20  ;;  %vm3293_vm6 = vweird.f32 %v6795_v21  ;;  %v6869_v54 = vor.u32 1.1754944e-38, %v3299_v49 }
 0x144   : > { %v6866_v44 = vadd.f32 1.0, %v5232_v29  ;;  %v1872_v14 = vand.u32 2147483647, %v6844_v41  ;;  %v6873_v55 = vadd.f32 %v6432_v62, %v1001_v33  ;;  %v6876_v8 = vmul.f32 %v2821_v38, %v6625_v26 }
 0x145   : > { %v3290_v42 = vsub.f32 1.0, %v3289_v23  ;;  %v1874_v3 = vand.u32 2147483648, %v6844_v41  ;;  %v6881_v58 = vadd.f32 %v6432_v62, %v1081_v17  ;;  %vm1868_vm7 = vweird.f32 %v6844_v41 }
 0x146   : > { %v5234_v39 = vpop.eup %5233  ;;  %5241 = vrcp.f32 %v6866_v44  ;;  %v2352_v2 = vand.u32 2147483647, %v6849_v45  ;;  %v4515_v53 = vmul.f32 -1.442695, %v6873_v55  ;;  %vm2348_vm8 = vweird.f32 %v6849_v45 }
 0x147   : > { %v5236_v60 = vpop.eup %5235  ;;  %v6885_v28 = vadd.f32 1.0, %v5234_v39  ;;  %v3291_v26 = vmul.f32 %v6854_v19, %v3290_v42  ;;  %v2354_v37 = vand.u32 2147483648, %v6849_v45  ;;  %vm3294_vm9 = vweird.f32 %v6854_v19  ;;  %v923_v39 = vpop.f32.mrf.mxu0 }
 0x148   : > { %v5238_v34 = vpop.eup %5237  ;;  %v1864_v13 = vmul.f32 %v5236_v60, %v6844_v41  ;;  %vm6893_vm10 = vcmp.eq.f32.partialorder %v1872_v14, 8.507059e+37  ;;  %v1875_v6 = vor.u32 1.1754944e-38, %v1874_v3  ;;  %v2834_v27 = vand.u32 2147483648, %v6866_v44  ;;  %vm6924_vm1 = vmor %vm3293_vm6, %vm3294_vm9  ;;  %v1161_v41 = vpop.f32.mrf.mxu3 }
 0x149   : > { %v2344_v46 = vmul.f32 %v5238_v34, %v6849_v45  ;;  %5243 = vrcp.f32 %v6885_v28  ;;  %v5240_v51 = vpop.eup %5239  ;;  %v4547_v0 = vmul.f32 -1.442695, %v6881_v58  ;;  %vm6901_vm11 = vcmp.eq.f32.partialorder %v2352_v2, 8.507059e+37 }
 0x14a   : > { %v1865_v10 = vsub.f32 1.0, %v1864_v13  ;;  %v6905_v24 = vadd.f32 1.0, %v5240_v51  ;;  %5245 = vpow2.f32 %v4515_v53  ;;  %v3292_v52 = vadd.f32 %v6854_v19, %v3291_v26 }
 0x14b   : > { %v2345_v48 = vsub.f32 1.0, %v2344_v46  ;;  %vm1869_vm12 = vweird.f32 %v5236_v60  ;;  %v2355_v30 = vor.u32 1.1754944e-38, %v2354_v37  ;;  %vm6912_vm13 = vcmp.eq.f32.partialorder %v3297_v40, 8.507059e+37 }
 0x14c   : > { %v5242_v25 = vpop.eup %5241  ;;  %v1866_v18 = vmul.f32 %v5236_v60, %v1865_v10  ;;  %vm2349_vm14 = vweird.f32 %v5238_v34  ;;  %vm2828_vm15 = vweird.f32 %v6866_v44  ;;  %v2832_v50 = vand.u32 2147483647, %v6866_v44  ;;  %vm1870_vm2 = vmor %vm1868_vm7, %vm1869_vm12 }
 0x14d   : > { %v2346_v59 = vmul.f32 %v5238_v34, %v2345_v48  ;;  %v2824_v1 = vmul.f32 %v5242_v25, %v6866_v44  ;;  %v2835_v20 = vor.u32 1.1754944e-38, %v2834_v27  ;;  %5247 = vrcp.f32 %v6905_v24  ;;  %vm2350_vm3 = vmor %vm2348_vm8, %vm2349_vm14 }
 0x14e   : > { %v1867_v11 = vadd.f32 %v5236_v60, %v1866_v18  ;;  %v3312_v49 = vand.u32 2147483647, %v6885_v28  ;;  %5249 = vpow2.f32 %v4547_v0  ;;  %v3296_v33 = vsel %vm6924_vm1, %v6854_v19, %v3292_v52 }
 0x14f   : > { %v5244_v22 = vpop.eup %5243  ;;  %v2347_v21 = vadd.f32 %v5238_v34, %v2346_v59  ;;  %v2825_v16 = vsub.f32 1.0, %v2824_v1  ;;  %v3314_v23 = vand.u32 2147483648, %v6885_v28  ;;  %vm2829_vm4 = vweird.f32 %v5242_v25  ;;  %v926_v1 = vpop.f32.mrf.mxu0 }
 0x150   : > { %v1871_v29 = vsel %vm1870_vm2, %v5236_v60, %v1867_v11  ;;  %v3304_v38 = vmul.f32 %v5244_v22, %v6885_v28  ;;  %v5246_v17 = vpop.eup %5245  ;;  %vm3309_vm5 = vweird.f32 %v5244_v22  ;;  %v6953_v26 = vadd.f32 %v6432_v62, %v1161_v41  ;;  %vm2830_vm6 = vmor %vm2828_vm15, %vm2829_vm4 }
 0x151   : > { %v1876_v40 = vsel %vm6893_vm10, %v1875_v6, %v1871_v29  ;;  %v2351_v42 = vsel %vm2350_vm3, %v5238_v34, %v2347_v21  ;;  %v2826_v14 = vmul.f32 %v5242_v25, %v2825_v16  ;;  %v6949_v60 = vadd.f32 1.0, %v5246_v17 }
 0x152   : > { %v3657_v19 = vmul.f32 %v1876_v40, %v6754_v47  ;;  %v2356_v3 = vsel %vm6901_vm11, %v2355_v30, %v2351_v42  ;;  %v3305_v45 = vsub.f32 1.0, %v3304_v38  ;;  %v6962_v37 = vadd.f32 %v6432_v62, %v923_v39 }
 0x153   : > { %v3689_v2 = vmul.f32 %v2356_v3, %v6762_v57  ;;  %v2827_v53 = vadd.f32 %v5242_v25, %v2826_v14  ;;  %v6955_v34 = vpop.eup %5247  ;;  %5251 = vrcp.f32 %v6949_v60  ;;  %vm2833_vm7 = vcmp.eq.f32.partialorder %v2832_v50, 8.507059e+37 }
 0x154   : > { %v4692_v13 = vpack.c.bf16 %v3657_v19, %v6858_v32  ;;  %v3306_v47 = vmul.f32 %v5244_v22, %v3305_v45  ;;  %v5250_v57 = vpop.eup %5249  ;;  %v1879_v51 = vmul.f32 %v6955_v34, %v6905_v24  ;;  %v3301_v32 = vsel %vm6912_vm13, %v6869_v54, %v3296_v33  ;;  %v1006_v19 = vpop.f32.mrf.mxu1 }
 0x155   : > { %v4772_v4 = vpack.c.bf16 %v3689_v2, %v6863_v63  ;;  %v2831_v46 = vsel %vm2830_vm6, %v5242_v25, %v2827_v53  ;;  %vm3308_vm8 = vweird.f32 %v6885_v28  ;;  %v3315_v63 = vor.u32 1.1754944e-38, %v3314_v23 }
 0x156   : > { %4992 = vst [vmem:[%s5991_s29 + $0x20] sm:$0xff] %v4692_v13   ;;  %v2836_v44 = vsel %vm2833_vm7, %v2835_v20, %v2831_v46  ;;  %v3307_v10 = vadd.f32 %v5244_v22, %v3306_v47  ;;  %vm3310_vm9 = vmor %vm3308_vm8, %vm3309_vm5  ;;  %v6975_v27 = vadd.f32 1.0, %v5250_v57  ;;  %v4579_v0 = vmul.f32 -1.442695, %v6953_v26 }
 0x157   : > { %5008 = vst [vmem:[%s5991_s29 + $0xa0] sm:$0xff] %v4772_v4   ;;  %v3721_v6 = vmul.f32 %v2836_v44, %v6771_v31  ;;  %vm3313_vm10 = vcmp.eq.f32.partialorder %v3312_v49, 8.507059e+37  ;;  %v1880_v12 = vsub.f32 1.0, %v1879_v51  ;;  %v4484_v54 = vmul.f32 -1.442695, %v6962_v37  ;;  %v1083_v31 = vpop.f32.mrf.mxu2 }
 0x158   : > { %v3311_v48 = vsel %vm3310_vm9, %v5244_v22, %v3307_v10  ;;  %5253 = vrcp.f32 %v6975_v27  ;;  %v3752_v25 = vmul.f32 %v3301_v32, %v6701_v61  ;;  %v1887_v18 = vand.u32 2147483647, %v6905_v24 }
 0x159   : > { %v4852_v5 = vpack.c.bf16 %v3721_v6, %v6876_v8  ;;  %v3316_v28 = vsel %vm3313_vm10, %v3315_v63, %v3311_v48  ;;  %v6981_v7 = vpop.eup %5251  ;;  %v1889_v30 = vand.u32 2147483648, %v6905_v24  ;;  %5255 = vpow2.f32 %v4579_v0  ;;  %v1163_v8 = vpop.f32.mrf.mxu3 }
 0x15a   : > { %v3753_v52 = vmul.f32 %v3316_v28, %v6809_v15  ;;  %v2359_v9 = vmul.f32 %v6981_v7, %v6949_v60  ;;  %v1881_v59 = vmul.f32 %v6955_v34, %v1880_v12  ;;  %5257 = vpow2.f32 %v4484_v54 }
 0x15b   : > { %5024 = vst [vmem:[%s5991_s29 + $0x120] sm:$0xff] %v4852_v5   ;;  %vm1883_vm11 = vweird.f32 %v6905_v24  ;;  %v6993_v15 = vadd.f32 %v6432_v62, %v1003_v36  ;;  %v6996_v43 = vadd.f32 %v6432_v62, %v1083_v31  ;;  %vm6999_vm12 = vcmp.eq.f32.partialorder %v1887_v18, 8.507059e+37 }
 0x15c   : > { %v4932_v56 = vpack.c.bf16 %v3753_v52, %v3752_v25  ;;  %v2360_v61 = vsub.f32 1.0, %v2359_v9  ;;  %v1890_v50 = vor.u32 1.1754944e-38, %v1889_v30  ;;  %vm2363_vm13 = vweird.f32 %v6949_v60 }
 0x15d   : > { %v7005_v20 = vadd.f32 %v6432_v62, %v1163_v8  ;;  %v4516_v16 = vmul.f32 -1.442695, %v6993_v15  ;;  %v4548_v49 = vmul.f32 -1.442695, %v6996_v43  ;;  %v7013_v33 = vadd.f32 %v6432_v62, %v926_v1 }
 0x15e   : > { %5040 = vst [vmem:[%s5991_s29 + $0x1a0] sm:$0xff] %v4932_v56   ;;  %v7007_v22 = vpop.eup %5253  ;;  %v2361_v21 = vmul.f32 %v6981_v7, %v2360_v61  ;;  %v1882_v29 = vadd.f32 %v6955_v34, %v1881_v59  ;;  %vm1884_vm14 = vweird.f32 %v6955_v34  ;;  %vm2364_vm15 = vweird.f32 %v6981_v7 }
 0x15f   : > { %v2839_v38 = vmul.f32 %v7007_v22, %v6975_v27  ;;  %v4580_v23 = vmul.f32 -1.442695, %v7005_v20  ;;  %v5256_v41 = vpop.eup %5255  ;;  %v2367_v40 = vand.u32 2147483647, %v6949_v60  ;;  %5259 = vpow2.f32 %v4516_v16  ;;  %vm7028_vm1 = vmor %vm1883_vm11, %vm1884_vm14  ;;  %v1086_v13 = vpop.f32.mrf.mxu2 }
 0x160   : > { %v2362_v17 = vadd.f32 %v6981_v7, %v2361_v21  ;;  %v5258_v42 = vpop.eup %5257  ;;  %v2369_v62 = vand.u32 2147483648, %v6949_v60  ;;  %v7024_v39 = vadd.f32 1.0, %v5256_v41  ;;  %5261 = vpow2.f32 %v4548_v49  ;;  %vm7043_vm2 = vmor %vm2363_vm13, %vm2364_vm15  ;;  %v7058_v60 = vld [vmem:[%s9362_s2] ss:$0 sm:$0xff] }
 0x161   : > { %v2840_v14 = vsub.f32 1.0, %v2839_v38  ;;  %v2847_v45 = vand.u32 2147483647, %v6975_v27  ;;  %v7033_v2 = vadd.f32 1.0, %v5258_v42  ;;  %5263 = vpow2.f32 %v4580_v23  ;;  %v1166_v10 = vpop.f32.mrf.mxu3  ;;  %v4650_v42 = vld [vmem:[%s5676_s24 + $0x178] sm:$0xff] }
 0x162   : > { %v4485_v53 = vmul.f32 -1.442695, %v7013_v33  ;;  %v1886_v47 = vsel %vm7028_vm1, %v6955_v34, %v1882_v29  ;;  %v2849_v4 = vand.u32 2147483648, %v6975_v27  ;;  %5265 = vrcp.f32 %v7024_v39  ;;  %4456 = vmatmul.msk.bf16.gmra.mxu2 %vm694_vm0, %v4650_v42 }
 0x163   : > { %v2841_v57 = vmul.f32 %v7007_v22, %v2840_v14  ;;  %v2366_v46 = vsel %vm7043_vm2, %v6981_v7, %v2362_v17  ;;  %vm2844_vm3 = vweird.f32 %v7007_v22  ;;  %5267 = vrcp.f32 %v7033_v2  ;;  %v4618_v17 = vld [vmem:[%s5676_s24 + $0x78] sm:$0xff] }
 0x164   : > { %v7061_v34 = vadd.f32 %v7058_v60, %v1006_v19  ;;  %vm2368_vm4 = vcmp.eq.f32.partialorder %v2367_v40, 8.507059e+37  ;;  %v2370_v51 = vor.u32 1.1754944e-38, %v2369_v62  ;;  %v7065_v44 = vadd.f32 %v7058_v60, %v1086_v13  ;;  %v4634_v40 = vld [vmem:[%s5676_s24 + $0xf8] sm:$0xff]  ;;  %4424 = vmatmul.msk.bf16.gmra.mxu0 %vm694_vm0, %v4618_v17 }
 0x165   : > { %v2842_v32 = vadd.f32 %v7007_v22, %v2841_v57  ;;  %v5260_v6 = vpop.eup %5259  ;;  %v1891_v63 = vsel %vm6999_vm12, %v1890_v50, %v1886_v47  ;;  %vm2843_vm5 = vweird.f32 %v6975_v27  ;;  %vm7070_vm6 = vcmp.eq.f32.partialorder %v2847_v45, 8.507059e+37  ;;  %v4666_v45 = vld [vmem:[%s5676_s24 + $0x1f8] sm:$0xff]  ;;  %4440 = vmatmul.msk.bf16.gmra.mxu1 %vm694_vm0, %v4634_v40 }
 0x166   : > { %5269 = vpow2.f32 %v4485_v53  ;;  %v5262_v48 = vpop.eup %5261  ;;  %v2371_v12 = vsel %vm2368_vm4, %v2370_v51, %v2366_v46  ;;  %vm7076_vm7 = vmor %vm2843_vm5, %vm2844_vm3  ;;  %v2850_v36 = vor.u32 1.1754944e-38, %v2849_v4  ;;  %v3329_v5 = vand.u32 2147483648, %v7024_v39  ;;  %4472 = vmatmul.msk.bf16.gmra.mxu3 %vm694_vm0, %v4666_v45 }
 0x167   : > { %v7081_v28 = vadd.f32 1.0, %v5260_v6  ;;  %v5264_v31 = vpop.eup %5263  ;;  %v2846_v27 = vsel %vm7076_vm7, %v7007_v22, %v2842_v32  ;;  %v7086_v7 = vadd.f32 1.0, %v5262_v48  ;;  %v4517_v25 = vmul.f32 -1.442695, %v7061_v34  ;;  %v928_v22 = vpop.f32.mrf.mxu0 }
 0x168   : > { %v7090_v52 = vadd.f32 %v7058_v60, %v1166_v10  ;;  %v7092_v18 = vpop.eup %5265  ;;  %v7095_v30 = vmul.f32 %v1891_v63, %v6834_v35  ;;  %v1902_v9 = vand.u32 2147483647, %v7033_v2  ;;  %v4549_v8 = vmul.f32 -1.442695, %v7065_v44 }
 0x169   : > { %5271 = vrcp.f32 %v7081_v28  ;;  %v5268_v56 = vpop.eup %5267  ;;  %v7101_v59 = vmul.f32 %v2371_v12, %v6873_v55  ;;  %v3319_v1 = vmul.f32 %v7092_v18, %v7024_v39  ;;  %v1904_v61 = vand.u32 2147483648, %v7033_v2 }
 0x16a   : > { %5273 = vrcp.f32 %v7086_v7  ;;  %v2851_v35 = vsel %vm7070_vm6, %v2850_v36, %v2846_v27  ;;  %v3327_v11 = vand.u32 2147483647, %v7024_v39  ;;  %v7110_v50 = vor.u32 1.1754944e-38, %v3329_v5 }
 0x16b   : > { %v1894_v55 = vmul.f32 %v5268_v56, %v7033_v2  ;;  %v3320_v16 = vsub.f32 1.0, %v3319_v1  ;;  %v2382_v49 = vand.u32 2147483647, %v7081_v28  ;;  %5275 = vpow2.f32 %v4517_v25 }
 0x16c   : > { %v5270_v21 = vpop.eup %5269  ;;  %v4581_v29 = vmul.f32 -1.442695, %v7090_v52  ;;  %vm3323_vm8 = vweird.f32 %v7024_v39  ;;  %vm1898_vm9 = vweird.f32 %v7033_v2  ;;  %vm7117_vm10 = vcmp.eq.f32.partialorder %v1902_v9, 8.507059e+37 }
 0x16d   : > { %v1895_v38 = vsub.f32 1.0, %v1894_v55  ;;  %v7121_v41 = vadd.f32 1.0, %v5264_v31  ;;  %v7127_v62 = vmul.f32 %v2851_v35, %v6881_v58  ;;  %v1905_v14 = vor.u32 1.1754944e-38, %v1904_v61 }
 0x16e   : > { %v7129_v19 = vadd.f32 1.0, %v5270_v21  ;;  %v7132_v3 = vadd.f32 %v7058_v60, %v928_v22  ;;  %vm1899_vm11 = vweird.f32 %v5268_v56  ;;  %vm2378_vm12 = vweird.f32 %v7081_v28 }
 0x16f   : > { %v5272_v53 = vpop.eup %5271  ;;  %v1896_v13 = vmul.f32 %v5268_v56, %v1895_v38  ;;  %5277 = vrcp.f32 %v7121_v41  ;;  %v3321_v47 = vmul.f32 %v7092_v18, %v3320_v16  ;;  %vm3324_vm13 = vweird.f32 %v7092_v18  ;;  %vm1900_vm1 = vmor %vm1898_vm9, %vm1899_vm11 }
 0x170   : > { %v5274_v58 = vpop.eup %5273  ;;  %v2374_v24 = vmul.f32 %v5272_v53, %v7081_v28  ;;  %v2384_v57 = vand.u32 2147483648, %v7081_v28  ;;  %vm7145_vm14 = vcmp.eq.f32.partialorder %v2382_v49, 8.507059e+37  ;;  %5279 = vpow2.f32 %v4549_v8  ;;  %vm7171_vm4 = vmor %vm3323_vm8, %vm3324_vm13 }
 0x171   : > { %v1897_v4 = vadd.f32 %v5268_v56, %v1896_v13  ;;  %v2854_v51 = vmul.f32 %v5274_v58, %v7086_v7  ;;  %v5276_v32 = vpop.eup %5275  ;;  %vm7150_vm15 = vcmp.eq.f32.partialorder %v3327_v11, 8.507059e+37  ;;  %vm2858_vm0 = vweird.f32 %v7086_v7 }
 0x172   : > { %v2375_v6 = vsub.f32 1.0, %v2374_v24  ;;  %v2862_v63 = vand.u32 2147483647, %v7086_v7  ;;  %5281 = vrcp.f32 %v7129_v19  ;;  %v2864_v12 = vand.u32 2147483648, %v7086_v7 }
 0x173   : > { %v1901_v0 = vsel %vm1900_vm1, %v5268_v56, %v1897_v4  ;;  %v2855_v48 = vsub.f32 1.0, %v2854_v51  ;;  %5283 = vpow2.f32 %v4581_v29  ;;  %v3322_v54 = vadd.f32 %v7092_v18, %v3321_v47 }
 0x174   : > { %v1906_v36 = vsel %vm7117_vm10, %v1905_v14, %v1901_v0  ;;  %v2376_v5 = vmul.f32 %v5272_v53, %v2375_v6  ;;  %vm2379_vm2 = vweird.f32 %v5272_v53  ;;  %vm2859_vm3 = vweird.f32 %v5274_v58  ;;  %v1168_v0 = vpop.f32.mrf.mxu3 }
 0x175   : > { %v5278_v2 = vpop.eup %5277  ;;  %v3659_v31 = vmul.f32 %v1906_v36, %v6962_v37  ;;  %v2856_v27 = vmul.f32 %v5274_v58, %v2855_v48  ;;  %v7165_v25 = vadd.f32 1.0, %v5276_v32  ;;  %v2385_v56 = vor.u32 1.1754944e-38, %v2384_v57  ;;  %vm2380_vm6 = vmor %vm2378_vm12, %vm2379_vm2  ;;  %v1088_v32 = vpop.f32.mrf.mxu2 }
 0x176   : > { %v2377_v8 = vadd.f32 %v5272_v53, %v2376_v5  ;;  %vm7175_vm5 = vcmp.eq.f32.partialorder %v2862_v63, 8.507059e+37  ;;  %v3334_v37 = vmul.f32 %v5278_v2, %v7121_v41  ;;  %v5280_v61 = vpop.eup %5279  ;;  %v2865_v11 = vor.u32 1.1754944e-38, %v2864_v12  ;;  %vm2860_vm7 = vmor %vm2858_vm0, %vm2859_vm3  ;;  %v931_v36 = vpop.f32.mrf.mxu0 }
 0x177   : > { %v4697_v35 = vpack.c.bf16 %v3659_v31, %v7095_v30  ;;  %v2857_v39 = vadd.f32 %v5274_v58, %v2856_v27  ;;  %5285 = vrcp.f32 %v7165_v25  ;;  %v3326_v22 = vsel %vm7171_vm4, %v7092_v18, %v3322_v54  ;;  %v1008_v18 = vpop.f32.mrf.mxu1 }
 0x178   : > { %v7184_v55 = vpop.eup %5281  ;;  %v2381_v21 = vsel %vm2380_vm6, %v5272_v53, %v2377_v8  ;;  %v3335_v16 = vsub.f32 1.0, %v3334_v37  ;;  %v3342_v30 = vand.u32 2147483647, %v7121_v41  ;;  %v3344_v38 = vand.u32 2147483648, %v7121_v41 }
 0x179   : > { %v5284_v28 = vpop.eup %5283  ;;  %4993 = vst [vmem:[%s5991_s29 + $0x28] sm:$0xff] %v4697_v35   ;;  %v2386_v49 = vsel %vm7145_vm14, %v2385_v56, %v2381_v21  ;;  %v2861_v29 = vsel %vm2860_vm7, %v5274_v58, %v2857_v39  ;;  %v1909_v23 = vmul.f32 %v7184_v55, %v7129_v19  ;;  %vm3339_vm8 = vweird.f32 %v5278_v2 }
 0x17a   : > { %v3691_v17 = vmul.f32 %v2386_v49, %v6993_v15  ;;  %v2866_v7 = vsel %vm7175_vm5, %v2865_v11, %v2861_v29  ;;  %v3336_v40 = vmul.f32 %v5278_v2, %v3335_v16  ;;  %v3331_v42 = vsel %vm7150_vm15, %v7110_v50, %v3326_v22 }
 0x17b   : > { %v3723_v14 = vmul.f32 %v2866_v7, %v6996_v43  ;;  %vm3338_vm9 = vweird.f32 %v7121_v41  ;;  %v7207_v45 = vadd.f32 1.0, %v5280_v61  ;;  %v1910_v13 = vsub.f32 1.0, %v1909_v23 }
 0x17c   : > { %v4777_v53 = vpack.c.bf16 %v3691_v17, %v7101_v59  ;;  %v3337_v15 = vadd.f32 %v5278_v2, %v3336_v40  ;;  %v7210_v58 = vadd.f32 1.0, %v5284_v28  ;;  %vm3340_vm10 = vmor %vm3338_vm9, %vm3339_vm8  ;;  %vm3343_vm11 = vcmp.eq.f32.partialorder %v3342_v30, 8.507059e+37 }
 0x17d   : > { %v7212_v47 = vpop.eup %5285  ;;  %v4857_v24 = vpack.c.bf16 %v3723_v14, %v7127_v62  ;;  %v3345_v50 = vor.u32 1.1754944e-38, %v3344_v38  ;;  %5287 = vrcp.f32 %v7207_v45  ;;  %v1917_v41 = vand.u32 2147483647, %v7129_v19  ;;  %v1091_v40 = vpop.f32.mrf.mxu2 }
 0x17e   : > { %5009 = vst [vmem:[%s5991_s29 + $0xa8] sm:$0xff] %v4777_v53   ;;  %v3341_v43 = vsel %vm3340_vm10, %v5278_v2, %v3337_v15  ;;  %v1919_v59 = vand.u32 2147483648, %v7129_v19  ;;  %v2389_v57 = vmul.f32 %v7212_v47, %v7165_v25  ;;  %v3754_v4 = vmul.f32 %v3331_v42, %v6953_v26 }
 0x17f   : > { %5025 = vst [vmem:[%s5991_s29 + $0x128] sm:$0xff] %v4857_v24   ;;  %v3346_v46 = vsel %vm3343_vm11, %v3345_v50, %v3341_v43  ;;  %v2397_v62 = vand.u32 2147483647, %v7165_v25  ;;  %v4486_v51 = vmul.f32 -1.442695, %v7132_v3  ;;  %v1911_v6 = vmul.f32 %v7184_v55, %v1910_v13  ;;  %v1011_v31 = vpop.f32.mrf.mxu1 }
 0x180   : > { %v3755_v10 = vmul.f32 %v3346_v46, %v7005_v20  ;;  %v2390_v63 = vsub.f32 1.0, %v2389_v57  ;;  %5289 = vrcp.f32 %v7210_v58  ;;  %vm1913_vm12 = vweird.f32 %v7129_v19  ;;  %v933_v57 = vpop.f32.mrf.mxu0 }
 0x181   : > { %v1920_v26 = vor.u32 1.1754944e-38, %v1919_v59  ;;  %v2399_v54 = vand.u32 2147483648, %v7165_v25  ;;  %vm1914_vm13 = vweird.f32 %v7184_v55  ;;  %vm7234_vm14 = vcmp.eq.f32.partialorder %v1917_v41, 8.507059e+37 }
 0x182   : > { %v4937_v48 = vpack.c.bf16 %v3755_v10, %v3754_v4  ;;  %v2391_v12 = vmul.f32 %v7212_v47, %v2390_v63  ;;  %vm2393_vm15 = vweird.f32 %v7165_v25  ;;  %5291 = vpow2.f32 %v4486_v51  ;;  %vm7272_vm3 = vmor %vm1913_vm12, %vm1914_vm13 }
 0x183   : > { %v7231_v5 = vpop.eup %5287  ;;  %v7240_v2 = vadd.f32 %v7058_v60, %v1008_v18  ;;  %v1912_v27 = vadd.f32 %v7184_v55, %v1911_v6  ;;  %vm2394_vm1 = vweird.f32 %v7212_v47  ;;  %vm7246_vm0 = vcmp.eq.f32.partialorder %v2397_v62, 8.507059e+37 }
 0x184   : > { %5041 = vst [vmem:[%s5991_s29 + $0x1a8] sm:$0xff] %v4937_v48   ;;  %v2392_v9 = vadd.f32 %v7212_v47, %v2391_v12  ;;  %v2869_v56 = vmul.f32 %v7231_v5, %v7207_v45  ;;  %v7254_v37 = vadd.f32 %v7058_v60, %v1088_v32  ;;  %v7257_v61 = vadd.f32 %v7058_v60, %v1168_v0  ;;  %vm7287_vm4 = vmor %vm2393_vm15, %vm2394_vm1 }
 0x185   : > { %v4518_v1 = vmul.f32 -1.442695, %v7240_v2  ;;  %v7260_v35 = vadd.f32 %v7058_v60, %v931_v36  ;;  %v2400_v11 = vor.u32 1.1754944e-38, %v2399_v54  ;;  %vm2873_vm2 = vweird.f32 %v7207_v45 }
 0x186   : > { %v7262_v39 = vpop.eup %5289  ;;  %v2870_v22 = vsub.f32 1.0, %v2869_v56  ;;  %v7266_v21 = vadd.f32 %v7058_v60, %v1011_v31  ;;  %v2877_v30 = vand.u32 2147483647, %v7207_v45  ;;  %v2879_v28 = vand.u32 2147483648, %v7207_v45 }
 0x187   : > { %v3349_v49 = vmul.f32 %v7262_v39, %v7210_v58  ;;  %5293 = vpow2.f32 %v4518_v1  ;;  %v1916_v29 = vsel %vm7272_vm3, %v7184_v55, %v1912_v27  ;;  %vm3353_vm5 = vweird.f32 %v7210_v58 }
 0x188   : > { %v2871_v38 = vmul.f32 %v7231_v5, %v2870_v22  ;;  %v4550_v23 = vmul.f32 -1.442695, %v7254_v37  ;;  %v4582_v18 = vmul.f32 -1.442695, %v7257_v61  ;;  %v5292_v17 = vpop.eup %5291  ;;  %v2396_v55 = vsel %vm7287_vm4, %v7212_v47, %v2392_v9  ;;  %v1171_v47 = vpop.f32.mrf.mxu3 }
 0x189   : > { %vm2874_vm6 = vweird.f32 %v7231_v5  ;;  %v3350_v25 = vsub.f32 1.0, %v3349_v49  ;;  %v4487_v7 = vmul.f32 -1.442695, %v7260_v35  ;;  %v7301_v14 = vadd.f32 1.0, %v5292_v17 }
 0x18a   : > { %v2872_v42 = vadd.f32 %v7231_v5, %v2871_v38  ;;  %5295 = vpow2.f32 %v4550_v23  ;;  %v4519_v53 = vmul.f32 -1.442695, %v7266_v21  ;;  %v2880_v15 = vor.u32 1.1754944e-38, %v2879_v28  ;;  %vm7310_vm7 = vmor %vm2873_vm2, %vm2874_vm6 }
 0x18b   : > { %v3351_v13 = vmul.f32 %v7262_v39, %v3350_v25  ;;  %v3357_v24 = vand.u32 2147483647, %v7210_v58  ;;  %5297 = vpow2.f32 %v4582_v18  ;;  %v1921_v50 = vsel %vm7234_vm14, %v1920_v26, %v1916_v29 }
 0x18c   : > { %v3359_v41 = vand.u32 2147483648, %v7210_v58  ;;  %5299 = vrcp.f32 %v7301_v14  ;;  %v7317_v59 = vadd.f32 %v7058_v60, %v1091_v40  ;;  %v2401_v46 = vsel %vm7246_vm0, %v2400_v11, %v2396_v55 }
 0x18d   : > { %v5294_v4 = vpop.eup %5293  ;;  %v2876_v45 = vsel %vm7310_vm7, %v7231_v5, %v2872_v42  ;;  %vm3354_vm8 = vweird.f32 %v7262_v39  ;;  %5301 = vpow2.f32 %v4487_v7  ;;  %v3352_v62 = vadd.f32 %v7262_v39, %v3351_v13 }
 0x18e   : > { %v7326_v51 = vadd.f32 1.0, %v5294_v4  ;;  %5303 = vpow2.f32 %v4519_v53  ;;  %v7329_v32 = vadd.f32 %v7058_v60, %v1171_v47  ;;  %v7332_v10 = vmul.f32 %v1921_v50, %v7013_v33  ;;  %vm7350_vm11 = vmor %vm3353_vm5, %vm3354_vm8 }
 0x18f   : > { %vm2878_vm9 = vcmp.eq.f32.partialorder %v2877_v30, 8.507059e+37  ;;  %vm7334_vm10 = vcmp.eq.f32.partialorder %v3357_v24, 8.507059e+37  ;;  %v7339_v63 = vadd.f32 %v7058_v60, %v933_v57  ;;  %v3360_v26 = vor.u32 1.1754944e-38, %v3359_v41 }
 0x190   : > { %v5296_v0 = vpop.eup %5295  ;;  %v2881_v48 = vsel %vm2878_vm9, %v2880_v15, %v2876_v45  ;;  %v1932_v12 = vand.u32 2147483647, %v7301_v14  ;;  %5305 = vrcp.f32 %v7326_v51  ;;  %v7344_v36 = vmul.f32 %v2401_v46, %v7061_v34 }
 0x191   : > { %v5298_v54 = vpop.eup %5297  ;;  %v1934_v5 = vand.u32 2147483648, %v7301_v14  ;;  %v7355_v20 = vadd.f32 1.0, %v5296_v0  ;;  %v4551_v31 = vmul.f32 -1.442695, %v7317_v59  ;;  %v3356_v34 = vsel %vm7350_vm11, %v7262_v39, %v3352_v62 }
 0x192   : > { %v5300_v27 = vpop.eup %5299  ;;  %vm1928_vm12 = vweird.f32 %v7301_v14  ;;  %v7362_v9 = vadd.f32 1.0, %v5298_v54  ;;  %v4583_v58 = vmul.f32 -1.442695, %v7329_v32  ;;  %v7366_v56 = vmul.f32 %v2881_v48, %v7065_v44 }
 0x193   : > { %v5302_v8 = vpop.eup %5301  ;;  %v1924_v1 = vmul.f32 %v5300_v27, %v7301_v14  ;;  %5307 = vrcp.f32 %v7355_v20  ;;  %v4488_v11 = vmul.f32 -1.442695, %v7339_v63  ;;  %vm7371_vm13 = vcmp.eq.f32.partialorder %v1932_v12, 8.507059e+37 }
 0x194   : > { %v5304_v22 = vpop.eup %5303  ;;  %v2412_v39 = vand.u32 2147483647, %v7326_v51  ;;  %v2414_v30 = vand.u32 2147483648, %v7326_v51  ;;  %5309 = vrcp.f32 %v7362_v9  ;;  %v7380_v44 = vsel %vm7334_vm10, %v3360_v26, %v3356_v34 }
 0x195   : > { %v1925_v28 = vsub.f32 1.0, %v1924_v1  ;;  %v1935_v49 = vor.u32 1.1754944e-38, %v1934_v5  ;;  %5311 = vpow2.f32 %v4551_v31  ;;  %vm2408_vm14 = vweird.f32 %v7326_v51 }
 0x196   : > { %v5306_v29 = vpop.eup %5305  ;;  %v7383_v19 = vadd.f32 1.0, %v5302_v8  ;;  %v7385_v38 = vadd.f32 1.0, %v5304_v22  ;;  %5313 = vpow2.f32 %v4583_v58  ;;  %vm1929_vm15 = vweird.f32 %v5300_v27 }
 0x197   : > { %v1926_v23 = vmul.f32 %v5300_v27, %v1925_v28  ;;  %v2404_v18 = vmul.f32 %v5306_v29, %v7326_v51  ;;  %5315 = vpow2.f32 %v4488_v11  ;;  %vm7388_vm1 = vcmp.eq.f32.partialorder %v2412_v39, 8.507059e+37  ;;  %vm1930_vm0 = vmor %vm1928_vm12, %vm1929_vm15 }
 0x198   : > { %v2415_v55 = vor.u32 1.1754944e-38, %v2414_v30  ;;  %v2892_v25 = vand.u32 2147483647, %v7355_v20  ;;  %5317 = vrcp.f32 %v7383_v19  ;;  %v2894_v53 = vand.u32 2147483648, %v7355_v20 }
 0x199   : > { %v5308_v7 = vpop.eup %5307  ;;  %v1927_v40 = vadd.f32 %v5300_v27, %v1926_v23  ;;  %v2405_v42 = vsub.f32 1.0, %v2404_v18  ;;  %5319 = vrcp.f32 %v7385_v38  ;;  %vm2888_vm2 = vweird.f32 %v7355_v20  ;;  %v1093_v18 = vpop.f32.mrf.mxu2 }
 0x19a   : > { %v5310_v15 = vpop.eup %5309  ;;  %v2884_v13 = vmul.f32 %v5308_v7, %v7355_v20  ;;  %vm3368_vm3 = vweird.f32 %v7362_v9  ;;  %v3372_v24 = vand.u32 2147483647, %v7362_v9  ;;  %vm2409_vm4 = vweird.f32 %v5306_v29 }
 0x19b   : > { %v5312_v47 = vpop.eup %5311  ;;  %v1931_v50 = vsel %vm1930_vm0, %v5300_v27, %v1927_v40  ;;  %v2406_v43 = vmul.f32 %v5306_v29, %v2405_v42  ;;  %v3364_v41 = vmul.f32 %v5310_v15, %v7362_v9  ;;  %vm7405_vm5 = vcmp.eq.f32.partialorder %v2892_v25, 8.507059e+37  ;;  %vm2410_vm6 = vmor %vm2408_vm14, %vm2409_vm4 }
 0x19c   : > { %v5314_v57 = vpop.eup %5313  ;;  %v1936_v4 = vsel %vm7371_vm13, %v1935_v49, %v1931_v50  ;;  %v2885_v14 = vsub.f32 1.0, %v2884_v13  ;;  %v3374_v45 = vand.u32 2147483648, %v7362_v9  ;;  %v2895_v48 = vor.u32 1.1754944e-38, %v2894_v53  ;;  %v1013_v49 = vpop.f32.mrf.mxu1 }
 0x19d   : > { %v7410_v62 = vpop.eup %5315  ;;  %v3661_v6 = vmul.f32 %v1936_v4, %v7132_v3  ;;  %v2407_v0 = vadd.f32 %v5306_v29, %v2406_v43  ;;  %v3365_v26 = vsub.f32 1.0, %v3364_v41  ;;  %vm2889_vm7 = vweird.f32 %v5308_v7  ;;  %v1173_v13 = vpop.f32.mrf.mxu3 }
 0x19e   : > { %v7413_v12 = vpop.eup %5317  ;;  %v2886_v54 = vmul.f32 %v5308_v7, %v2885_v14  ;;  %vm3369_vm8 = vweird.f32 %v5310_v15  ;;  %v7417_v33 = vadd.f32 1.0, %v5312_v47  ;;  %vm7426_vm9 = vcmp.eq.f32.partialorder %v3372_v24, 8.507059e+37  ;;  %vm2890_vm10 = vmor %vm2888_vm2, %vm2889_vm7 }
 0x19f   : > { %v7419_v5 = vpop.eup %5319  ;;  %v4702_v31 = vpack.c.bf16 %v3661_v6, %v7332_v10  ;;  %v2411_v27 = vsel %vm2410_vm6, %v5306_v29, %v2407_v0  ;;  %v3366_v3 = vmul.f32 %v5310_v15, %v3365_v26  ;;  %v1939_v34 = vmul.f32 %v7413_v12, %v7383_v19  ;;  %vm3370_vm11 = vmor %vm3368_vm3, %vm3369_vm8 }
 0x1a0   : > { %v2416_v58 = vsel %vm7388_vm1, %v2415_v55, %v2411_v27  ;;  %v2887_v8 = vadd.f32 %v5308_v7, %v2886_v54  ;;  %v2419_v1 = vmul.f32 %v7419_v5, %v7385_v38  ;;  %v3375_v22 = vor.u32 1.1754944e-38, %v3374_v45 }
 0x1a1   : > { %4994 = vst [vmem:[%s5991_s29 + $0x30] sm:$0xff] %v4702_v31   ;;  %v3693_v11 = vmul.f32 %v2416_v58, %v7240_v2  ;;  %v3367_v10 = vadd.f32 %v5310_v15, %v3366_v3  ;;  %v1940_v16 = vsub.f32 1.0, %v1939_v34  ;;  %5321 = vrcp.f32 %v7417_v33  ;;  %v1096_v27 = vpop.f32.mrf.mxu2 }
 0x1a2   : > { %v2891_v39 = vsel %vm2890_vm10, %v5308_v7, %v2887_v8  ;;  %v2420_v30 = vsub.f32 1.0, %v2419_v1  ;;  %v7440_v28 = vadd.f32 1.0, %v5314_v57  ;;  %v3756_v17 = vmul.f32 %v7380_v44, %v7090_v52 }
 0x1a3   : > { %v4782_v2 = vpack.c.bf16 %v3693_v11, %v7344_v36  ;;  %v2896_v20 = vsel %vm7405_vm5, %v2895_v48, %v2891_v39  ;;  %v3371_v29 = vsel %vm3370_vm11, %v5310_v15, %v3367_v10  ;;  %v1941_v23 = vmul.f32 %v7413_v12, %v1940_v16  ;;  %v936_v48 = vpop.f32.mrf.mxu0 }
 0x1a4   : > { %v3725_v9 = vmul.f32 %v2896_v20, %v7254_v37  ;;  %v3376_v55 = vsel %vm7426_vm9, %v3375_v22, %v3371_v29  ;;  %vm1943_vm12 = vweird.f32 %v7383_v19  ;;  %v1947_v25 = vand.u32 2147483647, %v7383_v19  ;;  %v1016_v26 = vpop.f32.mrf.mxu1 }
 0x1a5   : > { %5010 = vst [vmem:[%s5991_s29 + $0xb0] sm:$0xff] %v4782_v2   ;;  %v3757_v36 = vmul.f32 %v3376_v55, %v7257_v61  ;;  %v1949_v7 = vand.u32 2147483648, %v7383_v19  ;;  %v2421_v40 = vmul.f32 %v7419_v5, %v2420_v30  ;;  %v1942_v44 = vadd.f32 %v7413_v12, %v1941_v23 }
 0x1a6   : > { %v4862_v52 = vpack.c.bf16 %v3725_v9, %v7366_v56  ;;  %vm1944_vm13 = vweird.f32 %v7413_v12  ;;  %5323 = vrcp.f32 %v7440_v28  ;;  %v7462_v42 = vadd.f32 %v7058_v60, %v1013_v49 }
 0x1a7   : > { %v4942_v37 = vpack.c.bf16 %v3757_v36, %v3756_v17  ;;  %v7464_v53 = vpop.eup %5321  ;;  %v2427_v61 = vand.u32 2147483647, %v7385_v38  ;;  %v2429_v15 = vand.u32 2147483648, %v7385_v38  ;;  %vm7472_vm14 = vmor %vm1943_vm12, %vm1944_vm13  ;;  %v2422_v24 = vadd.f32 %v7419_v5, %v2421_v40  ;;  %v1176_v36 = vpop.f32.mrf.mxu3 }
 0x1a8   : > { %5026 = vst [vmem:[%s5991_s29 + $0x130] sm:$0xff] %v4862_v52   ;;  %vm2423_vm15 = vweird.f32 %v7385_v38  ;;  %vm2424_vm1 = vweird.f32 %v7419_v5  ;;  %v2899_v47 = vmul.f32 %v7464_v53, %v7417_v33  ;;  %v1946_v50 = vsel %vm7472_vm14, %v7413_v12, %v1942_v44 }
 0x1a9   : > { %5042 = vst [vmem:[%s5991_s29 + $0x1b0] sm:$0xff] %v4942_v37   ;;  %vm7484_vm0 = vcmp.eq.f32.partialorder %v1947_v25, 8.507059e+37  ;;  %v1950_v19 = vor.u32 1.1754944e-38, %v1949_v7  ;;  %v7489_v41 = vadd.f32 1.0, %v7410_v62  ;;  %v4520_v38 = vmul.f32 -1.442695, %v7462_v42  ;;  %vm7500_vm2 = vmor %vm2423_vm15, %vm2424_vm1 }
 0x1aa   : > { %v2900_v57 = vsub.f32 1.0, %v2899_v47  ;;  %v7493_v4 = vadd.f32 %v7058_v60, %v1093_v18  ;;  %v7496_v14 = vadd.f32 %v7058_v60, %v1173_v13  ;;  %vm7504_vm3 = vcmp.eq.f32.partialorder %v2427_v61, 8.507059e+37 }
 0x1ab   : > { %v2430_v62 = vor.u32 1.1754944e-38, %v2429_v15  ;;  %v2909_v0 = vand.u32 2147483648, %v7417_v33  ;;  %5325 = vrcp.f32 %v7489_v41  ;;  %v2426_v12 = vsel %vm7500_vm2, %v7419_v5, %v2422_v24  ;;  %v938_v56 = vpop.f32.mrf.mxu0 }
 0x1ac   : > { %v7498_v46 = vpop.eup %5323  ;;  %vm2903_vm4 = vweird.f32 %v7417_v33  ;;  %v2907_v54 = vand.u32 2147483647, %v7417_v33  ;;  %5327 = vpow2.f32 %v4520_v38  ;;  %v1951_v3 = vsel %vm7484_vm0, %v1950_v19, %v1946_v50  ;;  %v1018_v45 = vpop.f32.mrf.mxu1 }
 0x1ad   : > { %v3379_v31 = vmul.f32 %v7498_v46, %v7440_v28  ;;  %vm3383_vm5 = vweird.f32 %v7440_v28  ;;  %v4552_v34 = vmul.f32 -1.442695, %v7493_v4  ;;  %v4584_v58 = vmul.f32 -1.442695, %v7496_v14 }
 0x1ae   : > { %v2901_v5 = vmul.f32 %v7464_v53, %v2900_v57  ;;  %v7524_v51 = vadd.f32 %v7058_v60, %v936_v48  ;;  %v7527_v1 = vadd.f32 %v7058_v60, %v1016_v26  ;;  %v2431_v11 = vsel %vm7504_vm3, %v2430_v62, %v2426_v12 }
 0x1af   : > { %v3380_v8 = vsub.f32 1.0, %v3379_v31  ;;  %v2910_v10 = vor.u32 1.1754944e-38, %v2909_v0  ;;  %5329 = vpow2.f32 %v4552_v34  ;;  %v7532_v22 = vadd.f32 %v7058_v60, %v1096_v27  ;;  %v1098_v31 = vpop.f32.mrf.mxu2 }
 0x1b0   : > { %vm7534_vm6 = vcmp.eq.f32.partialorder %v2907_v54, 8.507059e+37  ;;  %v3387_v30 = vand.u32 2147483647, %v7440_v28  ;;  %5331 = vpow2.f32 %v4584_v58  ;;  %v4489_v49 = vmul.f32 -1.442695, %v7524_v51 }
 0x1b1   : > { %v3381_v39 = vmul.f32 %v7498_v46, %v3380_v8  ;;  %v5326_v2 = vpop.eup %5325  ;;  %v7542_v20 = vmul.f32 %v1951_v3, %v7260_v35  ;;  %vm2904_vm7 = vweird.f32 %v7464_v53  ;;  %v3389_v29 = vand.u32 2147483648, %v7440_v28 }
 0x1b2   : > { %v4521_v23 = vmul.f32 -1.442695, %v7527_v1  ;;  %v5328_v18 = vpop.eup %5327  ;;  %v7548_v17 = vmul.f32 %v2431_v11, %v7266_v21  ;;  %v2902_v9 = vadd.f32 %v7464_v53, %v2901_v5  ;;  %vm3384_vm8 = vweird.f32 %v7498_v46  ;;  %vm7566_vm10 = vmor %vm2903_vm4, %vm2904_vm7 }
 0x1b3   : > { %v1954_v55 = vmul.f32 %v5326_v2, %v7489_v41  ;;  %v3382_v35 = vadd.f32 %v7498_v46, %v3381_v39  ;;  %v7554_v25 = vadd.f32 1.0, %v5328_v18  ;;  %5333 = vpow2.f32 %v4489_v49  ;;  %vm7582_vm11 = vmor %vm3383_vm5, %vm3384_vm8 }
 0x1b4   : > { %v4553_v7 = vmul.f32 -1.442695, %v7532_v22  ;;  %vm7557_vm9 = vcmp.eq.f32.partialorder %v3387_v30, 8.507059e+37  ;;  %v1962_v52 = vand.u32 2147483647, %v7489_v41  ;;  %5335 = vpow2.f32 %v4521_v23 }
 0x1b5   : > { %v1955_v21 = vsub.f32 1.0, %v1954_v55  ;;  %v5330_v44 = vpop.eup %5329  ;;  %v3390_v61 = vor.u32 1.1754944e-38, %v3389_v29  ;;  %v1964_v15 = vand.u32 2147483648, %v7489_v41  ;;  %5337 = vrcp.f32 %v7554_v25 }
 0x1b6   : > { %v7573_v13 = vadd.f32 %v7058_v60, %v1176_v36  ;;  %v5332_v24 = vpop.eup %5331  ;;  %v2906_v47 = vsel %vm7566_vm10, %v7464_v53, %v2902_v9  ;;  %vm1959_vm12 = vweird.f32 %v5326_v2  ;;  %v7586_v43 = vadd.f32 1.0, %v5330_v44 }
 0x1b7   : > { %v1956_v50 = vmul.f32 %v5326_v2, %v1955_v21  ;;  %v3386_v19 = vsel %vm7582_vm11, %v7498_v46, %v3382_v35  ;;  %vm1958_vm13 = vweird.f32 %v7489_v41  ;;  %v7592_v57 = vadd.f32 1.0, %v5332_v24 }
 0x1b8   : > { %5339 = vpow2.f32 %v4553_v7  ;;  %vm7594_vm14 = vcmp.eq.f32.partialorder %v1962_v52, 8.507059e+37  ;;  %v7600_v38 = vadd.f32 %v7058_v60, %v938_v56  ;;  %v2911_v46 = vsel %vm7534_vm6, %v2910_v10, %v2906_v47  ;;  %vm1960_vm15 = vmor %vm1958_vm13, %vm1959_vm12 }
 0x1b9   : > { %v1957_v53 = vadd.f32 %v5326_v2, %v1956_v50  ;;  %5341 = vrcp.f32 %v7586_v43  ;;  %v5334_v6 = vpop.eup %5333  ;;  %v1965_v41 = vor.u32 1.1754944e-38, %v1964_v15  ;;  %v4585_v62 = vmul.f32 -1.442695, %v7573_v13 }
 0x1ba   : > { %5343 = vrcp.f32 %v7592_v57  ;;  %v5336_v0 = vpop.eup %5335  ;;  %v3391_v48 = vsel %vm7557_vm9, %v3390_v61, %v3386_v19  ;;  %v2442_v12 = vand.u32 2147483647, %v7554_v25  ;;  %v7609_v54 = vadd.f32 1.0, %v5334_v6 }
 0x1bb   : > { %v1961_v26 = vsel %vm1960_vm15, %v5326_v2, %v1957_v53  ;;  %v5338_v27 = vpop.eup %5337  ;;  %v2444_v34 = vand.u32 2147483648, %v7554_v25  ;;  %v7614_v58 = vadd.f32 1.0, %v5336_v0  ;;  %v7617_v5 = vadd.f32 %v7058_v60, %v1018_v45 }
 0x1bc   : > { %v1966_v3 = vsel %vm7594_vm14, %v1965_v41, %v1961_v26  ;;  %v7620_v8 = vmul.f32 %v2911_v46, %v7317_v59  ;;  %v2434_v10 = vmul.f32 %v5338_v27, %v7554_v25  ;;  %v7625_v16 = vmul.f32 -1.442695, %v7600_v38 }
 0x1bd   : > { %v3663_v11 = vmul.f32 %v1966_v3, %v7339_v63  ;;  %v7628_v30 = vmul.f32 %v3391_v48, %v7329_v32  ;;  %vm2438_vm1 = vweird.f32 %v7554_v25  ;;  %5345 = vrcp.f32 %v7609_v54 }
 0x1be   : > { %v5340_v39 = vpop.eup %5339  ;;  %v7633_v49 = vadd.f32 %v7058_v60, %v1098_v31  ;;  %v2435_v2 = vsub.f32 1.0, %v2434_v10  ;;  %vm7636_vm0 = vcmp.eq.f32.partialorder %v2442_v12, 8.507059e+37  ;;  %5347 = vrcp.f32 %v7614_v58 }
 0x1bf   : > { %v5342_v59 = vpop.eup %5341  ;;  %v4707_v63 = vpack.c.bf16 %v3663_v11, %v7542_v20  ;;  %v2445_v32 = vor.u32 1.1754944e-38, %v2444_v34  ;;  %vm2918_vm2 = vweird.f32 %v7586_v43  ;;  %v7644_v9 = vmul.f32 -1.442695, %v7617_v5 }
 0x1c0   : > { %v5344_v23 = vpop.eup %5343  ;;  %v2914_v18 = vmul.f32 %v5342_v59, %v7586_v43  ;;  %v2436_v60 = vmul.f32 %v5338_v27, %v2435_v2  ;;  %vm2439_vm3 = vweird.f32 %v5338_v27  ;;  %v2922_v20 = vand.u32 2147483647, %v7586_v43  ;;  %v1178_v2 = vpop.f32.mrf.mxu3 }
 0x1c1   : > { %4995 = vst [vmem:[%s5991_s29 + $0x38] sm:$0xff] %v4707_v63   ;;  %v3394_v55 = vmul.f32 %v5344_v23, %v7592_v57  ;;  %v2924_v35 = vand.u32 2147483648, %v7586_v43  ;;  %vm3398_vm4 = vweird.f32 %v7592_v57  ;;  %v7651_v7 = vadd.f32 1.0, %v5340_v39  ;;  %vm2440_vm5 = vmor %vm2438_vm1, %vm2439_vm3 }
 0x1c2   : > { %v2915_v36 = vsub.f32 1.0, %v2914_v18  ;;  %v2437_v40 = vadd.f32 %v5338_v27, %v2436_v60  ;;  %v3402_v52 = vand.u32 2147483647, %v7592_v57  ;;  %5349 = vpow2.f32 %v4585_v62  ;;  %v1021_v18 = vpop.f32.mrf.mxu1 }
 0x1c3   : > { %v3395_v21 = vsub.f32 1.0, %v3394_v55  ;;  %v7654_v44 = vpop.eup %5345  ;;  %vm2919_vm6 = vweird.f32 %v5342_v59  ;;  %v3404_v61 = vand.u32 2147483648, %v7592_v57  ;;  %5351 = vrcp.f32 %v7651_v7 }
 0x1c4   : > { %v2916_v37 = vmul.f32 %v5342_v59, %v2915_v36  ;;  %v7660_v15 = vpop.eup %5347  ;;  %v2441_v56 = vsel %vm2440_vm5, %v5338_v27, %v2437_v40  ;;  %vm3399_vm7 = vweird.f32 %v5344_v23  ;;  %v1969_v47 = vmul.f32 %v7654_v44, %v7609_v54  ;;  %vm2920_vm9 = vmor %vm2918_vm2, %vm2919_vm6 }
 0x1c5   : > { %v3396_v24 = vmul.f32 %v5344_v23, %v3395_v21  ;;  %v2446_v33 = vsel %vm7636_vm0, %v2445_v32, %v2441_v56  ;;  %vm2923_vm8 = vcmp.eq.f32.partialorder %v2922_v20, 8.507059e+37  ;;  %v2449_v25 = vmul.f32 %v7660_v15, %v7614_v58  ;;  %vm3400_vm10 = vmor %vm3398_vm4, %vm3399_vm7  ;;  %v7715_v20 = vld [vmem:[%s9362_s2] ss:$0 sm:$0xff] }
 0x1c6   : > { %v2917_v50 = vadd.f32 %v5342_v59, %v2916_v37  ;;  %v3695_v19 = vmul.f32 %v2446_v33, %v7462_v42  ;;  %v2925_v53 = vor.u32 1.1754944e-38, %v2924_v35  ;;  %v1970_v45 = vsub.f32 1.0, %v1969_v47  ;;  %v1101_v37 = vpop.f32.mrf.mxu2 }
 0x1c7   : > { %v3397_v28 = vadd.f32 %v5344_v23, %v3396_v24  ;;  %v3405_v46 = vor.u32 1.1754944e-38, %v3404_v61  ;;  %v1977_v41 = vand.u32 2147483647, %v7609_v54  ;;  %v2450_v62 = vsub.f32 1.0, %v2449_v25 }
 0x1c8   : > { %v2921_v6 = vsel %vm2920_vm9, %v5342_v59, %v2917_v50  ;;  %v5350_v0 = vpop.eup %5349  ;;  %v4787_v48 = vpack.c.bf16 %v3695_v19, %v7548_v17  ;;  %vm3403_vm11 = vcmp.eq.f32.partialorder %v3402_v52, 8.507059e+37  ;;  %v1971_v27 = vmul.f32 %v7654_v44, %v1970_v45 }
 0x1c9   : > { %v2926_v26 = vsel %vm2923_vm8, %v2925_v53, %v2921_v6  ;;  %v3401_v42 = vsel %vm3400_vm10, %v5344_v23, %v3397_v28  ;;  %v7675_v43 = vpop.eup %5351  ;;  %vm1973_vm12 = vweird.f32 %v7609_v54  ;;  %v1979_v3 = vand.u32 2147483648, %v7609_v54 }
 0x1ca   : > { %v3727_v12 = vmul.f32 %v2926_v26, %v7493_v4  ;;  %v3406_v31 = vsel %vm3403_vm11, %v3405_v46, %v3401_v42  ;;  %5011 = vst [vmem:[%s5991_s29 + $0xb8] sm:$0xff] %v4787_v48   ;;  %v2457_v17 = vand.u32 2147483647, %v7614_v58  ;;  %v2929_v34 = vmul.f32 %v7675_v43, %v7651_v7 }
 0x1cb   : > { %v3759_v57 = vmul.f32 %v3406_v31, %v7496_v14  ;;  %vm7687_vm13 = vcmp.eq.f32.partialorder %v1977_v41, 8.507059e+37  ;;  %v2451_v10 = vmul.f32 %v7660_v15, %v2450_v62  ;;  %v7692_v39 = vadd.f32 1.0, %v5350_v0 }
 0x1cc   : > { %v4867_v11 = vpack.c.bf16 %v3727_v12, %v7620_v8  ;;  %v2930_v59 = vsub.f32 1.0, %v2929_v34  ;;  %5353 = vpow2.f32 %v7625_v16  ;;  %v4554_v63 = vmul.f32 -1.442695, %v7633_v49  ;;  %v941_v8 = vpop.f32.mrf.mxu0 }
 0x1cd   : > { %v4947_v14 = vpack.c.bf16 %v3759_v57, %v7628_v30  ;;  %v1972_v29 = vadd.f32 %v7654_v44, %v1971_v27  ;;  %vm1974_vm14 = vweird.f32 %v7654_v44  ;;  %vm2453_vm15 = vweird.f32 %v7614_v58 }
 0x1ce   : > { %5027 = vst [vmem:[%s5991_s29 + $0x138] sm:$0xff] %v4867_v11   ;;  %5355 = vrcp.f32 %v7692_v39  ;;  %v1980_v23 = vor.u32 1.1754944e-38, %v1979_v3  ;;  %vm7703_vm1 = vcmp.eq.f32.partialorder %v2457_v17, 8.507059e+37  ;;  %v2459_v16 = vand.u32 2147483648, %v7614_v58  ;;  %vm7724_vm2 = vmor %vm1973_vm12, %vm1974_vm14 }
 0x1cf   : > { %5043 = vst [vmem:[%s5991_s29 + $0x1b8] sm:$0xff] %v4947_v14   ;;  %v2931_v32 = vmul.f32 %v7675_v43, %v2930_v59  ;;  %v2452_v60 = vadd.f32 %v7660_v15, %v2451_v10  ;;  %vm2454_vm0 = vweird.f32 %v7660_v15  ;;  %5357 = vpow2.f32 %v7644_v9 }
 0x1d0   : > { %v7718_v55 = vadd.f32 %v7715_v20, %v1178_v2  ;;  %vm2934_vm3 = vweird.f32 %v7675_v43  ;;  %v2937_v9 = vand.u32 2147483647, %v7651_v7  ;;  %5359 = vpow2.f32 %v4554_v63  ;;  %vm7745_vm4 = vmor %vm2453_vm15, %vm2454_vm0 }
 0x1d1   : > { %v7731_v35 = vadd.f32 %v7715_v20, %v941_v8  ;;  %v1976_v40 = vsel %vm7724_vm2, %v7654_v44, %v1972_v29  ;;  %v2932_v21 = vadd.f32 %v7675_v43, %v2931_v32  ;;  %v7739_v52 = vadd.f32 %v7715_v20, %v1021_v18 }
 0x1d2   : > { %v4586_v54 = vmul.f32 -1.442695, %v7718_v55  ;;  %v5354_v61 = vpop.eup %5353  ;;  %v2460_v24 = vor.u32 1.1754944e-38, %v2459_v16  ;;  %vm2933_vm5 = vweird.f32 %v7651_v7  ;;  %v2939_v44 = vand.u32 2147483648, %v7651_v7 }
 0x1d3   : > { %v4491_v47 = vmul.f32 -1.442695, %v7731_v35  ;;  %v2456_v50 = vsel %vm7745_vm4, %v7660_v15, %v2452_v60  ;;  %v7757_v25 = vadd.f32 1.0, %v5354_v61  ;;  %v4523_v58 = vmul.f32 -1.442695, %v7739_v52  ;;  %vm7764_vm6 = vmor %vm2933_vm5, %vm2934_vm3 }
 0x1d4   : > { %v7752_v33 = vpop.eup %5355  ;;  %5361 = vpow2.f32 %v4586_v54  ;;  %v1981_v19 = vsel %vm7687_vm13, %v1980_v23, %v1976_v40  ;;  %v7771_v15 = vadd.f32 %v7715_v20, %v1101_v37  ;;  %v2936_v45 = vsel %vm7764_vm6, %v7675_v43, %v2932_v21  ;;  %v1181_v43 = vpop.f32.mrf.mxu3 }
 0x1d5   : > { %v3409_v53 = vmul.f32 %v7752_v33, %v7692_v39  ;;  %5363 = vpow2.f32 %v4491_v47  ;;  %v5358_v28 = vpop.eup %5357  ;;  %vm2938_vm7 = vcmp.eq.f32.partialorder %v2937_v9, 8.507059e+37  ;;  %v3419_v6 = vand.u32 2147483648, %v7692_v39  ;;  %v943_v31 = vpop.f32.mrf.mxu0 }
 0x1d6   : > { %5365 = vrcp.f32 %v7757_v25  ;;  %v5360_v46 = vpop.eup %5359  ;;  %v2461_v41 = vsel %vm7703_vm1, %v2460_v24, %v2456_v50  ;;  %v2940_v62 = vor.u32 1.1754944e-38, %v2939_v44  ;;  %v7780_v48 = vadd.f32 1.0, %v5358_v28 }
 0x1d7   : > { %v3410_v0 = vsub.f32 1.0, %v3409_v53  ;;  %v7783_v26 = vmul.f32 %v1981_v19, %v7524_v51  ;;  %v3417_v42 = vand.u32 2147483647, %v7692_v39  ;;  %v7786_v12 = vadd.f32 1.0, %v5360_v46 }
 0x1d8   : > { %5367 = vpow2.f32 %v4523_v58  ;;  %v2941_v27 = vsel %vm2938_vm7, %v2940_v62, %v2936_v45  ;;  %vm3413_vm8 = vweird.f32 %v7692_v39  ;;  %v1992_v57 = vand.u32 2147483647, %v7757_v25 }
 0x1d9   : > { %5369 = vrcp.f32 %v7780_v48  ;;  %v4555_v3 = vmul.f32 -1.442695, %v7771_v15  ;;  %v7793_v51 = vmul.f32 %v2461_v41, %v7527_v1  ;;  %v7795_v34 = vor.u32 1.1754944e-38, %v3419_v6 }
 0x1da   : > { %v5362_v17 = vpop.eup %5361  ;;  %v1994_v11 = vand.u32 2147483648, %v7757_v25  ;;  %5371 = vrcp.f32 %v7786_v12  ;;  %v3411_v10 = vmul.f32 %v7752_v33, %v3410_v0  ;;  %v7803_v59 = vadd.f32 %v7715_v20, %v1181_v43 }
 0x1db   : > { %v5364_v4 = vpop.eup %5363  ;;  %v7800_v14 = vadd.f32 1.0, %v5362_v17  ;;  %v7806_v63 = vadd.f32 %v7715_v20, %v943_v31  ;;  %v7809_v1 = vmul.f32 %v2941_v27, %v7532_v22  ;;  %vm3414_vm9 = vweird.f32 %v7752_v33 }
 0x1dc   : > { %v5366_v2 = vpop.eup %5365  ;;  %vm1988_vm10 = vweird.f32 %v7757_v25  ;;  %v7813_v29 = vadd.f32 1.0, %v5364_v4  ;;  %vm7816_vm11 = vcmp.eq.f32.partialorder %v1992_v57, 8.507059e+37  ;;  %v2472_v30 = vand.u32 2147483647, %v7780_v48  ;;  %vm7844_vm0 = vmor %vm3413_vm8, %vm3414_vm9 }
 0x1dd   : > { %v1984_v8 = vmul.f32 %v5366_v2, %v7757_v25  ;;  %5373 = vpow2.f32 %v4555_v3  ;;  %v1995_v32 = vor.u32 1.1754944e-38, %v1994_v11  ;;  %v2474_v22 = vand.u32 2147483648, %v7780_v48 }
 0x1de   : > { %v5368_v16 = vpop.eup %5367  ;;  %v2952_v18 = vand.u32 2147483647, %v7786_v12  ;;  %5375 = vrcp.f32 %v7800_v14  ;;  %v3412_v36 = vadd.f32 %v7752_v33, %v3411_v10  ;;  %v2954_v40 = vand.u32 2147483648, %v7786_v12 }
 0x1df   : > { %v5370_v60 = vpop.eup %5369  ;;  %v1985_v9 = vsub.f32 1.0, %v1984_v8  ;;  %5377 = vrcp.f32 %v7813_v29  ;;  %vm2468_vm12 = vweird.f32 %v7780_v48  ;;  %vm2948_vm13 = vweird.f32 %v7786_v12 }
 0x1e0   : > { %v5372_v21 = vpop.eup %5371  ;;  %v2464_v54 = vmul.f32 %v5370_v60, %v7780_v48  ;;  %v4587_v37 = vmul.f32 -1.442695, %v7803_v59  ;;  %vm7831_vm14 = vcmp.eq.f32.partialorder %v3417_v42, 8.507059e+37  ;;  %vm1989_vm15 = vweird.f32 %v5366_v2 }
 0x1e1   : > { %v1986_v56 = vmul.f32 %v5366_v2, %v1985_v9  ;;  %vm7835_vm1 = vcmp.eq.f32.partialorder %v2472_v30, 8.507059e+37  ;;  %v2944_v44 = vmul.f32 %v5372_v21, %v7786_v12  ;;  %v2475_v58 = vor.u32 1.1754944e-38, %v2474_v22  ;;  %vm1990_vm3 = vmor %vm1988_vm10, %vm1989_vm15  ;;  %v1023_v30 = vpop.f32.mrf.mxu1 }
 0x1e2   : > { %v2465_v50 = vsub.f32 1.0, %v2464_v54  ;;  %vm7848_vm2 = vcmp.eq.f32.partialorder %v2952_v18, 8.507059e+37  ;;  %v7852_v7 = vadd.f32 1.0, %v5368_v16  ;;  %v3416_v28 = vsel %vm7844_vm0, %v7752_v33, %v3412_v36 }
 0x1e3   : > { %v5374_v53 = vpop.eup %5373  ;;  %v1987_v45 = vadd.f32 %v5366_v2, %v1986_v56  ;;  %v2945_v6 = vsub.f32 1.0, %v2944_v44  ;;  %v2955_v39 = vor.u32 1.1754944e-38, %v2954_v40  ;;  %vm2469_vm4 = vweird.f32 %v5370_v60 }
 0x1e4   : > { %v5376_v46 = vpop.eup %5375  ;;  %v2466_v41 = vmul.f32 %v5370_v60, %v2465_v50  ;;  %v3432_v62 = vand.u32 2147483647, %v7800_v14  ;;  %5379 = vrcp.f32 %v7852_v7  ;;  %vm2949_vm5 = vweird.f32 %v5372_v21  ;;  %vm2470_vm6 = vmor %vm2468_vm12, %vm2469_vm4 }
 0x1e5   : > { %v7861_v0 = vpop.eup %5377  ;;  %v1991_v42 = vsel %vm1990_vm3, %v5366_v2, %v1987_v45  ;;  %v2946_v43 = vmul.f32 %v5372_v21, %v2945_v6  ;;  %v3424_v33 = vmul.f32 %v5376_v46, %v7800_v14  ;;  %5381 = vpow2.f32 %v4587_v37  ;;  %vm2950_vm7 = vmor %vm2948_vm13, %vm2949_vm5 }
 0x1e6   : > { %v1996_v31 = vsel %vm7816_vm11, %v1995_v32, %v1991_v42  ;;  %v2467_v27 = vadd.f32 %v5370_v60, %v2466_v41  ;;  %v1999_v25 = vmul.f32 %v7861_v0, %v7813_v29  ;;  %v3434_v11 = vand.u32 2147483648, %v7800_v14 }
 0x1e7   : > { %v3665_v57 = vmul.f32 %v1996_v31, %v7600_v38  ;;  %v2947_v3 = vadd.f32 %v5372_v21, %v2946_v43  ;;  %v3425_v17 = vsub.f32 1.0, %v3424_v33  ;;  %vm3429_vm8 = vweird.f32 %v5376_v46 }
 0x1e8   : > { %v2471_v4 = vsel %vm2470_vm6, %v5370_v60, %v2467_v27  ;;  %v2000_v10 = vsub.f32 1.0, %v1999_v25  ;;  %v7874_v2 = vadd.f32 1.0, %v5374_v53  ;;  %v3421_v32 = vsel %vm7831_vm14, %v7795_v34, %v3416_v28 }
 0x1e9   : > { %v4712_v8 = vpack.c.bf16 %v3665_v57, %v7783_v26  ;;  %v2476_v38 = vsel %vm7835_vm1, %v2475_v58, %v2471_v4  ;;  %v2951_v48 = vsel %vm2950_vm7, %v5372_v21, %v2947_v3  ;;  %v3426_v23 = vmul.f32 %v5376_v46, %v3425_v17  ;;  %v1026_v42 = vpop.f32.mrf.mxu1 }
 0x1ea   : > { %v7879_v16 = vpop.eup %5379  ;;  %v3697_v12 = vmul.f32 %v2476_v38, %v7617_v5  ;;  %v2956_v22 = vsel %vm7848_vm2, %v2955_v39, %v2951_v48  ;;  %vm3428_vm9 = vweird.f32 %v7800_v14  ;;  %vm3433_vm10 = vcmp.eq.f32.partialorder %v3432_v62, 8.507059e+37  ;;  %v1103_v14 = vpop.f32.mrf.mxu2 }
 0x1eb   : > { %4996 = vst [vmem:[%s5991_s29 + $0x40] sm:$0xff] %v4712_v8   ;;  %v3729_v26 = vmul.f32 %v2956_v22, %v7633_v49  ;;  %v3427_v18 = vadd.f32 %v5376_v46, %v3426_v23  ;;  %v2479_v60 = vmul.f32 %v7879_v16, %v7852_v7  ;;  %v5382_v36 = vpop.eup %5381  ;;  %vm3430_vm11 = vmor %vm3428_vm9, %vm3429_vm8  ;;  %v3435_v5 = vor.u32 1.1754944e-38, %v3434_v11  ;;  %v946_v62 = vpop.f32.mrf.mxu0 }
 0x1ec   : > { %v4792_v34 = vpack.c.bf16 %v3697_v12, %v7793_v51  ;;  %v2001_v9 = vmul.f32 %v7861_v0, %v2000_v10  ;;  %5383 = vrcp.f32 %v7874_v2  ;;  %v2007_v21 = vand.u32 2147483647, %v7813_v29 }
 0x1ed   : > { %v4872_v49 = vpack.c.bf16 %v3729_v26, %v7809_v1  ;;  %v3431_v40 = vsel %vm3430_vm11, %v5376_v46, %v3427_v18  ;;  %v2009_v54 = vand.u32 2147483648, %v7813_v29  ;;  %v3760_v37 = vmul.f32 %v3421_v32, %v7573_v13  ;;  %v1183_v1 = vpop.f32.mrf.mxu3 }
 0x1ee   : > { %5012 = vst [vmem:[%s5991_s29 + $0xc0] sm:$0xff] %v4792_v34   ;;  %v3436_v61 = vsel %vm3433_vm10, %v3435_v5, %v3431_v40  ;;  %v2480_v51 = vsub.f32 1.0, %v2479_v60  ;;  %vm2003_vm12 = vweird.f32 %v7813_v29  ;;  %v2489_v24 = vand.u32 2147483648, %v7852_v7 }
 0x1ef   : > { %5028 = vst [vmem:[%s5991_s29 + $0x140] sm:$0xff] %v4872_v49   ;;  %v3761_v56 = vmul.f32 %v3436_v61, %v7718_v55  ;;  %v7905_v44 = vadd.f32 1.0, %v5382_v36  ;;  %v2002_v47 = vadd.f32 %v7861_v0, %v2001_v9  ;;  %vm2004_vm13 = vweird.f32 %v7861_v0 }
 0x1f0   : > { %v2487_v13 = vand.u32 2147483647, %v7852_v7  ;;  %v4492_v50 = vmul.f32 -1.442695, %v7806_v63  ;;  %vm7911_vm14 = vcmp.eq.f32.partialorder %v2007_v21, 8.507059e+37  ;;  %v2010_v55 = vor.u32 1.1754944e-38, %v2009_v54  ;;  %vm7926_vm1 = vmor %vm2003_vm12, %vm2004_vm13 }
 0x1f1   : > { %v4952_v58 = vpack.c.bf16 %v3761_v56, %v3760_v37  ;;  %5385 = vrcp.f32 %v7905_v44  ;;  %v2481_v28 = vmul.f32 %v7879_v16, %v2480_v51  ;;  %vm2483_vm15 = vweird.f32 %v7852_v7 }
 0x1f2   : > { %v7916_v53 = vpop.eup %5383  ;;  %5387 = vpow2.f32 %v4492_v50  ;;  %v7921_v45 = vadd.f32 %v7715_v20, %v1023_v30  ;;  %vm2484_vm0 = vweird.f32 %v7879_v16  ;;  %v2490_v39 = vor.u32 1.1754944e-38, %v2489_v24  ;;  %v1106_v4 = vpop.f32.mrf.mxu2 }
 0x1f3   : > { %5044 = vst [vmem:[%s5991_s29 + $0x1c0] sm:$0xff] %v4952_v58   ;;  %v2959_v46 = vmul.f32 %v7916_v53, %v7874_v2  ;;  %v7934_v41 = vadd.f32 %v7715_v20, %v1103_v14  ;;  %v2006_v43 = vsel %vm7926_vm1, %v7861_v0, %v2002_v47  ;;  %vm7939_vm2 = vcmp.eq.f32.partialorder %v2487_v13, 8.507059e+37  ;;  %vm7973_vm5 = vmor %vm2483_vm15, %vm2484_vm0  ;;  %v948_v13 = vpop.f32.mrf.mxu0 }
 0x1f4   : > { %vm2963_vm3 = vweird.f32 %v7874_v2  ;;  %v2967_v33 = vand.u32 2147483647, %v7874_v2  ;;  %v4524_v31 = vmul.f32 -1.442695, %v7921_v45  ;;  %v2969_v25 = vand.u32 2147483648, %v7874_v2 }
 0x1f5   : > { %v2960_v27 = vsub.f32 1.0, %v2959_v46  ;;  %v4556_v57 = vmul.f32 -1.442695, %v7934_v41  ;;  %v7949_v3 = vadd.f32 %v7715_v20, %v1183_v1  ;;  %v2482_v0 = vadd.f32 %v7879_v16, %v2481_v28  ;;  %v1186_v36 = vpop.f32.mrf.mxu3 }
 0x1f6   : > { %5389 = vpow2.f32 %v4524_v31  ;;  %v7953_v17 = vadd.f32 %v7715_v20, %v946_v62  ;;  %v7956_v11 = vadd.f32 %v7715_v20, %v1026_v42  ;;  %v2011_v8 = vsel %vm7911_vm14, %v2010_v55, %v2006_v43 }
 0x1f7   : > { %v7958_v10 = vpop.eup %5385  ;;  %v2961_v38 = vmul.f32 %v7916_v53, %v2960_v27  ;;  %5391 = vpow2.f32 %v4556_v57  ;;  %v4588_v48 = vmul.f32 -1.442695, %v7949_v3  ;;  %vm2964_vm4 = vweird.f32 %v7916_v53 }
 0x1f8   : > { %v5388_v23 = vpop.eup %5387  ;;  %v3439_v30 = vmul.f32 %v7958_v10, %v7905_v44  ;;  %v4493_v32 = vmul.f32 -1.442695, %v7953_v17  ;;  %v4525_v12 = vmul.f32 -1.442695, %v7956_v11  ;;  %v7981_v60 = vadd.f32 %v7715_v20, %v1106_v4  ;;  %vm7991_vm6 = vmor %vm2963_vm3, %vm2964_vm4 }
 0x1f9   : > { %v2962_v26 = vadd.f32 %v7916_v53, %v2961_v38  ;;  %v7978_v18 = vadd.f32 1.0, %v5388_v23  ;;  %5393 = vpow2.f32 %v4588_v48  ;;  %v7984_v34 = vmul.f32 %v2011_v8, %v7731_v35 }
 0x1fa   : > { %v2486_v7 = vsel %vm7973_vm5, %v7879_v16, %v2482_v0  ;;  %v3440_v5 = vsub.f32 1.0, %v3439_v30  ;;  %5395 = vpow2.f32 %v4493_v32  ;;  %vm7995_vm7 = vcmp.eq.f32.partialorder %v2967_v33, 8.507059e+37 }
 0x1fb   : > { %v3447_v49 = vand.u32 2147483647, %v7905_v44  ;;  %v3449_v35 = vand.u32 2147483648, %v7905_v44  ;;  %5397 = vrcp.f32 %v7978_v18  ;;  %v2966_v16 = vsel %vm7991_vm6, %v7916_v53, %v2962_v26 }
 0x1fc   : > { %v5390_v40 = vpop.eup %5389  ;;  %v3441_v2 = vmul.f32 %v7958_v10, %v3440_v5  ;;  %5399 = vpow2.f32 %v4525_v12  ;;  %v8007_v21 = vadd.f32 %v7715_v20, %v1186_v36  ;;  %v2491_v37 = vsel %vm7939_vm2, %v2490_v39, %v2486_v7 }
 0x1fd   : > { %v5392_v54 = vpop.eup %5391  ;;  %v2970_v61 = vor.u32 1.1754944e-38, %v2969_v25  ;;  %v8011_v51 = vadd.f32 1.0, %v5390_v40  ;;  %v4557_v56 = vmul.f32 -1.442695, %v7981_v60  ;;  %vm3444_vm8 = vweird.f32 %v7958_v10  ;;  %v1028_v40 = vpop.f32.mrf.mxu1 }
 0x1fe   : > { %v3442_v24 = vadd.f32 %v7958_v10, %v3441_v2  ;;  %v2022_v1 = vand.u32 2147483647, %v7978_v18  ;;  %v8017_v47 = vadd.f32 1.0, %v5392_v54  ;;  %vm3443_vm9 = vweird.f32 %v7905_v44 }
 0x1ff   : > { %v5394_v50 = vpop.eup %5393  ;;  %v2971_v58 = vsel %vm7995_vm7, %v2970_v61, %v2966_v16  ;;  %v2024_v19 = vand.u32 2147483648, %v7978_v18  ;;  %5401 = vrcp.f32 %v8011_v51  ;;  %vm8024_vm10 = vcmp.eq.f32.partialorder %v3447_v49, 8.507059e+37  ;;  %vm8035_vm11 = vmor %vm3443_vm9, %vm3444_vm8 }
 0x200   : > { %v5396_v55 = vpop.eup %5395  ;;  %v3450_v28 = vor.u32 1.1754944e-38, %v3449_v35  ;;  %5403 = vrcp.f32 %v8017_v47  ;;  %v4589_v6 = vmul.f32 -1.442695, %v8007_v21  ;;  %v8031_v46 = vmul.f32 %v2491_v37, %v7739_v52 }
 0x201   : > { %v5398_v39 = vpop.eup %5397  ;;  %vm2018_vm12 = vweird.f32 %v7978_v18  ;;  %5405 = vpow2.f32 %v4557_v56  ;;  %v8041_v62 = vadd.f32 %v7715_v20, %v948_v13  ;;  %v8044_v43 = vmul.f32 %v2971_v58, %v7771_v15 }
 0x202   : > { %v5400_v42 = vpop.eup %5399  ;;  %v3446_v52 = vsel %vm8035_vm11, %v7958_v10, %v3442_v24  ;;  %v2014_v29 = vmul.f32 %v5398_v39, %v7978_v18  ;;  %vm8050_vm13 = vcmp.eq.f32.partialorder %v2022_v1, 8.507059e+37  ;;  %v2025_v31 = vor.u32 1.1754944e-38, %v2024_v19 }
 0x203   : > { %v2502_v27 = vand.u32 2147483647, %v8011_v51  ;;  %v8055_v25 = vadd.f32 1.0, %v5394_v50  ;;  %v8057_v57 = vadd.f32 1.0, %v5396_v55  ;;  %v2504_v15 = vand.u32 2147483648, %v8011_v51 }
 0x204   : > { %v2015_v0 = vsub.f32 1.0, %v2014_v29  ;;  %v2982_v4 = vand.u32 2147483647, %v8017_v47  ;;  %5407 = vpow2.f32 %v4589_v6  ;;  %v3451_v8 = vsel %vm8024_vm10, %v3450_v28, %v3446_v52 }
 0x205   : > { %v5402_v10 = vpop.eup %5401  ;;  %v2984_v38 = vand.u32 2147483648, %v8017_v47  ;;  %5409 = vrcp.f32 %v8055_v25  ;;  %v8065_v48 = vadd.f32 1.0, %v5400_v42  ;;  %vm2019_vm14 = vweird.f32 %v5398_v39 }
 0x206   : > { %v5404_v23 = vpop.eup %5403  ;;  %v2016_v30 = vmul.f32 %v5398_v39, %v2015_v0  ;;  %v2494_v32 = vmul.f32 %v5402_v10, %v8011_v51  ;;  %5411 = vrcp.f32 %v8057_v57  ;;  %vm2498_vm15 = vweird.f32 %v8011_v51  ;;  %vm2020_vm2 = vmor %vm2018_vm12, %vm2019_vm14 }
 0x207   : > { %v5406_v12 = vpop.eup %5405  ;;  %vm8070_vm1 = vcmp.eq.f32.partialorder %v2502_v27, 8.507059e+37  ;;  %v2974_v26 = vmul.f32 %v5404_v23, %v8017_v47  ;;  %vm2978_vm0 = vweird.f32 %v8017_v47  ;;  %v8077_v36 = vmul.f32 %v3451_v8, %v7803_v59 }
 0x208   : > { %v2017_v7 = vadd.f32 %v5398_v39, %v2016_v30  ;;  %v2495_v5 = vsub.f32 1.0, %v2494_v32  ;;  %v2505_v9 = vor.u32 1.1754944e-38, %v2504_v15  ;;  %vm8081_vm3 = vcmp.eq.f32.partialorder %v2982_v4, 8.507059e+37 }
 0x209   : > { %v2975_v14 = vsub.f32 1.0, %v2974_v26  ;;  %v2985_v35 = vor.u32 1.1754944e-38, %v2984_v38  ;;  %5413 = vrcp.f32 %v8065_v48  ;;  %vm2499_vm4 = vweird.f32 %v5402_v10 }
 0x20a   : > { %v5408_v16 = vpop.eup %5407  ;;  %v2021_v2 = vsel %vm2020_vm2, %v5398_v39, %v2017_v7  ;;  %v2496_v54 = vmul.f32 %v5402_v10, %v2495_v5  ;;  %v8086_v59 = vadd.f32 1.0, %v5406_v12  ;;  %vm2979_vm5 = vweird.f32 %v5404_v23  ;;  %vm2500_vm6 = vmor %vm2498_vm15, %vm2499_vm4 }
 0x20b   : > { %v5410_v37 = vpop.eup %5409  ;;  %v2026_v18 = vsel %vm8050_vm13, %v2025_v31, %v2021_v2  ;;  %v2976_v61 = vmul.f32 %v5404_v23, %v2975_v14  ;;  %v4494_v56 = vmul.f32 -1.442695, %v8041_v62  ;;  %v8096_v58 = vadd.f32 %v7715_v20, %v1028_v40  ;;  %vm2980_vm7 = vmor %vm2978_vm0, %vm2979_vm5 }
 0x20c   : > { %v8091_v24 = vpop.eup %5411  ;;  %v3667_v1 = vmul.f32 %v2026_v18, %v7806_v63  ;;  %v2497_v13 = vadd.f32 %v5402_v10, %v2496_v54  ;;  %v3454_v50 = vmul.f32 %v5410_v37, %v8055_v25  ;;  %v3462_v55 = vand.u32 2147483647, %v8055_v25 }
 0x20d   : > { %v2977_v19 = vadd.f32 %v5404_v23, %v2976_v61  ;;  %v3464_v53 = vand.u32 2147483648, %v8055_v25  ;;  %v2029_v28 = vmul.f32 %v8091_v24, %v8057_v57  ;;  %vm3459_vm8 = vweird.f32 %v5410_v37 }
 0x20e   : > { %v4717_v63 = vpack.c.bf16 %v3667_v1, %v7984_v34  ;;  %v2501_v6 = vsel %vm2500_vm6, %v5402_v10, %v2497_v13  ;;  %v3455_v39 = vsub.f32 1.0, %v3454_v50  ;;  %5415 = vrcp.f32 %v8086_v59 }
 0x20f   : > { %v8107_v44 = vpop.eup %5413  ;;  %v2506_v51 = vsel %vm8070_vm1, %v2505_v9, %v2501_v6  ;;  %v2981_v42 = vsel %vm2980_vm7, %v5404_v23, %v2977_v19  ;;  %v2030_v52 = vsub.f32 1.0, %v2029_v28  ;;  %vm3458_vm9 = vweird.f32 %v8055_v25  ;;  %v1108_v25 = vpop.f32.mrf.mxu2 }
 0x210   : > { %4997 = vst [vmem:[%s5991_s29 + $0x48] sm:$0xff] %v4717_v63   ;;  %v3699_v29 = vmul.f32 %v2506_v51, %v7921_v45  ;;  %v2986_v34 = vsel %vm8081_vm3, %v2985_v35, %v2981_v42  ;;  %v3456_v33 = vmul.f32 %v5410_v37, %v3455_v39  ;;  %v2509_v47 = vmul.f32 %v8107_v44, %v8065_v48  ;;  %vm3460_vm10 = vmor %vm3458_vm9, %vm3459_vm8  ;;  %v1031_v6 = vpop.f32.mrf.mxu1 }
 0x211   : > { %v3731_v31 = vmul.f32 %v2986_v34, %v7934_v41  ;;  %v3465_v27 = vor.u32 1.1754944e-38, %v3464_v53  ;;  %v2037_v0 = vand.u32 2147483647, %v8057_v57  ;;  %v2031_v45 = vmul.f32 %v8091_v24, %v2030_v52 }
 0x212   : > { %v4797_v15 = vpack.c.bf16 %v3699_v29, %v8031_v46  ;;  %v3457_v4 = vadd.f32 %v5410_v37, %v3456_v33  ;;  %v2510_v10 = vsub.f32 1.0, %v2509_v47  ;;  %v2039_v38 = vand.u32 2147483648, %v8057_v57 }
 0x213   : > { %v4877_v8 = vpack.c.bf16 %v3731_v31, %v8044_v43  ;;  %v2517_v41 = vand.u32 2147483647, %v8065_v48  ;;  %v8127_v23 = vadd.f32 1.0, %v5408_v16  ;;  %vm3463_vm11 = vcmp.eq.f32.partialorder %v3462_v55, 8.507059e+37  ;;  %v951_v16 = vpop.f32.mrf.mxu0 }
 0x214   : > { %5013 = vst [vmem:[%s5991_s29 + $0xc8] sm:$0xff] %v4797_v15   ;;  %v3461_v30 = vsel %vm3460_vm10, %v5410_v37, %v3457_v4  ;;  %v2511_v46 = vmul.f32 %v8107_v44, %v2510_v10  ;;  %5417 = vpow2.f32 %v4494_v56  ;;  %v8131_v32 = vpop.eup %5415  ;;  %vm2033_vm12 = vweird.f32 %v8057_v57 }
 0x215   : > { %5029 = vst [vmem:[%s5991_s29 + $0x148] sm:$0xff] %v4877_v8   ;;  %v3466_v12 = vsel %vm3463_vm11, %v3465_v27, %v3461_v30  ;;  %v2519_v43 = vand.u32 2147483648, %v8065_v48  ;;  %5419 = vrcp.f32 %v8127_v23  ;;  %v2032_v26 = vadd.f32 %v8091_v24, %v2031_v45 }
 0x216   : > { %v3763_v22 = vmul.f32 %v3466_v12, %v7949_v3  ;;  %vm2034_vm13 = vweird.f32 %v8091_v24  ;;  %v2989_v7 = vmul.f32 %v8131_v32, %v8086_v59  ;;  %vm8142_vm14 = vcmp.eq.f32.partialorder %v2037_v0, 8.507059e+37  ;;  %v1188_v3 = vpop.f32.mrf.mxu3 }
 0x217   : > { %v2040_v9 = vor.u32 1.1754944e-38, %v2039_v38  ;;  %vm2513_vm15 = vweird.f32 %v8065_v48  ;;  %vm8147_vm1 = vcmp.eq.f32.partialorder %v2517_v41, 8.507059e+37  ;;  %v2512_v35 = vadd.f32 %v8107_v44, %v2511_v46  ;;  %vm8156_vm2 = vmor %vm2033_vm12, %vm2034_vm13  ;;  %v1111_v42 = vpop.f32.mrf.mxu2 }
 0x218   : > { %v4957_v49 = vpack.c.bf16 %v3763_v22, %v8077_v36  ;;  %vm2514_vm0 = vweird.f32 %v8107_v44  ;;  %v2990_v40 = vsub.f32 1.0, %v2989_v7  ;;  %v2520_v54 = vor.u32 1.1754944e-38, %v2519_v43 }
 0x219   : > { %vm2993_vm3 = vweird.f32 %v8086_v59  ;;  %v4526_v37 = vmul.f32 -1.442695, %v8096_v58  ;;  %v8163_v18 = vadd.f32 %v7715_v20, %v1108_v25  ;;  %v2036_v61 = vsel %vm8156_vm2, %v8091_v24, %v2032_v26  ;;  %vm8180_vm4 = vmor %vm2513_vm15, %vm2514_vm0 }
 0x21a   : > { %v5418_v36 = vpop.eup %5417  ;;  %5045 = vst [vmem:[%s5991_s29 + $0x1c8] sm:$0xff] %v4957_v49   ;;  %v2991_v57 = vmul.f32 %v8131_v32, %v2990_v40  ;;  %v2997_v56 = vand.u32 2147483647, %v8086_v59  ;;  %v8172_v1 = vadd.f32 %v7715_v20, %v1188_v3  ;;  %v8188_v55 = vadd.f32 %v7715_v20, %v951_v16 }
 0x21b   : > { %v8174_v13 = vpop.eup %5419  ;;  %v8184_v19 = vadd.f32 1.0, %v5418_v36  ;;  %5421 = vpow2.f32 %v4526_v37  ;;  %v4558_v24 = vmul.f32 -1.442695, %v8163_v18  ;;  %v2516_v53 = vsel %vm8180_vm4, %v8107_v44, %v2512_v35  ;;  %v953_v43 = vpop.f32.mrf.mxu0 }
 0x21c   : > { %v2999_v28 = vand.u32 2147483648, %v8086_v59  ;;  %v3469_v48 = vmul.f32 %v8174_v13, %v8127_v23  ;;  %v4590_v63 = vmul.f32 -1.442695, %v8172_v1  ;;  %v2041_v39 = vsel %vm8142_vm14, %v2040_v9, %v2036_v61  ;;  %v1033_v37 = vpop.f32.mrf.mxu1 }
 0x21d   : > { %v2992_v51 = vadd.f32 %v8131_v32, %v2991_v57  ;;  %vm2994_vm5 = vweird.f32 %v8131_v32  ;;  %5423 = vrcp.f32 %v8184_v19  ;;  %v3477_v44 = vand.u32 2147483647, %v8127_v23 }
 0x21e   : > { %v3470_v52 = vsub.f32 1.0, %v3469_v48  ;;  %5425 = vpow2.f32 %v4558_v24  ;;  %v4495_v29 = vmul.f32 -1.442695, %v8188_v55  ;;  %v2521_v34 = vsel %vm8147_vm1, %v2520_v54, %v2516_v53  ;;  %vm8213_vm7 = vmor %vm2993_vm3, %vm2994_vm5 }
 0x21f   : > { %vm8206_vm6 = vcmp.eq.f32.partialorder %v2997_v56, 8.507059e+37  ;;  %v3479_v47 = vand.u32 2147483648, %v8127_v23  ;;  %5427 = vpow2.f32 %v4590_v63  ;;  %v3000_v27 = vor.u32 1.1754944e-38, %v2999_v28 }
 0x220   : > { %v3471_v0 = vmul.f32 %v8174_v13, %v3470_v52  ;;  %5429 = vpow2.f32 %v4495_v29  ;;  %v8219_v15 = vadd.f32 %v7715_v20, %v1031_v6  ;;  %v8222_v45 = vmul.f32 %v2041_v39, %v7953_v17  ;;  %v1191_v17 = vpop.f32.mrf.mxu3 }
 0x221   : > { %v5422_v4 = vpop.eup %5421  ;;  %v2996_v10 = vsel %vm8213_vm7, %v8131_v32, %v2992_v51  ;;  %v2052_v59 = vand.u32 2147483647, %v8184_v19  ;;  %v2054_v8 = vand.u32 2147483648, %v8184_v19  ;;  %v8230_v38 = vmul.f32 %v2521_v34, %v7956_v11 }
 0x222   : > { %vm3473_vm8 = vweird.f32 %v8127_v23  ;;  %vm8233_vm9 = vcmp.eq.f32.partialorder %v3477_v44, 8.507059e+37  ;;  %v8237_v25 = vadd.f32 1.0, %v5422_v4  ;;  %v3472_v46 = vadd.f32 %v8174_v13, %v3471_v0  ;;  %v1113_v23 = vpop.f32.mrf.mxu2 }
 0x223   : > { %v5424_v30 = vpop.eup %5423  ;;  %vm3474_vm10 = vweird.f32 %v8174_v13  ;;  %v3480_v32 = vor.u32 1.1754944e-38, %v3479_v47  ;;  %v4527_v12 = vmul.f32 -1.442695, %v8219_v15  ;;  %v3001_v22 = vsel %vm8206_vm6, %v3000_v27, %v2996_v10 }
 0x224   : > { %v5426_v11 = vpop.eup %5425  ;;  %v2044_v26 = vmul.f32 %v5424_v30, %v8184_v19  ;;  %vm2048_vm11 = vweird.f32 %v8184_v19  ;;  %5431 = vrcp.f32 %v8237_v25  ;;  %vm8247_vm12 = vcmp.eq.f32.partialorder %v2052_v59, 8.507059e+37  ;;  %vm8261_vm13 = vmor %vm3473_vm8, %vm3474_vm10 }
 0x225   : > { %v5428_v7 = vpop.eup %5427  ;;  %v2055_v9 = vor.u32 1.1754944e-38, %v2054_v8  ;;  %v8252_v14 = vadd.f32 %v7715_v20, %v1111_v42  ;;  %v8255_v3 = vadd.f32 %v7715_v20, %v1191_v17  ;;  %v8265_v16 = vadd.f32 1.0, %v5426_v11 }
 0x226   : > { %v5430_v49 = vpop.eup %5429  ;;  %v2045_v40 = vsub.f32 1.0, %v2044_v26  ;;  %v8267_v2 = vadd.f32 1.0, %v5428_v7  ;;  %v8270_v54 = vadd.f32 %v7715_v20, %v953_v43  ;;  %v3476_v36 = vsel %vm8261_vm13, %v8174_v13, %v3472_v46 }
 0x227   : > { %vm2049_vm14 = vweird.f32 %v5424_v30  ;;  %v8275_v61 = vadd.f32 1.0, %v5430_v49  ;;  %5433 = vpow2.f32 %v4527_v12  ;;  %v2532_v56 = vand.u32 2147483647, %v8237_v25 }
 0x228   : > { %v2046_v57 = vmul.f32 %v5424_v30, %v2045_v40  ;;  %v2534_v50 = vand.u32 2147483648, %v8237_v25  ;;  %5435 = vrcp.f32 %v8265_v16  ;;  %v8281_v24 = vmul.f32 %v3001_v22, %v7981_v60  ;;  %vm2050_vm15 = vmor %vm2048_vm11, %vm2049_vm14 }
 0x229   : > { %5437 = vrcp.f32 %v8267_v2  ;;  %v4559_v53 = vmul.f32 -1.442695, %v8252_v14  ;;  %v8286_v13 = vadd.f32 %v7715_v20, %v1033_v37  ;;  %v4591_v63 = vmul.f32 -1.442695, %v8255_v3 }
 0x22a   : > { %v5432_v28 = vpop.eup %5431  ;;  %v2047_v48 = vadd.f32 %v5424_v30, %v2046_v57  ;;  %5439 = vrcp.f32 %v8275_v61  ;;  %v8291_v6 = vadd.f32 %v7715_v20, %v1113_v23  ;;  %v8295_v60 = vsel %vm8233_vm9, %v3480_v32, %v3476_v36 }
 0x22b   : > { %v2524_v39 = vmul.f32 %v5432_v28, %v8237_v25  ;;  %vm2528_vm1 = vweird.f32 %v8237_v25  ;;  %v4496_v51 = vmul.f32 -1.442695, %v8270_v54  ;;  %vm8303_vm0 = vcmp.eq.f32.partialorder %v2532_v56, 8.507059e+37 }
 0x22c   : > { %v2051_v42 = vsel %vm2050_vm15, %v5424_v30, %v2047_v48  ;;  %v2535_v20 = vor.u32 1.1754944e-38, %v2534_v50  ;;  %v3012_v44 = vand.u32 2147483647, %v8265_v16  ;;  %vm3008_vm2 = vweird.f32 %v8265_v16 }
 0x22d   : > { %v5434_v29 = vpop.eup %5433  ;;  %v2056_v34 = vsel %vm8247_vm12, %v2055_v9, %v2051_v42  ;;  %v2525_v19 = vsub.f32 1.0, %v2524_v39  ;;  %v3014_v33 = vand.u32 2147483648, %v8265_v16  ;;  %5441 = vpow2.f32 %v4559_v53 }
 0x22e   : > { %v5436_v47 = vpop.eup %5435  ;;  %v3669_v31 = vmul.f32 %v2056_v34, %v8041_v62  ;;  %vm3488_vm3 = vweird.f32 %v8267_v2  ;;  %v3492_v27 = vand.u32 2147483647, %v8267_v2  ;;  %v3494_v0 = vand.u32 2147483648, %v8267_v2 }
 0x22f   : > { %v8316_v4 = vadd.f32 1.0, %v5434_v29  ;;  %v5438_v10 = vpop.eup %5437  ;;  %v2526_v59 = vmul.f32 %v5432_v28, %v2525_v19  ;;  %vm2529_vm4 = vweird.f32 %v5432_v28  ;;  %v3004_v8 = vmul.f32 %v5436_v47, %v8265_v16 }
 0x230   : > { %5443 = vpow2.f32 %v4591_v63  ;;  %v8319_v41 = vpop.eup %5439  ;;  %v4722_v17 = vpack.c.bf16 %v3669_v31, %v8222_v45  ;;  %vm8322_vm5 = vcmp.eq.f32.partialorder %v3012_v44, 8.507059e+37  ;;  %v3484_v30 = vmul.f32 %v5438_v10, %v8267_v2  ;;  %vm2530_vm6 = vmor %vm2528_vm1, %vm2529_vm4 }
 0x231   : > { %5445 = vrcp.f32 %v8316_v4  ;;  %v2527_v46 = vadd.f32 %v5432_v28, %v2526_v59  ;;  %v3005_v32 = vsub.f32 1.0, %v3004_v8  ;;  %v3015_v12 = vor.u32 1.1754944e-38, %v3014_v33 }
 0x232   : > { %v2059_v43 = vmul.f32 %v8319_v41, %v8275_v61  ;;  %4998 = vst [vmem:[%s5991_s29 + $0x50] sm:$0xff] %v4722_v17   ;;  %v3485_v11 = vsub.f32 1.0, %v3484_v30  ;;  %vm8333_vm7 = vcmp.eq.f32.partialorder %v3492_v27, 8.507059e+37  ;;  %v3495_v22 = vor.u32 1.1754944e-38, %v3494_v0  ;;  %v8390_v27 = vld [vmem:[%s9362_s2] ss:$0 sm:$0xff] }
 0x233   : > { %vm2063_vm8 = vweird.f32 %v8275_v61  ;;  %v5442_v26 = vpop.eup %5441  ;;  %v2531_v7 = vsel %vm2530_vm6, %v5432_v28, %v2527_v46  ;;  %v3006_v5 = vmul.f32 %v5436_v47, %v3005_v32  ;;  %vm3009_vm9 = vweird.f32 %v5436_v47  ;;  %v1036_v32 = vpop.f32.mrf.mxu1 }
 0x234   : > { %v2060_v9 = vsub.f32 1.0, %v2059_v43  ;;  %v2536_v49 = vsel %vm8303_vm0, %v2535_v20, %v2531_v7  ;;  %v3486_v35 = vmul.f32 %v5438_v10, %v3485_v11  ;;  %vm3489_vm10 = vweird.f32 %v5438_v10  ;;  %vm3010_vm11 = vmor %vm3008_vm2, %vm3009_vm9  ;;  %v1193_v20 = vpop.f32.mrf.mxu3 }
 0x235   : > { %5447 = vpow2.f32 %v4496_v51  ;;  %v3701_v40 = vmul.f32 %v2536_v49, %v8096_v58  ;;  %v3007_v37 = vadd.f32 %v5436_v47, %v3006_v5  ;;  %v8342_v23 = vadd.f32 1.0, %v5442_v26  ;;  %vm3490_vm13 = vmor %vm3488_vm3, %vm3489_vm10 }
 0x236   : > { %v5444_v25 = vpop.eup %5443  ;;  %v2061_v36 = vmul.f32 %v8319_v41, %v2060_v9  ;;  %v3487_v56 = vadd.f32 %v5438_v10, %v3486_v35  ;;  %vm2064_vm12 = vweird.f32 %v8319_v41  ;;  %v2067_v50 = vand.u32 2147483647, %v8275_v61 }
 0x237   : > { %v8344_v57 = vpop.eup %5445  ;;  %v2069_v53 = vand.u32 2147483648, %v8275_v61  ;;  %v4802_v58 = vpack.c.bf16 %v3701_v40, %v8230_v38  ;;  %v3011_v28 = vsel %vm3010_vm11, %v5436_v47, %v3007_v37  ;;  %5449 = vrcp.f32 %v8342_v23  ;;  %vm8375_vm14 = vmor %vm2063_vm8, %vm2064_vm12 }
 0x238   : > { %v2062_v48 = vadd.f32 %v8319_v41, %v2061_v36  ;;  %v2539_v16 = vmul.f32 %v8344_v57, %v8316_v4  ;;  %v3016_v63 = vsel %vm8322_vm5, %v3015_v12, %v3011_v28  ;;  %v3491_v39 = vsel %vm3490_vm13, %v5438_v10, %v3487_v56  ;;  %v1116_v12 = vpop.f32.mrf.mxu2 }
 0x239   : > { %v8361_v51 = vadd.f32 1.0, %v5444_v25  ;;  %5014 = vst [vmem:[%s5991_s29 + $0xd0] sm:$0xff] %v4802_v58   ;;  %v3733_v38 = vmul.f32 %v3016_v63, %v8163_v18  ;;  %v3496_v2 = vsel %vm8333_vm7, %v3495_v22, %v3491_v39  ;;  %v2547_v52 = vand.u32 2147483647, %v8316_v4 }
 0x23a   : > { %v2540_v42 = vsub.f32 1.0, %v2539_v16  ;;  %v3764_v29 = vmul.f32 %v8295_v60, %v8007_v21  ;;  %v3765_v34 = vmul.f32 %v3496_v2, %v8172_v1  ;;  %v4528_v19 = vmul.f32 -1.442695, %v8286_v13  ;;  %v956_v60 = vpop.f32.mrf.mxu0 }
 0x23b   : > { %v5448_v44 = vpop.eup %5447  ;;  %v4882_v33 = vpack.c.bf16 %v3733_v38, %v8281_v24  ;;  %v2066_v47 = vsel %vm8375_vm14, %v8319_v41, %v2062_v48  ;;  %v2549_v1 = vand.u32 2147483648, %v8316_v4  ;;  %v2070_v61 = vor.u32 1.1754944e-38, %v2069_v53 }
 0x23c   : > { %v2541_v21 = vmul.f32 %v8344_v57, %v2540_v42  ;;  %v4962_v31 = vpack.c.bf16 %v3765_v34, %v3764_v29  ;;  %5451 = vrcp.f32 %v8361_v51  ;;  %v8393_v24 = vadd.f32 %v8390_v27, %v1193_v20  ;;  %v1196_v20 = vpop.f32.mrf.mxu3 }
 0x23d   : > { %5030 = vst [vmem:[%s5991_s29 + $0x150] sm:$0xff] %v4882_v33   ;;  %vm2068_vm15 = vcmp.eq.f32.partialorder %v2067_v50, 8.507059e+37  ;;  %vm2543_vm1 = vweird.f32 %v8316_v4  ;;  %vm8397_vm0 = vcmp.eq.f32.partialorder %v2547_v52, 8.507059e+37  ;;  %v4560_v10 = vmul.f32 -1.442695, %v8291_v6  ;;  %v8402_v59 = vpop.eup %5449 }
 0x23e   : > { %5046 = vst [vmem:[%s5991_s29 + $0x1d0] sm:$0xff] %v4962_v31   ;;  %v2071_v8 = vsel %vm2068_vm15, %v2070_v61, %v2066_v47  ;;  %v8405_v41 = vadd.f32 1.0, %v5448_v44  ;;  %5453 = vpow2.f32 %v4528_v19  ;;  %v8408_v17 = vadd.f32 %v8390_v27, %v956_v60 }
 0x23f   : > { %v2542_v62 = vadd.f32 %v8344_v57, %v2541_v21  ;;  %vm2544_vm2 = vweird.f32 %v8344_v57  ;;  %v2550_v30 = vor.u32 1.1754944e-38, %v2549_v1  ;;  %v3019_v46 = vmul.f32 %v8402_v59, %v8342_v23 }
 0x240   : > { %vm3023_vm3 = vweird.f32 %v8342_v23  ;;  %v3027_v43 = vand.u32 2147483647, %v8342_v23  ;;  %5455 = vrcp.f32 %v8405_v41  ;;  %v4592_v11 = vmul.f32 -1.442695, %v8393_v24  ;;  %vm8427_vm4 = vmor %vm2543_vm1, %vm2544_vm2 }
 0x241   : > { %v8419_v45 = vmul.f32 %v2071_v8, %v8188_v55  ;;  %v3020_v22 = vsub.f32 1.0, %v3019_v46  ;;  %v3029_v26 = vand.u32 2147483648, %v8342_v23  ;;  %v3507_v7 = vand.u32 2147483647, %v8361_v51 }
 0x242   : > { %v8423_v5 = vpop.eup %5451  ;;  %5457 = vpow2.f32 %v4560_v10  ;;  %v4497_v49 = vmul.f32 -1.442695, %v8408_v17  ;;  %v8433_v35 = vadd.f32 %v8390_v27, %v1036_v32  ;;  %v8436_v55 = vadd.f32 %v8390_v27, %v1116_v12  ;;  %v958_v0 = vpop.f32.mrf.mxu0 }
 0x243   : > { %v2546_v25 = vsel %vm8427_vm4, %v8344_v57, %v2542_v62  ;;  %v3021_v40 = vmul.f32 %v8402_v59, %v3020_v22  ;;  %v3499_v4 = vmul.f32 %v8423_v5, %v8361_v51  ;;  %v3509_v37 = vand.u32 2147483648, %v8361_v51  ;;  %v1038_v10 = vpop.f32.mrf.mxu1 }
 0x244   : > { %v5454_v36 = vpop.eup %5453  ;;  %vm3024_vm5 = vweird.f32 %v8402_v59  ;;  %vm8446_vm6 = vcmp.eq.f32.partialorder %v3027_v43, 8.507059e+37  ;;  %5459 = vpow2.f32 %v4592_v11  ;;  %v4529_v50 = vmul.f32 -1.442695, %v8433_v35 }
 0x245   : > { %v3022_v53 = vadd.f32 %v8402_v59, %v3021_v40  ;;  %v3500_v57 = vsub.f32 1.0, %v3499_v4  ;;  %vm3503_vm7 = vweird.f32 %v8361_v51  ;;  %v8453_v58 = vadd.f32 1.0, %v5454_v36  ;;  %vm8460_vm8 = vmor %vm3023_vm3, %vm3024_vm5 }
 0x246   : > { %v5456_v28 = vpop.eup %5455  ;;  %v2551_v48 = vsel %vm8397_vm0, %v2550_v30, %v2546_v25  ;;  %v3030_v16 = vor.u32 1.1754944e-38, %v3029_v26  ;;  %5461 = vpow2.f32 %v4497_v49  ;;  %v4561_v63 = vmul.f32 -1.442695, %v8436_v55 }
 0x247   : > { %v3501_v38 = vmul.f32 %v8423_v5, %v3500_v57  ;;  %vm8465_vm9 = vcmp.eq.f32.partialorder %v3507_v7, 8.507059e+37  ;;  %v3510_v42 = vor.u32 1.1754944e-38, %v3509_v37  ;;  %v2074_v52 = vmul.f32 %v5456_v28, %v8405_v41 }
 0x248   : > { %5463 = vpow2.f32 %v4529_v50  ;;  %v5458_v44 = vpop.eup %5457  ;;  %v3026_v23 = vsel %vm8460_vm8, %v8402_v59, %v3022_v53  ;;  %vm2078_vm10 = vweird.f32 %v8405_v41  ;;  %v2082_v29 = vand.u32 2147483647, %v8405_v41 }
 0x249   : > { %5465 = vrcp.f32 %v8453_v58  ;;  %v3502_v34 = vadd.f32 %v8423_v5, %v3501_v38  ;;  %vm3504_vm11 = vweird.f32 %v8423_v5  ;;  %v2075_v18 = vsub.f32 1.0, %v2074_v52 }
 0x24a   : > { %v2084_v19 = vand.u32 2147483648, %v8405_v41  ;;  %v5460_v33 = vpop.eup %5459  ;;  %vm2079_vm12 = vweird.f32 %v5456_v28  ;;  %v8479_v47 = vadd.f32 1.0, %v5458_v44  ;;  %5467 = vpow2.f32 %v4561_v63  ;;  %vm8496_vm13 = vmor %vm3503_vm7, %vm3504_vm11 }
 0x24b   : > { %v8482_v21 = vadd.f32 %v8390_v27, %v1196_v20  ;;  %v3031_v1 = vsel %vm8446_vm6, %v3030_v16, %v3026_v23  ;;  %v2076_v60 = vmul.f32 %v5456_v28, %v2075_v18  ;;  %v2562_v31 = vand.u32 2147483647, %v8453_v58  ;;  %vm2080_vm15 = vmor %vm2078_vm10, %vm2079_vm12 }
 0x24c   : > { %v8487_v61 = vadd.f32 1.0, %v5460_v33  ;;  %v5462_v59 = vpop.eup %5461  ;;  %v8490_v8 = vmul.f32 %v2551_v48, %v8219_v15  ;;  %vm8500_vm14 = vcmp.eq.f32.partialorder %v2082_v29, 8.507059e+37  ;;  %v2564_v46 = vand.u32 2147483648, %v8453_v58 }
 0x24d   : > { %5469 = vrcp.f32 %v8479_v47  ;;  %v3506_v15 = vsel %vm8496_vm13, %v8423_v5, %v3502_v34  ;;  %v2077_v12 = vadd.f32 %v5456_v28, %v2076_v60  ;;  %v2085_v43 = vor.u32 1.1754944e-38, %v2084_v19 }
 0x24e   : > { %v5464_v32 = vpop.eup %5463  ;;  %5471 = vrcp.f32 %v8487_v61  ;;  %v8511_v11 = vmul.f32 %v3031_v1, %v8252_v14  ;;  %vm2558_vm1 = vweird.f32 %v8453_v58  ;;  %v8518_v22 = vadd.f32 %v8390_v27, %v958_v0 }
 0x24f   : > { %v5466_v51 = vpop.eup %5465  ;;  %v8521_v26 = vadd.f32 %v8390_v27, %v1038_v10  ;;  %v2081_v7 = vsel %vm2080_vm15, %v5456_v28, %v2077_v12  ;;  %vm8524_vm0 = vcmp.eq.f32.partialorder %v2562_v31, 8.507059e+37  ;;  %v4593_v14 = vmul.f32 -1.442695, %v8482_v21 }
 0x250   : > { %v2554_v5 = vmul.f32 %v5466_v51, %v8453_v58  ;;  %v5468_v49 = vpop.eup %5467  ;;  %v3511_v41 = vsel %vm8465_vm9, %v3510_v42, %v3506_v15  ;;  %v2086_v25 = vsel %vm8500_vm14, %v2085_v43, %v2081_v7  ;;  %v2565_v40 = vor.u32 1.1754944e-38, %v2564_v46 }
 0x251   : > { %v8533_v4 = vadd.f32 1.0, %v5462_v59  ;;  %v3671_v37 = vmul.f32 %v2086_v25, %v8270_v54  ;;  %v3042_v56 = vand.u32 2147483647, %v8479_v47  ;;  %v8537_v50 = vadd.f32 1.0, %v5464_v32  ;;  %v1198_v25 = vpop.f32.mrf.mxu3 }
 0x252   : > { %v2555_v36 = vsub.f32 1.0, %v2554_v5  ;;  %v3044_v57 = vand.u32 2147483648, %v8479_v47  ;;  %v3522_v28 = vand.u32 2147483647, %v8487_v61  ;;  %v8542_v48 = vadd.f32 1.0, %v5468_v49  ;;  %v1118_v5 = vpop.f32.mrf.mxu2 }
 0x253   : > { %v5470_v53 = vpop.eup %5469  ;;  %5473 = vrcp.f32 %v8533_v4  ;;  %v4727_v63 = vpack.c.bf16 %v3671_v37, %v8419_v45  ;;  %vm2559_vm2 = vweird.f32 %v5466_v51  ;;  %v8547_v38 = vmul.f32 %v3511_v41, %v8255_v3 }
 0x254   : > { %v5472_v16 = vpop.eup %5471  ;;  %v2556_v39 = vmul.f32 %v5466_v51, %v2555_v36  ;;  %v3034_v54 = vmul.f32 %v5470_v53, %v8479_v47  ;;  %vm3038_vm3 = vweird.f32 %v8479_v47  ;;  %v3524_v42 = vand.u32 2147483648, %v8487_v61  ;;  %vm2560_vm5 = vmor %vm2558_vm1, %vm2559_vm2 }
 0x255   : > { %v3514_v2 = vmul.f32 %v5472_v16, %v8487_v61  ;;  %4999 = vst [vmem:[%s5991_s29 + $0x58] sm:$0xff] %v4727_v63   ;;  %vm8553_vm4 = vcmp.eq.f32.partialorder %v3042_v56, 8.507059e+37  ;;  %5475 = vrcp.f32 %v8537_v50  ;;  %v3045_v3 = vor.u32 1.1754944e-38, %v3044_v57  ;;  %v961_v63 = vpop.f32.mrf.mxu0 }
 0x256   : > { %v2557_v52 = vadd.f32 %v5466_v51, %v2556_v39  ;;  %v3035_v20 = vsub.f32 1.0, %v3034_v54  ;;  %vm3518_vm6 = vweird.f32 %v8487_v61  ;;  %5477 = vrcp.f32 %v8542_v48 }
 0x257   : > { %v3515_v45 = vsub.f32 1.0, %v3514_v2  ;;  %vm3039_vm7 = vweird.f32 %v5470_v53  ;;  %vm8562_vm8 = vcmp.eq.f32.partialorder %v3522_v28, 8.507059e+37  ;;  %vm3519_vm9 = vweird.f32 %v5472_v16 }
 0x258   : > { %v2561_v23 = vsel %vm2560_vm5, %v5466_v51, %v2557_v52  ;;  %v3036_v29 = vmul.f32 %v5470_v53, %v3035_v20  ;;  %v3525_v33 = vor.u32 1.1754944e-38, %v3524_v42  ;;  %vm2093_vm10 = vweird.f32 %v8533_v4  ;;  %vm3040_vm11 = vmor %vm3038_vm3, %vm3039_vm7 }
 0x259   : > { %v8566_v18 = vpop.eup %5473  ;;  %v2566_v19 = vsel %vm8524_vm0, %v2565_v40, %v2561_v23  ;;  %v3516_v58 = vmul.f32 %v5472_v16, %v3515_v45  ;;  %v2097_v10 = vand.u32 2147483647, %v8533_v4  ;;  %v2099_v59 = vand.u32 2147483648, %v8533_v4  ;;  %vm3520_vm12 = vmor %vm3518_vm6, %vm3519_vm9 }
 0x25a   : > { %v3703_v1 = vmul.f32 %v2566_v19, %v8286_v13  ;;  %v3037_v60 = vadd.f32 %v5470_v53, %v3036_v29  ;;  %v2089_v31 = vmul.f32 %v8566_v18, %v8533_v4  ;;  %5479 = vpow2.f32 %v4593_v14  ;;  %v1041_v29 = vpop.f32.mrf.mxu1 }
 0x25b   : > { %v3517_v0 = vadd.f32 %v5472_v16, %v3516_v58  ;;  %v8578_v62 = vpop.eup %5475  ;;  %v4498_v32 = vmul.f32 -1.442695, %v8518_v22  ;;  %vm2573_vm13 = vweird.f32 %v8537_v50  ;;  %v2577_v49 = vand.u32 2147483647, %v8537_v50 }
 0x25c   : > { %v4807_v13 = vpack.c.bf16 %v3703_v1, %v8490_v8  ;;  %v3041_v30 = vsel %vm3040_vm11, %v5470_v53, %v3037_v60  ;;  %v2090_v46 = vsub.f32 1.0, %v2089_v31  ;;  %v8584_v47 = vpop.eup %5477  ;;  %v2569_v43 = vmul.f32 %v8578_v62, %v8537_v50 }
 0x25d   : > { %v3046_v15 = vsel %vm8553_vm4, %v3045_v3, %v3041_v30  ;;  %v3521_v12 = vsel %vm3520_vm12, %v5472_v16, %v3517_v0  ;;  %v3049_v7 = vmul.f32 %v8584_v47, %v8542_v48  ;;  %v2579_v41 = vand.u32 2147483648, %v8537_v50 }
 0x25e   : > { %5015 = vst [vmem:[%s5991_s29 + $0xd8] sm:$0xff] %v4807_v13   ;;  %v3735_v8 = vmul.f32 %v3046_v15, %v8291_v6  ;;  %v3526_v61 = vsel %vm8562_vm8, %v3525_v33, %v3521_v12  ;;  %v2091_v51 = vmul.f32 %v8566_v18, %v2090_v46  ;;  %v2570_v14 = vsub.f32 1.0, %v2569_v43 }
 0x25f   : > { %v3767_v9 = vmul.f32 %v3526_v61, %v8393_v24  ;;  %vm2094_vm14 = vweird.f32 %v8566_v18  ;;  %v3050_v40 = vsub.f32 1.0, %v3049_v7  ;;  %5481 = vpow2.f32 %v4498_v32  ;;  %v1201_v61 = vpop.f32.mrf.mxu3 }
 0x260   : > { %v4887_v6 = vpack.c.bf16 %v3735_v8, %v8511_v11  ;;  %v5480_v37 = vpop.eup %5479  ;;  %v2571_v56 = vmul.f32 %v8578_v62, %v2570_v14  ;;  %v4530_v24 = vmul.f32 -1.442695, %v8521_v26  ;;  %v8607_v53 = vadd.f32 %v8390_v27, %v1118_v5  ;;  %vm8628_vm0 = vmor %vm2093_vm10, %vm2094_vm14 }
 0x261   : > { %v4967_v36 = vpack.c.bf16 %v3767_v9, %v8547_v38  ;;  %v2092_v57 = vadd.f32 %v8566_v18, %v2091_v51  ;;  %v3051_v28 = vmul.f32 %v8584_v47, %v3050_v40  ;;  %v8612_v11 = vadd.f32 1.0, %v5480_v37  ;;  %v963_v51 = vpop.f32.mrf.mxu0 }
 0x262   : > { %5031 = vst [vmem:[%s5991_s29 + $0x158] sm:$0xff] %v4887_v6   ;;  %v8615_v16 = vadd.f32 %v8390_v27, %v1198_v25  ;;  %v2572_v39 = vadd.f32 %v8578_v62, %v2571_v56  ;;  %vm2574_vm15 = vweird.f32 %v8578_v62  ;;  %5483 = vpow2.f32 %v4530_v24 }
 0x263   : > { %5047 = vst [vmem:[%s5991_s29 + $0x1d8] sm:$0xff] %v4967_v36   ;;  %v4562_v54 = vmul.f32 -1.442695, %v8607_v53  ;;  %v3052_v38 = vadd.f32 %v8584_v47, %v3051_v28  ;;  %vm3054_vm1 = vweird.f32 %v8584_v47  ;;  %5485 = vrcp.f32 %v8612_v11  ;;  %vm8643_vm4 = vmor %vm2573_vm13, %vm2574_vm15 }
 0x264   : > { %vm8632_vm2 = vcmp.eq.f32.partialorder %v2097_v10, 8.507059e+37  ;;  %vm3053_vm3 = vweird.f32 %v8542_v48  ;;  %v3059_v52 = vand.u32 2147483648, %v8542_v48  ;;  %v2096_v44 = vsel %vm8628_vm0, %v8566_v18, %v2092_v57 }
 0x265   : > { %5487 = vpow2.f32 %v4562_v54  ;;  %v5482_v20 = vpop.eup %5481  ;;  %v3057_v3 = vand.u32 2147483647, %v8542_v48  ;;  %v4594_v45 = vmul.f32 -1.442695, %v8615_v16  ;;  %v8650_v23 = vadd.f32 %v8390_v27, %v961_v63  ;;  %vm8657_vm6 = vmor %vm3053_vm3, %vm3054_vm1 }
 0x266   : > { %v2100_v34 = vor.u32 1.1754944e-38, %v2099_v59  ;;  %v2576_v19 = vsel %vm8643_vm4, %v8578_v62, %v2572_v39  ;;  %vm2578_vm5 = vcmp.eq.f32.partialorder %v2577_v49, 8.507059e+37  ;;  %v2580_v18 = vor.u32 1.1754944e-38, %v2579_v41 }
 0x267   : > { %v3056_v48 = vsel %vm8657_vm6, %v8584_v47, %v3052_v38  ;;  %v8664_v58 = vadd.f32 1.0, %v5482_v20  ;;  %5489 = vpow2.f32 %v4594_v45  ;;  %v4499_v33 = vmul.f32 -1.442695, %v8650_v23  ;;  %v1121_v47 = vpop.f32.mrf.mxu2 }
 0x268   : > { %v5484_v1 = vpop.eup %5483  ;;  %v2101_v60 = vsel %vm8632_vm2, %v2100_v34, %v2096_v44  ;;  %v3060_v31 = vor.u32 1.1754944e-38, %v3059_v52  ;;  %v3539_v0 = vand.u32 2147483648, %v8612_v11  ;;  %v8671_v10 = vadd.f32 %v8390_v27, %v1041_v29 }
 0x269   : > { %v8673_v59 = vpop.eup %5485  ;;  %v2581_v62 = vsel %vm2578_vm5, %v2580_v18, %v2576_v19  ;;  %vm3058_vm7 = vcmp.eq.f32.partialorder %v3057_v3, 8.507059e+37  ;;  %5491 = vrcp.f32 %v8664_v58  ;;  %v8678_v32 = vadd.f32 1.0, %v5484_v1 }
 0x26a   : > { %v3061_v30 = vsel %vm3058_vm7, %v3060_v31, %v3056_v48  ;;  %v3529_v46 = vmul.f32 %v8673_v59, %v8612_v11  ;;  %5493 = vpow2.f32 %v4499_v33  ;;  %v8681_v15 = vmul.f32 %v2101_v60, %v8408_v17 }
 0x26b   : > { %v5488_v13 = vpop.eup %5487  ;;  %v3537_v12 = vand.u32 2147483647, %v8612_v11  ;;  %v4531_v8 = vmul.f32 -1.442695, %v8671_v10  ;;  %v8688_v7 = vmul.f32 %v2581_v62, %v8433_v35  ;;  %v8690_v5 = vor.u32 1.1754944e-38, %v3539_v0 }
 0x26c   : > { %v8684_v43 = vadd.f32 1.0, %v5488_v13  ;;  %v2112_v9 = vand.u32 2147483647, %v8664_v58  ;;  %5495 = vrcp.f32 %v8678_v32  ;;  %v8695_v17 = vmul.f32 %v3061_v30, %v8436_v55 }
 0x26d   : > { %v5490_v14 = vpop.eup %5489  ;;  %v3530_v49 = vsub.f32 1.0, %v3529_v46  ;;  %v2114_v41 = vand.u32 2147483648, %v8664_v58  ;;  %v8702_v35 = vadd.f32 %v8390_v27, %v1121_v47  ;;  %v8705_v6 = vadd.f32 %v8390_v27, %v1201_v61 }
 0x26e   : > { %5497 = vrcp.f32 %v8684_v43  ;;  %v8699_v25 = vadd.f32 1.0, %v5490_v14  ;;  %v8708_v40 = vadd.f32 %v8390_v27, %v963_v51  ;;  %vm3533_vm8 = vweird.f32 %v8612_v11 }
 0x26f   : > { %v5492_v37 = vpop.eup %5491  ;;  %vm2108_vm9 = vweird.f32 %v8664_v58  ;;  %v2592_v55 = vand.u32 2147483647, %v8678_v32  ;;  %v2594_v36 = vand.u32 2147483648, %v8678_v32  ;;  %5499 = vpow2.f32 %v4531_v8  ;;  %v1123_v4 = vpop.f32.mrf.mxu2 }
 0x270   : > { %v5494_v56 = vpop.eup %5493  ;;  %vm3534_vm10 = vweird.f32 %v8673_v59  ;;  %v2104_v24 = vmul.f32 %v5492_v37, %v8664_v58  ;;  %vm8716_vm11 = vcmp.eq.f32.partialorder %v2112_v9, 8.507059e+37  ;;  %v3072_v28 = vand.u32 2147483647, %v8684_v43 }
 0x271   : > { %v3531_v63 = vmul.f32 %v8673_v59, %v3530_v49  ;;  %v2115_v39 = vor.u32 1.1754944e-38, %v2114_v41  ;;  %v3074_v54 = vand.u32 2147483648, %v8684_v43  ;;  %5501 = vrcp.f32 %v8699_v25  ;;  %vm8755_vm5 = vmor %vm3533_vm8, %vm3534_vm10 }
 0x272   : > { %v5496_v38 = vpop.eup %5495  ;;  %v2105_v2 = vsub.f32 1.0, %v2104_v24  ;;  %vm2588_vm12 = vweird.f32 %v8678_v32  ;;  %v8725_v42 = vadd.f32 1.0, %v5494_v56  ;;  %v4563_v52 = vmul.f32 -1.442695, %v8702_v35 }
 0x273   : > { %v2584_v44 = vmul.f32 %v5496_v38, %v8678_v32  ;;  %vm8729_vm13 = vcmp.eq.f32.partialorder %v2592_v55, 8.507059e+37  ;;  %v2595_v3 = vor.u32 1.1754944e-38, %v2594_v36  ;;  %vm3068_vm14 = vweird.f32 %v8684_v43 }
 0x274   : > { %v5498_v20 = vpop.eup %5497  ;;  %vm8734_vm15 = vcmp.eq.f32.partialorder %v3537_v12, 8.507059e+37  ;;  %v2106_v29 = vmul.f32 %v5492_v37, %v2105_v2  ;;  %vm2109_vm1 = vweird.f32 %v5492_v37  ;;  %vm8739_vm0 = vcmp.eq.f32.partialorder %v3072_v28, 8.507059e+37 }
 0x275   : > { %v3064_v34 = vmul.f32 %v5498_v20, %v8684_v43  ;;  %v5500_v18 = vpop.eup %5499  ;;  %v3532_v50 = vadd.f32 %v8673_v59, %v3531_v63  ;;  %v2585_v48 = vsub.f32 1.0, %v2584_v44  ;;  %v3075_v33 = vor.u32 1.1754944e-38, %v3074_v54  ;;  %vm2110_vm3 = vmor %vm2108_vm9, %vm2109_vm1  ;;  %v1043_v63 = vpop.f32.mrf.mxu1 }
 0x276   : > { %5503 = vrcp.f32 %v8725_v42  ;;  %v2107_v1 = vadd.f32 %v5492_v37, %v2106_v29  ;;  %vm3548_vm2 = vweird.f32 %v8699_v25  ;;  %vm2589_vm4 = vweird.f32 %v5496_v38 }
 0x277   : > { %v3065_v60 = vsub.f32 1.0, %v3064_v34  ;;  %5505 = vpow2.f32 %v4563_v52  ;;  %v5502_v31 = vpop.eup %5501  ;;  %v2586_v0 = vmul.f32 %v5496_v38, %v2585_v48  ;;  %v3552_v62 = vand.u32 2147483647, %v8699_v25  ;;  %vm2590_vm7 = vmor %vm2588_vm12, %vm2589_vm4 }
 0x278   : > { %v8749_v13 = vadd.f32 1.0, %v5500_v18  ;;  %v2111_v46 = vsel %vm2110_vm3, %v5492_v37, %v2107_v1  ;;  %vm3069_vm6 = vweird.f32 %v5498_v20  ;;  %v3544_v58 = vmul.f32 %v5502_v31, %v8699_v25 }
 0x279   : > { %v3066_v47 = vmul.f32 %v5498_v20, %v3065_v60  ;;  %v3536_v12 = vsel %vm8755_vm5, %v8673_v59, %v3532_v50  ;;  %v2116_v8 = vsel %vm8716_vm11, %v2115_v39, %v2111_v46  ;;  %v2587_v61 = vadd.f32 %v5496_v38, %v2586_v0  ;;  %vm3070_vm8 = vmor %vm3068_vm14, %vm3069_vm6  ;;  %v966_v0 = vpop.f32.mrf.mxu0 }
 0x27a   : > { %v3554_v51 = vand.u32 2147483648, %v8699_v25  ;;  %v3673_v11 = vmul.f32 %v2116_v8, %v8518_v22  ;;  %v3545_v14 = vsub.f32 1.0, %v3544_v58  ;;  %5507 = vrcp.f32 %v8749_v13 }
 0x27b   : > { %v3067_v9 = vadd.f32 %v5498_v20, %v3066_v47  ;;  %v2591_v41 = vsel %vm2590_vm7, %v5496_v38, %v2587_v61  ;;  %vm3549_vm9 = vweird.f32 %v5502_v31  ;;  %v4595_v59 = vmul.f32 -1.442695, %v8705_v6 }
 0x27c   : > { %v8770_v49 = vpop.eup %5503  ;;  %v4500_v37 = vmul.f32 -1.442695, %v8708_v40  ;;  %v4732_v32 = vpack.c.bf16 %v3673_v11, %v8681_v15  ;;  %v2596_v55 = vsel %vm8729_vm13, %v2595_v3, %v2591_v41  ;;  %v3546_v56 = vmul.f32 %v5502_v31, %v3545_v14  ;;  %vm3550_vm11 = vmor %vm3548_vm2, %vm3549_vm9 }
 0x27d   : > { %v5506_v22 = vpop.eup %5505  ;;  %v3071_v36 = vsel %vm3070_vm8, %v5498_v20, %v3067_v9  ;;  %v3541_v24 = vsel %vm8734_vm15, %v8690_v5, %v3536_v12  ;;  %v3705_v43 = vmul.f32 %v2596_v55, %v8521_v26  ;;  %v2119_v28 = vmul.f32 %v8770_v49, %v8725_v42  ;;  %v1046_v14 = vpop.f32.mrf.mxu1 }
 0x27e   : > { %v3076_v57 = vsel %vm8739_vm0, %v3075_v33, %v3071_v36  ;;  %5000 = vst [vmem:[%s5991_s29 + $0x60] sm:$0xff] %v4732_v32   ;;  %v3547_v39 = vadd.f32 %v5502_v31, %v3546_v56  ;;  %vm3553_vm10 = vcmp.eq.f32.partialorder %v3552_v62, 8.507059e+37  ;;  %v3555_v54 = vor.u32 1.1754944e-38, %v3554_v51 }
 0x27f   : > { %v3737_v15 = vmul.f32 %v3076_v57, %v8607_v53  ;;  %v4812_v38 = vpack.c.bf16 %v3705_v43, %v8688_v7  ;;  %v2120_v26 = vsub.f32 1.0, %v2119_v28  ;;  %v8793_v5 = vadd.f32 1.0, %v5506_v22 }
 0x280   : > { %5509 = vpow2.f32 %v4595_v59  ;;  %v8795_v2 = vpop.eup %5507  ;;  %v3551_v20 = vsel %vm3550_vm11, %v5502_v31, %v3547_v39  ;;  %v8799_v53 = vadd.f32 %v8390_v27, %v1043_v63  ;;  %v3768_v3 = vmul.f32 %v3541_v24, %v8482_v21 }
 0x281   : > { %v4892_v52 = vpack.c.bf16 %v3737_v15, %v8695_v17  ;;  %5511 = vpow2.f32 %v4500_v37  ;;  %5016 = vst [vmem:[%s5991_s29 + $0xe0] sm:$0xff] %v4812_v38   ;;  %v3556_v7 = vsel %vm3553_vm10, %v3555_v54, %v3551_v20  ;;  %v2121_v44 = vmul.f32 %v8770_v49, %v2120_v26  ;;  %v1203_v17 = vpop.f32.mrf.mxu3 }
 0x282   : > { %v2599_v25 = vmul.f32 %v8795_v2, %v8749_v13  ;;  %v3769_v45 = vmul.f32 %v3556_v7, %v8615_v16  ;;  %5513 = vrcp.f32 %v8793_v5  ;;  %vm2123_vm12 = vweird.f32 %v8725_v42  ;;  %v1126_v7 = vpop.f32.mrf.mxu2 }
 0x283   : > { %5032 = vst [vmem:[%s5991_s29 + $0x160] sm:$0xff] %v4892_v52   ;;  %v4532_v34 = vmul.f32 -1.442695, %v8799_v53  ;;  %v2122_v18 = vadd.f32 %v8770_v49, %v2121_v44  ;;  %vm2124_vm13 = vweird.f32 %v8770_v49  ;;  %v8814_v50 = vadd.f32 %v8390_v27, %v1123_v4 }
 0x284   : > { %v2600_v29 = vsub.f32 1.0, %v2599_v25  ;;  %v4972_v19 = vpack.c.bf16 %v3769_v45, %v3768_v3  ;;  %v8818_v16 = vadd.f32 %v8390_v27, %v1203_v17  ;;  %v2127_v1 = vand.u32 2147483647, %v8725_v42  ;;  %vm8827_vm14 = vmor %vm2123_vm12, %vm2124_vm13 }
 0x285   : > { %5515 = vpow2.f32 %v4532_v34  ;;  %v2129_v60 = vand.u32 2147483648, %v8725_v42  ;;  %vm2603_vm15 = vweird.f32 %v8749_v13  ;;  %vm2604_vm1 = vweird.f32 %v8795_v2 }
 0x286   : > { %v5510_v21 = vpop.eup %5509  ;;  %v2601_v48 = vmul.f32 %v8795_v2, %v2600_v29  ;;  %5048 = vst [vmem:[%s5991_s29 + $0x1e0] sm:$0xff] %v4972_v19   ;;  %v2607_v30 = vand.u32 2147483647, %v8749_v13  ;;  %v2126_v58 = vsel %vm8827_vm14, %v8770_v49, %v2122_v18  ;;  %v4564_v12 = vmul.f32 -1.442695, %v8814_v50  ;;  %vm8856_vm2 = vmor %vm2603_vm15, %vm2604_vm1 }
 0x287   : > { %v5512_v33 = vpop.eup %5511  ;;  %v8823_v31 = vadd.f32 1.0, %v5510_v21  ;;  %v4596_v61 = vmul.f32 -1.442695, %v8818_v16  ;;  %v8849_v51 = vadd.f32 %v8390_v27, %v966_v0  ;;  %vm2128_vm0 = vcmp.eq.f32.partialorder %v2127_v1, 8.507059e+37 }
 0x288   : > { %v8834_v46 = vadd.f32 1.0, %v5512_v33  ;;  %v8836_v47 = vpop.eup %5513  ;;  %v2602_v42 = vadd.f32 %v8795_v2, %v2601_v48  ;;  %v2130_v11 = vor.u32 1.1754944e-38, %v2129_v60  ;;  %v2609_v9 = vand.u32 2147483648, %v8749_v13 }
 0x289   : > { %5517 = vrcp.f32 %v8823_v31  ;;  %v3079_v8 = vmul.f32 %v8836_v47, %v8793_v5  ;;  %vm8860_vm3 = vcmp.eq.f32.partialorder %v2607_v30, 8.507059e+37  ;;  %v3087_v22 = vand.u32 2147483647, %v8793_v5 }
 0x28a   : > { %5519 = vrcp.f32 %v8834_v46  ;;  %v3089_v32 = vand.u32 2147483648, %v8793_v5  ;;  %v2131_v55 = vsel %vm2128_vm0, %v2130_v11, %v2126_v58  ;;  %v2606_v36 = vsel %vm8856_vm2, %v8795_v2, %v2602_v42 }
 0x28b   : > { %v5516_v49 = vpop.eup %5515  ;;  %v3080_v37 = vsub.f32 1.0, %v3079_v8  ;;  %5521 = vpow2.f32 %v4564_v12  ;;  %v4501_v24 = vmul.f32 -1.442695, %v8849_v51  ;;  %v8874_v43 = vadd.f32 %v8390_v27, %v1046_v14  ;;  %v1206_v12 = vpop.f32.mrf.mxu3 }
 0x28c   : > { %v8869_v56 = vadd.f32 1.0, %v5516_v49  ;;  %5523 = vpow2.f32 %v4596_v61  ;;  %v2610_v28 = vor.u32 1.1754944e-38, %v2609_v9  ;;  %vm3083_vm4 = vweird.f32 %v8793_v5  ;;  %v968_v49 = vpop.f32.mrf.mxu0 }
 0x28d   : > { %v3081_v13 = vmul.f32 %v8836_v47, %v3080_v37  ;;  %v3569_v63 = vand.u32 2147483648, %v8823_v31  ;;  %v8882_v39 = vmul.f32 %v2131_v55, %v8650_v23  ;;  %vm8884_vm5 = vcmp.eq.f32.partialorder %v3087_v22, 8.507059e+37 }
 0x28e   : > { %5525 = vrcp.f32 %v8869_v56  ;;  %v3090_v38 = vor.u32 1.1754944e-38, %v3089_v32  ;;  %v3567_v26 = vand.u32 2147483647, %v8823_v31  ;;  %v2611_v2 = vsel %vm8860_vm3, %v2610_v28, %v2606_v36 }
 0x28f   : > { %v8876_v57 = vpop.eup %5517  ;;  %vm3084_vm6 = vweird.f32 %v8836_v47  ;;  %v3082_v23 = vadd.f32 %v8836_v47, %v3081_v13  ;;  %v2142_v44 = vand.u32 2147483647, %v8834_v46  ;;  %5527 = vpow2.f32 %v4501_v24 }
 0x290   : > { %v5520_v15 = vpop.eup %5519  ;;  %v3559_v52 = vmul.f32 %v8876_v57, %v8823_v31  ;;  %v4533_v25 = vmul.f32 -1.442695, %v8874_v43  ;;  %v8898_v3 = vor.u32 1.1754944e-38, %v3569_v63  ;;  %vm2138_vm7 = vweird.f32 %v8834_v46  ;;  %vm8914_vm8 = vmor %vm3083_vm4, %vm3084_vm6 }
 0x291   : > { %v2134_v20 = vmul.f32 %v5520_v15, %v8834_v46  ;;  %v5522_v4 = vpop.eup %5521  ;;  %v2144_v17 = vand.u32 2147483648, %v8834_v46  ;;  %v8903_v34 = vmul.f32 %v2611_v2, %v8671_v10  ;;  %v8908_v18 = vadd.f32 %v8390_v27, %v1126_v7 }
 0x292   : > { %v5524_v29 = vpop.eup %5523  ;;  %v8905_v19 = vadd.f32 1.0, %v5522_v4  ;;  %5529 = vpow2.f32 %v4533_v25  ;;  %v3560_v33 = vsub.f32 1.0, %v3559_v52  ;;  %vm2139_vm9 = vweird.f32 %v5520_v15 }
 0x293   : > { %v2135_v45 = vsub.f32 1.0, %v2134_v20  ;;  %v8918_v10 = vadd.f32 1.0, %v5524_v29  ;;  %v3086_v60 = vsel %vm8914_vm8, %v8836_v47, %v3082_v23  ;;  %vm8923_vm10 = vcmp.eq.f32.partialorder %v2142_v44, 8.507059e+37  ;;  %vm2140_vm12 = vmor %vm2138_vm7, %vm2139_vm9 }
 0x294   : > { %v5526_v21 = vpop.eup %5525  ;;  %5531 = vrcp.f32 %v8905_v19  ;;  %vm3563_vm11 = vweird.f32 %v8823_v31  ;;  %v2145_v30 = vor.u32 1.1754944e-38, %v2144_v17  ;;  %v2622_v58 = vand.u32 2147483647, %v8869_v56 }
 0x295   : > { %v2136_v1 = vmul.f32 %v5520_v15, %v2135_v45  ;;  %v2614_v62 = vmul.f32 %v5526_v21, %v8869_v56  ;;  %v2624_v42 = vand.u32 2147483648, %v8869_v56  ;;  %v5528_v8 = vpop.eup %5527  ;;  %vm2618_vm13 = vweird.f32 %v8869_v56 }
 0x296   : > { %5533 = vrcp.f32 %v8918_v10  ;;  %v4565_v61 = vmul.f32 -1.442695, %v8908_v18  ;;  %v3091_v11 = vsel %vm8884_vm5, %v3090_v38, %v3086_v60  ;;  %v3561_v9 = vmul.f32 %v8876_v57, %v3560_v33 }
 0x297   : > { %v2137_v5 = vadd.f32 %v5520_v15, %v2136_v1  ;;  %v2615_v47 = vsub.f32 1.0, %v2614_v62  ;;  %vm3564_vm14 = vweird.f32 %v8876_v57  ;;  %vm2619_vm15 = vweird.f32 %v5526_v21 }
 0x298   : > { %v5530_v41 = vpop.eup %5529  ;;  %v8944_v37 = vadd.f32 %v8390_v27, %v1206_v12  ;;  %vm8946_vm1 = vcmp.eq.f32.partialorder %v3567_v26, 8.507059e+37  ;;  %vm8951_vm0 = vcmp.eq.f32.partialorder %v2622_v58, 8.507059e+37  ;;  %v2625_v36 = vor.u32 1.1754944e-38, %v2624_v42  ;;  %vm2620_vm2 = vmor %vm2618_vm13, %vm2619_vm15 }
 0x299   : > { %v2141_v14 = vsel %vm2140_vm12, %v5520_v15, %v2137_v5  ;;  %v2616_v59 = vmul.f32 %v5526_v21, %v2615_v47  ;;  %v8955_v13 = vadd.f32 1.0, %v5528_v8  ;;  %v8957_v63 = vadd.f32 1.0, %v5530_v41  ;;  %vm8983_vm4 = vmor %vm3563_vm11, %vm3564_vm14 }
 0x29a   : > { %v2146_v46 = vsel %vm8923_vm10, %v2145_v30, %v2141_v14  ;;  %v5532_v24 = vpop.eup %5531  ;;  %5535 = vpow2.f32 %v4565_v61  ;;  %v8960_v15 = vadd.f32 %v8390_v27, %v968_v49  ;;  %v8963_v54 = vmul.f32 %v3091_v11, %v8702_v35  ;;  %v1048_v30 = vpop.f32.mrf.mxu1 }
 0x29b   : > { %v3675_v32 = vmul.f32 %v2146_v46, %v8708_v40  ;;  %v2617_v28 = vadd.f32 %v5526_v21, %v2616_v59  ;;  %v3562_v40 = vadd.f32 %v8876_v57, %v3561_v9  ;;  %v3094_v26 = vmul.f32 %v5532_v24, %v8905_v19  ;;  %v9020_v9 = vld [vmem:[%s9362_s2] ss:$0 sm:$0xff] }
 0x29c   : > { %v5534_v2 = vpop.eup %5533  ;;  %vm3098_vm3 = vweird.f32 %v8905_v19  ;;  %5537 = vrcp.f32 %v8955_v13  ;;  %v4597_v27 = vmul.f32 -1.442695, %v8944_v37  ;;  %v3104_v44 = vand.u32 2147483648, %v8905_v19 }
 0x29d   : > { %v4737_v38 = vpack.c.bf16 %v3675_v32, %v8882_v39  ;;  %v2621_v52 = vsel %vm2620_vm2, %v5526_v21, %v2617_v28  ;;  %v3095_v20 = vsub.f32 1.0, %v3094_v26  ;;  %v3102_v39 = vand.u32 2147483647, %v8905_v19  ;;  %v1128_v19 = vpop.f32.mrf.mxu2 }
 0x29e   : > { %v2626_v35 = vsel %vm8951_vm0, %v2625_v36, %v2621_v52  ;;  %v3574_v56 = vmul.f32 %v5534_v2, %v8918_v10  ;;  %5539 = vrcp.f32 %v8957_v63  ;;  %v4502_v25 = vmul.f32 -1.442695, %v8960_v15 }
 0x29f   : > { %5001 = vst [vmem:[%s5991_s29 + $0x68] sm:$0xff] %v4737_v38   ;;  %v3707_v23 = vmul.f32 %v2626_v35, %v8799_v53  ;;  %v3566_v4 = vsel %vm8983_vm4, %v8876_v57, %v3562_v40  ;;  %v3096_v45 = vmul.f32 %v5532_v24, %v3095_v20  ;;  %vm3099_vm5 = vweird.f32 %v5532_v24 }
 0x2a0   : > { %v3575_v31 = vsub.f32 1.0, %v3574_v56  ;;  %v5536_v17 = vpop.eup %5535  ;;  %v3582_v21 = vand.u32 2147483647, %v8918_v10  ;;  %v3584_v53 = vand.u32 2147483648, %v8918_v10  ;;  %5541 = vpow2.f32 %v4597_v27  ;;  %vm3100_vm7 = vmor %vm3098_vm3, %vm3099_vm5 }
 0x2a1   : > { %v4817_v29 = vpack.c.bf16 %v3707_v23, %v8903_v34  ;;  %v3097_v48 = vadd.f32 %v5532_v24, %v3096_v45  ;;  %vm3579_vm6 = vweird.f32 %v5534_v2  ;;  %v8997_v1 = vadd.f32 1.0, %v5536_v17 }
 0x2a2   : > { %v3576_v33 = vmul.f32 %v5534_v2, %v3575_v31  ;;  %v8999_v60 = vpop.eup %5537  ;;  %v3571_v57 = vsel %vm8946_vm1, %v8898_v3, %v3566_v4  ;;  %v3105_v34 = vor.u32 1.1754944e-38, %v3104_v44  ;;  %vm3578_vm8 = vweird.f32 %v8918_v10 }
 0x2a3   : > { %5017 = vst [vmem:[%s5991_s29 + $0xe8] sm:$0xff] %v4817_v29   ;;  %5543 = vpow2.f32 %v4502_v25  ;;  %v3101_v0 = vsel %vm3100_vm7, %v5532_v24, %v3097_v48  ;;  %vm3103_vm9 = vcmp.eq.f32.partialorder %v3102_v39, 8.507059e+37  ;;  %v2149_v5 = vmul.f32 %v8999_v60, %v8955_v13  ;;  %vm3580_vm10 = vmor %vm3578_vm8, %vm3579_vm6 }
 0x2a4   : > { %v3577_v62 = vadd.f32 %v5534_v2, %v3576_v33  ;;  %v9010_v58 = vpop.eup %5539  ;;  %v3106_v42 = vsel %vm3103_vm9, %v3105_v34, %v3101_v0  ;;  %vm3583_vm11 = vcmp.eq.f32.partialorder %v3582_v21, 8.507059e+37  ;;  %v3585_v3 = vor.u32 1.1754944e-38, %v3584_v53 }
 0x2a5   : > { %5545 = vrcp.f32 %v8997_v1  ;;  %v3739_v10 = vmul.f32 %v3106_v42, %v8814_v50  ;;  %v2150_v8 = vsub.f32 1.0, %v2149_v5  ;;  %v2629_v47 = vmul.f32 %v9010_v58, %v8957_v63  ;;  %v1051_v5 = vpop.f32.mrf.mxu1 }
 0x2a6   : > { %v3581_v12 = vsel %vm3580_vm10, %v5534_v2, %v3577_v62  ;;  %v5542_v61 = vpop.eup %5541  ;;  %v9023_v14 = vadd.f32 %v9020_v9, %v1048_v30  ;;  %v3770_v49 = vmul.f32 %v3571_v57, %v8705_v6  ;;  %v9029_v46 = vadd.f32 %v9020_v9, %v1128_v19  ;;  %v971_v2 = vpop.f32.mrf.mxu0 }
 0x2a7   : > { %v3586_v11 = vsel %vm3583_vm11, %v3585_v3, %v3581_v12  ;;  %v4897_v50 = vpack.c.bf16 %v3739_v10, %v8963_v54  ;;  %v9031_v22 = vadd.f32 1.0, %v5542_v61  ;;  %v2151_v55 = vmul.f32 %v8999_v60, %v2150_v8  ;;  %v1208_v54 = vpop.f32.mrf.mxu3 }
 0x2a8   : > { %v3771_v41 = vmul.f32 %v3586_v11, %v8818_v16  ;;  %v2630_v36 = vsub.f32 1.0, %v2629_v47  ;;  %v4534_v6 = vmul.f32 -1.442695, %v9023_v14  ;;  %v4566_v16 = vmul.f32 -1.442695, %v9029_v46  ;;  %v1131_v11 = vpop.f32.mrf.mxu2 }
 0x2a9   : > { %v5544_v59 = vpop.eup %5543  ;;  %5033 = vst [vmem:[%s5991_s29 + $0x168] sm:$0xff] %v4897_v50   ;;  %5547 = vrcp.f32 %v9031_v22  ;;  %vm2153_vm12 = vweird.f32 %v8955_v13  ;;  %v2152_v40 = vadd.f32 %v8999_v60, %v2151_v55  ;;  %vm2154_vm13 = vweird.f32 %v8999_v60 }
 0x2aa   : > { %v4977_v32 = vpack.c.bf16 %v3771_v41, %v3770_v49  ;;  %v9035_v24 = vadd.f32 1.0, %v5544_v59  ;;  %v2631_v38 = vmul.f32 %v9010_v58, %v2630_v36  ;;  %v2157_v52 = vand.u32 2147483647, %v8955_v13  ;;  %vm9059_vm14 = vmor %vm2153_vm12, %vm2154_vm13 }
 0x2ab   : > { %v9037_v28 = vpop.eup %5545  ;;  %v2159_v27 = vand.u32 2147483648, %v8955_v13  ;;  %v2637_v35 = vand.u32 2147483647, %v8957_v63  ;;  %v2639_v20 = vand.u32 2147483648, %v8957_v63  ;;  %v9055_v39 = vadd.f32 %v9020_v9, %v1208_v54 }
 0x2ac   : > { %5049 = vst [vmem:[%s5991_s29 + $0x1e8] sm:$0xff] %v4977_v32   ;;  %5549 = vrcp.f32 %v9035_v24  ;;  %v3109_v26 = vmul.f32 %v9037_v28, %v8997_v1  ;;  %vm2633_vm15 = vweird.f32 %v8957_v63  ;;  %vm2634_vm1 = vweird.f32 %v9010_v58 }
 0x2ad   : > { %5551 = vpow2.f32 %v4534_v6  ;;  %v3119_v7 = vand.u32 2147483648, %v8997_v1  ;;  %v9067_v23 = vadd.f32 %v9020_v9, %v971_v2  ;;  %v2156_v25 = vsel %vm9059_vm14, %v8999_v60, %v2152_v40  ;;  %vm9088_vm4 = vmor %vm2633_vm15, %vm2634_vm1 }
 0x2ae   : > { %5553 = vpow2.f32 %v4566_v16  ;;  %v2632_v13 = vadd.f32 %v9010_v58, %v2631_v38  ;;  %v3110_v4 = vsub.f32 1.0, %v3109_v26  ;;  %v4598_v45 = vmul.f32 -1.442695, %v9055_v39  ;;  %v973_v41 = vpop.f32.mrf.mxu0 }
 0x2af   : > { %v9069_v44 = vpop.eup %5547  ;;  %vm2158_vm0 = vcmp.eq.f32.partialorder %v2157_v52, 8.507059e+37  ;;  %v2160_v17 = vor.u32 1.1754944e-38, %v2159_v27  ;;  %vm9076_vm2 = vcmp.eq.f32.partialorder %v2637_v35, 8.507059e+37  ;;  %v4503_v21 = vmul.f32 -1.442695, %v9067_v23  ;;  %v1211_v2 = vpop.f32.mrf.mxu3 }
 0x2b0   : > { %v2640_v53 = vor.u32 1.1754944e-38, %v2639_v20  ;;  %vm3113_vm3 = vweird.f32 %v8997_v1  ;;  %v3117_v48 = vand.u32 2147483647, %v8997_v1  ;;  %v3120_v0 = vor.u32 1.1754944e-38, %v3119_v7 }
 0x2b1   : > { %v2161_v57 = vsel %vm2158_vm0, %v2160_v17, %v2156_v25  ;;  %v3589_v62 = vmul.f32 %v9069_v44, %v9031_v22  ;;  %5555 = vpow2.f32 %v4598_v45  ;;  %v2636_v42 = vsel %vm9088_vm4, %v9010_v58, %v2632_v13 }
 0x2b2   : > { %v5550_v31 = vpop.eup %5549  ;;  %v3111_v3 = vmul.f32 %v9037_v28, %v3110_v4  ;;  %v2172_v63 = vand.u32 2147483647, %v9035_v24  ;;  %v2174_v12 = vand.u32 2147483648, %v9035_v24  ;;  %5557 = vpow2.f32 %v4503_v21 }
 0x2b3   : > { %v2164_v33 = vmul.f32 %v5550_v31, %v9035_v24  ;;  %v5552_v60 = vpop.eup %5551  ;;  %vm9104_vm5 = vcmp.eq.f32.partialorder %v3117_v48, 8.507059e+37  ;;  %vm2169_vm6 = vweird.f32 %v5550_v31  ;;  %v9110_v58 = vadd.f32 %v9020_v9, %v1051_v5 }
 0x2b4   : > { %v5554_v30 = vpop.eup %5553  ;;  %v9098_v10 = vadd.f32 1.0, %v5552_v60  ;;  %vm3114_vm7 = vweird.f32 %v9037_v28  ;;  %v3590_v49 = vsub.f32 1.0, %v3589_v62  ;;  %v3597_v50 = vand.u32 2147483647, %v9031_v22 }
 0x2b5   : > { %v2165_v19 = vsub.f32 1.0, %v2164_v33  ;;  %v9102_v8 = vadd.f32 1.0, %v5554_v30  ;;  %v2641_v59 = vsel %vm9076_vm2, %v2640_v53, %v2636_v42  ;;  %v3112_v32 = vadd.f32 %v9037_v28, %v3111_v3  ;;  %vm9137_vm12 = vmor %vm3113_vm3, %vm3114_vm7 }
 0x2b6   : > { %5559 = vrcp.f32 %v9098_v10  ;;  %vm2168_vm8 = vweird.f32 %v9035_v24  ;;  %v3676_v6 = vmul.f32 %v2161_v57, %v8849_v51  ;;  %v3599_v16 = vand.u32 2147483648, %v9031_v22 }
 0x2b7   : > { %v2166_v61 = vmul.f32 %v5550_v31, %v2165_v19  ;;  %5561 = vrcp.f32 %v9102_v8  ;;  %v5556_v36 = vpop.eup %5555  ;;  %vm2170_vm9 = vmor %vm2168_vm8, %vm2169_vm6  ;;  %v2175_v54 = vor.u32 1.1754944e-38, %v2174_v12  ;;  %v9123_v40 = vadd.f32 %v9020_v9, %v1131_v11 }
 0x2b8   : > { %vm3593_vm10 = vweird.f32 %v9031_v22  ;;  %vm2173_vm11 = vcmp.eq.f32.partialorder %v2172_v63, 8.507059e+37  ;;  %v4535_v26 = vmul.f32 -1.442695, %v9110_v58  ;;  %v9128_v24 = vadd.f32 %v9020_v9, %v973_v41  ;;  %v5558_v52 = vpop.eup %5557 }
 0x2b9   : > { %v2167_v55 = vadd.f32 %v5550_v31, %v2166_v61  ;;  %v9131_v51 = vmul.f32 %v2641_v59, %v8874_v43  ;;  %v3591_v35 = vmul.f32 %v9069_v44, %v3590_v49  ;;  %v9142_v56 = vadd.f32 1.0, %v5556_v36 }
 0x2ba   : > { %v3116_v25 = vsel %vm9137_vm12, %v9037_v28, %v3112_v32  ;;  %vm3594_vm13 = vweird.f32 %v9069_v44  ;;  %v9149_v1 = vadd.f32 1.0, %v5558_v52  ;;  %v4567_v45 = vmul.f32 -1.442695, %v9123_v40  ;;  %v1053_v32 = vpop.f32.mrf.mxu1 }
 0x2bb   : > { %v2171_v38 = vsel %vm2170_vm9, %v5550_v31, %v2167_v55  ;;  %5563 = vrcp.f32 %v9142_v56  ;;  %v9155_v31 = vadd.f32 %v9020_v9, %v1211_v2  ;;  %v4504_v29 = vmul.f32 -1.442695, %v9128_v24  ;;  %vm9178_vm0 = vmor %vm3593_vm10, %vm3594_vm13 }
 0x2bc   : > { %v2176_v20 = vsel %vm2173_vm11, %v2175_v54, %v2171_v38  ;;  %v5560_v7 = vpop.eup %5559  ;;  %5565 = vpow2.f32 %v4535_v26  ;;  %v3592_v21 = vadd.f32 %v9069_v44, %v3591_v35  ;;  %v2652_v48 = vand.u32 2147483647, %v9098_v10 }
 0x2bd   : > { %v3677_v43 = vmul.f32 %v2176_v20, %v8960_v15  ;;  %v5562_v13 = vpop.eup %5561  ;;  %v2644_v4 = vmul.f32 %v5560_v7, %v9098_v10  ;;  %v3121_v15 = vsel %vm9104_vm5, %v3120_v0, %v3116_v25  ;;  %v2654_v33 = vand.u32 2147483648, %v9098_v10 }
 0x2be   : > { %v3124_v28 = vmul.f32 %v5562_v13, %v9102_v8  ;;  %v3132_v57 = vand.u32 2147483647, %v9102_v8  ;;  %5567 = vrcp.f32 %v9149_v1  ;;  %vm2649_vm14 = vweird.f32 %v5560_v7 }
 0x2bf   : > { %v4742_v17 = vpack.c.bf16 %v3677_v43, %v3676_v6  ;;  %v2645_v53 = vsub.f32 1.0, %v2644_v4  ;;  %v3134_v62 = vand.u32 2147483648, %v9102_v8  ;;  %5569 = vpow2.f32 %v4567_v45 }
 0x2c0   : > { %v3125_v60 = vsub.f32 1.0, %v3124_v28  ;;  %vm9168_vm15 = vcmp.eq.f32.partialorder %v3597_v50, 8.507059e+37  ;;  %vm3129_vm1 = vweird.f32 %v5562_v13  ;;  %v4599_v30 = vmul.f32 -1.442695, %v9155_v31 }
 0x2c1   : > { %5002 = vst [vmem:[%s5991_s29 + $0x70] sm:$0xff] %v4742_v17   ;;  %v2646_v34 = vmul.f32 %v5560_v7, %v2645_v53  ;;  %5571 = vpow2.f32 %v4504_v29  ;;  %v5564_v42 = vpop.eup %5563  ;;  %v3740_v3 = vmul.f32 %v3121_v15, %v8908_v18  ;;  %vm2648_vm2 = vweird.f32 %v9098_v10 }
 0x2c2   : > { %v3126_v5 = vmul.f32 %v5562_v13, %v3125_v60  ;;  %vm3128_vm3 = vweird.f32 %v9102_v8  ;;  %v5566_v12 = vpop.eup %5565  ;;  %v3596_v47 = vsel %vm9178_vm0, %v9069_v44, %v3592_v21  ;;  %vm2650_vm4 = vmor %vm2648_vm2, %vm2649_vm14  ;;  %v2655_v18 = vor.u32 1.1754944e-38, %v2654_v33  ;;  %v1213_v33 = vpop.f32.mrf.mxu3 }
 0x2c3   : > { %v2647_v63 = vadd.f32 %v5560_v7, %v2646_v34  ;;  %v3604_v11 = vmul.f32 %v5564_v42, %v9142_v56  ;;  %vm2653_vm5 = vcmp.eq.f32.partialorder %v2652_v48, 8.507059e+37  ;;  %vm3130_vm6 = vmor %vm3128_vm3, %vm3129_vm1  ;;  %vm3133_vm7 = vcmp.eq.f32.partialorder %v3132_v57, 8.507059e+37  ;;  %v1133_v48 = vpop.f32.mrf.mxu2 }
 0x2c4   : > { %v3127_v61 = vadd.f32 %v5562_v13, %v3126_v5  ;;  %v3135_v50 = vor.u32 1.1754944e-38, %v3134_v62  ;;  %v9190_v10 = vpop.eup %5567  ;;  %5573 = vpow2.f32 %v4599_v30  ;;  %v3614_v6 = vand.u32 2147483648, %v9142_v56 }
 0x2c5   : > { %v2651_v49 = vsel %vm2650_vm4, %v5560_v7, %v2647_v63  ;;  %v3605_v59 = vsub.f32 1.0, %v3604_v11  ;;  %v5570_v44 = vpop.eup %5569  ;;  %v9194_v54 = vadd.f32 1.0, %v5566_v12  ;;  %vm3609_vm8 = vweird.f32 %v5564_v42 }
 0x2c6   : > { %v2656_v8 = vsel %vm2653_vm5, %v2655_v18, %v2651_v49  ;;  %v3131_v41 = vsel %vm3130_vm6, %v5562_v13, %v3127_v61  ;;  %v3612_v52 = vand.u32 2147483647, %v9142_v56  ;;  %v3600_v27 = vor.u32 1.1754944e-38, %v3599_v16 }
 0x2c7   : > { %v3709_v55 = vmul.f32 %v2656_v8, %v9023_v14  ;;  %v3136_v36 = vsel %vm3133_vm7, %v3135_v50, %v3131_v41  ;;  %v5572_v38 = vpop.eup %5571  ;;  %v3606_v2 = vmul.f32 %v5564_v42, %v3605_v59  ;;  %v2179_v14 = vmul.f32 %v9190_v10, %v9149_v1 }
 0x2c8   : > { %v3741_v26 = vmul.f32 %v3136_v36, %v9029_v46  ;;  %v9204_v20 = vadd.f32 %v9020_v9, %v1053_v32  ;;  %vm3608_vm9 = vweird.f32 %v9142_v56  ;;  %v9207_v46 = vadd.f32 1.0, %v5570_v44 }
 0x2c9   : > { %v4822_v35 = vpack.c.bf16 %v3709_v55, %v9131_v51  ;;  %v3607_v25 = vadd.f32 %v5564_v42, %v3606_v2  ;;  %v3601_v43 = vsel %vm9168_vm15, %v3600_v27, %v3596_v47  ;;  %vm3610_vm10 = vmor %vm3608_vm9, %vm3609_vm8  ;;  %v3615_v22 = vor.u32 1.1754944e-38, %v3614_v6 }
 0x2ca   : > { %v4902_v7 = vpack.c.bf16 %v3741_v26, %v3740_v3  ;;  %5575 = vrcp.f32 %v9194_v54  ;;  %v1631_v16 = vadd.f32 1.0, %v5572_v38  ;;  %v5574_v51 = vpop.eup %5573  ;;  %vm3613_vm11 = vcmp.eq.f32.partialorder %v3612_v52, 8.507059e+37 }
 0x2cb   : > { %5018 = vst [vmem:[%s5991_s29 + $0xf0] sm:$0xff] %v4822_v35   ;;  %v3611_v13 = vsel %vm3610_vm10, %v5564_v42, %v3607_v25  ;;  %v2180_v45 = vsub.f32 1.0, %v2179_v14  ;;  %v3772_v56 = vmul.f32 %v3601_v43, %v8944_v37  ;;  %5577 = vrcp.f32 %v9207_v46 }
 0x2cc   : > { %5034 = vst [vmem:[%s5991_s29 + $0x170] sm:$0xff] %v4902_v7   ;;  %v3616_v4 = vsel %vm3613_vm11, %v3615_v22, %v3611_v13  ;;  %5579 = vrcp.f32 %v1631_v16  ;;  %v4536_v28 = vmul.f32 -1.442695, %v9204_v20  ;;  %v9221_v53 = vadd.f32 1.0, %v5574_v51 }
 0x2cd   : > { %v3773_v17 = vmul.f32 %v3616_v4, %v9055_v39  ;;  %v2181_v21 = vmul.f32 %v9190_v10, %v2180_v45  ;;  %vm2183_vm12 = vweird.f32 %v9149_v1  ;;  %v9230_v39 = vadd.f32 %v9020_v9, %v1133_v48 }
 0x2ce   : > { %5581 = vpow2.f32 %v4536_v28  ;;  %vm2184_vm13 = vweird.f32 %v9190_v10  ;;  %v9236_v62 = vadd.f32 %v9020_v9, %v1213_v33  ;;  %v2187_v0 = vand.u32 2147483647, %v9149_v1 }
 0x2cf   : > { %v4982_v29 = vpack.c.bf16 %v3773_v17, %v3772_v56  ;;  %v2182_v34 = vadd.f32 %v9190_v10, %v2181_v21  ;;  %5583 = vrcp.f32 %v9221_v53  ;;  %v2189_v30 = vand.u32 2147483648, %v9149_v1  ;;  %vm9242_vm14 = vmor %vm2183_vm12, %vm2184_vm13 }
 0x2d0   : > { %v9218_v15 = vpop.eup %5575  ;;  %v4568_v42 = vmul.f32 -1.442695, %v9230_v39  ;;  %v4600_v3 = vmul.f32 -1.442695, %v9236_v62  ;;  %v2202_v61 = vand.u32 2147483647, %v1631_v16  ;;  %vm2198_vm0 = vweird.f32 %v1631_v16 }
 0x2d1   : > { %5050 = vst [vmem:[%s5991_s29 + $0x1f0] sm:$0xff] %v4982_v29   ;;  %v9224_v60 = vpop.eup %5577  ;;  %v2659_v37 = vmul.f32 %v9218_v15, %v9194_v54  ;;  %v2186_v18 = vsel %vm9242_vm14, %v9190_v10, %v2182_v34  ;;  %v2204_v1 = vand.u32 2147483648, %v1631_v16  ;;  %vm2188_vm1 = vcmp.eq.f32.partialorder %v2187_v0, 8.507059e+37 }
 0x2d2   : > { %v5580_v57 = vpop.eup %5579  ;;  %v3139_v12 = vmul.f32 %v9224_v60, %v9207_v46  ;;  %5585 = vpow2.f32 %v4568_v42  ;;  %v2190_v8 = vor.u32 1.1754944e-38, %v2189_v30  ;;  %vm2203_vm3 = vcmp.eq.f32.partialorder %v2202_v61, 8.507059e+37 }
 0x2d3   : > { %v2194_v5 = vmul.f32 %v5580_v57, %v1631_v16  ;;  %v2660_v63 = vsub.f32 1.0, %v2659_v37  ;;  %vm2199_vm15 = vweird.f32 %v5580_v57  ;;  %5587 = vpow2.f32 %v4600_v3 }
 0x2d4   : > { %v5582_v9 = vpop.eup %5581  ;;  %v2191_v32 = vsel %vm2188_vm1, %v2190_v8, %v2186_v18  ;;  %vm2200_vm2 = vmor %vm2198_vm0, %vm2199_vm15  ;;  %v2205_v10 = vor.u32 1.1754944e-38, %v2204_v1  ;;  %v3140_v44 = vsub.f32 1.0, %v3139_v12  ;;  %vm2663_vm4 = vweird.f32 %v9194_v54 }
 0x2d5   : > { %v2195_v47 = vsub.f32 1.0, %v2194_v5  ;;  %v9251_v49 = vadd.f32 1.0, %v5582_v9  ;;  %v9253_v50 = vpop.eup %5583  ;;  %v2661_v41 = vmul.f32 %v9218_v15, %v2660_v63  ;;  %vm2664_vm5 = vweird.f32 %v9218_v15 }
 0x2d6   : > { %v3619_v55 = vmul.f32 %v9253_v50, %v9221_v53  ;;  %v3678_v2 = vmul.f32 %v2191_v32, %v9067_v23  ;;  %v2667_v14 = vand.u32 2147483647, %v9194_v54  ;;  %v2669_v7 = vand.u32 2147483648, %v9194_v54  ;;  %vm9276_vm6 = vmor %vm2663_vm4, %vm2664_vm5 }
 0x2d7   : > { %v2196_v11 = vmul.f32 %v5580_v57, %v2195_v47  ;;  %5589 = vrcp.f32 %v9251_v49  ;;  %v2662_v52 = vadd.f32 %v9218_v15, %v2661_v41  ;;  %v3141_v22 = vmul.f32 %v9224_v60, %v3140_v44 }
 0x2d8   : > { %v5586_v6 = vpop.eup %5585  ;;  %v3620_v16 = vsub.f32 1.0, %v3619_v55  ;;  %v3149_v45 = vand.u32 2147483648, %v9207_v46  ;;  %v3627_v56 = vand.u32 2147483647, %v9221_v53  ;;  %vm2668_vm7 = vcmp.eq.f32.partialorder %v2667_v14, 8.507059e+37 }
 0x2d9   : > { %v2197_v59 = vadd.f32 %v5580_v57, %v2196_v11  ;;  %v5588_v26 = vpop.eup %5587  ;;  %v9264_v35 = vadd.f32 1.0, %v5586_v6  ;;  %v2666_v4 = vsel %vm9276_vm6, %v9218_v15, %v2662_v52  ;;  %v2670_v54 = vor.u32 1.1754944e-38, %v2669_v7 }
 0x2da   : > { %v9268_v25 = vadd.f32 1.0, %v5588_v26  ;;  %vm3143_vm8 = vweird.f32 %v9207_v46  ;;  %v3142_v28 = vadd.f32 %v9224_v60, %v3141_v22  ;;  %vm3144_vm9 = vweird.f32 %v9224_v60 }
 0x2db   : > { %v2201_v36 = vsel %vm2200_vm2, %v5580_v57, %v2197_v59  ;;  %5591 = vrcp.f32 %v9264_v35  ;;  %v3621_v29 = vmul.f32 %v9253_v50, %v3620_v16  ;;  %v2684_v21 = vand.u32 2147483648, %v9251_v49  ;;  %vm9307_vm14 = vmor %vm3143_vm8, %vm3144_vm9 }
 0x2dc   : > { %v2206_v38 = vsel %vm2203_vm3, %v2205_v10, %v2201_v36  ;;  %5593 = vrcp.f32 %v9268_v25  ;;  %v2671_v48 = vsel %vm2668_vm7, %v2670_v54, %v2666_v4  ;;  %v2682_v37 = vand.u32 2147483647, %v9251_v49 }
 0x2dd   : > { %v3679_v27 = vmul.f32 %v2206_v38, %v9128_v24  ;;  %v5590_v43 = vpop.eup %5589  ;;  %v3147_v24 = vand.u32 2147483647, %v9207_v46  ;;  %v3150_v34 = vor.u32 1.1754944e-38, %v3149_v45  ;;  %vm3623_vm12 = vweird.f32 %v9221_v53 }
 0x2de   : > { %v2674_v13 = vmul.f32 %v5590_v43, %v9251_v49  ;;  %vm2679_vm11 = vweird.f32 %v5590_v43  ;;  %vm9300_vm13 = vcmp.eq.f32.partialorder %v3627_v56, 8.507059e+37  ;;  %v3629_v5 = vand.u32 2147483648, %v9221_v53 }
 0x2df   : > { %v4747_v51 = vpack.c.bf16 %v3679_v27, %v3678_v2  ;;  %vm9294_vm10 = vcmp.eq.f32.partialorder %v3147_v24, 8.507059e+37  ;;  %vm3624_vm15 = vweird.f32 %v9253_v50  ;;  %vm2678_vm1 = vweird.f32 %v9251_v49 }
 0x2e0   : > { %v2675_v17 = vsub.f32 1.0, %v2674_v13  ;;  %v3710_v63 = vmul.f32 %v2671_v48, %v9110_v58  ;;  %v3622_v12 = vadd.f32 %v9253_v50, %v3621_v29  ;;  %vm2680_vm0 = vmor %vm2678_vm1, %vm2679_vm11  ;;  %v2685_v47 = vor.u32 1.1754944e-38, %v2684_v21 }
 0x2e1   : > { %5003 = vst [vmem:[%s5991_s29 + $0x78] sm:$0xff] %v4747_v51   ;;  %v5592_v57 = vpop.eup %5591  ;;  %v3146_v9 = vsel %vm9307_vm14, %v9224_v60, %v3142_v28  ;;  %vm2683_vm2 = vcmp.eq.f32.partialorder %v2682_v37, 8.507059e+37  ;;  %v3162_v11 = vand.u32 2147483647, %v9264_v35  ;;  %v3164_v49 = vand.u32 2147483648, %v9264_v35  ;;  %vm9327_vm3 = vmor %vm3623_vm12, %vm3624_vm15 }
 0x2e2   : > { %v2676_v33 = vmul.f32 %v5590_v43, %v2675_v17  ;;  %v5594_v30 = vpop.eup %5593  ;;  %v3154_v19 = vmul.f32 %v5592_v57, %v9264_v35  ;;  %vm3159_vm4 = vweird.f32 %v5592_v57  ;;  %v3644_v59 = vand.u32 2147483648, %v9268_v25 }
 0x2e3   : > { %v3634_v46 = vmul.f32 %v5594_v30, %v9268_v25  ;;  %v3626_v32 = vsel %vm9327_vm3, %v9253_v50, %v3622_v12  ;;  %vm3639_vm5 = vweird.f32 %v5594_v30  ;;  %v3642_v44 = vand.u32 2147483647, %v9268_v25 }
 0x2e4   : > { %v2677_v3 = vadd.f32 %v5590_v43, %v2676_v33  ;;  %v3155_v61 = vsub.f32 1.0, %v3154_v19  ;;  %v3630_v53 = vor.u32 1.1754944e-38, %v3629_v5  ;;  %vm3158_vm6 = vweird.f32 %v9264_v35 }
 0x2e5   : > { %v3635_v58 = vsub.f32 1.0, %v3634_v46  ;;  %vm3160_vm7 = vmor %vm3158_vm6, %vm3159_vm4  ;;  %v3165_v6 = vor.u32 1.1754944e-38, %v3164_v49  ;;  %vm3638_vm8 = vweird.f32 %v9268_v25  ;;  %vm3163_vm9 = vcmp.eq.f32.partialorder %v3162_v11, 8.507059e+37 }
 0x2e6   : > { %v2681_v18 = vsel %vm2680_vm0, %v5590_v43, %v2677_v3  ;;  %v3156_v60 = vmul.f32 %v5592_v57, %v3155_v61  ;;  %v3631_v50 = vsel %vm9300_vm13, %v3630_v53, %v3626_v32  ;;  %vm3640_vm11 = vmor %vm3638_vm8, %vm3639_vm5  ;;  %v3645_v2 = vor.u32 1.1754944e-38, %v3644_v59 }
 0x2e7   : > { %v2686_v1 = vsel %vm2683_vm2, %v2685_v47, %v2681_v18  ;;  %v3636_v10 = vmul.f32 %v5594_v30, %v3635_v58  ;;  %vm3643_vm12 = vcmp.eq.f32.partialorder %v3642_v44, 8.507059e+37  ;;  %v3774_v25 = vmul.f32 %v3631_v50, %v9155_v31 }
 0x2e8   : > { %v3711_v41 = vmul.f32 %v2686_v1, %v9204_v20  ;;  %v3157_v36 = vadd.f32 %v5592_v57, %v3156_v60  ;;  %v3151_v20 = vsel %vm9294_vm10, %v3150_v34, %v3146_v9 }
 0x2e9   : > { %v3637_v38 = vadd.f32 %v5594_v30, %v3636_v10  ;;  %v3742_v35 = vmul.f32 %v3151_v20, %v9123_v40 }
 0x2ea   : > { %v4827_v55 = vpack.c.bf16 %v3711_v41, %v3710_v63  ;;  %v3161_v26 = vsel %vm3160_vm7, %v5592_v57, %v3157_v36 }
 0x2eb   : > { %v3166_v52 = vsel %vm3163_vm9, %v3165_v6, %v3161_v26  ;;  %v3641_v27 = vsel %vm3640_vm11, %v5594_v30, %v3637_v38 }
 0x2ec   : > { %5019 = vst [vmem:[%s5991_s29 + $0xf8] sm:$0xff] %v4827_v55   ;;  %v3743_v14 = vmul.f32 %v3166_v52, %v9230_v39  ;;  %v3646_v7 = vsel %vm3643_vm12, %v3645_v2, %v3641_v27 }
 0x2ed   : > { %v3775_v43 = vmul.f32 %v3646_v7, %v9236_v62 }
 0x2ee   : > { %v4907_v22 = vpack.c.bf16 %v3743_v14, %v3742_v35 }
 0x2ef   : > { %v4987_v16 = vpack.c.bf16 %v3775_v43, %v3774_v25 }
 0x2f0   : > { %5035 = vst [vmem:[%s5991_s29 + $0x178] sm:$0xff] %v4907_v22  }
 0x2f1   : > { %5051 = vst [vmem:[%s5991_s29 + $0x1f8] sm:$0xff] %v4987_v16  }
 0x2f2 PF: > { %s13_s14 = sadd.s32 1, %s5622_s14   ;;  %s9680_s12 = smov %s5618_s13 }
 0x2f3   : > { %p10_p5 = scmp.ge.s32.totalorder %s13_s14, 4   ;;  %s9681_s13 = smov %s9683_s15 }
 0x2f5   :  { %12 = sbr.rel (!%p10_p5) target bundleno = 2 (0x2), region = 68 }

// kernel: just_efficientnet_forward.10
= control target key start
LH: loop header
LB: loop body
LE: loop exit
PB: predicated region body
PF: predicated region fallthrough
CT: control target
= control target key end

     0   :  { %s1314_s12 = smov 0   ;;  %s1316_s13 = smov 0   ;;  %s1547_s0 = inlined_call_operand.vmem [shape: bf16[128,432], index: 0, kind: input, shape index: {}]   ;;  %s1548_s1 = inlined_call_operand.vmem [shape: bf16[432,128], index: 1, kind: input, shape index: {}]   ;;  %s1549_s2 = inlined_call_operand.vmem [shape: f32[1,128], index: 2, kind: input, shape index: {}]   ;;  %s1550_s3 = inlined_call_operand.vmem [shape: bf16[128,128], index: 3, kind: output, shape index: {}]  }
   0x1   :  { %s1318_s14 = smov 0  }
   0x2 LB: > { %s25_s15 = sadd.s32 1, %s1288_s13  ;;  %p954_p0 = scmp.ge.s32.totalorder %s1292_s14, 1  ;;  %s1292_s14 = sphi %s1318_s14, %s13_s14   ;;  %s1288_s13 = sphi %s1316_s13, %s1556_s13   ;;  %s1284_s12 = sphi %s1314_s12, %s1555_s12  }
   0x3   : > { %p27_p1 = scmp.ge.s32.totalorder %s25_s15, 2  ;;  %p170_p2 = scmp.lt.s32.totalorder %s1292_s14, 3 }
   0x5   : > { %s1558_s15 = smov (%p27_p1, %s25_s15), 0  ;;  %p171_p3 = pnand %p954_p0, %p170_p2 }
   0x6   : > { %s955_s22 = sshll.u32 (!%p171_p3), %s1284_s12, 3 }
   0x7   : > { %174 = sbr.rel (%p171_p3) target bundleno = 271 (0x10f), region = 32  ;;  %p206_p4 = scmp.lt.s32.totalorder (!%p171_p3), %s955_s22, 15 }
   0xc   : > { %v1170_v0 = vld [vmem:[%s1548_s1 + $0x38] sm:$0xff]  ;;  %v1169_v3 = vld [vmem:[%s1548_s1 + $0x30] sm:$0xff]  ;;  %s1560_s22 = smov (!%p206_p4, %s955_s22), 15  ;;  %v1168_v7 = vld [vmem:[%s1548_s1 + $0x28] sm:$0xff]  ;;  %vm541_vm0 = vcmask 392192  }
   0xd   : > { %v1178_v1 = vld [vmem:[%s1548_s1 + $0x78] sm:$0xff]  ;;  %554 = vmatpush.bf16.msra.mxu0 %v1170_v0  ;;  %v1177_v4 = vld [vmem:[%s1548_s1 + $0x70] sm:$0xff]  ;;  %v1176_v8 = vld [vmem:[%s1548_s1 + $0x68] sm:$0xff]  ;;  %s1146_s8 = sshll.u32 %s1560_s22, 4 }
   0xe   : > { %v1186_v2 = vld [vmem:[%s1548_s1 + $0xb8] sm:$0xff]  ;;  %583 = vmatpush.bf16.msra.mxu1 %v1178_v1  ;;  %v1185_v5 = vld [vmem:[%s1548_s1 + $0xb0] sm:$0xff]  ;;  %v1184_v9 = vld [vmem:[%s1548_s1 + $0xa8] sm:$0xff]  ;;  %s1371_s18 = scalar_lea.vmem %s1547_s0, %s1146_s8 }
   0xf   : > { %612 = vmatpush.bf16.msra.mxu2 %v1186_v2  ;;  %v1189_v6 = vld [vmem:[%s1548_s1 + $0xd0] sm:$0xff]  ;;  %v1188_v10 = vld [vmem:[%s1548_s1 + $0xc8] sm:$0xff]  ;;  %v1167_v11 = vld [vmem:[%s1548_s1 + $0x20] sm:$0xff] }
  0x10   : > { %646 = vmatpush.bf16.msra.mxu3 %v1189_v6  ;;  %v1175_v12 = vld [vmem:[%s1548_s1 + $0x60] sm:$0xff]  ;;  %v1148_v15 = vld [vmem:[%s1371_s18 + $0xc] sm:$0xf]  ;;  %v972_v16 = vld [vmem:[%s1371_s18 + $0x18] sm:$0xf0] }
  0x11   : > { %555 = vmatpush.bf16.msra.mxu0 %v1169_v3  ;;  %v1183_v13 = vld [vmem:[%s1548_s1 + $0xa0] sm:$0xff]  ;;  %v1166_v17 = vld [vmem:[%s1548_s1 + $0x18] sm:$0xff]  ;;  %v975_v20 = vor.u32 %v1148_v15, %v972_v16  ;;  %v1165_v21 = vld [vmem:[%s1548_s1 + $0x10] sm:$0xff] }
  0x12   : > { %584 = vmatpush.bf16.msra.mxu1 %v1177_v4  ;;  %v1187_v14 = vld [vmem:[%s1548_s1 + $0xc0] sm:$0xff]  ;;  %v1174_v18 = vld [vmem:[%s1548_s1 + $0x58] sm:$0xff]  ;;  %v1173_v22 = vld [vmem:[%s1548_s1 + $0x50] sm:$0xff] }
  0x13   : > { %613 = vmatpush.bf16.msra.mxu2 %v1185_v5  ;;  %v1182_v19 = vld [vmem:[%s1548_s1 + $0x98] sm:$0xff]  ;;  %v1181_v23 = vld [vmem:[%s1548_s1 + $0x90] sm:$0xff]  ;;  %v1164_v24 = vld [vmem:[%s1548_s1 + $0x8] sm:$0xff] }
  0x14   : > { %647 = vmatpush.bf16.msra.mxu3 %v1188_v10  ;;  %v1172_v25 = vld [vmem:[%s1548_s1 + $0x48] sm:$0xff]  ;;  %v1163_v27 = vld [vmem:[%s1548_s1] sm:$0xff]  ;;  %v1149_v30 = vld [vmem:[%s1371_s18 + $0xc] sm:$0xf0] }
  0x15   : > { %556 = vmatpush.bf16.msra.mxu0 %v1168_v7  ;;  %v1180_v26 = vld [vmem:[%s1548_s1 + $0x88] sm:$0xff]  ;;  %v1171_v28 = vld [vmem:[%s1548_s1 + $0x40] sm:$0xff]  ;;  %v964_v32 = vld [vmem:[%s1371_s18 + $0x10] sm:$0xf0] }
  0x16   : > { %585 = vmatpush.bf16.msra.mxu1 %v1176_v8  ;;  %v962_v29 = vld [vmem:[%s1371_s18] sm:$0xf]  ;;  %v1147_v31 = vld [vmem:[%s1371_s18 + $0x4] sm:$0xf]  ;;  %v970_v34 = vld [vmem:[%s1371_s18 + $0x8] sm:$0xf] }
  0x17   : > { %614 = vmatpush.bf16.msra.mxu2 %v1184_v9  ;;  %v1179_v33 = vld [vmem:[%s1548_s1 + $0x80] sm:$0xff]  ;;  %v1150_v35 = vld [vmem:[%s1371_s18 + $0x14] sm:$0xf0]  ;;  %v1152_v36 = vld [vmem:[%s1371_s18 + $0x2c] sm:$0xf]  ;;  %v963_v38 = vor.u32 %v1149_v30, %v962_v29  ;;  %v967_v39 = vor.u32 %v1147_v31, %v964_v32 }
  0x18   : > { %648 = vmatpush.bf16.msra.mxu3 %v1187_v14  ;;  %v988_v37 = vld [vmem:[%s1371_s18 + $0x38] sm:$0xf0]  ;;  %v971_v40 = vor.u32 %v1150_v35, %v970_v34  ;;  %v978_v42 = vld [vmem:[%s1371_s18 + $0x20] sm:$0xf]  ;;  %v1153_v43 = vld [vmem:[%s1371_s18 + $0x2c] sm:$0xf0] }
  0x19   : > { %557 = vmatpush.bf16.msra.mxu0 %v1167_v11  ;;  %v991_v41 = vor.u32 %v1152_v36, %v988_v37  ;;  %v1151_v44 = vld [vmem:[%s1371_s18 + $0x24] sm:$0xf]  ;;  %v980_v45 = vld [vmem:[%s1371_s18 + $0x30] sm:$0xf0]  ;;  %v986_v46 = vld [vmem:[%s1371_s18 + $0x28] sm:$0xf]  ;;  %v979_v50 = vor.u32 %v1153_v43, %v978_v42 }
  0x1a   : > { %586 = vmatpush.bf16.msra.mxu1 %v1175_v12  ;;  %v1154_v47 = vld [vmem:[%s1371_s18 + $0x34] sm:$0xf0]  ;;  %v1156_v48 = vld [vmem:[%s1371_s18 + $0x4c] sm:$0xf]  ;;  %v1004_v49 = vld [vmem:[%s1371_s18 + $0x58] sm:$0xf0]  ;;  %v983_v51 = vor.u32 %v1151_v44, %v980_v45 }
  0x1b   : > { %615 = vmatpush.bf16.msra.mxu2 %v1183_v13  ;;  %1132 = vmatmul.msk.bf16.vlgmr.msra.gmra.mxu3 %vm541_vm0, %v975_v20  ;;  %v987_v52 = vor.u32 %v1154_v47, %v986_v46  ;;  %v1007_v53 = vor.u32 %v1156_v48, %v1004_v49  ;;  %v994_v54 = vld [vmem:[%s1371_s18 + $0x40] sm:$0xf]  ;;  %v1157_v55 = vld [vmem:[%s1371_s18 + $0x4c] sm:$0xf0]  ;;  %v1155_v56 = vld [vmem:[%s1371_s18 + $0x44] sm:$0xf] }
  0x1c   : > { %v996_v57 = vld [vmem:[%s1371_s18 + $0x50] sm:$0xf0]  ;;  %v1002_v58 = vld [vmem:[%s1371_s18 + $0x48] sm:$0xf]  ;;  %v1158_v59 = vld [vmem:[%s1371_s18 + $0x54] sm:$0xf0]  ;;  %v995_v62 = vor.u32 %v1157_v55, %v994_v54 }
  0x1d   : > { %558 = vmatpush.bf16.msra.mxu0 %v1166_v17  ;;  %v1160_v60 = vld [vmem:[%s1371_s18 + $0x6c] sm:$0xf]  ;;  %v1020_v61 = vld [vmem:[%s1371_s18 + $0x78] sm:$0xf0]  ;;  %v999_v63 = vor.u32 %v1155_v56, %v996_v57  ;;  %v1003_v0 = vor.u32 %v1158_v59, %v1002_v58  ;;  %v1010_v2 = vld [vmem:[%s1371_s18 + $0x60] sm:$0xf] }
  0x1e   : > { %587 = vmatpush.bf16.msra.mxu1 %v1174_v18  ;;  %v1023_v1 = vor.u32 %v1160_v60, %v1020_v61  ;;  %v1161_v3 = vld [vmem:[%s1371_s18 + $0x6c] sm:$0xf0]  ;;  %v1159_v4 = vld [vmem:[%s1371_s18 + $0x64] sm:$0xf]  ;;  %v1012_v5 = vld [vmem:[%s1371_s18 + $0x70] sm:$0xf0] }
  0x1f   : > { %616 = vmatpush.bf16.msra.mxu2 %v1182_v19  ;;  %v1018_v6 = vld [vmem:[%s1371_s18 + $0x68] sm:$0xf]  ;;  %v1162_v7 = vld [vmem:[%s1371_s18 + $0x74] sm:$0xf0]  ;;  %v1011_v8 = vor.u32 %v1161_v3, %v1010_v2  ;;  %v1015_v9 = vor.u32 %v1159_v4, %v1012_v5  ;;  %v1460_v12 = vld [vmem:[%s1549_s2] ss:$0 sm:$0xff] }
  0x20   : > { %v1019_v10 = vor.u32 %v1162_v7, %v1018_v6  ;;  %s959_s18 = sshll.u32 %s1560_s22, 2 }
  0x21   : > { %559 = vmatpush.bf16.msra.mxu0 %v1165_v21  ;;  %s1499_s7 = scalar_lea.vmem %s1550_s3, %s959_s18 }
  0x22   : > { %588 = vmatpush.bf16.msra.mxu1 %v1173_v22 }
  0x23   : > { %617 = vmatpush.bf16.msra.mxu2 %v1181_v23 }
  0x25   : > { %560 = vmatpush.bf16.msra.mxu0 %v1164_v24 }
  0x26   : > { %589 = vmatpush.bf16.msra.mxu1 %v1172_v25 }
  0x27   : > { %618 = vmatpush.bf16.msra.mxu2 %v1180_v26 }
  0x29   : > { %561 = vmatpush.bf16.msra.mxu0 %v1163_v27 }
  0x2a   : > { %590 = vmatpush.bf16.msra.mxu1 %v1171_v28 }
  0x2b   : > { %619 = vmatpush.bf16.msra.mxu2 %v1179_v33  ;;  %1133 = vmatmul.msk.bf16.gmra.mxu3 %vm541_vm0, %v991_v41 }
  0x2c   : > { %562 = vmatmul.bf16.vlgmr.msra.gmra.mxu0 %v963_v38 }
  0x2d   : > { %591 = vmatmul.bf16.vlgmr.msra.gmra.mxu1 %v967_v39 }
  0x2e   : > { %620 = vmatmul.bf16.vlgmr.msra.gmra.mxu2 %v971_v40 }
  0x3b   : > { %1134 = vmatmul.msk.bf16.gmra.mxu3 %vm541_vm0, %v1007_v53 }
  0x3c   : > { %567 = vmatmul.bf16.gmra.mxu0 %v979_v50 }
  0x3d   : > { %596 = vmatmul.bf16.gmra.mxu1 %v983_v51 }
  0x3e   : > { %625 = vmatmul.bf16.gmra.mxu2 %v987_v52 }
  0x4b   : > { %1135 = vmatmul.msk.bf16.gmra.mxu3 %vm541_vm0, %v1023_v1 }
  0x4c   : > { %572 = vmatmul.bf16.gmra.mxu0 %v995_v62 }
  0x4d   : > { %601 = vmatmul.bf16.gmra.mxu1 %v999_v63 }
  0x4e   : > { %630 = vmatmul.bf16.gmra.mxu2 %v1003_v0 }
  0x5c   : > { %577 = vmatmul.bf16.gmra.mxu0 %v1011_v8 }
  0x5d   : > { %606 = vmatmul.bf16.gmra.mxu1 %v1015_v9 }
  0x5e   : > { %635 = vmatmul.bf16.gmra.mxu2 %v1019_v10 }
  0x9e   : > { %v650_v11 = vpop.f32.mrf.mxu3 }
  0xa6   : > { %v652_v17 = vpop.f32.mrf.mxu3 }
  0xa9   : > { %v563_v13 = vpop.f32.mrf.mxu0 }
  0xaa   : > { %v592_v14 = vpop.f32.mrf.mxu1  ;;  %v564_v15 = vadd.f32 %v1460_v12, %v563_v13 }
  0xac   : > { %v593_v16 = vadd.f32 %v592_v14, %v564_v15 }
  0xae   : > { %v655_v27 = vpop.f32.mrf.mxu3 }
  0xb1   : > { %v621_v18 = vpop.f32.mrf.mxu2  ;;  %v565_v20 = vpop.f32.mrf.mxu0 }
  0xb2   : > { %v622_v19 = vadd.f32 %v621_v18, %v593_v16  ;;  %v594_v21 = vpop.f32.mrf.mxu1  ;;  %v566_v23 = vadd.f32 %v1460_v12, %v565_v20 }
  0xb4   : > { %v1463_v22 = vadd.f32 %v650_v11, %v622_v19  ;;  %v595_v25 = vadd.f32 %v594_v21, %v566_v23 }
  0xb6   : > { %v1136_v24 = vmul.f32 -1.442695, %v1463_v22  ;;  %v657_v41 = vpop.f32.mrf.mxu3 }
  0xb8   : > { %1238 = vpow2.f32 %v1136_v24 }
  0xb9   : > { %v623_v26 = vpop.f32.mrf.mxu2  ;;  %v568_v29 = vpop.f32.mrf.mxu0 }
  0xba   : > { %v624_v28 = vadd.f32 %v623_v26, %v595_v25  ;;  %v597_v30 = vpop.f32.mrf.mxu1  ;;  %v569_v31 = vadd.f32 %v1460_v12, %v568_v29 }
  0xbc   : > { %v1468_v32 = vadd.f32 %v652_v17, %v624_v28  ;;  %v598_v35 = vadd.f32 %v597_v30, %v569_v31 }
  0xbe   : > { %v1239_v33 = vpop.eup %1238  ;;  %v1137_v34 = vmul.f32 -1.442695, %v1468_v32  ;;  %v660_v58 = vpop.f32.mrf.mxu3 }
  0xbf   : > { %v694_v36 = vadd.f32 1.0, %v1239_v33 }
  0xc0   : > { %1240 = vpow2.f32 %v1137_v34 }
  0xc1   : > { %1242 = vrcp.f32 %v694_v36  ;;  %v626_v37 = vpop.f32.mrf.mxu2  ;;  %v570_v39 = vpop.f32.mrf.mxu0  ;;  %vm707_vm2 = vweird.f32 %v694_v36  ;;  %v713_v2 = vand.u32 2147483648, %v694_v36  ;;  %v711_v5 = vand.u32 2147483647, %v694_v36 }
  0xc2   : > { %v627_v38 = vadd.f32 %v626_v37, %v598_v35  ;;  %v599_v40 = vpop.f32.mrf.mxu1  ;;  %v571_v43 = vadd.f32 %v1460_v12, %v570_v39 }
  0xc3   : > { %v714_v17 = vor.u32 1.1754944e-38, %v713_v2  ;;  %vm712_vm5 = vcmp.eq.f32.partialorder %v711_v5, 8.507059e+37 }
  0xc4   : > { %v1471_v42 = vadd.f32 %v655_v27, %v627_v38  ;;  %v600_v49 = vadd.f32 %v599_v40, %v571_v43 }
  0xc6   : > { %v1241_v44 = vpop.eup %1240  ;;  %v1138_v45 = vmul.f32 -1.442695, %v1471_v42  ;;  %v662_v26 = vpop.f32.mrf.mxu3 }
  0xc7   : > { %v1243_v46 = vpop.eup %1242  ;;  %v695_v47 = vadd.f32 1.0, %v1241_v44 }
  0xc8   : > { %v703_v48 = vmul.f32 %v1243_v46, %v694_v36  ;;  %1244 = vpow2.f32 %v1138_v45  ;;  %vm708_vm1 = vweird.f32 %v1243_v46 }
  0xc9   : > { %1246 = vrcp.f32 %v695_v47  ;;  %v628_v50 = vpop.f32.mrf.mxu2  ;;  %v573_v53 = vpop.f32.mrf.mxu0  ;;  %vm1482_vm3 = vmor %vm707_vm2, %vm708_vm1  ;;  %v726_v10 = vand.u32 2147483647, %v695_v47  ;;  %v728_v11 = vand.u32 2147483648, %v695_v47  ;;  %vm722_vm6 = vweird.f32 %v695_v47 }
  0xca   : > { %v704_v51 = vsub.f32 1.0, %v703_v48  ;;  %v629_v52 = vadd.f32 %v628_v50, %v600_v49  ;;  %v602_v54 = vpop.f32.mrf.mxu1  ;;  %v574_v55 = vadd.f32 %v1460_v12, %v573_v53 }
  0xcb   : > { %vm727_vm8 = vcmp.eq.f32.partialorder %v726_v10, 8.507059e+37  ;;  %v729_v24 = vor.u32 1.1754944e-38, %v728_v11 }
  0xcc   : > { %v705_v56 = vmul.f32 %v1243_v46, %v704_v51  ;;  %v1476_v57 = vadd.f32 %v657_v41, %v629_v52  ;;  %v603_v61 = vadd.f32 %v602_v54, %v574_v55 }
  0xce   : > { %v1245_v59 = vpop.eup %1244  ;;  %v1139_v60 = vmul.f32 -1.442695, %v1476_v57  ;;  %v706_v63 = vadd.f32 %v1243_v46, %v705_v56  ;;  %v665_v50 = vpop.f32.mrf.mxu3 }
  0xcf   : > { %v1247_v62 = vpop.eup %1246  ;;  %v1479_v0 = vadd.f32 1.0, %v1245_v59 }
  0xd0   : > { %v718_v1 = vmul.f32 %v1247_v62, %v695_v47  ;;  %1248 = vpow2.f32 %v1139_v60  ;;  %v710_v9 = vsel %vm1482_vm3, %v1243_v46, %v706_v63  ;;  %vm723_vm4 = vweird.f32 %v1247_v62 }
  0xd1   : > { %1250 = vrcp.f32 %v1479_v0  ;;  %v631_v3 = vpop.f32.mrf.mxu2  ;;  %v575_v8 = vpop.f32.mrf.mxu0  ;;  %v715_v23 = vsel %vm712_vm5, %v714_v17, %v710_v9  ;;  %vm724_vm7 = vmor %vm722_vm6, %vm723_vm4  ;;  %vm737_vm10 = vweird.f32 %v1479_v0  ;;  %v743_v49 = vand.u32 2147483648, %v1479_v0 }
  0xd2   : > { %v719_v6 = vsub.f32 1.0, %v718_v1  ;;  %v632_v7 = vadd.f32 %v631_v3, %v603_v61  ;;  %v604_v13 = vpop.f32.mrf.mxu1  ;;  %v576_v16 = vadd.f32 %v1460_v12, %v575_v8  ;;  %v822_v33 = vmul.f32 %v715_v23, %v1463_v22 }
  0xd3   : > { %v741_v53 = vand.u32 2147483647, %v1479_v0  ;;  %v744_v1 = vor.u32 1.1754944e-38, %v743_v49 }
  0xd4   : > { %v720_v14 = vmul.f32 %v1247_v62, %v719_v6  ;;  %v1488_v15 = vadd.f32 %v660_v58, %v632_v7  ;;  %v605_v29 = vadd.f32 %v604_v13, %v576_v16 }
  0xd5   : > { %vm742_vm13 = vcmp.eq.f32.partialorder %v741_v53, 8.507059e+37 }
  0xd6   : > { %v1249_v18 = vpop.eup %1248  ;;  %v721_v19 = vadd.f32 %v1247_v62, %v720_v14  ;;  %v1140_v20 = vmul.f32 -1.442695, %v1488_v15 }
  0xd7   : > { %v1251_v21 = vpop.eup %1250  ;;  %v697_v25 = vadd.f32 1.0, %v1249_v18 }
  0xd8   : > { %v725_v27 = vsel %vm724_vm7, %v1247_v62, %v721_v19  ;;  %v733_v28 = vmul.f32 %v1251_v21, %v1479_v0  ;;  %1252 = vpow2.f32 %v1140_v20  ;;  %vm738_vm9 = vweird.f32 %v1251_v21  ;;  %v667_v19 = vpop.f32.mrf.mxu3 }
  0xd9   : > { %v730_v30 = vsel %vm727_vm8, %v729_v24, %v725_v27  ;;  %1254 = vrcp.f32 %v697_v25  ;;  %v633_v31 = vpop.f32.mrf.mxu2  ;;  %v578_v37 = vpop.f32.mrf.mxu0  ;;  %vm1511_vm11 = vmor %vm737_vm10, %vm738_vm9  ;;  %v756_v59 = vand.u32 2147483647, %v697_v25  ;;  %v758_v60 = vand.u32 2147483648, %v697_v25 }
  0xda   : > { %v823_v34 = vmul.f32 %v730_v30, %v1468_v32  ;;  %v734_v35 = vsub.f32 1.0, %v733_v28  ;;  %v634_v36 = vadd.f32 %v633_v31, %v605_v29  ;;  %v579_v38 = vadd.f32 %v1460_v12, %v578_v37  ;;  %v607_v43 = vpop.f32.mrf.mxu1 }
  0xdb   : > { %vm752_vm14 = vweird.f32 %v697_v25  ;;  %vm757_vm0 = vcmp.eq.f32.partialorder %v756_v59, 8.507059e+37  ;;  %v759_v6 = vor.u32 1.1754944e-38, %v758_v60 }
  0xdc   : > { %v1193_v39 = vpack.c.bf16 %v823_v34, %v822_v33  ;;  %v735_v40 = vmul.f32 %v1251_v21, %v734_v35  ;;  %v1502_v41 = vadd.f32 %v662_v26, %v634_v36  ;;  %v608_v32 = vadd.f32 %v607_v43, %v579_v38 }
  0xde   : > { %v1253_v44 = vpop.eup %1252  ;;  %1194 = vst [vmem:[%s1499_s7] sm:$0xff] %v1193_v39   ;;  %v1141_v22 = vmul.f32 -1.442695, %v1502_v41  ;;  %v736_v46 = vadd.f32 %v1251_v21, %v735_v40 }
  0xdf   : > { %v1255_v45 = vpop.eup %1254  ;;  %v1506_v47 = vadd.f32 1.0, %v1253_v44 }
  0xe0   : > { %v748_v48 = vmul.f32 %v1255_v45, %v697_v25  ;;  %1256 = vpow2.f32 %v1141_v22  ;;  %v740_v58 = vsel %vm1511_vm11, %v1251_v21, %v736_v46  ;;  %vm753_vm12 = vweird.f32 %v1255_v45 }
  0xe1   : > { %1258 = vrcp.f32 %v1506_v47  ;;  %v636_v51 = vpop.f32.mrf.mxu2  ;;  %v580_v56 = vpop.f32.mrf.mxu0  ;;  %v745_v5 = vsel %vm742_vm13, %v744_v1, %v740_v58  ;;  %vm754_vm15 = vmor %vm752_vm14, %vm753_vm12  ;;  %vm767_vm2 = vweird.f32 %v1506_v47 }
  0xe2   : > { %v749_v54 = vsub.f32 1.0, %v748_v48  ;;  %v637_v55 = vadd.f32 %v636_v51, %v608_v32  ;;  %v581_v63 = vadd.f32 %v1460_v12, %v580_v56  ;;  %v609_v8 = vpop.f32.mrf.mxu1  ;;  %v824_v14 = vmul.f32 %v745_v5, %v1471_v42 }
  0xe3   : > { %v773_v42 = vand.u32 2147483648, %v1506_v47 }
  0xe4   : > { %v750_v61 = vmul.f32 %v1255_v45, %v749_v54  ;;  %v1518_v62 = vadd.f32 %v665_v50, %v637_v55  ;;  %v610_v12 = vadd.f32 %v609_v8, %v581_v63 }
  0xe5   : > { %v774_v36 = vor.u32 1.1754944e-38, %v773_v42 }
  0xe6   : > { %v1257_v2 = vpop.eup %1256  ;;  %v751_v3 = vadd.f32 %v1255_v45, %v750_v61  ;;  %v1142_v0 = vmul.f32 -1.442695, %v1518_v62 }
  0xe7   : > { %v1259_v4 = vpop.eup %1258  ;;  %v699_v7 = vadd.f32 1.0, %v1257_v2 }
  0xe8   : > { %v755_v9 = vsel %vm754_vm15, %v1255_v45, %v751_v3  ;;  %v763_v10 = vmul.f32 %v1259_v4, %v1506_v47  ;;  %1260 = vpow2.f32 %v1142_v0  ;;  %vm768_vm1 = vweird.f32 %v1259_v4 }
  0xe9   : > { %v760_v11 = vsel %vm757_vm0, %v759_v6, %v755_v9  ;;  %1262 = vrcp.f32 %v699_v7  ;;  %v638_v13 = vpop.f32.mrf.mxu2  ;;  %vm769_vm3 = vmor %vm767_vm2, %vm768_vm1  ;;  %v788_v31 = vand.u32 2147483648, %v699_v7  ;;  %v786_v35 = vand.u32 2147483647, %v699_v7 }
  0xea   : > { %v825_v16 = vmul.f32 %v760_v11, %v1476_v57  ;;  %v764_v17 = vsub.f32 1.0, %v763_v10  ;;  %v639_v18 = vadd.f32 %v638_v13, %v610_v12  ;;  %v771_v57 = vand.u32 2147483647, %v1506_v47 }
  0xeb   : > { %vm782_vm6 = vweird.f32 %v699_v7  ;;  %v789_v43 = vor.u32 1.1754944e-38, %v788_v31  ;;  %vm787_vm8 = vcmp.eq.f32.partialorder %v786_v35, 8.507059e+37 }
  0xec   : > { %v1198_v20 = vpack.c.bf16 %v825_v16, %v824_v14  ;;  %v765_v21 = vmul.f32 %v1259_v4, %v764_v17  ;;  %v1525_v23 = vadd.f32 %v667_v19, %v639_v18  ;;  %vm772_vm5 = vcmp.eq.f32.partialorder %v771_v57, 8.507059e+37 }
  0xee   : > { %v1261_v24 = vpop.eup %1260  ;;  %1210 = vst [vmem:[%s1499_s7 + $0x8] sm:$0xff] %v1198_v20   ;;  %v1143_v25 = vmul.f32 -1.442695, %v1525_v23  ;;  %v766_v28 = vadd.f32 %v1259_v4, %v765_v21 }
  0xef   : > { %v1263_v26 = vpop.eup %1262  ;;  %v700_v27 = vadd.f32 1.0, %v1261_v24 }
  0xf0   : > { %v778_v29 = vmul.f32 %v1263_v26, %v699_v7  ;;  %1264 = vpow2.f32 %v1143_v25  ;;  %v770_v33 = vsel %vm769_vm3, %v1259_v4, %v766_v28  ;;  %vm783_vm4 = vweird.f32 %v1263_v26 }
  0xf1   : > { %1266 = vrcp.f32 %v700_v27  ;;  %v775_v40 = vsel %vm772_vm5, %v774_v36, %v770_v33  ;;  %vm784_vm7 = vmor %vm782_vm6, %vm783_vm4  ;;  %v803_v54 = vand.u32 2147483648, %v700_v27  ;;  %vm797_vm10 = vweird.f32 %v700_v27 }
  0xf2   : > { %v779_v30 = vsub.f32 1.0, %v778_v29  ;;  %v826_v46 = vmul.f32 %v775_v40, %v1488_v15  ;;  %v801_v55 = vand.u32 2147483647, %v700_v27 }
  0xf4   : > { %v780_v34 = vmul.f32 %v1263_v26, %v779_v30  ;;  %vm802_vm13 = vcmp.eq.f32.partialorder %v801_v55, 8.507059e+37 }
  0xf6   : > { %v1265_v37 = vpop.eup %1264  ;;  %v781_v38 = vadd.f32 %v1263_v26, %v780_v34 }
  0xf7   : > { %v1267_v39 = vpop.eup %1266  ;;  %v701_v44 = vadd.f32 1.0, %v1265_v37 }
  0xf8   : > { %v785_v22 = vsel %vm784_vm7, %v1263_v26, %v781_v38  ;;  %v793_v32 = vmul.f32 %v1267_v39, %v700_v27  ;;  %vm798_vm9 = vweird.f32 %v1267_v39 }
  0xf9   : > { %v790_v45 = vsel %vm787_vm8, %v789_v43, %v785_v22  ;;  %1268 = vrcp.f32 %v701_v44  ;;  %vm799_vm11 = vmor %vm797_vm10, %vm798_vm9  ;;  %v818_v58 = vand.u32 2147483648, %v701_v44  ;;  %v816_v15 = vand.u32 2147483647, %v701_v44 }
  0xfa   : > { %v827_v47 = vmul.f32 %v790_v45, %v1502_v41  ;;  %v794_v48 = vsub.f32 1.0, %v793_v32  ;;  %v804_v41 = vor.u32 1.1754944e-38, %v803_v54  ;;  %vm812_vm14 = vweird.f32 %v701_v44 }
  0xfb   : > { %v819_v1 = vor.u32 1.1754944e-38, %v818_v58  ;;  %vm817_vm0 = vcmp.eq.f32.partialorder %v816_v15, 8.507059e+37 }
  0xfc   : > { %v1203_v49 = vpack.c.bf16 %v827_v47, %v826_v46  ;;  %v795_v50 = vmul.f32 %v1267_v39, %v794_v48 }
  0xfe   : > { %1211 = vst [vmem:[%s1499_s7 + $0x10] sm:$0xff] %v1203_v49   ;;  %v796_v52 = vadd.f32 %v1267_v39, %v795_v50 }
  0xff   : > { %v1269_v51 = vpop.eup %1268 }
 0x100   : > { %v808_v53 = vmul.f32 %v1269_v51, %v701_v44  ;;  %v800_v59 = vsel %vm799_vm11, %v1267_v39, %v796_v52  ;;  %vm813_vm12 = vweird.f32 %v1269_v51 }
 0x101   : > { %v805_v63 = vsel %vm802_vm13, %v804_v41, %v800_v59  ;;  %vm814_vm15 = vmor %vm812_vm14, %vm813_vm12 }
 0x102   : > { %v809_v56 = vsub.f32 1.0, %v808_v53  ;;  %v828_v0 = vmul.f32 %v805_v63, %v1518_v62 }
 0x104   : > { %v810_v60 = vmul.f32 %v1269_v51, %v809_v56 }
 0x106   : > { %v811_v61 = vadd.f32 %v1269_v51, %v810_v60 }
 0x108   : > { %v815_v2 = vsel %vm814_vm15, %v1269_v51, %v811_v61 }
 0x109   : > { %v820_v3 = vsel %vm817_vm0, %v819_v1, %v815_v2 }
 0x10a   : > { %v829_v4 = vmul.f32 %v820_v3, %v1525_v23 }
 0x10c   : > { %v1208_v5 = vpack.c.bf16 %v829_v4, %v828_v0 }
 0x10e   : > { %1212 = vst [vmem:[%s1499_s7 + $0x18] sm:$0xff] %v1208_v5  }
 0x10f PF: > { %s13_s14 = sadd.s32 1, %s1292_s14   ;;  %s1555_s12 = smov %s1288_s13 }
 0x110   : > { %p10_p5 = scmp.ge.s32.totalorder %s13_s14, 4   ;;  %s1556_s13 = smov %s1558_s15 }
 0x112   :  { %12 = sbr.rel (!%p10_p5) target bundleno = 2 (0x2), region = 68 }

// kernel: just_efficientnet_forward.11
= control target key start
LH: loop header
LB: loop body
LE: loop exit
PB: predicated region body
PF: predicated region fallthrough
CT: control target
= control target key end

     0   :  { %s1543_s12 = smov 0   ;;  %s1545_s13 = smov 0   ;;  %s2077_s0 = inlined_call_operand.vmem [shape: bf16[32,576], index: 0, kind: input, shape index: {}]   ;;  %s2078_s1 = inlined_call_operand.vmem [shape: bf16[576,256], index: 1, kind: input, shape index: {}]   ;;  %s2079_s2 = inlined_call_operand.vmem [shape: f32[1,256], index: 2, kind: input, shape index: {}]   ;;  %s2080_s3 = inlined_call_operand.vmem [shape: bf16[32,256], index: 3, kind: output, shape index: {}]  }
   0x1   :  { %s1547_s14 = smov 0  }
   0x2 LB: > { %s25_s15 = sadd.s32 1, %s1517_s13  ;;  %p1058_p0 = scmp.ge.s32.totalorder %s1521_s14, 1  ;;  %s1521_s14 = sphi %s1547_s14, %s13_s14   ;;  %s1517_s13 = sphi %s1545_s13, %s2084_s13   ;;  %s1513_s12 = sphi %s1543_s12, %s2083_s12  }
   0x3   : > { %p27_p1 = scmp.ge.s32.totalorder %s25_s15, 2  ;;  %p174_p2 = scmp.lt.s32.totalorder %s1521_s14, 3 }
   0x5   : > { %s2086_s15 = smov (%p27_p1, %s25_s15), 0  ;;  %p175_p3 = pnand %p1058_p0, %p174_p2 }
   0x6   : > { %s1059_s27 = sshll.u32 (!%p175_p3), %s1513_s12, 1 }
   0x7   : > { %178 = sbr.rel (%p175_p3) target bundleno = 265 (0x109), region = 32  ;;  %p214_p4 = scmp.lt.s32.totalorder (!%p175_p3), %s1059_s27, 3 }
   0xc   : > { %v1142_v0 = vld [vmem:[%s2078_s1 + $0x70] sm:$0xf]  ;;  %v1401_v1 = vld [vmem:[%s2078_s1 + $0x74] sm:$0xf0]  ;;  %v1134_v11 = vld [vmem:[%s2078_s1 + $0x60] sm:$0xf] }
   0xd   : > { %v1206_v2 = vld [vmem:[%s2078_s1 + $0xf0] sm:$0xf]  ;;  %v1143_v3 = vor.u32 %v1401_v1, %v1142_v0  ;;  %v1417_v4 = vld [vmem:[%s2078_s1 + $0xf4] sm:$0xf0]  ;;  %v1399_v13 = vld [vmem:[%s2078_s1 + $0x64] sm:$0xf0] }
   0xe   : > { %v1270_v5 = vld [vmem:[%s2078_s1 + $0x170] sm:$0xf]  ;;  %v1433_v6 = vld [vmem:[%s2078_s1 + $0x174] sm:$0xf0]  ;;  %v1207_v7 = vor.u32 %v1417_v4, %v1206_v2  ;;  %v1198_v14 = vld [vmem:[%s2078_s1 + $0xe0] sm:$0xf]  ;;  %v1135_v16 = vor.u32 %v1399_v13, %v1134_v11 }
   0xf   : > { %v1271_v8 = vor.u32 %v1433_v6, %v1270_v5  ;;  %v1334_v9 = vld [vmem:[%s2078_s1 + $0x1f0] sm:$0xf]  ;;  %v1449_v10 = vld [vmem:[%s2078_s1 + $0x1f4] sm:$0xf0]  ;;  %717 = vmatpush.bf16.msra.mxu0 %v1143_v3  ;;  %v1415_v15 = vld [vmem:[%s2078_s1 + $0xe4] sm:$0xf0] }
  0x10   : > { %v1335_v12 = vor.u32 %v1449_v10, %v1334_v9  ;;  %731 = vmatpush.bf16.msra.mxu1 %v1207_v7  ;;  %v1199_v17 = vor.u32 %v1415_v15, %v1198_v14  ;;  %v1262_v18 = vld [vmem:[%s2078_s1 + $0x160] sm:$0xf]  ;;  %v1431_v19 = vld [vmem:[%s2078_s1 + $0x164] sm:$0xf0]  ;;  %v1126_v23 = vld [vmem:[%s2078_s1 + $0x50] sm:$0xf] }
  0x11   : > { %745 = vmatpush.bf16.msra.mxu2 %v1271_v8  ;;  %v1326_v20 = vld [vmem:[%s2078_s1 + $0x1e0] sm:$0xf]  ;;  %v1263_v21 = vor.u32 %v1431_v19, %v1262_v18  ;;  %v1447_v22 = vld [vmem:[%s2078_s1 + $0x1e4] sm:$0xf0]  ;;  %v1397_v24 = vld [vmem:[%s2078_s1 + $0x54] sm:$0xf0] }
  0x12   : > { %759 = vmatpush.bf16.msra.mxu3 %v1335_v12  ;;  %v1327_v25 = vor.u32 %v1447_v22, %v1326_v20  ;;  %v1190_v26 = vld [vmem:[%s2078_s1 + $0xd0] sm:$0xf]  ;;  %v1413_v27 = vld [vmem:[%s2078_s1 + $0xd4] sm:$0xf0]  ;;  %v1127_v29 = vor.u32 %v1397_v24, %v1126_v23  ;;  %v1118_v35 = vld [vmem:[%s2078_s1 + $0x40] sm:$0xf] }
  0x13   : > { %v1254_v28 = vld [vmem:[%s2078_s1 + $0x150] sm:$0xf]  ;;  %718 = vmatpush.bf16.msra.mxu0 %v1135_v16  ;;  %v1429_v30 = vld [vmem:[%s2078_s1 + $0x154] sm:$0xf0]  ;;  %v1191_v33 = vor.u32 %v1413_v27, %v1190_v26  ;;  %v1395_v36 = vld [vmem:[%s2078_s1 + $0x44] sm:$0xf0] }
  0x14   : > { %v1318_v31 = vld [vmem:[%s2078_s1 + $0x1d0] sm:$0xf]  ;;  %v1445_v32 = vld [vmem:[%s2078_s1 + $0x1d4] sm:$0xf0]  ;;  %732 = vmatpush.bf16.msra.mxu1 %v1199_v17  ;;  %v1255_v34 = vor.u32 %v1429_v30, %v1254_v28  ;;  %v1182_v37 = vld [vmem:[%s2078_s1 + $0xc0] sm:$0xf]  ;;  %v1119_v44 = vor.u32 %v1395_v36, %v1118_v35 }
  0x15   : > { %746 = vmatpush.bf16.msra.mxu2 %v1263_v21  ;;  %v1319_v38 = vor.u32 %v1445_v32, %v1318_v31  ;;  %v1411_v39 = vld [vmem:[%s2078_s1 + $0xc4] sm:$0xf0]  ;;  %v1246_v40 = vld [vmem:[%s2078_s1 + $0x140] sm:$0xf]  ;;  %v1110_v47 = vld [vmem:[%s2078_s1 + $0x30] sm:$0xf] }
  0x16   : > { %760 = vmatpush.bf16.msra.mxu3 %v1327_v25  ;;  %v1427_v41 = vld [vmem:[%s2078_s1 + $0x144] sm:$0xf0]  ;;  %v1310_v42 = vld [vmem:[%s2078_s1 + $0x1c0] sm:$0xf]  ;;  %v1183_v45 = vor.u32 %v1411_v39, %v1182_v37  ;;  %v1393_v48 = vld [vmem:[%s2078_s1 + $0x34] sm:$0xf0] }
  0x17   : > { %v1443_v43 = vld [vmem:[%s2078_s1 + $0x1c4] sm:$0xf0]  ;;  %719 = vmatpush.bf16.msra.mxu0 %v1127_v29  ;;  %v1247_v46 = vor.u32 %v1427_v41, %v1246_v40  ;;  %v1174_v49 = vld [vmem:[%s2078_s1 + $0xb0] sm:$0xf]  ;;  %v1409_v51 = vld [vmem:[%s2078_s1 + $0xb4] sm:$0xf0]  ;;  %v1111_v56 = vor.u32 %v1393_v48, %v1110_v47 }
  0x18   : > { %733 = vmatpush.bf16.msra.mxu1 %v1191_v33  ;;  %v1311_v50 = vor.u32 %v1443_v43, %v1310_v42  ;;  %v1238_v52 = vld [vmem:[%s2078_s1 + $0x130] sm:$0xf]  ;;  %v1425_v53 = vld [vmem:[%s2078_s1 + $0x134] sm:$0xf0]  ;;  %v1175_v57 = vor.u32 %v1409_v51, %v1174_v49  ;;  %v1102_v59 = vld [vmem:[%s2078_s1 + $0x20] sm:$0xf] }
  0x19   : > { %747 = vmatpush.bf16.msra.mxu2 %v1255_v34  ;;  %v1302_v54 = vld [vmem:[%s2078_s1 + $0x1b0] sm:$0xf]  ;;  %v1441_v55 = vld [vmem:[%s2078_s1 + $0x1b4] sm:$0xf0]  ;;  %v1239_v58 = vor.u32 %v1425_v53, %v1238_v52  ;;  %v1391_v60 = vld [vmem:[%s2078_s1 + $0x24] sm:$0xf0] }
  0x1a   : > { %761 = vmatpush.bf16.msra.mxu3 %v1319_v38  ;;  %v1166_v61 = vld [vmem:[%s2078_s1 + $0xa0] sm:$0xf]  ;;  %v1303_v62 = vor.u32 %v1441_v55, %v1302_v54  ;;  %v1407_v63 = vld [vmem:[%s2078_s1 + $0xa4] sm:$0xf0]  ;;  %v1103_v4 = vor.u32 %v1391_v60, %v1102_v59  ;;  %v1094_v5 = vld [vmem:[%s2078_s1 + $0x10] sm:$0xf] }
  0x1b   : > { %720 = vmatpush.bf16.msra.mxu0 %v1119_v44  ;;  %v1230_v0 = vld [vmem:[%s2078_s1 + $0x120] sm:$0xf]  ;;  %v1423_v1 = vld [vmem:[%s2078_s1 + $0x124] sm:$0xf0]  ;;  %v1167_v6 = vor.u32 %v1407_v63, %v1166_v61  ;;  %v1389_v8 = vld [vmem:[%s2078_s1 + $0x14] sm:$0xf0] }
  0x1c   : > { %734 = vmatpush.bf16.msra.mxu1 %v1183_v45  ;;  %v1294_v2 = vld [vmem:[%s2078_s1 + $0x1a0] sm:$0xf]  ;;  %v1439_v3 = vld [vmem:[%s2078_s1 + $0x1a4] sm:$0xf0]  ;;  %v1231_v7 = vor.u32 %v1423_v1, %v1230_v0  ;;  %v1158_v9 = vld [vmem:[%s2078_s1 + $0x90] sm:$0xf]  ;;  %v1095_v18 = vor.u32 %v1389_v8, %v1094_v5 }
  0x1d   : > { %748 = vmatpush.bf16.msra.mxu2 %v1247_v46  ;;  %v1405_v10 = vld [vmem:[%s2078_s1 + $0x94] sm:$0xf0]  ;;  %v1295_v11 = vor.u32 %v1439_v3, %v1294_v2  ;;  %v1222_v12 = vld [vmem:[%s2078_s1 + $0x110] sm:$0xf]  ;;  %v1086_v16 = vld [vmem:[%s2078_s1] sm:$0xf] }
  0x1e   : > { %762 = vmatpush.bf16.msra.mxu3 %v1311_v50  ;;  %v1421_v13 = vld [vmem:[%s2078_s1 + $0x114] sm:$0xf0]  ;;  %v1286_v14 = vld [vmem:[%s2078_s1 + $0x190] sm:$0xf]  ;;  %v1387_v17 = vld [vmem:[%s2078_s1 + $0x4] sm:$0xf0]  ;;  %v1159_v22 = vor.u32 %v1405_v10, %v1158_v9 }
  0x1f   : > { %721 = vmatpush.bf16.msra.mxu0 %v1111_v56  ;;  %v1437_v15 = vld [vmem:[%s2078_s1 + $0x194] sm:$0xf0]  ;;  %v1150_v19 = vld [vmem:[%s2078_s1 + $0x80] sm:$0xf]  ;;  %v1403_v20 = vld [vmem:[%s2078_s1 + $0x84] sm:$0xf0]  ;;  %v1223_v23 = vor.u32 %v1421_v13, %v1222_v12  ;;  %v1087_v32 = vor.u32 %v1387_v17, %v1086_v16 }
  0x20   : > { %735 = vmatpush.bf16.msra.mxu1 %v1175_v57  ;;  %v1214_v21 = vld [vmem:[%s2078_s1 + $0x100] sm:$0xf]  ;;  %v1419_v24 = vld [vmem:[%s2078_s1 + $0x104] sm:$0xf0]  ;;  %v1287_v26 = vor.u32 %v1437_v15, %v1286_v14  ;;  %v1366_v28 = vld [vmem:[%s2078_s1 + $0x230] sm:$0xf]  ;;  %v1151_v35 = vor.u32 %v1403_v20, %v1150_v19 }
  0x21   : > { %749 = vmatpush.bf16.msra.mxu2 %v1239_v58  ;;  %v1278_v25 = vld [vmem:[%s2078_s1 + $0x180] sm:$0xf]  ;;  %v1435_v27 = vld [vmem:[%s2078_s1 + $0x184] sm:$0xf0]  ;;  %v1457_v29 = vld [vmem:[%s2078_s1 + $0x234] sm:$0xf0]  ;;  %v1215_v36 = vor.u32 %v1419_v24, %v1214_v21 }
  0x22   : > { %763 = vmatpush.bf16.msra.mxu3 %v1303_v62  ;;  %v1400_v30 = vld [vmem:[%s2078_s1 + $0x74] sm:$0xf]  ;;  %v1144_v31 = vld [vmem:[%s2078_s1 + $0x78] sm:$0xf0]  ;;  %s2088_s27 = smov (!%p214_p4, %s1059_s27), 3  ;;  %v1279_v39 = vor.u32 %v1435_v27, %v1278_v25  ;;  %v1367_v40 = vor.u32 %v1457_v29, %v1366_v28  ;;  %vm713_vm0 = vcmask 523264  }
  0x23   : > { %722 = vmatpush.bf16.msra.mxu0 %v1103_v4  ;;  %v1416_v33 = vld [vmem:[%s2078_s1 + $0xf4] sm:$0xf]  ;;  %v1208_v34 = vld [vmem:[%s2078_s1 + $0xf8] sm:$0xf0]  ;;  %s1458_s22 = smul.u32 20, %s2088_s27  ;;  %v1147_v43 = vor.u32 %v1400_v30, %v1144_v31  ;;  %s1380_s9 = sshll.u32 %s2088_s27, 3 }
  0x24   : > { %736 = vmatpush.bf16.msra.mxu1 %v1167_v6  ;;  %v1432_v37 = vld [vmem:[%s2078_s1 + $0x174] sm:$0xf]  ;;  %v1272_v38 = vld [vmem:[%s2078_s1 + $0x178] sm:$0xf0]  ;;  %v1358_v41 = vld [vmem:[%s2078_s1 + $0x220] sm:$0xf]  ;;  %v1211_v44 = vor.u32 %v1416_v33, %v1208_v34  ;;  %s240_s11 = scalar_lea.vmem %s2080_s3, %s1380_s9 }
  0x25   : > { %750 = vmatpush.bf16.msra.mxu2 %v1231_v7  ;;  %v1455_v42 = vld [vmem:[%s2078_s1 + $0x224] sm:$0xf0]  ;;  %v1398_v45 = vld [vmem:[%s2078_s1 + $0x64] sm:$0xf]  ;;  %v1136_v46 = vld [vmem:[%s2078_s1 + $0x68] sm:$0xf0]  ;;  %v1275_v48 = vor.u32 %v1432_v37, %v1272_v38  ;;  %s1801_s12 = scalar_lea.vmem %s2077_s0, %s1458_s22 }
  0x26   : > { %764 = vmatpush.bf16.msra.mxu3 %v1295_v11  ;;  %v1414_v47 = vld [vmem:[%s2078_s1 + $0xe4] sm:$0xf]  ;;  %v1200_v49 = vld [vmem:[%s2078_s1 + $0xe8] sm:$0xf0]  ;;  %v1066_v52 = vld [vmem:[%s1801_s12] sm:$0xf]  ;;  %v1359_v59 = vor.u32 %v1455_v42, %v1358_v41  ;;  %v1139_v60 = vor.u32 %v1398_v45, %v1136_v46 }
  0x27   : > { %723 = vmatpush.bf16.msra.mxu0 %v1095_v18  ;;  %v1430_v50 = vld [vmem:[%s2078_s1 + $0x164] sm:$0xf]  ;;  %v1264_v51 = vld [vmem:[%s2078_s1 + $0x168] sm:$0xf0]  ;;  %v1383_v53 = vld [vmem:[%s1801_s12 + $0x10] sm:$0xf0]  ;;  %v1203_v0 = vor.u32 %v1414_v47, %v1200_v49 }
  0x28   : > { %737 = vmatpush.bf16.msra.mxu1 %v1159_v22  ;;  %v1074_v54 = vld [vmem:[%s1801_s12 + $0x8] sm:$0xf]  ;;  %v1350_v55 = vld [vmem:[%s2078_s1 + $0x210] sm:$0xf]  ;;  %v1453_v56 = vld [vmem:[%s2078_s1 + $0x214] sm:$0xf0]  ;;  %v1821_v57 = vor.u32 %v1383_v53, %v1066_v52  ;;  %v1267_v5 = vor.u32 %v1430_v50, %v1264_v51 }
  0x29   : > { %751 = vmatpush.bf16.msra.mxu2 %v1223_v23  ;;  %v1384_v58 = vld [vmem:[%s1801_s12 + $0x18] sm:$0xf0]  ;;  %v1382_v61 = vld [vmem:[%s1801_s12 + $0xc] sm:$0xf]  ;;  %v1076_v62 = vld [vmem:[%s1801_s12 + $0x1c] sm:$0xf0]  ;;  %v1351_v12 = vor.u32 %v1453_v56, %v1350_v55 }
  0x2a   : > { %765 = vmatpush.bf16.msra.mxu3 %v1287_v26  ;;  %v1826_v63 = vor.u32 %v1384_v58, %v1074_v54  ;;  %v1828_v1 = vor.u32 %v1382_v61, %v1076_v62  ;;  %v1381_v2 = vld [vmem:[%s1801_s12 + $0x4] sm:$0xf]  ;;  %v1068_v3 = vld [vmem:[%s1801_s12 + $0x14] sm:$0xf0]  ;;  %v1396_v4 = vld [vmem:[%s2078_s1 + $0x54] sm:$0xf] }
  0x2b   : > { %724 = vmatpush.bf16.msra.mxu0 %v1087_v32  ;;  %v1836_v6 = vor.u32 %v1381_v2, %v1068_v3  ;;  %v1128_v7 = vld [vmem:[%s2078_s1 + $0x58] sm:$0xf0]  ;;  %v1412_v8 = vld [vmem:[%s2078_s1 + $0xd4] sm:$0xf]  ;;  %v1342_v13 = vld [vmem:[%s2078_s1 + $0x200] sm:$0xf] }
  0x2c   : > { %738 = vmatpush.bf16.msra.mxu1 %v1151_v35  ;;  %v1192_v9 = vld [vmem:[%s2078_s1 + $0xd8] sm:$0xf0]  ;;  %v1428_v10 = vld [vmem:[%s2078_s1 + $0x154] sm:$0xf]  ;;  %v1131_v14 = vor.u32 %v1396_v4, %v1128_v7  ;;  %v1451_v16 = vld [vmem:[%s2078_s1 + $0x204] sm:$0xf0] }
  0x2d   : > { %752 = vmatpush.bf16.msra.mxu2 %v1215_v36  ;;  %v1256_v11 = vld [vmem:[%s2078_s1 + $0x158] sm:$0xf0]  ;;  %v1195_v15 = vor.u32 %v1412_v8, %v1192_v9  ;;  %v1394_v17 = vld [vmem:[%s2078_s1 + $0x44] sm:$0xf]  ;;  %v1120_v18 = vld [vmem:[%s2078_s1 + $0x48] sm:$0xf0]  ;;  %v1343_v26 = vor.u32 %v1451_v16, %v1342_v13 }
  0x2e   : > { %766 = vmatpush.bf16.msra.mxu3 %v1279_v39  ;;  %725 = vmatmul.bf16.vlgmr.msra.gmra.mxu0 %v1821_v57  ;;  %v1259_v19 = vor.u32 %v1428_v10, %v1256_v11  ;;  %v1410_v20 = vld [vmem:[%s2078_s1 + $0xc4] sm:$0xf]  ;;  %v1184_v21 = vld [vmem:[%s2078_s1 + $0xc8] sm:$0xf0]  ;;  %v1448_v24 = vld [vmem:[%s2078_s1 + $0x1f4] sm:$0xf]  ;;  %v1123_v27 = vor.u32 %v1394_v17, %v1120_v18 }
  0x2f   : > { %777 = vmatpush.bf16.msrb.mxu0 %v1367_v40  ;;  %739 = vmatmul.bf16.vlgmr.msra.gmra.mxu1 %v1836_v6  ;;  %v1426_v22 = vld [vmem:[%s2078_s1 + $0x144] sm:$0xf]  ;;  %v1248_v23 = vld [vmem:[%s2078_s1 + $0x148] sm:$0xf0]  ;;  %v1336_v25 = vld [vmem:[%s2078_s1 + $0x1f8] sm:$0xf0]  ;;  %v1187_v28 = vor.u32 %v1410_v20, %v1184_v21 }
  0x30   : > { %787 = vmatpush.bf16.msrb.mxu1 %v1147_v43  ;;  %753 = vmatmul.bf16.vlgmr.msra.gmra.mxu2 %v1826_v63  ;;  %v1392_v29 = vld [vmem:[%s2078_s1 + $0x34] sm:$0xf]  ;;  %v1112_v30 = vld [vmem:[%s2078_s1 + $0x38] sm:$0xf0]  ;;  %v1251_v31 = vor.u32 %v1426_v22, %v1248_v23  ;;  %v1339_v32 = vor.u32 %v1448_v24, %v1336_v25  ;;  %v1446_v37 = vld [vmem:[%s2078_s1 + $0x1e4] sm:$0xf] }
  0x31   : > { %801 = vmatpush.bf16.msrb.mxu2 %v1211_v44  ;;  %767 = vmatmul.bf16.vlgmr.msra.gmra.mxu3 %v1828_v1  ;;  %v1408_v33 = vld [vmem:[%s2078_s1 + $0xb4] sm:$0xf]  ;;  %v1176_v34 = vld [vmem:[%s2078_s1 + $0xb8] sm:$0xf0]  ;;  %v1328_v38 = vld [vmem:[%s2078_s1 + $0x1e8] sm:$0xf0]  ;;  %v1115_v41 = vor.u32 %v1392_v29, %v1112_v30 }
  0x32   : > { %815 = vmatpush.bf16.msrb.mxu3 %v1275_v48  ;;  %v1424_v35 = vld [vmem:[%s2078_s1 + $0x134] sm:$0xf]  ;;  %v1240_v36 = vld [vmem:[%s2078_s1 + $0x138] sm:$0xf0]  ;;  %v1082_v39 = vld [vmem:[%s1801_s12 + $0x10] sm:$0xf]  ;;  %v1179_v42 = vor.u32 %v1408_v33, %v1176_v34  ;;  %v1331_v46 = vor.u32 %v1446_v37, %v1328_v38 }
  0x33   : > { %778 = vmatpush.bf16.msrb.mxu0 %v1359_v59  ;;  %v1385_v40 = vld [vmem:[%s1801_s12 + $0x20] sm:$0xf0]  ;;  %v1104_v44 = vld [vmem:[%s2078_s1 + $0x28] sm:$0xf0]  ;;  %v1243_v45 = vor.u32 %v1424_v35, %v1240_v36  ;;  %v1444_v52 = vld [vmem:[%s2078_s1 + $0x1d4] sm:$0xf] }
  0x34   : > { %788 = vmatpush.bf16.msrb.mxu1 %v1139_v60  ;;  %v1390_v43 = vld [vmem:[%s2078_s1 + $0x24] sm:$0xf]  ;;  %v1168_v48 = vld [vmem:[%s2078_s1 + $0xa8] sm:$0xf0]  ;;  %v1927_v50 = vor.u32 %v1385_v40, %v1082_v39  ;;  %v1320_v53 = vld [vmem:[%s2078_s1 + $0x1d8] sm:$0xf0] }
  0x35   : > { %802 = vmatpush.bf16.msrb.mxu2 %v1203_v0  ;;  %v1406_v47 = vld [vmem:[%s2078_s1 + $0xa4] sm:$0xf]  ;;  %v1232_v51 = vld [vmem:[%s2078_s1 + $0x128] sm:$0xf0]  ;;  %v1107_v54 = vor.u32 %v1390_v43, %v1104_v44  ;;  %v1388_v56 = vld [vmem:[%s2078_s1 + $0x14] sm:$0xf]  ;;  %v1323_v60 = vor.u32 %v1444_v52, %v1320_v53 }
  0x36   : > { %816 = vmatpush.bf16.msrb.mxu3 %v1267_v5  ;;  %v1422_v49 = vld [vmem:[%s2078_s1 + $0x124] sm:$0xf]  ;;  %v1171_v55 = vor.u32 %v1406_v47, %v1168_v48  ;;  %v1096_v58 = vld [vmem:[%s2078_s1 + $0x18] sm:$0xf0]  ;;  %v1404_v61 = vld [vmem:[%s2078_s1 + $0x94] sm:$0xf] }
  0x37   : > { %779 = vmatpush.bf16.msrb.mxu0 %v1351_v12  ;;  %v1235_v59 = vor.u32 %v1422_v49, %v1232_v51  ;;  %v1160_v62 = vld [vmem:[%s2078_s1 + $0x98] sm:$0xf0]  ;;  %v1420_v0 = vld [vmem:[%s2078_s1 + $0x114] sm:$0xf]  ;;  %v1442_v3 = vld [vmem:[%s2078_s1 + $0x1c4] sm:$0xf]  ;;  %v1099_v5 = vor.u32 %v1388_v56, %v1096_v58 }
  0x38   : > { %789 = vmatpush.bf16.msrb.mxu1 %v1131_v14  ;;  %v1224_v2 = vld [vmem:[%s2078_s1 + $0x118] sm:$0xf0]  ;;  %v1312_v4 = vld [vmem:[%s2078_s1 + $0x1c8] sm:$0xf0]  ;;  %v1163_v7 = vor.u32 %v1404_v61, %v1160_v62  ;;  %v1386_v8 = vld [vmem:[%s2078_s1 + $0x4] sm:$0xf] }
  0x39   : > { %803 = vmatpush.bf16.msrb.mxu2 %v1195_v15  ;;  %v1088_v9 = vld [vmem:[%s2078_s1 + $0x8] sm:$0xf0]  ;;  %v1227_v10 = vor.u32 %v1420_v0, %v1224_v2  ;;  %v1315_v11 = vor.u32 %v1442_v3, %v1312_v4  ;;  %v1402_v12 = vld [vmem:[%s2078_s1 + $0x84] sm:$0xf]  ;;  %v1440_v16 = vld [vmem:[%s2078_s1 + $0x1b4] sm:$0xf] }
  0x3a   : > { %817 = vmatpush.bf16.msrb.mxu3 %v1259_v19  ;;  %v1152_v13 = vld [vmem:[%s2078_s1 + $0x88] sm:$0xf0]  ;;  %v1418_v14 = vld [vmem:[%s2078_s1 + $0x104] sm:$0xf]  ;;  %v1304_v17 = vld [vmem:[%s2078_s1 + $0x1b8] sm:$0xf0]  ;;  %v1091_v20 = vor.u32 %v1386_v8, %v1088_v9 }
  0x3b   : > { %780 = vmatpush.bf16.msrb.mxu0 %v1343_v26  ;;  %v1216_v15 = vld [vmem:[%s2078_s1 + $0x108] sm:$0xf0]  ;;  %v1456_v18 = vld [vmem:[%s2078_s1 + $0x234] sm:$0xf]  ;;  %v1368_v19 = vld [vmem:[%s2078_s1 + $0x238] sm:$0xf0]  ;;  %v1155_v21 = vor.u32 %v1402_v12, %v1152_v13  ;;  %v1307_v23 = vor.u32 %v1440_v16, %v1304_v17 }
  0x3c   : > { %790 = vmatpush.bf16.msrb.mxu1 %v1123_v27  ;;  %v1219_v22 = vor.u32 %v1418_v14, %v1216_v15  ;;  %v1371_v24 = vor.u32 %v1456_v18, %v1368_v19  ;;  %v1438_v25 = vld [vmem:[%s2078_s1 + $0x1a4] sm:$0xf]  ;;  %v1296_v26 = vld [vmem:[%s2078_s1 + $0x1a8] sm:$0xf0]  ;;  %v1452_v33 = vld [vmem:[%s2078_s1 + $0x214] sm:$0xf] }
  0x3d   : > { %804 = vmatpush.bf16.msrb.mxu2 %v1187_v28  ;;  %v1454_v27 = vld [vmem:[%s2078_s1 + $0x224] sm:$0xf]  ;;  %v1360_v28 = vld [vmem:[%s2078_s1 + $0x228] sm:$0xf0]  ;;  %v1299_v29 = vor.u32 %v1438_v25, %v1296_v26  ;;  %v1352_v34 = vld [vmem:[%s2078_s1 + $0x218] sm:$0xf0] }
  0x3e   : > { %818 = vmatpush.bf16.msrb.mxu3 %v1251_v31  ;;  %1372 = vmatmul.msk.bf16.vlgmr.msrb.gmra.mxu0 %vm713_vm0, %v1927_v50  ;;  %v1363_v30 = vor.u32 %v1454_v27, %v1360_v28  ;;  %v1436_v31 = vld [vmem:[%s2078_s1 + $0x194] sm:$0xf]  ;;  %v1355_v36 = vor.u32 %v1452_v33, %v1352_v34  ;;  %v1450_v37 = vld [vmem:[%s2078_s1 + $0x204] sm:$0xf] }
  0x3f   : > { %829 = vmatpush.bf16.msra.mxu0 %v1339_v32  ;;  %v1288_v32 = vld [vmem:[%s2078_s1 + $0x198] sm:$0xf0] }
  0x40   : > { %791 = vmatpush.bf16.msrb.mxu1 %v1115_v41  ;;  %v1291_v35 = vor.u32 %v1436_v31, %v1288_v32  ;;  %v322_v41 = vld [vmem:[%s2079_s2] sm:$0x3] }
  0x41   : > { %805 = vmatpush.bf16.msrb.mxu2 %v1179_v42  ;;  %v324_v42 = vperm.slane %v322_v41, 0  ;;  %v325_v2 = vperm.slane %v322_v41, 1 }
  0x42   : > { %819 = vmatpush.bf16.msrb.mxu3 %v1243_v45 }
  0x43   : > { %830 = vmatpush.bf16.msra.mxu0 %v1331_v46 }
  0x44   : > { %792 = vmatpush.bf16.msrb.mxu1 %v1107_v54 }
  0x45   : > { %806 = vmatpush.bf16.msrb.mxu2 %v1171_v55 }
  0x46   : > { %820 = vmatpush.bf16.msrb.mxu3 %v1235_v59 }
  0x47   : > { %831 = vmatpush.bf16.msra.mxu0 %v1323_v60 }
  0x48   : > { %793 = vmatpush.bf16.msrb.mxu1 %v1099_v5 }
  0x49   : > { %807 = vmatpush.bf16.msrb.mxu2 %v1163_v7 }
  0x4a   : > { %821 = vmatpush.bf16.msrb.mxu3 %v1227_v10 }
  0x4b   : > { %832 = vmatpush.bf16.msra.mxu0 %v1315_v11 }
  0x4c   : > { %794 = vmatpush.bf16.msrb.mxu1 %v1091_v20 }
  0x4d   : > { %808 = vmatpush.bf16.msrb.mxu2 %v1155_v21 }
  0x4e   : > { %822 = vmatpush.bf16.msrb.mxu3 %v1219_v22 }
  0x4f   : > { %833 = vmatpush.bf16.msra.mxu0 %v1307_v23  ;;  %795 = vmatmul.bf16.vlgmr.msrb.gmra.mxu1 %v1821_v57  ;;  %v1434_v57 = vld [vmem:[%s2078_s1 + $0x184] sm:$0xf] }
  0x50   : > { %847 = vmatpush.bf16.msra.mxu1 %v1371_v24  ;;  %809 = vmatmul.bf16.vlgmr.msrb.gmra.mxu2 %v1836_v6  ;;  %v1280_v6 = vld [vmem:[%s2078_s1 + $0x188] sm:$0xf0] }
  0x51   : > { %823 = vmatmul.bf16.vlgmr.msrb.gmra.mxu3 %v1826_v63  ;;  %v1344_v63 = vld [vmem:[%s2078_s1 + $0x208] sm:$0xf0]  ;;  %v1283_v38 = vor.u32 %v1434_v57, %v1280_v6 }
  0x52   : > { %v1347_v39 = vor.u32 %v1450_v37, %v1344_v63 }
  0x53   : > { %834 = vmatpush.bf16.msra.mxu0 %v1299_v29 }
  0x54   : > { %848 = vmatpush.bf16.msra.mxu1 %v1363_v30 }
  0x57   : > { %835 = vmatpush.bf16.msra.mxu0 %v1291_v35 }
  0x58   : > { %849 = vmatpush.bf16.msra.mxu1 %v1355_v36 }
  0x5b   : > { %836 = vmatpush.bf16.msra.mxu0 %v1283_v38 }
  0x5c   : > { %850 = vmatpush.bf16.msra.mxu1 %v1347_v39 }
  0x5e   : > { %837 = vmatmul.bf16.vlgmr.msra.gmra.mxu0 %v1828_v1 }
  0x5f   : > { %1373 = vmatmul.msk.bf16.vlgmr.msra.gmra.mxu1 %vm713_vm0, %v1927_v50 }
  0xab   : > { %v726_v40 = vpop.f32.mrf.mxu0 }
  0xac   : > { %v727_v43 = vadd.f32 %v726_v40, %v324_v42  ;;  %v740_v44 = vpop.f32.mrf.mxu1 }
  0xae   : > { %v741_v46 = vadd.f32 %v740_v44, %v727_v43 }
  0xb3   : > { %v728_v45 = vpop.f32.mrf.mxu0  ;;  %v754_v47 = vpop.f32.mrf.mxu2 }
  0xb4   : > { %v755_v48 = vadd.f32 %v754_v47, %v741_v46  ;;  %v768_v49 = vpop.f32.mrf.mxu3  ;;  %v729_v51 = vadd.f32 %v728_v45, %v324_v42  ;;  %v742_v52 = vpop.f32.mrf.mxu1 }
  0xb6   : > { %v769_v1 = vadd.f32 %v768_v49, %v755_v48  ;;  %v743_v54 = vadd.f32 %v742_v52, %v729_v51 }
  0xbb   : > { %v782_v53 = vpop.f32.mrf.mxu0  ;;  %v756_v55 = vpop.f32.mrf.mxu2 }
  0xbc   : > { %v2039_v50 = vadd.f32 %v782_v53, %v769_v1  ;;  %v757_v56 = vadd.f32 %v756_v55, %v743_v54  ;;  %v770_v58 = vpop.f32.mrf.mxu3 }
  0xbe   : > { %v1374_v59 = vmul.f32 -1.442695, %v2039_v50  ;;  %v771_v61 = vadd.f32 %v770_v58, %v757_v56 }
  0xc0   : > { %1483 = vpow2.f32 %v1374_v59 }
  0xc3   : > { %v784_v60 = vpop.f32.mrf.mxu0 }
  0xc4   : > { %v2042_v0 = vadd.f32 %v784_v60, %v771_v61 }
  0xc6   : > { %v1376_v3 = vmul.f32 -1.442695, %v2042_v0  ;;  %v1484_v9 = vpop.eup %1483 }
  0xc7   : > { %v869_v11 = vadd.f32 1.0, %v1484_v9 }
  0xc8   : > { %1485 = vpow2.f32 %v1376_v3 }
  0xc9   : > { %1487 = vrcp.f32 %v869_v11  ;;  %v884_v41 = vand.u32 2147483648, %v869_v11  ;;  %vm878_vm2 = vweird.f32 %v869_v11  ;;  %v882_v42 = vand.u32 2147483647, %v869_v11 }
  0xcb   : > { %v885_v49 = vor.u32 1.1754944e-38, %v884_v41  ;;  %vm883_vm5 = vcmp.eq.f32.partialorder %v882_v42, 8.507059e+37 }
  0xcc   : > { %v796_v62 = vpop.f32.mrf.mxu1 }
  0xcd   : > { %v797_v4 = vadd.f32 %v796_v62, %v325_v2 }
  0xce   : > { %v1486_v17 = vpop.eup %1485 }
  0xcf   : > { %v2045_v21 = vadd.f32 1.0, %v1486_v17  ;;  %v1488_v26 = vpop.eup %1487 }
  0xd0   : > { %v874_v29 = vmul.f32 %v1488_v26, %v869_v11  ;;  %vm879_vm1 = vweird.f32 %v1488_v26 }
  0xd1   : > { %vm880_vm3 = vmor %vm878_vm2, %vm879_vm1  ;;  %vm908_vm10 = vweird.f32 %v2045_v21  ;;  %v914_v58 = vand.u32 2147483648, %v2045_v21  ;;  %v912_v62 = vand.u32 2147483647, %v2045_v21 }
  0xd2   : > { %v875_v35 = vsub.f32 1.0, %v874_v29 }
  0xd3   : > { %v810_v5 = vpop.f32.mrf.mxu2  ;;  %v915_v9 = vor.u32 1.1754944e-38, %v914_v58  ;;  %vm913_vm13 = vcmp.eq.f32.partialorder %v912_v62, 8.507059e+37 }
  0xd4   : > { %v811_v7 = vadd.f32 %v810_v5, %v797_v4  ;;  %v798_v8 = vpop.f32.mrf.mxu1  ;;  %v824_v10 = vpop.f32.mrf.mxu3  ;;  %v876_v57 = vmul.f32 %v1488_v26, %v875_v35 }
  0xd5   : > { %v799_v14 = vadd.f32 %v798_v8, %v325_v2 }
  0xd6   : > { %v825_v12 = vadd.f32 %v824_v10, %v811_v7  ;;  %v877_v39 = vadd.f32 %v1488_v26, %v876_v57 }
  0xd8   : > { %v881_v46 = vsel %vm880_vm3, %v1488_v26, %v877_v39 }
  0xd9   : > { %v886_v53 = vsel %vm883_vm5, %v885_v49, %v881_v46 }
  0xda   : > { %v933_v60 = vmul.f32 %v886_v53, %v2039_v50 }
  0xdb   : > { %v838_v13 = vpop.f32.mrf.mxu0  ;;  %v812_v16 = vpop.f32.mrf.mxu2 }
  0xdc   : > { %v839_v15 = vadd.f32 %v838_v13, %v825_v12  ;;  %v813_v18 = vadd.f32 %v812_v16, %v799_v14  ;;  %v852_v19 = vpop.f32.mrf.mxu1  ;;  %v826_v22 = vpop.f32.mrf.mxu3 }
  0xde   : > { %v853_v20 = vadd.f32 %v852_v19, %v839_v15  ;;  %v827_v24 = vadd.f32 %v826_v22, %v813_v18 }
  0xe0   : > { %v1375_v23 = vmul.f32 -1.442695, %v853_v20 }
  0xe2   : > { %1489 = vpow2.f32 %v1375_v23 }
  0xe3   : > { %v840_v25 = vpop.f32.mrf.mxu0  ;;  %1491 = vrcp.f32 %v2045_v21 }
  0xe4   : > { %v841_v27 = vadd.f32 %v840_v25, %v827_v24  ;;  %v854_v28 = vpop.f32.mrf.mxu1 }
  0xe6   : > { %v2048_v30 = vadd.f32 %v854_v28, %v841_v27 }
  0xe8   : > { %v1490_v31 = vpop.eup %1489  ;;  %v1377_v32 = vmul.f32 -1.442695, %v2048_v30 }
  0xe9   : > { %v870_v33 = vadd.f32 1.0, %v1490_v31  ;;  %v1492_v34 = vpop.eup %1491 }
  0xea   : > { %1493 = vpow2.f32 %v1377_v32  ;;  %v904_v36 = vmul.f32 %v1492_v34, %v2045_v21  ;;  %vm909_vm7 = vweird.f32 %v1492_v34 }
  0xeb   : > { %1495 = vrcp.f32 %v870_v33  ;;  %v899_v45 = vand.u32 2147483648, %v870_v33  ;;  %v897_v48 = vand.u32 2147483647, %v870_v33  ;;  %vm893_vm6 = vweird.f32 %v870_v33  ;;  %vm2056_vm11 = vmor %vm908_vm10, %vm909_vm7 }
  0xec   : > { %v905_v63 = vsub.f32 1.0, %v904_v36 }
  0xed   : > { %v900_v54 = vor.u32 1.1754944e-38, %v899_v45  ;;  %vm898_vm9 = vcmp.eq.f32.partialorder %v897_v48, 8.507059e+37 }
  0xee   : > { %v906_v44 = vmul.f32 %v1492_v34, %v905_v63 }
  0xf0   : > { %v1494_v6 = vpop.eup %1493  ;;  %v907_v1 = vadd.f32 %v1492_v34, %v906_v44 }
  0xf1   : > { %v1496_v37 = vpop.eup %1495  ;;  %v872_v38 = vadd.f32 1.0, %v1494_v6 }
  0xf2   : > { %v889_v40 = vmul.f32 %v1496_v37, %v870_v33  ;;  %vm894_vm4 = vweird.f32 %v1496_v37  ;;  %v911_v4 = vsel %vm2056_vm11, %v1492_v34, %v907_v1 }
  0xf3   : > { %1497 = vrcp.f32 %v872_v38  ;;  %vm895_vm8 = vmor %vm893_vm6, %vm894_vm4  ;;  %v929_v5 = vand.u32 2147483648, %v872_v38  ;;  %v927_v50 = vand.u32 2147483647, %v872_v38  ;;  %vm923_vm14 = vweird.f32 %v872_v38 }
  0xf4   : > { %v890_v43 = vsub.f32 1.0, %v889_v40  ;;  %v916_v11 = vsel %vm913_vm13, %v915_v9, %v911_v4 }
  0xf5   : > { %v930_v12 = vor.u32 1.1754944e-38, %v929_v5  ;;  %vm928_vm0 = vcmp.eq.f32.partialorder %v927_v50, 8.507059e+37  ;;  %v935_v15 = vmul.f32 %v916_v11, %v2042_v0 }
  0xf6   : > { %v891_v47 = vmul.f32 %v1496_v37, %v890_v43 }
  0xf8   : > { %v892_v51 = vadd.f32 %v1496_v37, %v891_v47 }
  0xf9   : > { %v1498_v52 = vpop.eup %1497 }
  0xfa   : > { %v896_v55 = vsel %vm895_vm8, %v1496_v37, %v892_v51  ;;  %v919_v56 = vmul.f32 %v1498_v52, %v872_v38  ;;  %vm924_vm12 = vweird.f32 %v1498_v52 }
  0xfb   : > { %v901_v59 = vsel %vm898_vm9, %v900_v54, %v896_v55  ;;  %vm925_vm15 = vmor %vm923_vm14, %vm924_vm12 }
  0xfc   : > { %v934_v2 = vmul.f32 %v901_v59, %v853_v20  ;;  %v920_v3 = vsub.f32 1.0, %v919_v56 }
  0xfe   : > { %v937_v7 = vpack.c.bf16 %v934_v2, %v933_v60  ;;  %v921_v8 = vmul.f32 %v1498_v52, %v920_v3 }
 0x100   : > { %939 = vst [vmem:[%s240_s11] sm:$0xff] %v937_v7  ;;  %v922_v10 = vadd.f32 %v1498_v52, %v921_v8 }
 0x102   : > { %v926_v13 = vsel %vm925_vm15, %v1498_v52, %v922_v10 }
 0x103   : > { %v931_v14 = vsel %vm928_vm0, %v930_v12, %v926_v13 }
 0x104   : > { %v936_v16 = vmul.f32 %v931_v14, %v2048_v30 }
 0x106   : > { %v938_v17 = vpack.c.bf16 %v936_v16, %v935_v15 }
 0x108   : > { %940 = vst [vmem:[%s240_s11 + $0x8] sm:$0xff] %v938_v17 }
 0x109 PF: > { %s13_s14 = sadd.s32 1, %s1521_s14   ;;  %s2083_s12 = smov %s1517_s13 }
 0x10a   : > { %p10_p5 = scmp.ge.s32.totalorder %s13_s14, 4   ;;  %s2084_s13 = smov %s2086_s15 }
 0x10c   :  { %12 = sbr.rel (!%p10_p5) target bundleno = 2 (0x2), region = 68 }

// kernel: just_efficientnet_forward.13
= control target key start
LH: loop header
LB: loop body
LE: loop exit
PB: predicated region body
PF: predicated region fallthrough
CT: control target
= control target key end

     0   :  { %s1091_s12 = smov 0   ;;  %s1093_s13 = smov 0   ;;  %s1300_s0 = inlined_call_operand.vmem [shape: bf16[8,256], index: 0, kind: input, shape index: {}]   ;;  %s1301_s1 = inlined_call_operand.vmem [shape: bf16[256,1280], index: 1, kind: input, shape index: {}]   ;;  %s1302_s2 = inlined_call_operand.vmem [shape: f32[1,1280], index: 2, kind: input, shape index: {}]   ;;  %s1303_s3 = inlined_call_operand.vmem [shape: bf16[8,1280], index: 3, kind: output, shape index: {}]  }
   0x1   :  { %s1095_s14 = smov 0   ;;  %s1097_s15 = smov 0  }
   0x2   :  { %s1099_s16 = smov 0  }
   0x3 LB: > { %s22_s17 = sadd.s32 1, %s1065_s15  ;;  %p65_p1 = scmp.ne.s32.totalorder %s1057_s13, %s1053_s12  ;;  %s1069_s16 = sphi %s1099_s16, %s13_s16   ;;  %s1065_s15 = sphi %s1097_s15, %s1307_s15   ;;  %s1061_s14 = sphi %s1095_s14, %s1306_s14   ;;  %s1057_s13 = sphi %s1093_s13, %s1305_s13   ;;  %s1053_s12 = sphi %s1091_s12, %s1304_s12  }
   0x4   : > { %p23_p0 = scmp.ge.s32.totalorder %s22_s17, 5  ;;  %p66_p2 = scmp.eq.s32.totalorder %s1069_s16, 0 }
   0x5   : > { %s58_s19 = sadd.s32 1, %s1057_s13  ;;  %p809_p5 = scmp.ge.s32.totalorder %s1069_s16, 5 }
   0x6   : > { %s1309_s17 = smov (%p23_p0, %s22_s17), 0  ;;  %p67_p3 = por %p66_p2, %p65_p1 }
   0x7   : > { %s55_s18 = ssub.s32 %s1065_s15, %s1309_s17  ;;  %153 = sbr.rel (%p809_p5) target bundleno = 48 (0x30), region = 20 }
   0x8   : > { %p56_p4 = scmp.eq.s32.totalorder %s55_s18, 0 }
   0xa   : > { %s1126_s20 = scalar_select %p56_p4, %s1057_s13, %s58_s19  }
   0xc   : > { %156 = sbr.rel (!%p67_p3) target bundleno = 48 (0x30), region = 24  ;;  %s158_s21 = sand.u32 (%p67_p3), 1, %s1057_s13  }
   0xd   : > { %s950_s22 = sshll.u32 (%p67_p3), %s1065_s15, 3  ;;  %s810_s23 = sshll.u32 (%p67_p3), %s158_s21, 8 }
   0xe   : > { %s1134_s26 = scalar_lea.vmem (%p67_p3), %s1301_s1, %s950_s22  ;;  %s1139_s27 = scalar_lea.vmem (%p67_p3), [#allocation2], %s810_s23 }
   0xf   : > { %v254_v0 = vld [vmem:[%s1134_s26] sm:$0xff] (%p67_p3)  ;;  %v256_v1 = vld [vmem:[%s1134_s26 + $0x28] sm:$0xff] (%p67_p3)  ;;  %v258_v2 = vld [vmem:[%s1134_s26 + $0x50] sm:$0xff] (%p67_p3) }
  0x10   : > { %255 = vst [vmem:[%s1139_s27] sm:$0xff] (%p67_p3), %v254_v0  ;;  %v260_v3 = vld [vmem:[%s1134_s26 + $0x78] sm:$0xff] (%p67_p3)  ;;  %v262_v4 = vld [vmem:[%s1134_s26 + $0xa0] sm:$0xff] (%p67_p3)  ;;  %v264_v5 = vld [vmem:[%s1134_s26 + $0xc8] sm:$0xff] (%p67_p3) }
  0x11   : > { %257 = vst [vmem:[%s1139_s27 + $0x8] sm:$0xff] %v256_v1  ;;  %v266_v6 = vld [vmem:[%s1134_s26 + $0xf0] sm:$0xff]  ;;  %v268_v7 = vld [vmem:[%s1134_s26 + $0x118] sm:$0xff]  ;;  %v270_v8 = vld [vmem:[%s1134_s26 + $0x140] sm:$0xff] }
  0x12   : > { %259 = vst [vmem:[%s1139_s27 + $0x10] sm:$0xff] %v258_v2  ;;  %v272_v9 = vld [vmem:[%s1134_s26 + $0x168] sm:$0xff]  ;;  %v274_v10 = vld [vmem:[%s1134_s26 + $0x190] sm:$0xff]  ;;  %v276_v11 = vld [vmem:[%s1134_s26 + $0x1b8] sm:$0xff] }
  0x13   : > { %261 = vst [vmem:[%s1139_s27 + $0x18] sm:$0xff] %v260_v3  ;;  %v278_v12 = vld [vmem:[%s1134_s26 + $0x1e0] sm:$0xff]  ;;  %v280_v13 = vld [vmem:[%s1134_s26 + $0x208] sm:$0xff]  ;;  %v282_v14 = vld [vmem:[%s1134_s26 + $0x230] sm:$0xff] }
  0x14   : > { %263 = vst [vmem:[%s1139_s27 + $0x20] sm:$0xff] %v262_v4  ;;  %v284_v15 = vld [vmem:[%s1134_s26 + $0x258] sm:$0xff]  ;;  %v286_v16 = vld [vmem:[%s1134_s26 + $0x280] sm:$0xff]  ;;  %v288_v17 = vld [vmem:[%s1134_s26 + $0x2a8] sm:$0xff] }
  0x15   : > { %265 = vst [vmem:[%s1139_s27 + $0x28] sm:$0xff] %v264_v5  ;;  %v290_v18 = vld [vmem:[%s1134_s26 + $0x2d0] sm:$0xff]  ;;  %v292_v19 = vld [vmem:[%s1134_s26 + $0x2f8] sm:$0xff]  ;;  %v294_v20 = vld [vmem:[%s1134_s26 + $0x320] sm:$0xff] }
  0x16   : > { %267 = vst [vmem:[%s1139_s27 + $0x30] sm:$0xff] %v266_v6  ;;  %v296_v21 = vld [vmem:[%s1134_s26 + $0x348] sm:$0xff]  ;;  %v298_v22 = vld [vmem:[%s1134_s26 + $0x370] sm:$0xff]  ;;  %v300_v23 = vld [vmem:[%s1134_s26 + $0x398] sm:$0xff] }
  0x17   : > { %269 = vst [vmem:[%s1139_s27 + $0x38] sm:$0xff] %v268_v7  ;;  %v302_v24 = vld [vmem:[%s1134_s26 + $0x3c0] sm:$0xff]  ;;  %v304_v25 = vld [vmem:[%s1134_s26 + $0x3e8] sm:$0xff]  ;;  %v306_v26 = vld [vmem:[%s1134_s26 + $0x410] sm:$0xff] }
  0x18   : > { %271 = vst [vmem:[%s1139_s27 + $0x40] sm:$0xff] %v270_v8  ;;  %v308_v27 = vld [vmem:[%s1134_s26 + $0x438] sm:$0xff]  ;;  %v310_v28 = vld [vmem:[%s1134_s26 + $0x460] sm:$0xff]  ;;  %v312_v29 = vld [vmem:[%s1134_s26 + $0x488] sm:$0xff] }
  0x19   : > { %273 = vst [vmem:[%s1139_s27 + $0x48] sm:$0xff] %v272_v9  ;;  %v314_v30 = vld [vmem:[%s1134_s26 + $0x4b0] sm:$0xff]  ;;  %v316_v31 = vld [vmem:[%s1134_s26 + $0x4d8] sm:$0xff] }
  0x1a   : > { %275 = vst [vmem:[%s1139_s27 + $0x50] sm:$0xff] %v274_v10 }
  0x1b   : > { %277 = vst [vmem:[%s1139_s27 + $0x58] sm:$0xff] %v276_v11 }
  0x1c   : > { %279 = vst [vmem:[%s1139_s27 + $0x60] sm:$0xff] %v278_v12 }
  0x1d   : > { %281 = vst [vmem:[%s1139_s27 + $0x68] sm:$0xff] %v280_v13 }
  0x1e   : > { %283 = vst [vmem:[%s1139_s27 + $0x70] sm:$0xff] %v282_v14 }
  0x1f   : > { %285 = vst [vmem:[%s1139_s27 + $0x78] sm:$0xff] %v284_v15 }
  0x20   : > { %287 = vst [vmem:[%s1139_s27 + $0x80] sm:$0xff] %v286_v16 }
  0x21   : > { %289 = vst [vmem:[%s1139_s27 + $0x88] sm:$0xff] %v288_v17 }
  0x22   : > { %291 = vst [vmem:[%s1139_s27 + $0x90] sm:$0xff] %v290_v18 }
  0x23   : > { %293 = vst [vmem:[%s1139_s27 + $0x98] sm:$0xff] %v292_v19 }
  0x24   : > { %295 = vst [vmem:[%s1139_s27 + $0xa0] sm:$0xff] %v294_v20 }
  0x25   : > { %297 = vst [vmem:[%s1139_s27 + $0xa8] sm:$0xff] %v296_v21 }
  0x26   : > { %299 = vst [vmem:[%s1139_s27 + $0xb0] sm:$0xff] %v298_v22 }
  0x27   : > { %301 = vst [vmem:[%s1139_s27 + $0xb8] sm:$0xff] %v300_v23 }
  0x28   : > { %303 = vst [vmem:[%s1139_s27 + $0xc0] sm:$0xff] %v302_v24 }
  0x29   : > { %305 = vst [vmem:[%s1139_s27 + $0xc8] sm:$0xff] %v304_v25 }
  0x2a   : > { %307 = vst [vmem:[%s1139_s27 + $0xd0] sm:$0xff] %v306_v26 }
  0x2b   : > { %309 = vst [vmem:[%s1139_s27 + $0xd8] sm:$0xff] %v308_v27 }
  0x2c   : > { %311 = vst [vmem:[%s1139_s27 + $0xe0] sm:$0xff] %v310_v28 }
  0x2d   : > { %313 = vst [vmem:[%s1139_s27 + $0xe8] sm:$0xff] %v312_v29 }
  0x2e   : > { %315 = vst [vmem:[%s1139_s27 + $0xf0] sm:$0xff] %v314_v30 }
  0x2f   : > { %317 = vst [vmem:[%s1139_s27 + $0xf8] sm:$0xff] %v316_v31 }
  0x30 PF: > { %p813_p6 = scmp.ge.s32.totalorder %s1069_s16, 1  ;;  %p330_p7 = scmp.lt.s32.totalorder %s1069_s16, 6 }
  0x32   : > { %p331_p8 = pnand %p813_p6, %p330_p7 }
  0x33   : > { %s337_s28 = sand.u32 (!%p331_p8), 1, %s1053_s12   ;;  %s815_s6 = sshll.u32 (!%p331_p8), %s1061_s14, 1 }
  0x34   : > { %334 = sbr.rel (%p331_p8) target bundleno = 261 (0x105), region = 66  ;;  %s814_s29 = sshll.u32 (!%p331_p8), %s337_s28, 8 }
  0x35   : > { %s1205_s30 = scalar_lea.vmem (!%p331_p8), [#allocation2], %s814_s29  ;;  %p380_p9 = scmp.lt.s32.totalorder (!%p331_p8), %s815_s6, 9 }
  0x39   : > { %v876_v32 = vld [vmem:[%s1205_s30 + $0x70] sm:$0xf]  ;;  %v966_v33 = vld [vmem:[%s1205_s30 + $0x74] sm:$0xf0]  ;;  %v965_v37 = vld [vmem:[%s1205_s30 + $0x74] sm:$0xf] }
  0x3a   : > { %v940_v34 = vld [vmem:[%s1205_s30 + $0xf0] sm:$0xf]  ;;  %v877_v35 = vor.u32 %v966_v33, %v876_v32  ;;  %v982_v36 = vld [vmem:[%s1205_s30 + $0xf4] sm:$0xf0]  ;;  %v878_v38 = vld [vmem:[%s1205_s30 + $0x78] sm:$0xf0] }
  0x3b   : > { %v941_v39 = vor.u32 %v982_v36, %v940_v34  ;;  %v881_v40 = vor.u32 %v965_v37, %v878_v38  ;;  %v981_v41 = vld [vmem:[%s1205_s30 + $0xf4] sm:$0xf]  ;;  %v942_v42 = vld [vmem:[%s1205_s30 + $0xf8] sm:$0xf0]  ;;  %v868_v43 = vld [vmem:[%s1205_s30 + $0x60] sm:$0xf] }
  0x3c   : > { %600 = vmatpush.bf16.msra.mxu0 %v877_v35  ;;  %v945_v44 = vor.u32 %v981_v41, %v942_v42  ;;  %v964_v45 = vld [vmem:[%s1205_s30 + $0x64] sm:$0xf0]  ;;  %v932_v46 = vld [vmem:[%s1205_s30 + $0xe0] sm:$0xf]  ;;  %v963_v50 = vld [vmem:[%s1205_s30 + $0x64] sm:$0xf] }
  0x3d   : > { %v980_v47 = vld [vmem:[%s1205_s30 + $0xe4] sm:$0xf0]  ;;  %613 = vmatpush.bf16.msra.mxu1 %v941_v39  ;;  %626 = vmatpush.bf16.msra.mxu2 %v881_v40  ;;  %v869_v48 = vor.u32 %v964_v45, %v868_v43  ;;  %v870_v51 = vld [vmem:[%s1205_s30 + $0x68] sm:$0xf0]  ;;  %v979_v52 = vld [vmem:[%s1205_s30 + $0xe4] sm:$0xf] }
  0x3e   : > { %v933_v49 = vor.u32 %v980_v47, %v932_v46  ;;  %639 = vmatpush.bf16.msra.mxu3 %v945_v44  ;;  %v873_v53 = vor.u32 %v963_v50, %v870_v51  ;;  %v934_v54 = vld [vmem:[%s1205_s30 + $0xe8] sm:$0xf0]  ;;  %v860_v55 = vld [vmem:[%s1205_s30 + $0x50] sm:$0xf]  ;;  %v962_v56 = vld [vmem:[%s1205_s30 + $0x54] sm:$0xf0] }
  0x3f   : > { %v937_v57 = vor.u32 %v979_v52, %v934_v54  ;;  %v924_v58 = vld [vmem:[%s1205_s30 + $0xd0] sm:$0xf]  ;;  %v978_v59 = vld [vmem:[%s1205_s30 + $0xd4] sm:$0xf0]  ;;  %v961_v60 = vld [vmem:[%s1205_s30 + $0x54] sm:$0xf]  ;;  %v861_v61 = vor.u32 %v962_v56, %v860_v55 }
  0x40   : > { %601 = vmatpush.bf16.msra.mxu0 %v869_v48  ;;  %v862_v62 = vld [vmem:[%s1205_s30 + $0x58] sm:$0xf0]  ;;  %v977_v63 = vld [vmem:[%s1205_s30 + $0xd4] sm:$0xf]  ;;  %v925_v1 = vor.u32 %v978_v59, %v924_v58  ;;  %v852_v3 = vld [vmem:[%s1205_s30 + $0x40] sm:$0xf] }
  0x41   : > { %v926_v0 = vld [vmem:[%s1205_s30 + $0xd8] sm:$0xf0]  ;;  %614 = vmatpush.bf16.msra.mxu1 %v933_v49  ;;  %627 = vmatpush.bf16.msra.mxu2 %v873_v53  ;;  %v865_v2 = vor.u32 %v961_v60, %v862_v62  ;;  %v960_v4 = vld [vmem:[%s1205_s30 + $0x44] sm:$0xf0]  ;;  %v916_v5 = vld [vmem:[%s1205_s30 + $0xc0] sm:$0xf] }
  0x42   : > { %640 = vmatpush.bf16.msra.mxu3 %v937_v57  ;;  %v929_v6 = vor.u32 %v977_v63, %v926_v0  ;;  %v976_v7 = vld [vmem:[%s1205_s30 + $0xc4] sm:$0xf0]  ;;  %v959_v8 = vld [vmem:[%s1205_s30 + $0x44] sm:$0xf]  ;;  %v854_v9 = vld [vmem:[%s1205_s30 + $0x48] sm:$0xf0]  ;;  %v853_v12 = vor.u32 %v960_v4, %v852_v3 }
  0x43   : > { %v975_v10 = vld [vmem:[%s1205_s30 + $0xc4] sm:$0xf]  ;;  %v918_v11 = vld [vmem:[%s1205_s30 + $0xc8] sm:$0xf0]  ;;  %v917_v13 = vor.u32 %v976_v7, %v916_v5  ;;  %v857_v14 = vor.u32 %v959_v8, %v854_v9  ;;  %v844_v15 = vld [vmem:[%s1205_s30 + $0x30] sm:$0xf] }
  0x44   : > { %602 = vmatpush.bf16.msra.mxu0 %v861_v61  ;;  %v958_v16 = vld [vmem:[%s1205_s30 + $0x34] sm:$0xf0]  ;;  %v908_v17 = vld [vmem:[%s1205_s30 + $0xb0] sm:$0xf]  ;;  %v921_v18 = vor.u32 %v975_v10, %v918_v11  ;;  %v957_v20 = vld [vmem:[%s1205_s30 + $0x34] sm:$0xf] }
  0x45   : > { %615 = vmatpush.bf16.msra.mxu1 %v925_v1  ;;  %628 = vmatpush.bf16.msra.mxu2 %v865_v2  ;;  %v974_v19 = vld [vmem:[%s1205_s30 + $0xb4] sm:$0xf0]  ;;  %v846_v21 = vld [vmem:[%s1205_s30 + $0x38] sm:$0xf0]  ;;  %v973_v22 = vld [vmem:[%s1205_s30 + $0xb4] sm:$0xf]  ;;  %v845_v24 = vor.u32 %v958_v16, %v844_v15 }
  0x46   : > { %641 = vmatpush.bf16.msra.mxu3 %v929_v6  ;;  %v910_v23 = vld [vmem:[%s1205_s30 + $0xb8] sm:$0xf0]  ;;  %v909_v25 = vor.u32 %v974_v19, %v908_v17  ;;  %v849_v26 = vor.u32 %v957_v20, %v846_v21  ;;  %v836_v27 = vld [vmem:[%s1205_s30 + $0x20] sm:$0xf]  ;;  %v956_v28 = vld [vmem:[%s1205_s30 + $0x24] sm:$0xf0] }
  0x47   : > { %v900_v29 = vld [vmem:[%s1205_s30 + $0xa0] sm:$0xf]  ;;  %v913_v30 = vor.u32 %v973_v22, %v910_v23  ;;  %v972_v31 = vld [vmem:[%s1205_s30 + $0xa4] sm:$0xf0]  ;;  %v955_v32 = vld [vmem:[%s1205_s30 + $0x24] sm:$0xf]  ;;  %v837_v36 = vor.u32 %v956_v28, %v836_v27 }
  0x48   : > { %603 = vmatpush.bf16.msra.mxu0 %v853_v12  ;;  %v838_v33 = vld [vmem:[%s1205_s30 + $0x28] sm:$0xf0]  ;;  %v971_v34 = vld [vmem:[%s1205_s30 + $0xa4] sm:$0xf]  ;;  %v901_v37 = vor.u32 %v972_v31, %v900_v29  ;;  %v828_v39 = vld [vmem:[%s1205_s30 + $0x10] sm:$0xf] }
  0x49   : > { %616 = vmatpush.bf16.msra.mxu1 %v917_v13  ;;  %629 = vmatpush.bf16.msra.mxu2 %v857_v14  ;;  %v902_v35 = vld [vmem:[%s1205_s30 + $0xa8] sm:$0xf0]  ;;  %v841_v38 = vor.u32 %v955_v32, %v838_v33  ;;  %v954_v40 = vld [vmem:[%s1205_s30 + $0x14] sm:$0xf0]  ;;  %v892_v41 = vld [vmem:[%s1205_s30 + $0x90] sm:$0xf] }
  0x4a   : > { %642 = vmatpush.bf16.msra.mxu3 %v921_v18  ;;  %v905_v42 = vor.u32 %v971_v34, %v902_v35  ;;  %v970_v43 = vld [vmem:[%s1205_s30 + $0x94] sm:$0xf0]  ;;  %v953_v44 = vld [vmem:[%s1205_s30 + $0x14] sm:$0xf]  ;;  %v830_v45 = vld [vmem:[%s1205_s30 + $0x18] sm:$0xf0]  ;;  %v829_v48 = vor.u32 %v954_v40, %v828_v39 }
  0x4b   : > { %v969_v46 = vld [vmem:[%s1205_s30 + $0x94] sm:$0xf]  ;;  %v894_v47 = vld [vmem:[%s1205_s30 + $0x98] sm:$0xf0]  ;;  %v394_v49 = vld [vmem:[%s1300_s0] sm:$0xff]  ;;  %v893_v50 = vor.u32 %v970_v43, %v892_v41  ;;  %v833_v51 = vor.u32 %v953_v44, %v830_v45  ;;  %s1311_s6 = smov (!%p380_p9, %s815_s6), 9 }
  0x4c   : > { %604 = vmatpush.bf16.msra.mxu0 %v845_v24  ;;  %v820_v52 = vld [vmem:[%s1205_s30] sm:$0xf]  ;;  %v952_v53 = vld [vmem:[%s1205_s30 + $0x4] sm:$0xf0]  ;;  %v897_v55 = vor.u32 %v969_v46, %v894_v47  ;;  %v951_v57 = vld [vmem:[%s1205_s30 + $0x4] sm:$0xf]  ;;  %v434_v61 = vunpack.c.l.b16 %v394_v49  ;;  %v435_v63 = vunpack.c.h.b16 %v394_v49  ;;  %s382_s9 = scalar_lea.vmem %s1302_s2, %s1311_s6 }
  0x4d   : > { %617 = vmatpush.bf16.msra.mxu1 %v909_v25  ;;  %630 = vmatpush.bf16.msra.mxu2 %v849_v26  ;;  %v884_v54 = vld [vmem:[%s1205_s30 + $0x80] sm:$0xf]  ;;  %v968_v56 = vld [vmem:[%s1205_s30 + $0x84] sm:$0xf0]  ;;  %v822_v58 = vld [vmem:[%s1205_s30 + $0x8] sm:$0xf0]  ;;  %v821_v62 = vor.u32 %v952_v53, %v820_v52 }
  0x4e   : > { %643 = vmatpush.bf16.msra.mxu3 %v913_v30  ;;  %v967_v59 = vld [vmem:[%s1205_s30 + $0x84] sm:$0xf]  ;;  %v886_v60 = vld [vmem:[%s1205_s30 + $0x88] sm:$0xf0]  ;;  %v885_v0 = vor.u32 %v968_v56, %v884_v54  ;;  %v825_v1 = vor.u32 %v951_v57, %v822_v58  ;;  %v436_v3 = vpack.c.b16 %v434_v61, %v434_v61  ;;  %v437_v4 = vpack.c.b16 %v435_v63, %v435_v63  ;;  %v427_v5 = vld [vmem:[%s382_s9] sm:$0x3] }
  0x4f   : > { %v889_v2 = vor.u32 %v967_v59, %v886_v60  ;;  %v429_v6 = vperm.slane %v427_v5, 0  ;;  %v430_v11 = vperm.slane %v427_v5, 1  ;;  %s817_s10 = sshll.u32 %s1311_s6, 2 }
  0x50   : > { %605 = vmatpush.bf16.msra.mxu0 %v837_v36  ;;  %s392_s14 = scalar_lea.vmem %s1303_s3, %s817_s10 }
  0x51   : > { %618 = vmatpush.bf16.msra.mxu1 %v901_v37  ;;  %631 = vmatpush.bf16.msra.mxu2 %v841_v38 }
  0x52   : > { %644 = vmatpush.bf16.msra.mxu3 %v905_v42 }
  0x54   : > { %606 = vmatpush.bf16.msra.mxu0 %v829_v48 }
  0x55   : > { %619 = vmatpush.bf16.msra.mxu1 %v893_v50  ;;  %632 = vmatpush.bf16.msra.mxu2 %v833_v51 }
  0x56   : > { %645 = vmatpush.bf16.msra.mxu3 %v897_v55 }
  0x58   : > { %607 = vmatpush.bf16.msra.mxu0 %v821_v62 }
  0x59   : > { %620 = vmatpush.bf16.msra.mxu1 %v885_v0  ;;  %633 = vmatpush.bf16.msra.mxu2 %v825_v1 }
  0x5a   : > { %646 = vmatpush.bf16.msra.mxu3 %v889_v2 }
  0x5b   : > { %608 = vmatmul.bf16.vlgmr.msra.gmra.mxu0 %v436_v3 }
  0x5c   : > { %621 = vmatmul.bf16.vlgmr.msra.gmra.mxu1 %v437_v4  ;;  %634 = vmatmul.bf16.vlgmr.msra.gmra.mxu2 %v436_v3 }
  0x5d   : > { %647 = vmatmul.bf16.vlgmr.msra.gmra.mxu3 %v437_v4 }
  0xd8   : > { %v609_v7 = vpop.f32.mrf.mxu0 }
  0xd9   : > { %v610_v8 = vadd.f32 %v609_v7, %v429_v6  ;;  %v622_v9 = vpop.f32.mrf.mxu1 }
  0xdb   : > { %v623_v10 = vadd.f32 %v622_v9, %v610_v8 }
  0xdd   : > { %v946_v12 = vmul.f32 -1.442695, %v623_v10 }
  0xdf   : > { %1023 = vpow2.f32 %v946_v12  ;;  %v635_v13 = vpop.f32.mrf.mxu2 }
  0xe0   : > { %v636_v14 = vadd.f32 %v635_v13, %v430_v11  ;;  %v648_v15 = vpop.f32.mrf.mxu3  ;;  %v611_v16 = vpop.f32.mrf.mxu0 }
  0xe1   : > { %v624_v17 = vpop.f32.mrf.mxu1 }
  0xe2   : > { %v649_v18 = vadd.f32 %v648_v15, %v636_v14 }
  0xe4   : > { %v947_v19 = vmul.f32 -1.442695, %v649_v18 }
  0xe5   : > { %v1024_v20 = vpop.eup %1023 }
  0xe6   : > { %v658_v21 = vadd.f32 1.0, %v1024_v20  ;;  %1025 = vpow2.f32 %v947_v19 }
  0xe7   : > { %v637_v22 = vpop.f32.mrf.mxu2 }
  0xe8   : > { %1027 = vrcp.f32 %v658_v21  ;;  %v650_v23 = vpop.f32.mrf.mxu3  ;;  %vm665_vm0 = vweird.f32 %v658_v21  ;;  %v671_v33 = vand.u32 2147483648, %v658_v21  ;;  %v669_v34 = vand.u32 2147483647, %v658_v21 }
  0xea   : > { %v672_v40 = vor.u32 1.1754944e-38, %v671_v33  ;;  %vm670_vm4 = vcmp.eq.f32.partialorder %v669_v34, 8.507059e+37 }
  0xec   : > { %v1026_v24 = vpop.eup %1025 }
  0xed   : > { %v659_v25 = vadd.f32 1.0, %v1026_v24 }
  0xee   : > { %v1028_v26 = vpop.eup %1027 }
  0xef   : > { %v661_v27 = vmul.f32 %v1028_v26, %v658_v21  ;;  %1029 = vrcp.f32 %v659_v25  ;;  %vm666_vm1 = vweird.f32 %v1028_v26  ;;  %v686_v36 = vand.u32 2147483648, %v659_v25 }
  0xf0   : > { %vm667_vm2 = vmor %vm665_vm0, %vm666_vm1  ;;  %v684_v39 = vand.u32 2147483647, %v659_v25  ;;  %vm680_vm5 = vweird.f32 %v659_v25 }
  0xf1   : > { %v662_v28 = vsub.f32 1.0, %v661_v27  ;;  %v687_v43 = vor.u32 1.1754944e-38, %v686_v36 }
  0xf2   : > { %vm685_vm7 = vcmp.eq.f32.partialorder %v684_v39, 8.507059e+37 }
  0xf3   : > { %v663_v29 = vmul.f32 %v1028_v26, %v662_v28 }
  0xf5   : > { %v1030_v30 = vpop.eup %1029  ;;  %v664_v31 = vadd.f32 %v1028_v26, %v663_v29 }
  0xf6   : > { %v676_v32 = vmul.f32 %v1030_v30, %v659_v25  ;;  %vm681_vm3 = vweird.f32 %v1030_v30 }
  0xf7   : > { %v668_v37 = vsel %vm667_vm2, %v1028_v26, %v664_v31  ;;  %vm682_vm6 = vmor %vm680_vm5, %vm681_vm3 }
  0xf8   : > { %v677_v35 = vsub.f32 1.0, %v676_v32  ;;  %v673_v42 = vsel %vm670_vm4, %v672_v40, %v668_v37 }
  0xf9   : > { %v690_v46 = vmul.f32 %v673_v42, %v623_v10 }
  0xfa   : > { %v678_v38 = vmul.f32 %v1030_v30, %v677_v35 }
  0xfc   : > { %v679_v41 = vadd.f32 %v1030_v30, %v678_v38 }
  0xfe   : > { %v683_v44 = vsel %vm682_vm6, %v1030_v30, %v679_v41 }
  0xff   : > { %v688_v45 = vsel %vm685_vm7, %v687_v43, %v683_v44 }
 0x100   : > { %v691_v47 = vmul.f32 %v688_v45, %v649_v18 }
 0x102   : > { %v692_v48 = vpack.c.bf16 %v691_v47, %v690_v46 }
 0x104   : > { %693 = vst [vmem:[%s392_s14] sm:$0xff] %v692_v48 }
 0x105 PF: > { %s13_s16 = sadd.s32 1, %s1069_s16   ;;  %s1304_s12 = smov %s1057_s13 }
 0x106   : > { %p10_p10 = scmp.ge.s32.totalorder %s13_s16, 7   ;;  %s1305_s13 = smov %s1126_s20 }
 0x107   : > { %s1306_s14 = smov %s1065_s15  ;;  %s1307_s15 = smov %s1309_s17 }
 0x108   :  { %12 = sbr.rel (!%p10_p10) target bundleno = 3 (0x3), region = 111 }

// kernel: just_efficientnet_forward.12
= control target key start
LH: loop header
LB: loop body
LE: loop exit
PB: predicated region body
PF: predicated region fallthrough
CT: control target
= control target key end

     0   :  { %vm1148_vm0 = vcmask 261120   ;;  %s3608_s1 = inlined_call_operand.vmem [shape: bf16[1440,256], index: 1, kind: input, shape index: {}]   ;;  %s3609_s0 = inlined_call_operand.vmem [shape: bf16[8,1440], index: 0, kind: input, shape index: {}]   ;;  %s3610_s2 = inlined_call_operand.vmem [shape: f32[1,256], index: 2, kind: input, shape index: {}]   ;;  %s3611_s3 = inlined_call_operand.vmem [shape: bf16[8,256], index: 3, kind: output, shape index: {}]  }
   0x1   :  { %v1568_v0 = vld [vmem:[%s3608_s1 + $0x70] sm:$0xf]  ;;  %v2249_v1 = vld [vmem:[%s3608_s1 + $0x74] sm:$0xf0]  ;;  %v1560_v11 = vld [vmem:[%s3608_s1 + $0x60] sm:$0xf] }
   0x2   :  { %v1632_v2 = vld [vmem:[%s3608_s1 + $0xf0] sm:$0xf]  ;;  %v1569_v3 = vor.u32 %v2249_v1, %v1568_v0  ;;  %v2265_v4 = vld [vmem:[%s3608_s1 + $0xf4] sm:$0xf0]  ;;  %v2247_v13 = vld [vmem:[%s3608_s1 + $0x64] sm:$0xf0] }
   0x3   :  { %v1696_v5 = vld [vmem:[%s3608_s1 + $0x170] sm:$0xf]  ;;  %v2281_v6 = vld [vmem:[%s3608_s1 + $0x174] sm:$0xf0]  ;;  %v1633_v7 = vor.u32 %v2265_v4, %v1632_v2  ;;  %v1624_v14 = vld [vmem:[%s3608_s1 + $0xe0] sm:$0xf]  ;;  %v1561_v16 = vor.u32 %v2247_v13, %v1560_v11 }
   0x4   :  { %v1697_v8 = vor.u32 %v2281_v6, %v1696_v5  ;;  %v1760_v9 = vld [vmem:[%s3608_s1 + $0x1f0] sm:$0xf]  ;;  %v2297_v10 = vld [vmem:[%s3608_s1 + $0x1f4] sm:$0xf0]  ;;  %1152 = vmatpush.bf16.msra.mxu0 %v1569_v3  ;;  %v2263_v15 = vld [vmem:[%s3608_s1 + $0xe4] sm:$0xf0] }
   0x5   :  { %v1761_v12 = vor.u32 %v2297_v10, %v1760_v9  ;;  %1165 = vmatpush.bf16.msra.mxu1 %v1633_v7  ;;  %v1625_v17 = vor.u32 %v2263_v15, %v1624_v14  ;;  %v1688_v18 = vld [vmem:[%s3608_s1 + $0x160] sm:$0xf]  ;;  %v2279_v19 = vld [vmem:[%s3608_s1 + $0x164] sm:$0xf0]  ;;  %v1552_v23 = vld [vmem:[%s3608_s1 + $0x50] sm:$0xf] }
   0x6   :  { %1178 = vmatpush.bf16.msra.mxu2 %v1697_v8  ;;  %v1752_v20 = vld [vmem:[%s3608_s1 + $0x1e0] sm:$0xf]  ;;  %v1689_v21 = vor.u32 %v2279_v19, %v1688_v18  ;;  %v2295_v22 = vld [vmem:[%s3608_s1 + $0x1e4] sm:$0xf0]  ;;  %v2245_v24 = vld [vmem:[%s3608_s1 + $0x54] sm:$0xf0] }
   0x7   :  { %1191 = vmatpush.bf16.msra.mxu3 %v1761_v12  ;;  %v1753_v25 = vor.u32 %v2295_v22, %v1752_v20  ;;  %v1616_v26 = vld [vmem:[%s3608_s1 + $0xd0] sm:$0xf]  ;;  %v2261_v27 = vld [vmem:[%s3608_s1 + $0xd4] sm:$0xf0]  ;;  %v1553_v29 = vor.u32 %v2245_v24, %v1552_v23  ;;  %v1544_v35 = vld [vmem:[%s3608_s1 + $0x40] sm:$0xf] }
   0x8   :  { %v1680_v28 = vld [vmem:[%s3608_s1 + $0x150] sm:$0xf]  ;;  %1153 = vmatpush.bf16.msra.mxu0 %v1561_v16  ;;  %v2277_v30 = vld [vmem:[%s3608_s1 + $0x154] sm:$0xf0]  ;;  %v1617_v33 = vor.u32 %v2261_v27, %v1616_v26  ;;  %v2243_v36 = vld [vmem:[%s3608_s1 + $0x44] sm:$0xf0] }
   0x9   :  { %v1744_v31 = vld [vmem:[%s3608_s1 + $0x1d0] sm:$0xf]  ;;  %v2293_v32 = vld [vmem:[%s3608_s1 + $0x1d4] sm:$0xf0]  ;;  %1166 = vmatpush.bf16.msra.mxu1 %v1625_v17  ;;  %v1681_v34 = vor.u32 %v2277_v30, %v1680_v28  ;;  %v1608_v37 = vld [vmem:[%s3608_s1 + $0xc0] sm:$0xf]  ;;  %v1545_v44 = vor.u32 %v2243_v36, %v1544_v35 }
   0xa   :  { %1179 = vmatpush.bf16.msra.mxu2 %v1689_v21  ;;  %v1745_v38 = vor.u32 %v2293_v32, %v1744_v31  ;;  %v2259_v39 = vld [vmem:[%s3608_s1 + $0xc4] sm:$0xf0]  ;;  %v1672_v40 = vld [vmem:[%s3608_s1 + $0x140] sm:$0xf]  ;;  %v1536_v47 = vld [vmem:[%s3608_s1 + $0x30] sm:$0xf] }
   0xb   :  { %1192 = vmatpush.bf16.msra.mxu3 %v1753_v25  ;;  %v2275_v41 = vld [vmem:[%s3608_s1 + $0x144] sm:$0xf0]  ;;  %v1736_v42 = vld [vmem:[%s3608_s1 + $0x1c0] sm:$0xf]  ;;  %v1609_v45 = vor.u32 %v2259_v39, %v1608_v37  ;;  %v2241_v48 = vld [vmem:[%s3608_s1 + $0x34] sm:$0xf0] }
   0xc   :  { %v2291_v43 = vld [vmem:[%s3608_s1 + $0x1c4] sm:$0xf0]  ;;  %1154 = vmatpush.bf16.msra.mxu0 %v1553_v29  ;;  %v1673_v46 = vor.u32 %v2275_v41, %v1672_v40  ;;  %v1600_v49 = vld [vmem:[%s3608_s1 + $0xb0] sm:$0xf]  ;;  %v2257_v51 = vld [vmem:[%s3608_s1 + $0xb4] sm:$0xf0]  ;;  %v1537_v56 = vor.u32 %v2241_v48, %v1536_v47 }
   0xd   :  { %1167 = vmatpush.bf16.msra.mxu1 %v1617_v33  ;;  %v1737_v50 = vor.u32 %v2291_v43, %v1736_v42  ;;  %v1664_v52 = vld [vmem:[%s3608_s1 + $0x130] sm:$0xf]  ;;  %v2273_v53 = vld [vmem:[%s3608_s1 + $0x134] sm:$0xf0]  ;;  %v1601_v57 = vor.u32 %v2257_v51, %v1600_v49  ;;  %v1528_v59 = vld [vmem:[%s3608_s1 + $0x20] sm:$0xf] }
   0xe   :  { %1180 = vmatpush.bf16.msra.mxu2 %v1681_v34  ;;  %v1728_v54 = vld [vmem:[%s3608_s1 + $0x1b0] sm:$0xf]  ;;  %v2289_v55 = vld [vmem:[%s3608_s1 + $0x1b4] sm:$0xf0]  ;;  %v1665_v58 = vor.u32 %v2273_v53, %v1664_v52  ;;  %v2239_v60 = vld [vmem:[%s3608_s1 + $0x24] sm:$0xf0] }
   0xf   :  { %1193 = vmatpush.bf16.msra.mxu3 %v1745_v38  ;;  %v1592_v61 = vld [vmem:[%s3608_s1 + $0xa0] sm:$0xf]  ;;  %v1729_v62 = vor.u32 %v2289_v55, %v1728_v54  ;;  %v2255_v63 = vld [vmem:[%s3608_s1 + $0xa4] sm:$0xf0]  ;;  %v1529_v4 = vor.u32 %v2239_v60, %v1528_v59  ;;  %v1520_v7 = vld [vmem:[%s3608_s1 + $0x10] sm:$0xf] }
  0x10   :  { %1155 = vmatpush.bf16.msra.mxu0 %v1545_v44  ;;  %v1656_v0 = vld [vmem:[%s3608_s1 + $0x120] sm:$0xf]  ;;  %v2271_v1 = vld [vmem:[%s3608_s1 + $0x124] sm:$0xf0]  ;;  %v1593_v5 = vor.u32 %v2255_v63, %v1592_v61  ;;  %v2237_v8 = vld [vmem:[%s3608_s1 + $0x14] sm:$0xf0] }
  0x11   :  { %1168 = vmatpush.bf16.msra.mxu1 %v1609_v45  ;;  %v1720_v2 = vld [vmem:[%s3608_s1 + $0x1a0] sm:$0xf]  ;;  %v2287_v3 = vld [vmem:[%s3608_s1 + $0x1a4] sm:$0xf0]  ;;  %v1657_v6 = vor.u32 %v2271_v1, %v1656_v0  ;;  %v1584_v9 = vld [vmem:[%s3608_s1 + $0x90] sm:$0xf]  ;;  %v1521_v16 = vor.u32 %v2237_v8, %v1520_v7 }
  0x12   :  { %1181 = vmatpush.bf16.msra.mxu2 %v1673_v46  ;;  %v1721_v10 = vor.u32 %v2287_v3, %v1720_v2  ;;  %v2253_v11 = vld [vmem:[%s3608_s1 + $0x94] sm:$0xf0]  ;;  %v1648_v12 = vld [vmem:[%s3608_s1 + $0x110] sm:$0xf]  ;;  %v1512_v17 = vld [vmem:[%s3608_s1] sm:$0xf] }
  0x13   :  { %1194 = vmatpush.bf16.msra.mxu3 %v1737_v50  ;;  %v2269_v13 = vld [vmem:[%s3608_s1 + $0x114] sm:$0xf0]  ;;  %v1712_v14 = vld [vmem:[%s3608_s1 + $0x190] sm:$0xf]  ;;  %v2235_v18 = vld [vmem:[%s3608_s1 + $0x4] sm:$0xf0]  ;;  %v1585_v19 = vor.u32 %v2253_v11, %v1584_v9 }
  0x14   :  { %1156 = vmatpush.bf16.msra.mxu0 %v1537_v56  ;;  %v2285_v15 = vld [vmem:[%s3608_s1 + $0x194] sm:$0xf0]  ;;  %v1649_v20 = vor.u32 %v2269_v13, %v1648_v12  ;;  %v1576_v21 = vld [vmem:[%s3608_s1 + $0x80] sm:$0xf]  ;;  %v2251_v22 = vld [vmem:[%s3608_s1 + $0x84] sm:$0xf0]  ;;  %v1513_v31 = vor.u32 %v2235_v18, %v1512_v17 }
  0x15   :  { %1169 = vmatpush.bf16.msra.mxu1 %v1601_v57  ;;  %v1640_v23 = vld [vmem:[%s3608_s1 + $0x100] sm:$0xf]  ;;  %v1713_v24 = vor.u32 %v2285_v15, %v1712_v14  ;;  %v2267_v25 = vld [vmem:[%s3608_s1 + $0x104] sm:$0xf0]  ;;  %v1824_v28 = vld [vmem:[%s3608_s1 + $0x270] sm:$0xf]  ;;  %v1577_v35 = vor.u32 %v2251_v22, %v1576_v21 }
  0x16   :  { %1182 = vmatpush.bf16.msra.mxu2 %v1665_v58  ;;  %v1704_v26 = vld [vmem:[%s3608_s1 + $0x180] sm:$0xf]  ;;  %v2283_v27 = vld [vmem:[%s3608_s1 + $0x184] sm:$0xf0]  ;;  %v2313_v29 = vld [vmem:[%s3608_s1 + $0x274] sm:$0xf0]  ;;  %v1641_v36 = vor.u32 %v2267_v25, %v1640_v23 }
  0x17   :  { %1195 = vmatpush.bf16.msra.mxu3 %v1729_v62  ;;  %v1888_v30 = vld [vmem:[%s3608_s1 + $0x2f0] sm:$0xf]  ;;  %v2329_v32 = vld [vmem:[%s3608_s1 + $0x2f4] sm:$0xf0]  ;;  %v1705_v39 = vor.u32 %v2283_v27, %v1704_v26  ;;  %v1825_v40 = vor.u32 %v2313_v29, %v1824_v28  ;;  %v1816_v43 = vld [vmem:[%s3608_s1 + $0x260] sm:$0xf] }
  0x18   :  { %1157 = vmatpush.bf16.msra.mxu0 %v1529_v4  ;;  %v1952_v33 = vld [vmem:[%s3608_s1 + $0x370] sm:$0xf]  ;;  %v2345_v34 = vld [vmem:[%s3608_s1 + $0x374] sm:$0xf0]  ;;  %v1889_v41 = vor.u32 %v2329_v32, %v1888_v30  ;;  %v2311_v44 = vld [vmem:[%s3608_s1 + $0x264] sm:$0xf0] }
  0x19   :  { %1170 = vmatpush.bf16.msra.mxu1 %v1593_v5  ;;  %v2016_v37 = vld [vmem:[%s3608_s1 + $0x3f0] sm:$0xf]  ;;  %v2361_v38 = vld [vmem:[%s3608_s1 + $0x3f4] sm:$0xf0]  ;;  %v1953_v42 = vor.u32 %v2345_v34, %v1952_v33  ;;  %v1880_v45 = vld [vmem:[%s3608_s1 + $0x2e0] sm:$0xf]  ;;  %v1817_v52 = vor.u32 %v2311_v44, %v1816_v43 }
  0x1a   :  { %1183 = vmatpush.bf16.msra.mxu2 %v1657_v6  ;;  %v2017_v46 = vor.u32 %v2361_v38, %v2016_v37  ;;  %v2327_v47 = vld [vmem:[%s3608_s1 + $0x2e4] sm:$0xf0]  ;;  %v1944_v48 = vld [vmem:[%s3608_s1 + $0x360] sm:$0xf]  ;;  %v1808_v53 = vld [vmem:[%s3608_s1 + $0x250] sm:$0xf] }
  0x1b   :  { %1196 = vmatpush.bf16.msra.mxu3 %v1721_v10  ;;  %v2343_v49 = vld [vmem:[%s3608_s1 + $0x364] sm:$0xf0]  ;;  %v2008_v50 = vld [vmem:[%s3608_s1 + $0x3e0] sm:$0xf]  ;;  %v1881_v54 = vor.u32 %v2327_v47, %v1880_v45  ;;  %v2309_v56 = vld [vmem:[%s3608_s1 + $0x254] sm:$0xf0] }
  0x1c   :  { %1158 = vmatpush.bf16.msra.mxu0 %v1521_v16  ;;  %v2359_v51 = vld [vmem:[%s3608_s1 + $0x3e4] sm:$0xf0]  ;;  %v1945_v55 = vor.u32 %v2343_v49, %v1944_v48  ;;  %v1872_v57 = vld [vmem:[%s3608_s1 + $0x2d0] sm:$0xf]  ;;  %v2325_v60 = vld [vmem:[%s3608_s1 + $0x2d4] sm:$0xf0]  ;;  %v1809_v3 = vor.u32 %v2309_v56, %v1808_v53 }
  0x1d   :  { %1171 = vmatpush.bf16.msra.mxu1 %v1585_v19  ;;  %v16_v58 = vld [vmem:[%s3609_s0 + $0x8] sm:$0xff]  ;;  %v2009_v59 = vor.u32 %v2359_v51, %v2008_v50  ;;  %v1936_v61 = vld [vmem:[%s3608_s1 + $0x350] sm:$0xf]  ;;  %v2341_v62 = vld [vmem:[%s3608_s1 + $0x354] sm:$0xf0]  ;;  %v1873_v7 = vor.u32 %v2325_v60, %v1872_v57 }
  0x1e   :  { %1184 = vmatpush.bf16.msra.mxu2 %v1649_v20  ;;  %v216_v63 = vunpack.c.h.b16 %v16_v58  ;;  %v215_v0 = vunpack.c.l.b16 %v16_v58  ;;  %v2000_v1 = vld [vmem:[%s3608_s1 + $0x3d0] sm:$0xf]  ;;  %v2357_v2 = vld [vmem:[%s3608_s1 + $0x3d4] sm:$0xf0]  ;;  %v15_v6 = vld [vmem:[%s3609_s0] sm:$0xff]  ;;  %v1937_v8 = vor.u32 %v2341_v62, %v1936_v61 }
  0x1f   :  { %1197 = vmatpush.bf16.msra.mxu3 %v1713_v24  ;;  %v1800_v9 = vld [vmem:[%s3608_s1 + $0x240] sm:$0xf]  ;;  %v2307_v10 = vld [vmem:[%s3608_s1 + $0x244] sm:$0xf0]  ;;  %v213_v12 = vunpack.c.l.b16 %v15_v6  ;;  %v214_v13 = vunpack.c.h.b16 %v15_v6  ;;  %v2001_v14 = vor.u32 %v2357_v2, %v2000_v1  ;;  %v1792_v25 = vld [vmem:[%s3608_s1 + $0x230] sm:$0xf] }
  0x20   :  { %1159 = vmatpush.bf16.msra.mxu0 %v1513_v31  ;;  %v2709_v4 = vpack.c.b16 %v216_v63, %v216_v63  ;;  %v2711_v5 = vpack.c.b16 %v215_v0, %v215_v0  ;;  %v1864_v11 = vld [vmem:[%s3608_s1 + $0x2c0] sm:$0xf]  ;;  %v2323_v15 = vld [vmem:[%s3608_s1 + $0x2c4] sm:$0xf0]  ;;  %v1801_v22 = vor.u32 %v2307_v10, %v1800_v9  ;;  %v2305_v26 = vld [vmem:[%s3608_s1 + $0x234] sm:$0xf0] }
  0x21   :  { %1172 = vmatpush.bf16.msra.mxu1 %v1577_v35  ;;  %v1928_v16 = vld [vmem:[%s3608_s1 + $0x340] sm:$0xf]  ;;  %v2339_v17 = vld [vmem:[%s3608_s1 + $0x344] sm:$0xf0]  ;;  %v2742_v20 = vpack.c.b16 %v213_v12, %v213_v12  ;;  %v2744_v21 = vpack.c.b16 %v214_v13, %v214_v13  ;;  %v1865_v23 = vor.u32 %v2323_v15, %v1864_v11  ;;  %v1856_v27 = vld [vmem:[%s3608_s1 + $0x2b0] sm:$0xf]  ;;  %v1793_v34 = vor.u32 %v2305_v26, %v1792_v25 }
  0x22   :  { %1185 = vmatpush.bf16.msra.mxu2 %v1641_v36  ;;  %v1992_v18 = vld [vmem:[%s3608_s1 + $0x3c0] sm:$0xf]  ;;  %v2355_v19 = vld [vmem:[%s3608_s1 + $0x3c4] sm:$0xf0]  ;;  %v1929_v24 = vor.u32 %v2339_v17, %v1928_v16  ;;  %v2321_v29 = vld [vmem:[%s3608_s1 + $0x2b4] sm:$0xf0] }
  0x23   :  { %1198 = vmatpush.bf16.msra.mxu3 %v1705_v39  ;;  %v1993_v28 = vor.u32 %v2355_v19, %v1992_v18  ;;  %v1920_v30 = vld [vmem:[%s3608_s1 + $0x330] sm:$0xf]  ;;  %v2337_v31 = vld [vmem:[%s3608_s1 + $0x334] sm:$0xf0]  ;;  %1160 = vmatmul.bf16.vlgmr.msra.gmra.mxu0 %v2742_v20  ;;  %v1857_v35 = vor.u32 %v2321_v29, %v1856_v27  ;;  %v1784_v37 = vld [vmem:[%s3608_s1 + $0x220] sm:$0xf] }
  0x24   :  { %1204 = vmatpush.bf16.msrb.mxu0 %v1825_v40  ;;  %v1984_v32 = vld [vmem:[%s3608_s1 + $0x3b0] sm:$0xf]  ;;  %v2353_v33 = vld [vmem:[%s3608_s1 + $0x3b4] sm:$0xf0]  ;;  %1173 = vmatmul.bf16.vlgmr.msra.gmra.mxu1 %v2744_v21  ;;  %v1921_v36 = vor.u32 %v2337_v31, %v1920_v30  ;;  %v2303_v38 = vld [vmem:[%s3608_s1 + $0x224] sm:$0xf0] }
  0x25   :  { %1217 = vmatpush.bf16.msrb.mxu1 %v1889_v41  ;;  %1186 = vmatmul.bf16.vlgmr.msra.gmra.mxu2 %v2711_v5  ;;  %v1848_v39 = vld [vmem:[%s3608_s1 + $0x2a0] sm:$0xf]  ;;  %v1985_v40 = vor.u32 %v2353_v33, %v1984_v32  ;;  %v2319_v41 = vld [vmem:[%s3608_s1 + $0x2a4] sm:$0xf0]  ;;  %v1776_v49 = vld [vmem:[%s3608_s1 + $0x210] sm:$0xf] }
  0x26   :  { %1230 = vmatpush.bf16.msrb.mxu2 %v1953_v42  ;;  %1199 = vmatmul.bf16.vlgmr.msra.gmra.mxu3 %v2709_v4  ;;  %v1912_v42 = vld [vmem:[%s3608_s1 + $0x320] sm:$0xf]  ;;  %v2335_v43 = vld [vmem:[%s3608_s1 + $0x324] sm:$0xf0]  ;;  %v1849_v47 = vor.u32 %v2319_v41, %v1848_v39  ;;  %v2301_v50 = vld [vmem:[%s3608_s1 + $0x214] sm:$0xf0] }
  0x27   :  { %1243 = vmatpush.bf16.msrb.mxu3 %v2017_v46  ;;  %v1976_v44 = vld [vmem:[%s3608_s1 + $0x3a0] sm:$0xf]  ;;  %v2351_v45 = vld [vmem:[%s3608_s1 + $0x3a4] sm:$0xf0]  ;;  %v1785_v46 = vor.u32 %v2303_v38, %v1784_v37  ;;  %v1913_v48 = vor.u32 %v2335_v43, %v1912_v42  ;;  %v1840_v51 = vld [vmem:[%s3608_s1 + $0x290] sm:$0xf] }
  0x28   :  { %1205 = vmatpush.bf16.msrb.mxu0 %v1817_v52  ;;  %v1977_v52 = vor.u32 %v2351_v45, %v1976_v44  ;;  %v2317_v53 = vld [vmem:[%s3608_s1 + $0x294] sm:$0xf0]  ;;  %v1968_v56 = vld [vmem:[%s3608_s1 + $0x390] sm:$0xf]  ;;  %v1768_v58 = vld [vmem:[%s3608_s1 + $0x200] sm:$0xf] }
  0x29   :  { %1218 = vmatpush.bf16.msrb.mxu1 %v1881_v54  ;;  %v1904_v54 = vld [vmem:[%s3608_s1 + $0x310] sm:$0xf]  ;;  %v2349_v57 = vld [vmem:[%s3608_s1 + $0x394] sm:$0xf0]  ;;  %v2299_v60 = vld [vmem:[%s3608_s1 + $0x204] sm:$0xf0]  ;;  %v1841_v63 = vor.u32 %v2317_v53, %v1840_v51 }
  0x2a   :  { %1231 = vmatpush.bf16.msrb.mxu2 %v1945_v55  ;;  %v2333_v55 = vld [vmem:[%s3608_s1 + $0x314] sm:$0xf0]  ;;  %v1832_v61 = vld [vmem:[%s3608_s1 + $0x280] sm:$0xf]  ;;  %v2315_v62 = vld [vmem:[%s3608_s1 + $0x284] sm:$0xf0]  ;;  %v1969_v6 = vor.u32 %v2349_v57, %v1968_v56  ;;  %v1769_v13 = vor.u32 %v2299_v60, %v1768_v58 }
  0x2b   :  { %1244 = vmatpush.bf16.msrb.mxu3 %v2009_v59  ;;  %v1777_v59 = vor.u32 %v2301_v50, %v1776_v49  ;;  %v1905_v0 = vor.u32 %v2333_v55, %v1904_v54  ;;  %v1896_v1 = vld [vmem:[%s3608_s1 + $0x300] sm:$0xf]  ;;  %v2331_v2 = vld [vmem:[%s3608_s1 + $0x304] sm:$0xf0]  ;;  %v17_v9 = vld [vmem:[%s3609_s0 + $0x10] sm:$0xff]  ;;  %v1833_v18 = vor.u32 %v2315_v62, %v1832_v61 }
  0x2c   :  { %1206 = vmatpush.bf16.msrb.mxu0 %v1809_v3  ;;  %v18_v3 = vld [vmem:[%s3609_s0 + $0x18] sm:$0xff]  ;;  %v2080_v10 = vld [vmem:[%s3608_s1 + $0x470] sm:$0xf]  ;;  %v1897_v19 = vor.u32 %v2331_v2, %v1896_v1  ;;  %v217_v25 = vunpack.c.l.b16 %v17_v9  ;;  %v2072_v31 = vld [vmem:[%s3608_s1 + $0x460] sm:$0xf] }
  0x2d   :  { %1219 = vmatpush.bf16.msrb.mxu1 %v1873_v7  ;;  %v1960_v7 = vld [vmem:[%s3608_s1 + $0x380] sm:$0xf]  ;;  %v2377_v11 = vld [vmem:[%s3608_s1 + $0x474] sm:$0xf0]  ;;  %v2144_v12 = vld [vmem:[%s3608_s1 + $0x4f0] sm:$0xf]  ;;  %v219_v17 = vunpack.c.l.b16 %v18_v3 }
  0x2e   :  { %1232 = vmatpush.bf16.msrb.mxu2 %v1937_v8  ;;  %v2347_v8 = vld [vmem:[%s3608_s1 + $0x384] sm:$0xf0]  ;;  %v2208_v15 = vld [vmem:[%s3608_s1 + $0x570] sm:$0xf]  ;;  %v2409_v16 = vld [vmem:[%s3608_s1 + $0x574] sm:$0xf0]  ;;  %v2081_v27 = vor.u32 %v2377_v11, %v2080_v10  ;;  %v2902_v42 = vpack.c.b16 %v217_v25, %v217_v25 }
  0x2f   :  { %1245 = vmatpush.bf16.msrb.mxu3 %v2001_v14  ;;  %v2393_v14 = vld [vmem:[%s3608_s1 + $0x4f4] sm:$0xf0]  ;;  %v1961_v26 = vor.u32 %v2347_v8, %v1960_v7  ;;  %v2209_v30 = vor.u32 %v2409_v16, %v2208_v15  ;;  %v2375_v32 = vld [vmem:[%s3608_s1 + $0x464] sm:$0xf0]  ;;  %v2136_v33 = vld [vmem:[%s3608_s1 + $0x4e0] sm:$0xf]  ;;  %v2892_v38 = vpack.c.b16 %v219_v17, %v219_v17 }
  0x30   :  { %1207 = vmatpush.bf16.msrb.mxu0 %v1801_v22  ;;  %v2224_v22 = vld [vmem:[%s3608_s1 + $0x590] sm:$0xf]  ;;  %v2145_v29 = vor.u32 %v2393_v14, %v2144_v12  ;;  %v2407_v37 = vld [vmem:[%s3608_s1 + $0x564] sm:$0xf0]  ;;  %v2216_v39 = vld [vmem:[%s3608_s1 + $0x580] sm:$0xf]  ;;  %v2073_v43 = vor.u32 %v2375_v32, %v2072_v31 }
  0x31   :  { %1220 = vmatpush.bf16.msrb.mxu1 %v1865_v23  ;;  %v2413_v23 = vld [vmem:[%s3608_s1 + $0x594] sm:$0xf0]  ;;  %v2248_v44 = vld [vmem:[%s3608_s1 + $0x74] sm:$0xf]  ;;  %v1570_v45 = vld [vmem:[%s3608_s1 + $0x78] sm:$0xf0] }
  0x32   :  { %1233 = vmatpush.bf16.msrb.mxu2 %v1929_v24  ;;  %v220_v24 = vunpack.c.h.b16 %v18_v3  ;;  %v2064_v49 = vld [vmem:[%s3608_s1 + $0x450] sm:$0xf]  ;;  %v2373_v50 = vld [vmem:[%s3608_s1 + $0x454] sm:$0xf0]  ;;  %v1573_v56 = vor.u32 %v2248_v44, %v1570_v45  ;;  %v2246_v58 = vld [vmem:[%s3608_s1 + $0x64] sm:$0xf] }
  0x33   :  { %1246 = vmatpush.bf16.msrb.mxu3 %v1993_v28  ;;  %v218_v28 = vunpack.c.h.b16 %v17_v9  ;;  %v2128_v51 = vld [vmem:[%s3608_s1 + $0x4d0] sm:$0xf]  ;;  %v2389_v53 = vld [vmem:[%s3608_s1 + $0x4d4] sm:$0xf0]  ;;  %v2065_v57 = vor.u32 %v2373_v50, %v2064_v49  ;;  %v2056_v62 = vld [vmem:[%s3608_s1 + $0x440] sm:$0xf] }
  0x34   :  { %1208 = vmatpush.bf16.msrb.mxu0 %v1793_v34  ;;  %v2225_v34 = vor.u32 %v2413_v23, %v2224_v22  ;;  %v2900_v41 = vpack.c.b16 %v220_v24, %v220_v24  ;;  %v2192_v54 = vld [vmem:[%s3608_s1 + $0x550] sm:$0xf]  ;;  %v2405_v55 = vld [vmem:[%s3608_s1 + $0x554] sm:$0xf0]  ;;  %v2129_v60 = vor.u32 %v2389_v53, %v2128_v51  ;;  %v2387_v1 = vld [vmem:[%s3608_s1 + $0x4c4] sm:$0xf0] }
  0x35   :  { %1221 = vmatpush.bf16.msrb.mxu1 %v1857_v35  ;;  %v2391_v35 = vld [vmem:[%s3608_s1 + $0x4e4] sm:$0xf0]  ;;  %v2193_v61 = vor.u32 %v2405_v55, %v2192_v54  ;;  %v2184_v2 = vld [vmem:[%s3608_s1 + $0x540] sm:$0xf]  ;;  %v2244_v8 = vld [vmem:[%s3608_s1 + $0x54] sm:$0xf] }
  0x36   :  { %1234 = vmatpush.bf16.msrb.mxu2 %v1921_v36  ;;  %v2200_v36 = vld [vmem:[%s3608_s1 + $0x560] sm:$0xf]  ;;  %v2403_v3 = vld [vmem:[%s3608_s1 + $0x544] sm:$0xf0]  ;;  %v1554_v9 = vld [vmem:[%s3608_s1 + $0x58] sm:$0xf0] }
  0x37   :  { %1247 = vmatpush.bf16.msrb.mxu3 %v1985_v40  ;;  %v2411_v40 = vld [vmem:[%s3608_s1 + $0x584] sm:$0xf0]  ;;  %v2185_v11 = vor.u32 %v2403_v3, %v2184_v2  ;;  %v2048_v12 = vld [vmem:[%s3608_s1 + $0x430] sm:$0xf]  ;;  %v2385_v15 = vld [vmem:[%s3608_s1 + $0x4b4] sm:$0xf0] }
  0x38   :  { %1209 = vmatpush.bf16.msrb.mxu0 %v1785_v46  ;;  %v2910_v46 = vpack.c.b16 %v218_v28, %v218_v28  ;;  %v2112_v14 = vld [vmem:[%s3608_s1 + $0x4b0] sm:$0xf]  ;;  %v2401_v17 = vld [vmem:[%s3608_s1 + $0x534] sm:$0xf0]  ;;  %v2242_v23 = vld [vmem:[%s3608_s1 + $0x44] sm:$0xf] }
  0x39   :  { %1222 = vmatpush.bf16.msrb.mxu1 %v1849_v47  ;;  %v2137_v47 = vor.u32 %v2391_v35, %v2136_v33  ;;  %v2176_v16 = vld [vmem:[%s3608_s1 + $0x530] sm:$0xf]  ;;  %v1546_v24 = vld [vmem:[%s3608_s1 + $0x48] sm:$0xf0]  ;;  %v2040_v28 = vld [vmem:[%s3608_s1 + $0x420] sm:$0xf] }
  0x3a   :  { %1235 = vmatpush.bf16.msrb.mxu2 %v1913_v48  ;;  %v2201_v48 = vor.u32 %v2407_v37, %v2200_v36  ;;  %v2383_v31 = vld [vmem:[%s3608_s1 + $0x4a4] sm:$0xf0]  ;;  %v2168_v32 = vld [vmem:[%s3608_s1 + $0x520] sm:$0xf]  ;;  %v2240_v36 = vld [vmem:[%s3608_s1 + $0x34] sm:$0xf] }
  0x3b   :  { %1248 = vmatpush.bf16.msrb.mxu3 %v1977_v52  ;;  %v2217_v52 = vor.u32 %v2411_v40, %v2216_v39  ;;  %v2399_v33 = vld [vmem:[%s3608_s1 + $0x524] sm:$0xf0]  ;;  %v1538_v37 = vld [vmem:[%s3608_s1 + $0x38] sm:$0xf0]  ;;  %v2032_v39 = vld [vmem:[%s3608_s1 + $0x410] sm:$0xf] }
  0x3c   :  { %1210 = vmatpush.bf16.msrb.mxu0 %v1777_v59  ;;  %v1562_v59 = vld [vmem:[%s3608_s1 + $0x68] sm:$0xf0]  ;;  %v2169_v44 = vor.u32 %v2399_v33, %v2168_v32  ;;  %v2365_v45 = vld [vmem:[%s3608_s1 + $0x414] sm:$0xf0]  ;;  %v2160_v49 = vld [vmem:[%s3608_s1 + $0x510] sm:$0xf]  ;;  %v1541_v51 = vor.u32 %v2240_v36, %v1538_v37 }
  0x3d   :  { %1223 = vmatpush.bf16.msrb.mxu1 %v1841_v63  ;;  %v2371_v63 = vld [vmem:[%s3608_s1 + $0x444] sm:$0xf0]  ;;  %v2397_v50 = vld [vmem:[%s3608_s1 + $0x514] sm:$0xf0]  ;;  %v2033_v53 = vor.u32 %v2365_v45, %v2032_v39  ;;  %v1530_v54 = vld [vmem:[%s3608_s1 + $0x28] sm:$0xf0] }
  0x3e   :  { %1236 = vmatpush.bf16.msrb.mxu2 %v1905_v0  ;;  %v2120_v0 = vld [vmem:[%s3608_s1 + $0x4c0] sm:$0xf]  ;;  %v2057_v7 = vor.u32 %v2371_v63, %v2056_v62  ;;  %v2395_v63 = vld [vmem:[%s3608_s1 + $0x504] sm:$0xf0]  ;;  %v1634_v2 = vld [vmem:[%s3608_s1 + $0xf8] sm:$0xf0] }
  0x3f   :  { %1249 = vmatpush.bf16.msrb.mxu3 %v1969_v6  ;;  %v1565_v6 = vor.u32 %v2246_v58, %v1562_v59  ;;  %v2121_v10 = vor.u32 %v2387_v1, %v2120_v0  ;;  %v2024_v55 = vld [vmem:[%s3608_s1 + $0x400] sm:$0xf]  ;;  %v2161_v58 = vor.u32 %v2397_v50, %v2160_v49  ;;  %v2363_v59 = vld [vmem:[%s3608_s1 + $0x404] sm:$0xf0]  ;;  %v2264_v0 = vld [vmem:[%s3608_s1 + $0xf4] sm:$0xf] }
  0x40   :  { %1211 = vmatpush.bf16.msrb.mxu0 %v1769_v13  ;;  %v2369_v13 = vld [vmem:[%s3608_s1 + $0x434] sm:$0xf0]  ;;  %v2152_v62 = vld [vmem:[%s3608_s1 + $0x500] sm:$0xf]  ;;  %v2280_v3 = vld [vmem:[%s3608_s1 + $0x174] sm:$0xf] }
  0x41   :  { %1224 = vmatpush.bf16.msrb.mxu1 %v1833_v18  ;;  %v1557_v18 = vor.u32 %v2244_v8, %v1554_v9  ;;  %v2049_v22 = vor.u32 %v2369_v13, %v2048_v12  ;;  %v2025_v8 = vor.u32 %v2363_v59, %v2024_v55  ;;  %v2236_v9 = vld [vmem:[%s3608_s1 + $0x14] sm:$0xf]  ;;  %v1826_v33 = vld [vmem:[%s3608_s1 + $0x278] sm:$0xf0]  ;;  %v2294_v36 = vld [vmem:[%s3608_s1 + $0x1e4] sm:$0xf] }
  0x42   :  { %1237 = vmatpush.bf16.msrb.mxu2 %v1897_v19  ;;  %v2985_v19 = vld [vmem:[%s3609_s0 + $0x28] sm:$0xff]  ;;  %v2312_v32 = vld [vmem:[%s3608_s1 + $0x274] sm:$0xf]  ;;  %v2310_v50 = vld [vmem:[%s3608_s1 + $0x264] sm:$0xf] }
  0x43   :  { %1250 = vmatpush.bf16.msrb.mxu3 %v1961_v26  ;;  %1212 = vmatmul.bf16.vlgmr.msrb.gmra.mxu0 %v2902_v42  ;;  %v224_v25 = vunpack.c.h.b16 %v2985_v19  ;;  %v2113_v26 = vor.u32 %v2385_v15, %v2112_v14  ;;  %v2153_v14 = vor.u32 %v2395_v63, %v2152_v62  ;;  %v1637_v15 = vor.u32 %v2264_v0, %v1634_v2  ;;  %v1754_v37 = vld [vmem:[%s3608_s1 + $0x1e8] sm:$0xf0]  ;;  %v2260_v39 = vld [vmem:[%s3608_s1 + $0xd4] sm:$0xf]  ;;  %v1746_v55 = vld [vmem:[%s3608_s1 + $0x1d8] sm:$0xf0] }
  0x44   :  { %1256 = vmatpush.bf16.msra.mxu0 %v2081_v27  ;;  %1225 = vmatmul.bf16.vlgmr.msrb.gmra.mxu1 %v2910_v46  ;;  %v2177_v27 = vor.u32 %v2401_v17, %v2176_v16  ;;  %v2296_v17 = vld [vmem:[%s3608_s1 + $0x1f4] sm:$0xf]  ;;  %v1757_v49 = vor.u32 %v2294_v36, %v1754_v37  ;;  %v1674_v59 = vld [vmem:[%s3608_s1 + $0x148] sm:$0xf0]  ;;  %v1810_v63 = vld [vmem:[%s3608_s1 + $0x258] sm:$0xf0] }
  0x45   :  { %1269 = vmatpush.bf16.msra.mxu1 %v2145_v29  ;;  %1238 = vmatmul.bf16.vlgmr.msrb.gmra.mxu2 %v2892_v38  ;;  %v2367_v29 = vld [vmem:[%s3608_s1 + $0x424] sm:$0xf0]  ;;  %v3021_v40 = vpack.c.b16 %v224_v25, %v224_v25  ;;  %v2278_v25 = vld [vmem:[%s3608_s1 + $0x164] sm:$0xf]  ;;  %v2276_v45 = vld [vmem:[%s3608_s1 + $0x154] sm:$0xf] }
  0x46   :  { %1282 = vmatpush.bf16.msra.mxu2 %v2209_v30  ;;  %1251 = vmatmul.bf16.vlgmr.msrb.gmra.mxu3 %v2900_v41  ;;  %v2104_v30 = vld [vmem:[%s3608_s1 + $0x4a0] sm:$0xf]  ;;  %v2041_v35 = vor.u32 %v2367_v29, %v2040_v28  ;;  %v2234_v29 = vld [vmem:[%s3608_s1 + $0x4] sm:$0xf]  ;;  %v2308_v62 = vld [vmem:[%s3608_s1 + $0x254] sm:$0xf] }
  0x47   :  { %1301 = vmatpush.bf16.msra.mxu3 %v2225_v34  ;;  %v1549_v34 = vor.u32 %v2242_v23, %v1546_v24  ;;  %v1626_v24 = vld [vmem:[%s3608_s1 + $0xe8] sm:$0xf0]  ;;  %v2290_v2 = vld [vmem:[%s3608_s1 + $0x1c4] sm:$0xf]  ;;  %v2268_v36 = vld [vmem:[%s3608_s1 + $0x114] sm:$0xf] }
  0x48   :  { %1257 = vmatpush.bf16.msra.mxu0 %v2073_v43  ;;  %v2105_v43 = vor.u32 %v2383_v31, %v2104_v30  ;;  %v1514_v30 = vld [vmem:[%s3608_s1 + $0x8] sm:$0xf0]  ;;  %v1650_v37 = vld [vmem:[%s3608_s1 + $0x118] sm:$0xf0] }
  0x49   :  { %1270 = vmatpush.bf16.msra.mxu1 %v2137_v47  ;;  %v2096_v47 = vld [vmem:[%s3608_s1 + $0x490] sm:$0xf] }
  0x4a   :  { %1283 = vmatpush.bf16.msra.mxu2 %v2201_v48  ;;  %v2381_v48 = vld [vmem:[%s3608_s1 + $0x494] sm:$0xf0] }
  0x4b   :  { %1302 = vmatpush.bf16.msra.mxu3 %v2217_v52  ;;  %v2238_v52 = vld [vmem:[%s3608_s1 + $0x24] sm:$0xf] }
  0x4c   :  { %1258 = vmatpush.bf16.msra.mxu0 %v2065_v57  ;;  %v2097_v57 = vor.u32 %v2381_v48, %v2096_v47  ;;  %v1533_v1 = vor.u32 %v2238_v52, %v1530_v54  ;;  %v1682_v47 = vld [vmem:[%s3608_s1 + $0x158] sm:$0xf0]  ;;  %v1829_v48 = vor.u32 %v2312_v32, %v1826_v33  ;;  %v2292_v54 = vld [vmem:[%s3608_s1 + $0x1d4] sm:$0xf]  ;;  %v2286_v32 = vld [vmem:[%s3608_s1 + $0x1a4] sm:$0xf] }
  0x4d   :  { %1271 = vmatpush.bf16.msra.mxu1 %v2129_v60  ;;  %v2088_v60 = vld [vmem:[%s3608_s1 + $0x480] sm:$0xf]  ;;  %v1722_v33 = vld [vmem:[%s3608_s1 + $0x1a8] sm:$0xf0] }
  0x4e   :  { %1284 = vmatpush.bf16.msra.mxu2 %v2193_v61  ;;  %v2379_v61 = vld [vmem:[%s3608_s1 + $0x484] sm:$0xf0] }
  0x4f   :  { %1308 = vmatpush.bf16.msrb.mxu3 %v1573_v56  ;;  %v19_v56 = vld [vmem:[%s3609_s0 + $0x20] sm:$0xff]  ;;  %v2089_v13 = vor.u32 %v2379_v61, %v2088_v60  ;;  %v1749_v61 = vor.u32 %v2292_v54, %v1746_v55  ;;  %v1642_v54 = vld [vmem:[%s3608_s1 + $0x108] sm:$0xf0]  ;;  %v2328_v55 = vld [vmem:[%s3608_s1 + $0x2f4] sm:$0xf] }
  0x50   :  { %1259 = vmatpush.bf16.msra.mxu0 %v2057_v7  ;;  %v221_v7 = vunpack.c.l.b16 %v19_v56  ;;  %v222_v12 = vunpack.c.h.b16 %v19_v56  ;;  %v2258_v56 = vld [vmem:[%s3608_s1 + $0xc4] sm:$0xf] }
  0x51   :  { %1272 = vmatpush.bf16.msra.mxu1 %v2121_v10  ;;  %v1522_v10 = vld [vmem:[%s3608_s1 + $0x18] sm:$0xf0] }
  0x52   :  { %1285 = vmatpush.bf16.msra.mxu2 %v2185_v11  ;;  %v223_v11 = vunpack.c.l.b16 %v2985_v19  ;;  %v1525_v19 = vor.u32 %v2236_v9, %v1522_v10  ;;  %v3095_v23 = vpack.c.b16 %v221_v7, %v221_v7  ;;  %v3108_v28 = vpack.c.b16 %v222_v12, %v222_v12  ;;  %v1602_v7 = vld [vmem:[%s3608_s1 + $0xb8] sm:$0xf0]  ;;  %v2306_v12 = vld [vmem:[%s3608_s1 + $0x244] sm:$0xf] }
  0x53   :  { %1309 = vmatpush.bf16.msrb.mxu3 %v1565_v6  ;;  %v1698_v6 = vld [vmem:[%s3608_s1 + $0x178] sm:$0xf0]  ;;  %v1813_v10 = vor.u32 %v2308_v62, %v1810_v63 }
  0x54   :  { %1260 = vmatpush.bf16.msra.mxu0 %v2049_v22  ;;  %v1701_v16 = vor.u32 %v2280_v3, %v1698_v6  ;;  %v2262_v22 = vld [vmem:[%s3608_s1 + $0xe4] sm:$0xf]  ;;  %v1738_v3 = vld [vmem:[%s3608_s1 + $0x1c8] sm:$0xf0]  ;;  %v2256_v6 = vld [vmem:[%s3608_s1 + $0xb4] sm:$0xf] }
  0x55   :  { %1273 = vmatpush.bf16.msra.mxu1 %v2113_v26  ;;  %v1690_v26 = vld [vmem:[%s3608_s1 + $0x168] sm:$0xf0]  ;;  %v1666_v9 = vld [vmem:[%s3608_s1 + $0x138] sm:$0xf0] }
  0x56   :  { %1286 = vmatpush.bf16.msra.mxu2 %v2177_v27  ;;  %2230 = vmatmul.msk.bf16.vlgmr.msra.gmra.mxu3 %vm1148_vm0, %v3021_v40  ;;  %v3106_v27 = vpack.c.b16 %v223_v11, %v223_v11  ;;  %v1741_v11 = vor.u32 %v2290_v2, %v1738_v3  ;;  %v1778_v62 = vld [vmem:[%s3608_s1 + $0x218] sm:$0xf0]  ;;  %v1706_v2 = vld [vmem:[%s3608_s1 + $0x188] sm:$0xf0] }
  0x57   :  { %1310 = vmatpush.bf16.msrb.mxu3 %v1557_v18  ;;  %v1762_v18 = vld [vmem:[%s3608_s1 + $0x1f8] sm:$0xf0] }
  0x58   :  { %1261 = vmatpush.bf16.msra.mxu0 %v2041_v35  ;;  %v1765_v31 = vor.u32 %v2296_v17, %v1762_v18  ;;  %v1693_v35 = vor.u32 %v2278_v25, %v1690_v26  ;;  %v2254_v17 = vld [vmem:[%s3608_s1 + $0xa4] sm:$0xf]  ;;  %v1594_v18 = vld [vmem:[%s3608_s1 + $0xa8] sm:$0xf0]  ;;  %v2304_v26 = vld [vmem:[%s3608_s1 + $0x234] sm:$0xf] }
  0x59   :  { %1274 = vmatpush.bf16.msra.mxu1 %v2105_v43  ;;  %v1517_v43 = vor.u32 %v2234_v29, %v1514_v30  ;;  %v1794_v29 = vld [vmem:[%s3608_s1 + $0x238] sm:$0xf0]  ;;  %v1597_v30 = vor.u32 %v2254_v17, %v1594_v18  ;;  %v2376_v17 = vld [vmem:[%s3608_s1 + $0x474] sm:$0xf] }
  0x5a   :  { %1287 = vmatpush.bf16.msra.mxu2 %v2169_v44  ;;  %v1618_v44 = vld [vmem:[%s3608_s1 + $0xd8] sm:$0xf0] }
  0x5b   :  { %1311 = vmatpush.bf16.msrb.mxu3 %v1549_v34  ;;  %v1629_v34 = vor.u32 %v2262_v22, %v1626_v24  ;;  %v1621_v52 = vor.u32 %v2260_v39, %v1618_v44  ;;  %v2270_v22 = vld [vmem:[%s3608_s1 + $0x124] sm:$0xf]  ;;  %v1797_v39 = vor.u32 %v2304_v26, %v1794_v29  ;;  %v2082_v18 = vld [vmem:[%s3608_s1 + $0x478] sm:$0xf0]  ;;  %v2324_v26 = vld [vmem:[%s3608_s1 + $0x2d4] sm:$0xf] }
  0x5c   :  { %1262 = vmatpush.bf16.msra.mxu0 %v2033_v53  ;;  %v1685_v53 = vor.u32 %v2276_v45, %v1682_v47  ;;  %v2302_v44 = vld [vmem:[%s3608_s1 + $0x224] sm:$0xf]  ;;  %v1786_v45 = vld [vmem:[%s3608_s1 + $0x228] sm:$0xf0]  ;;  %v2284_v47 = vld [vmem:[%s3608_s1 + $0x194] sm:$0xf] }
  0x5d   :  { %1275 = vmatpush.bf16.msra.mxu1 %v2097_v57  ;;  %v1610_v57 = vld [vmem:[%s3608_s1 + $0xc8] sm:$0xf0] }
  0x5e   :  { %1288 = vmatpush.bf16.msra.mxu2 %v2161_v58  ;;  %v2274_v58 = vld [vmem:[%s3608_s1 + $0x144] sm:$0xf]  ;;  %v1613_v0 = vor.u32 %v2258_v56, %v1610_v57  ;;  %v1789_v56 = vor.u32 %v2302_v44, %v1786_v45  ;;  %v1890_v57 = vld [vmem:[%s3608_s1 + $0x2f8] sm:$0xf0] }
  0x5f   :  { %1312 = vmatpush.bf16.msrb.mxu3 %v1541_v51  ;;  %v1818_v51 = vld [vmem:[%s3608_s1 + $0x268] sm:$0xf0]  ;;  %v1893_v3 = vor.u32 %v2328_v55, %v1890_v57  ;;  %v2322_v44 = vld [vmem:[%s3608_s1 + $0x2c4] sm:$0xf]  ;;  %v2320_v55 = vld [vmem:[%s3608_s1 + $0x2b4] sm:$0xf] }
  0x60   :  { %1263 = vmatpush.bf16.msra.mxu0 %v2025_v8  ;;  %v1821_v60 = vor.u32 %v2310_v50, %v1818_v51  ;;  %v2272_v8 = vld [vmem:[%s3608_s1 + $0x134] sm:$0xf]  ;;  %v1714_v50 = vld [vmem:[%s3608_s1 + $0x198] sm:$0xf0]  ;;  %v2250_v51 = vld [vmem:[%s3608_s1 + $0x84] sm:$0xf] }
  0x61   :  { %1276 = vmatpush.bf16.msra.mxu1 %v2089_v13  ;;  %v1802_v13 = vld [vmem:[%s3608_s1 + $0x248] sm:$0xf0]  ;;  %v2338_v45 = vld [vmem:[%s3608_s1 + $0x344] sm:$0xf]  ;;  %v2336_v57 = vld [vmem:[%s3608_s1 + $0x334] sm:$0xf] }
  0x62   :  { %1289 = vmatpush.bf16.msra.mxu2 %v2153_v14  ;;  %v1605_v14 = vor.u32 %v2256_v6, %v1602_v7  ;;  %v1805_v24 = vor.u32 %v2306_v12, %v1802_v13  ;;  %v2360_v7 = vld [vmem:[%s3608_s1 + $0x3f4] sm:$0xf]  ;;  %v2342_v12 = vld [vmem:[%s3608_s1 + $0x364] sm:$0xf]  ;;  %v1946_v13 = vld [vmem:[%s3608_s1 + $0x368] sm:$0xf0] }
  0x63   :  { %1313 = vmatpush.bf16.msrb.mxu3 %v1533_v1  ;;  %1264 = vmatmul.bf16.vlgmr.msra.gmra.mxu0 %v3095_v23  ;;  %v1677_v1 = vor.u32 %v2274_v58, %v1674_v59  ;;  %v2344_v58 = vld [vmem:[%s3608_s1 + $0x374] sm:$0xf]  ;;  %v1954_v59 = vld [vmem:[%s3608_s1 + $0x378] sm:$0xf0] }
  0x64   :  { %1321 = vmatpush.bf16.msrb.mxu0 %v1637_v15  ;;  %1277 = vmatmul.bf16.vlgmr.msra.gmra.mxu1 %v3108_v28  ;;  %v1669_v15 = vor.u32 %v2272_v8, %v1666_v9  ;;  %v1957_v6 = vor.u32 %v2344_v58, %v1954_v59  ;;  %v2018_v8 = vld [vmem:[%s3608_s1 + $0x3f8] sm:$0xf0]  ;;  %v2326_v9 = vld [vmem:[%s3608_s1 + $0x2e4] sm:$0xf] }
  0x65   :  { %1334 = vmatpush.bf16.msrb.mxu1 %v1701_v16  ;;  %1290 = vmatmul.bf16.vlgmr.msra.gmra.mxu2 %v3106_v27  ;;  %v1730_v16 = vld [vmem:[%s3608_s1 + $0x1b8] sm:$0xf0] }
  0x66   :  { %1347 = vmatpush.bf16.msrb.mxu2 %v1765_v31  ;;  %v1922_v58 = vld [vmem:[%s3608_s1 + $0x338] sm:$0xf0] }
  0x67   :  { %1314 = vmatpush.bf16.msrb.mxu3 %v1525_v19  ;;  %v1658_v19 = vld [vmem:[%s3608_s1 + $0x128] sm:$0xf0] }
  0x68   :  { %1322 = vmatpush.bf16.msrb.mxu0 %v1629_v34  ;;  %v1661_v31 = vor.u32 %v2270_v22, %v1658_v19  ;;  %v2252_v34 = vld [vmem:[%s3608_s1 + $0x94] sm:$0xf]  ;;  %v1949_v19 = vor.u32 %v2342_v12, %v1946_v13 }
  0x69   :  { %1335 = vmatpush.bf16.msrb.mxu1 %v1693_v35  ;;  %v1586_v35 = vld [vmem:[%s3608_s1 + $0x98] sm:$0xf0] }
  0x6a   :  { %1348 = vmatpush.bf16.msrb.mxu2 %v1757_v49  ;;  %v1653_v49 = vor.u32 %v2268_v36, %v1650_v37  ;;  %v2074_v36 = vld [vmem:[%s3608_s1 + $0x468] sm:$0xf0] }
  0x6b   :  { %1315 = vmatpush.bf16.msrb.mxu3 %v1517_v43  ;;  %v1725_v43 = vor.u32 %v2286_v32, %v1722_v33  ;;  %v1938_v32 = vld [vmem:[%s3608_s1 + $0x358] sm:$0xf0]  ;;  %v2085_v33 = vor.u32 %v2376_v17, %v2082_v18  ;;  %v2332_v17 = vld [vmem:[%s3608_s1 + $0x314] sm:$0xf] }
  0x6c   :  { %1323 = vmatpush.bf16.msrb.mxu0 %v1621_v52  ;;  %v1578_v52 = vld [vmem:[%s3608_s1 + $0x88] sm:$0xf0]  ;;  %v1906_v18 = vld [vmem:[%s3608_s1 + $0x318] sm:$0xf0] }
  0x6d   :  { %1336 = vmatpush.bf16.msrb.mxu1 %v1685_v53  ;;  %v2266_v53 = vld [vmem:[%s3608_s1 + $0x104] sm:$0xf]  ;;  %v1581_v63 = vor.u32 %v2250_v51, %v1578_v52  ;;  %v2066_v51 = vld [vmem:[%s3608_s1 + $0x458] sm:$0xf0] }
  0x6e   :  { %1316 = vmatmul.bf16.vlgmr.msrb.gmra.mxu3 %v2742_v20  ;;  %1349 = vmatpush.bf16.msrb.mxu2 %v1749_v61  ;;  %v2288_v20 = vld [vmem:[%s3608_s1 + $0x1b4] sm:$0xf] }
  0x6f   :  { %1360 = vmatpush.bf16.msra.mxu3 %v1829_v48  ;;  %v1733_v25 = vor.u32 %v2288_v20, %v1730_v16  ;;  %v1589_v48 = vor.u32 %v2252_v34, %v1586_v35  ;;  %v2300_v61 = vld [vmem:[%s3608_s1 + $0x214] sm:$0xf]  ;;  %v1770_v20 = vld [vmem:[%s3608_s1 + $0x208] sm:$0xf0]  ;;  %v2021_v16 = vor.u32 %v2360_v7, %v2018_v8  ;;  %v2374_v35 = vld [vmem:[%s3608_s1 + $0x464] sm:$0xf] }
  0x70   :  { %1324 = vmatpush.bf16.msrb.mxu0 %v1613_v0  ;;  %v1645_v0 = vor.u32 %v2266_v53, %v1642_v54  ;;  %v1994_v54 = vld [vmem:[%s3608_s1 + $0x3c8] sm:$0xf0] }
  0x71   :  { %1337 = vmatpush.bf16.msrb.mxu1 %v1677_v1  ;;  %v2282_v1 = vld [vmem:[%s3608_s1 + $0x184] sm:$0xf]  ;;  %v1914_v7 = vld [vmem:[%s3608_s1 + $0x328] sm:$0xf0] }
  0x72   :  { %1350 = vmatpush.bf16.msrb.mxu2 %v1741_v11  ;;  %v1882_v11 = vld [vmem:[%s3608_s1 + $0x2e8] sm:$0xf0] }
  0x73   :  { %1361 = vmatpush.bf16.msra.mxu3 %v1821_v60  ;;  %v1717_v60 = vor.u32 %v2284_v47, %v1714_v50  ;;  %v1885_v22 = vor.u32 %v2326_v9, %v1882_v11  ;;  %v1930_v47 = vld [vmem:[%s3608_s1 + $0x348] sm:$0xf0]  ;;  %v2372_v50 = vld [vmem:[%s3608_s1 + $0x454] sm:$0xf]  ;;  %v2050_v11 = vld [vmem:[%s3608_s1 + $0x438] sm:$0xf0] }
  0x74   :  { %1325 = vmatpush.bf16.msrb.mxu0 %v1605_v14  ;;  %v1709_v14 = vor.u32 %v2282_v1, %v1706_v2  ;;  %v1933_v53 = vor.u32 %v2338_v45, %v1930_v47  ;;  %v2069_v59 = vor.u32 %v2372_v50, %v2066_v51  ;;  %v1986_v1 = vld [vmem:[%s3608_s1 + $0x3b8] sm:$0xf0]  ;;  %v2318_v2 = vld [vmem:[%s3608_s1 + $0x2a4] sm:$0xf]  ;;  %v1962_v50 = vld [vmem:[%s3608_s1 + $0x388] sm:$0xf0] }
  0x75   :  { %1338 = vmatpush.bf16.msrb.mxu1 %v1669_v15  ;;  %v2298_v15 = vld [vmem:[%s3608_s1 + $0x204] sm:$0xf]  ;;  %v2034_v45 = vld [vmem:[%s3608_s1 + $0x418] sm:$0xf0] }
  0x76   :  { %1351 = vmatpush.bf16.msrb.mxu2 %v1733_v25  ;;  %v2010_v25 = vld [vmem:[%s3608_s1 + $0x3e8] sm:$0xf0]  ;;  %v1773_v29 = vor.u32 %v2298_v15, %v1770_v20  ;;  %v2316_v20 = vld [vmem:[%s3608_s1 + $0x294] sm:$0xf] }
  0x77   :  { %1362 = vmatpush.bf16.msra.mxu3 %v1813_v10  ;;  %v1781_v10 = vor.u32 %v2300_v61, %v1778_v62  ;;  %v2370_v61 = vld [vmem:[%s3608_s1 + $0x444] sm:$0xf]  ;;  %v2058_v62 = vld [vmem:[%s3608_s1 + $0x448] sm:$0xf0] }
  0x78   :  { %1326 = vmatpush.bf16.msrb.mxu0 %v1597_v30  ;;  %v1874_v30 = vld [vmem:[%s3608_s1 + $0x2d8] sm:$0xf0]  ;;  %v2061_v8 = vor.u32 %v2370_v61, %v2058_v62  ;;  %v1978_v15 = vld [vmem:[%s3608_s1 + $0x3a8] sm:$0xf0] }
  0x79   :  { %1339 = vmatpush.bf16.msrb.mxu1 %v1661_v31  ;;  %v2340_v31 = vld [vmem:[%s3608_s1 + $0x354] sm:$0xf]  ;;  %v1877_v37 = vor.u32 %v2324_v26, %v1874_v30  ;;  %v1909_v30 = vor.u32 %v2332_v17, %v1906_v18  ;;  %v2026_v61 = vld [vmem:[%s3608_s1 + $0x408] sm:$0xf0]  ;;  %v3557_v17 = vld [vmem:[%s3610_s2] sm:$0x3] }
  0x7a   :  { %1352 = vmatpush.bf16.msrb.mxu2 %v1725_v43  ;;  %v2002_v43 = vld [vmem:[%s3608_s1 + $0x3d8] sm:$0xf0]  ;;  %v2348_v26 = vld [vmem:[%s3608_s1 + $0x394] sm:$0xf] }
  0x7b   :  { %1363 = vmatpush.bf16.msra.mxu3 %v1805_v24  ;;  %v2358_v24 = vld [vmem:[%s3608_s1 + $0x3e4] sm:$0xf] }
  0x7c   :  { %1327 = vmatpush.bf16.msrb.mxu0 %v1589_v48  ;;  %v2013_v34 = vor.u32 %v2358_v24, %v2010_v25  ;;  %v2077_v48 = vor.u32 %v2374_v35, %v2074_v36  ;;  %v2366_v24 = vld [vmem:[%s3608_s1 + $0x424] sm:$0xf]  ;;  %v2042_v25 = vld [vmem:[%s3608_s1 + $0x428] sm:$0xf0]  ;;  %v2392_v36 = vld [vmem:[%s3608_s1 + $0x4f4] sm:$0xf] }
  0x7d   :  { %1340 = vmatpush.bf16.msrb.mxu1 %v1653_v49  ;;  %v1898_v35 = vld [vmem:[%s3608_s1 + $0x308] sm:$0xf0] }
  0x7e   :  { %1353 = vmatpush.bf16.msrb.mxu2 %v1717_v60 }
  0x7f   :  { %1364 = vmatpush.bf16.msra.mxu3 %v1797_v39  ;;  %v1941_v39 = vor.u32 %v2340_v31, %v1938_v32  ;;  %v1970_v31 = vld [vmem:[%s3608_s1 + $0x398] sm:$0xf0]  ;;  %v2314_v32 = vld [vmem:[%s3608_s1 + $0x284] sm:$0xf] }
  0x80   :  { %1328 = vmatpush.bf16.msrb.mxu0 %v1581_v63 }
  0x81   :  { %1341 = vmatpush.bf16.msrb.mxu1 %v1645_v0  ;;  %v1925_v0 = vor.u32 %v2336_v57, %v1922_v58  ;;  %v2406_v57 = vld [vmem:[%s3608_s1 + $0x564] sm:$0xf]  ;;  %v2202_v58 = vld [vmem:[%s3608_s1 + $0x568] sm:$0xf0] }
  0x82   :  { %1354 = vmatpush.bf16.msrb.mxu2 %v1709_v14  ;;  %v2350_v14 = vld [vmem:[%s3608_s1 + $0x3a4] sm:$0xf] }
  0x83   :  { %1365 = vmatpush.bf16.msra.mxu3 %v1789_v56  ;;  %1329 = vmatmul.bf16.vlgmr.msrb.gmra.mxu0 %v2744_v21  ;;  %v2356_v21 = vld [vmem:[%s3608_s1 + $0x3d4] sm:$0xf]  ;;  %v1858_v56 = vld [vmem:[%s3608_s1 + $0x2b8] sm:$0xf0] }
  0x84   :  { %1373 = vmatpush.bf16.msra.mxu0 %v1893_v3  ;;  %1342 = vmatmul.bf16.vlgmr.msrb.gmra.mxu1 %v2711_v5  ;;  %v1866_v5 = vld [vmem:[%s3608_s1 + $0x2c8] sm:$0xf0]  ;;  %v2005_v49 = vor.u32 %v2356_v21, %v2002_v43  ;;  %v1861_v63 = vor.u32 %v2320_v55, %v1858_v56  ;;  %v2408_v21 = vld [vmem:[%s3608_s1 + $0x574] sm:$0xf]  ;;  %v2210_v43 = vld [vmem:[%s3608_s1 + $0x578] sm:$0xf0] }
  0x85   :  { %1386 = vmatpush.bf16.msra.mxu1 %v1957_v6  ;;  %1355 = vmatmul.bf16.vlgmr.msrb.gmra.mxu2 %v2709_v4  ;;  %v1869_v52 = vor.u32 %v2322_v44, %v1866_v5  ;;  %v2354_v4 = vld [vmem:[%s3608_s1 + $0x3c4] sm:$0xf]  ;;  %v1850_v3 = vld [vmem:[%s3608_s1 + $0x2a8] sm:$0xf0]  ;;  %v1973_v44 = vor.u32 %v2348_v26, %v1970_v31  ;;  %v2364_v5 = vld [vmem:[%s3608_s1 + $0x414] sm:$0xf] }
  0x86   :  { %1399 = vmatpush.bf16.msra.mxu2 %v2021_v16  ;;  %v1997_v60 = vor.u32 %v2354_v4, %v1994_v54  ;;  %v2334_v6 = vld [vmem:[%s3608_s1 + $0x324] sm:$0xf]  ;;  %v1853_v12 = vor.u32 %v2318_v2, %v1850_v3  ;;  %v1842_v16 = vld [vmem:[%s3608_s1 + $0x298] sm:$0xf0]  ;;  %v2412_v4 = vld [vmem:[%s3608_s1 + $0x594] sm:$0xf]  ;;  %v2037_v55 = vor.u32 %v2364_v5, %v2034_v45 }
  0x87   :  { %1366 = vmatpush.bf16.msra.mxu3 %v1781_v10  ;;  %v2368_v10 = vld [vmem:[%s3608_s1 + $0x434] sm:$0xf]  ;;  %v1917_v13 = vor.u32 %v2334_v6, %v1914_v7  ;;  %v2226_v54 = vld [vmem:[%s3608_s1 + $0x598] sm:$0xf0]  ;;  %v2138_v56 = vld [vmem:[%s3608_s1 + $0x4e8] sm:$0xf0] }
  0x88   :  { %1374 = vmatpush.bf16.msra.mxu0 %v1885_v22  ;;  %v2053_v22 = vor.u32 %v2368_v10, %v2050_v11  ;;  %v2229_v62 = vor.u32 %v2412_v4, %v2226_v54  ;;  %v2388_v3 = vld [vmem:[%s3608_s1 + $0x4d4] sm:$0xf]  ;;  %v2130_v6 = vld [vmem:[%s3608_s1 + $0x4d8] sm:$0xf0]  ;;  %v2170_v26 = vld [vmem:[%s3608_s1 + $0x528] sm:$0xf0] }
  0x89   :  { %1387 = vmatpush.bf16.msra.mxu1 %v1949_v19  ;;  %v1981_v19 = vor.u32 %v2350_v14, %v1978_v15  ;;  %v2404_v7 = vld [vmem:[%s3608_s1 + $0x554] sm:$0xf]  ;;  %v2133_v10 = vor.u32 %v2388_v3, %v2130_v6 }
  0x8a   :  { %1400 = vmatpush.bf16.msra.mxu2 %v2013_v34  ;;  %v2330_v34 = vld [vmem:[%s3608_s1 + $0x304] sm:$0xf]  ;;  %v2384_v15 = vld [vmem:[%s3608_s1 + $0x4b4] sm:$0xf] }
  0x8b   :  { %1367 = vmatpush.bf16.msra.mxu3 %v1773_v29  ;;  %v1845_v29 = vor.u32 %v2316_v20, %v1842_v16  ;;  %v2114_v20 = vld [vmem:[%s3608_s1 + $0x4b8] sm:$0xf0]  ;;  %v2400_v16 = vld [vmem:[%s3608_s1 + $0x534] sm:$0xf] }
  0x8c   :  { %1375 = vmatpush.bf16.msra.mxu0 %v1877_v37  ;;  %v2045_v37 = vor.u32 %v2366_v24, %v2042_v25  ;;  %v2117_v18 = vor.u32 %v2384_v15, %v2114_v20  ;;  %v2106_v24 = vld [vmem:[%s3608_s1 + $0x4a8] sm:$0xf0]  ;;  %v2398_v25 = vld [vmem:[%s3608_s1 + $0x524] sm:$0xf] }
  0x8d   :  { %1388 = vmatpush.bf16.msra.mxu1 %v1941_v39  ;;  %v2146_v39 = vld [vmem:[%s3608_s1 + $0x4f8] sm:$0xf0]  ;;  %v2173_v31 = vor.u32 %v2398_v25, %v2170_v26 }
  0x8e   :  { %1368 = vmatmul.bf16.vlgmr.msra.gmra.mxu3 %v2902_v42  ;;  %1401 = vmatpush.bf16.msra.mxu2 %v2005_v49  ;;  %v2352_v42 = vld [vmem:[%s3608_s1 + $0x3b4] sm:$0xf]  ;;  %v2346_v49 = vld [vmem:[%s3608_s1 + $0x384] sm:$0xf]  ;;  %v2149_v51 = vor.u32 %v2392_v36, %v2146_v39  ;;  %v2162_v36 = vld [vmem:[%s3608_s1 + $0x518] sm:$0xf0] }
  0x8f   :  { %1412 = vmatpush.bf16.msrb.mxu3 %v2085_v33  ;;  %v1989_v9 = vor.u32 %v2352_v42, %v1986_v1  ;;  %v1834_v33 = vld [vmem:[%s3608_s1 + $0x288] sm:$0xf0]  ;;  %v2410_v42 = vld [vmem:[%s3608_s1 + $0x584] sm:$0xf] }
  0x90   :  { %1376 = vmatpush.bf16.msra.mxu0 %v1869_v52  ;;  %v1837_v47 = vor.u32 %v2314_v32, %v1834_v33  ;;  %v2213_v52 = vor.u32 %v2408_v21, %v2210_v43  ;;  %v2218_v1 = vld [vmem:[%s3608_s1 + $0x588] sm:$0xf0]  ;;  %v2380_v32 = vld [vmem:[%s3608_s1 + $0x494] sm:$0xf]  ;;  %v2098_v33 = vld [vmem:[%s3608_s1 + $0x498] sm:$0xf0] }
  0x91   :  { %1389 = vmatpush.bf16.msra.mxu1 %v1933_v53  ;;  %v2390_v53 = vld [vmem:[%s3608_s1 + $0x4e4] sm:$0xf]  ;;  %v2101_v43 = vor.u32 %v2380_v32, %v2098_v33 }
  0x92   :  { %1402 = vmatpush.bf16.msra.mxu2 %v1997_v60  ;;  %v2362_v60 = vld [vmem:[%s3608_s1 + $0x404] sm:$0xf] }
  0x93   :  { %1413 = vmatpush.bf16.msrb.mxu3 %v2077_v48  ;;  %v1901_v48 = vor.u32 %v2330_v34, %v1898_v35  ;;  %v2029_v2 = vor.u32 %v2362_v60, %v2026_v61  ;;  %v2396_v35 = vld [vmem:[%s3608_s1 + $0x514] sm:$0xf] }
  0x94   :  { %1377 = vmatpush.bf16.msra.mxu0 %v1861_v63  ;;  %v2141_v63 = vor.u32 %v2390_v53, %v2138_v56  ;;  %v2165_v45 = vor.u32 %v2396_v35, %v2162_v36 }
  0x95   :  { %1390 = vmatpush.bf16.msra.mxu1 %v1925_v0  ;;  %v2205_v0 = vor.u32 %v2406_v57, %v2202_v58 }
  0x96   :  { %1403 = vmatpush.bf16.msra.mxu2 %v1989_v9  ;;  %v2221_v9 = vor.u32 %v2410_v42, %v2218_v1 }
  0x97   :  { %1414 = vmatpush.bf16.msrb.mxu3 %v2069_v59  ;;  %v1965_v59 = vor.u32 %v2346_v49, %v1962_v50  ;;  %v2394_v49 = vld [vmem:[%s3608_s1 + $0x504] sm:$0xf]  ;;  %v2154_v50 = vld [vmem:[%s3608_s1 + $0x508] sm:$0xf0] }
  0x98   :  { %1378 = vmatpush.bf16.msra.mxu0 %v1853_v12  ;;  %v2122_v12 = vld [vmem:[%s3608_s1 + $0x4c8] sm:$0xf0]  ;;  %v2157_v53 = vor.u32 %v2394_v49, %v2154_v50 }
  0x99   :  { %1391 = vmatpush.bf16.msra.mxu1 %v1917_v13  ;;  %v2186_v13 = vld [vmem:[%s3608_s1 + $0x548] sm:$0xf0] }
  0x9a   :  { %1404 = vmatpush.bf16.msra.mxu2 %v1981_v19  ;;  %v2382_v19 = vld [vmem:[%s3608_s1 + $0x4a4] sm:$0xf] }
  0x9b   :  { %1415 = vmatpush.bf16.msrb.mxu3 %v2061_v8  ;;  %v2194_v8 = vld [vmem:[%s3608_s1 + $0x558] sm:$0xf0] }
  0x9c   :  { %1379 = vmatpush.bf16.msra.mxu0 %v1845_v29  ;;  %v2197_v11 = vor.u32 %v2404_v7, %v2194_v8  ;;  %v203_v29 = vperm.slane %v3557_v17, 0 }
  0x9d   :  { %1392 = vmatpush.bf16.msra.mxu1 %v1909_v30  ;;  %v2109_v30 = vor.u32 %v2382_v19, %v2106_v24  ;;  %v204_v24 = vperm.slane %v3557_v17, 1 }
  0x9e   :  { %1405 = vmatpush.bf16.msra.mxu2 %v1973_v44 }
  0x9f   :  { %1416 = vmatpush.bf16.msrb.mxu3 %v2053_v22 }
  0xa0   :  { %1380 = vmatpush.bf16.msra.mxu0 %v1837_v47  ;;  %v1161_v34 = vpop.f32.mrf.mxu0  ;;  %v2378_v47 = vld [vmem:[%s3608_s1 + $0x484] sm:$0xf] }
  0xa1   :  { %1393 = vmatpush.bf16.msra.mxu1 %v1901_v48  ;;  %v1174_v39 = vpop.f32.mrf.mxu1  ;;  %v2090_v48 = vld [vmem:[%s3608_s1 + $0x488] sm:$0xf0] }
  0xa2   :  { %1406 = vmatpush.bf16.msra.mxu2 %v1965_v59 }
  0xa3   :  { %1417 = vmatpush.bf16.msrb.mxu3 %v2045_v37  ;;  %1381 = vmatmul.bf16.vlgmr.msra.gmra.mxu0 %v2910_v46  ;;  %v2386_v46 = vld [vmem:[%s3608_s1 + $0x4c4] sm:$0xf]  ;;  %v1162_v37 = vadd.f32 %v1161_v34, %v203_v29 }
  0xa4   :  { %1425 = vmatpush.bf16.msrb.mxu0 %v2149_v51  ;;  %1394 = vmatmul.bf16.vlgmr.msra.gmra.mxu1 %v2892_v38  ;;  %v2402_v38 = vld [vmem:[%s3608_s1 + $0x544] sm:$0xf] }
  0xa5   :  { %1438 = vmatpush.bf16.msrb.mxu1 %v2213_v52  ;;  %1407 = vmatmul.bf16.vlgmr.msra.gmra.mxu2 %v2900_v41  ;;  %v2125_v41 = vor.u32 %v2386_v46, %v2122_v12  ;;  %v2189_v14 = vor.u32 %v2402_v38, %v2186_v13  ;;  %v1175_v44 = vadd.f32 %v1174_v39, %v1162_v37 }
  0xa6   :  { %1457 = vmatpush.bf16.msrb.mxu2 %v2229_v62 }
  0xa7   :  { %1418 = vmatpush.bf16.msrb.mxu3 %v2037_v55 }
  0xa8   :  { %1426 = vmatpush.bf16.msrb.mxu0 %v2141_v63  ;;  %v1187_v21 = vpop.f32.mrf.mxu2  ;;  %v1163_v4 = vpop.f32.mrf.mxu0 }
  0xa9   :  { %1439 = vmatpush.bf16.msrb.mxu1 %v2205_v0  ;;  %v1200_v5 = vpop.f32.mrf.mxu3  ;;  %v1188_v51 = vadd.f32 %v1187_v21, %v1175_v44  ;;  %v1176_v54 = vpop.f32.mrf.mxu1 }
  0xaa   :  { %1458 = vmatpush.bf16.msrb.mxu2 %v2221_v9 }
  0xab   :  { %1419 = vmatpush.bf16.msrb.mxu3 %v2029_v2  ;;  %v1201_v52 = vadd.f32 %v1200_v5, %v1188_v51 }
  0xac   :  { %1427 = vmatpush.bf16.msrb.mxu0 %v2133_v10 }
  0xad   :  { %1440 = vmatpush.bf16.msrb.mxu1 %v2197_v11 }
  0xae   :  { %1420 = vmatmul.bf16.vlgmr.msrb.gmra.mxu3 %v3095_v23  ;;  %v2178_v23 = vld [vmem:[%s3608_s1 + $0x538] sm:$0xf0] }
  0xaf   :  { %v2181_v22 = vor.u32 %v2400_v16, %v2178_v23 }
  0xb0   :  { %1428 = vmatpush.bf16.msrb.mxu0 %v2125_v41  ;;  %v1189_v55 = vpop.f32.mrf.mxu2 }
  0xb1   :  { %1441 = vmatpush.bf16.msrb.mxu1 %v2189_v14  ;;  %v1202_v56 = vpop.f32.mrf.mxu3 }
  0xb4   :  { %1429 = vmatpush.bf16.msrb.mxu0 %v2117_v18 }
  0xb5   :  { %1442 = vmatpush.bf16.msrb.mxu1 %v2181_v22  ;;  %2231 = vmatmul.msk.bf16.vlgmr.msrb.gmra.mxu2 %vm1148_vm0, %v3021_v40  ;;  %v2093_v40 = vor.u32 %v2378_v47, %v2090_v48 }
  0xb8   :  { %1430 = vmatpush.bf16.msrb.mxu0 %v2109_v30 }
  0xb9   :  { %1443 = vmatpush.bf16.msrb.mxu1 %v2173_v31 }
  0xbc   :  { %1431 = vmatpush.bf16.msrb.mxu0 %v2101_v43 }
  0xbd   :  { %1444 = vmatpush.bf16.msrb.mxu1 %v2165_v45 }
  0xc0   :  { %1432 = vmatpush.bf16.msrb.mxu0 %v2093_v40  ;;  %v1213_v57 = vpop.f32.mrf.mxu0 }
  0xc1   :  { %1445 = vmatpush.bf16.msrb.mxu1 %v2157_v53  ;;  %v1214_v58 = vadd.f32 %v1213_v57, %v1201_v52  ;;  %v1226_v59 = vpop.f32.mrf.mxu1 }
  0xc3   :  { %1433 = vmatmul.bf16.vlgmr.msrb.gmra.mxu0 %v3108_v28  ;;  %v1227_v60 = vadd.f32 %v1226_v59, %v1214_v58 }
  0xc4   :  { %1446 = vmatmul.bf16.vlgmr.msrb.gmra.mxu1 %v3106_v27 }
  0xc8   :  { %v1239_v61 = vpop.f32.mrf.mxu2  ;;  %v1215_v42 = vpop.f32.mrf.mxu0 }
  0xc9   :  { %v1240_v62 = vadd.f32 %v1239_v61, %v1227_v60  ;;  %v1252_v63 = vpop.f32.mrf.mxu3  ;;  %v1228_v1 = vpop.f32.mrf.mxu1 }
  0xcb   :  { %v1253_v0 = vadd.f32 %v1252_v63, %v1240_v62 }
  0xd0   :  { %v1241_v2 = vpop.f32.mrf.mxu2 }
  0xd1   :  { %v1254_v3 = vpop.f32.mrf.mxu3 }
  0xd9   :  { %v1304_v6 = vpop.f32.mrf.mxu3 }
  0xe0   :  { %v1265_v7 = vpop.f32.mrf.mxu0 }
  0xe1   :  { %v1266_v8 = vadd.f32 %v1265_v7, %v1253_v0  ;;  %v1278_v9 = vpop.f32.mrf.mxu1  ;;  %v1306_v28 = vpop.f32.mrf.mxu3 }
  0xe3   :  { %v1279_v10 = vadd.f32 %v1278_v9, %v1266_v8 }
  0xe8   :  { %v1291_v11 = vpop.f32.mrf.mxu2  ;;  %v1267_v46 = vpop.f32.mrf.mxu0 }
  0xe9   :  { %v1292_v27 = vadd.f32 %v1291_v11, %v1279_v10  ;;  %v1280_v12 = vpop.f32.mrf.mxu1 }
  0xeb   :  { %v3600_v38 = vadd.f32 %v1304_v6, %v1292_v27 }
  0xed   :  { %v2232_v21 = vmul.f32 -1.442695, %v3600_v38 }
  0xef   :  { %2414 = vpow2.f32 %v2232_v21 }
  0xf0   :  { %v1293_v41 = vpop.f32.mrf.mxu2 }
  0xf1   :  { %v1317_v13 = vpop.f32.mrf.mxu3 }
  0xf2   :  { %v1318_v26 = vadd.f32 %v1317_v13, %v204_v24 }
  0xf5   :  { %v2415_v48 = vpop.eup %2414 }
  0xf6   :  { %v1470_v50 = vadd.f32 1.0, %v2415_v48 }
  0xf8   :  { %2416 = vrcp.f32 %v1470_v50  ;;  %v1483_v2 = vand.u32 2147483648, %v1470_v50  ;;  %vm1477_vm2 = vweird.f32 %v1470_v50  ;;  %v1481_v3 = vand.u32 2147483647, %v1470_v50 }
  0xf9   :  { %v1319_v14 = vpop.f32.mrf.mxu3 }
  0xfa   :  { %v1484_v28 = vor.u32 1.1754944e-38, %v1483_v2  ;;  %vm1482_vm5 = vcmp.eq.f32.partialorder %v1481_v3, 8.507059e+37 }
  0xfe   :  { %v2417_v58 = vpop.eup %2416 }
  0xff   :  { %v1473_v59 = vmul.f32 %v2417_v58, %v1470_v50  ;;  %vm1478_vm1 = vweird.f32 %v2417_v58 }
 0x100   :  { %v1330_v15 = vpop.f32.mrf.mxu0  ;;  %vm1479_vm3 = vmor %vm1477_vm2, %vm1478_vm1 }
 0x101   :  { %v1343_v20 = vpop.f32.mrf.mxu1  ;;  %v1331_v29 = vadd.f32 %v1330_v15, %v1318_v26  ;;  %v1474_v62 = vsub.f32 1.0, %v1473_v59 }
 0x103   :  { %v1344_v32 = vadd.f32 %v1343_v20, %v1331_v29  ;;  %v1475_v63 = vmul.f32 %v2417_v58, %v1474_v62 }
 0x105   :  { %v1476_v42 = vadd.f32 %v2417_v58, %v1475_v63 }
 0x107   :  { %v1480_v8 = vsel %vm1479_vm3, %v2417_v58, %v1476_v42 }
 0x108   :  { %v1332_v16 = vpop.f32.mrf.mxu0  ;;  %v1356_v23 = vpop.f32.mrf.mxu2  ;;  %v1485_v27 = vsel %vm1482_vm5, %v1484_v28, %v1480_v8 }
 0x109   :  { %v1345_v18 = vpop.f32.mrf.mxu1  ;;  %v1357_v33 = vadd.f32 %v1356_v23, %v1344_v32  ;;  %v1502_v41 = vmul.f32 %v1485_v27, %v3600_v38 }
 0x110   :  { %v1358_v19 = vpop.f32.mrf.mxu2 }
 0x111   :  { %v1369_v22 = vpop.f32.mrf.mxu3 }
 0x112   :  { %v1370_v37 = vadd.f32 %v1369_v22, %v1357_v33 }
 0x119   :  { %v1371_v25 = vpop.f32.mrf.mxu3 }
 0x120   :  { %v1382_v30 = vpop.f32.mrf.mxu0 }
 0x121   :  { %v1395_v31 = vpop.f32.mrf.mxu1  ;;  %v1383_v43 = vadd.f32 %v1382_v30, %v1370_v37 }
 0x123   :  { %v1396_v5 = vadd.f32 %v1395_v31, %v1383_v43 }
 0x128   :  { %v1384_v34 = vpop.f32.mrf.mxu0  ;;  %v1408_v35 = vpop.f32.mrf.mxu2 }
 0x129   :  { %v1397_v36 = vpop.f32.mrf.mxu1  ;;  %v1409_v17 = vadd.f32 %v1408_v35, %v1396_v5 }
 0x130   :  { %v1410_v44 = vpop.f32.mrf.mxu2 }
 0x131   :  { %v1421_v39 = vpop.f32.mrf.mxu3 }
 0x132   :  { %v1422_v49 = vadd.f32 %v1421_v39, %v1409_v17 }
 0x138   :  { %v1460_v47 = vpop.f32.mrf.mxu2 }
 0x139   :  { %v1423_v45 = vpop.f32.mrf.mxu3 }
 0x140   :  { %v1434_v51 = vpop.f32.mrf.mxu0  ;;  %v1462_v4 = vpop.f32.mrf.mxu2 }
 0x141   :  { %v1435_v40 = vadd.f32 %v1434_v51, %v1422_v49  ;;  %v1447_v52 = vpop.f32.mrf.mxu1 }
 0x143   :  { %v1448_v53 = vadd.f32 %v1447_v52, %v1435_v40 }
 0x145   :  { %v1461_v54 = vadd.f32 %v1460_v47, %v1448_v53 }
 0x147   :  { %v2233_v55 = vmul.f32 -1.442695, %v1461_v54 }
 0x148   :  { %v1436_v56 = vpop.f32.mrf.mxu0 }
 0x149   :  { %2418 = vpow2.f32 %v2233_v55  ;;  %v1449_v57 = vpop.f32.mrf.mxu1 }
 0x14f   :  { %v2419_v60 = vpop.eup %2418 }
 0x150   :  { %v1471_v61 = vadd.f32 1.0, %v2419_v60 }
 0x152   :  { %2420 = vrcp.f32 %v1471_v61  ;;  %v1498_v7 = vand.u32 2147483648, %v1471_v61  ;;  %v1496_v10 = vand.u32 2147483647, %v1471_v61  ;;  %vm1492_vm6 = vweird.f32 %v1471_v61 }
 0x154   :  { %v1499_v46 = vor.u32 1.1754944e-38, %v1498_v7  ;;  %vm1497_vm8 = vcmp.eq.f32.partialorder %v1496_v10, 8.507059e+37 }
 0x158   :  { %v2421_v0 = vpop.eup %2420 }
 0x159   :  { %v1488_v1 = vmul.f32 %v2421_v0, %v1471_v61  ;;  %vm1493_vm4 = vweird.f32 %v2421_v0 }
 0x15a   :  { %vm1494_vm7 = vmor %vm1492_vm6, %vm1493_vm4 }
 0x15b   :  { %v1489_v6 = vsub.f32 1.0, %v1488_v1 }
 0x15d   :  { %v1490_v9 = vmul.f32 %v2421_v0, %v1489_v6 }
 0x15f   :  { %v1491_v11 = vadd.f32 %v2421_v0, %v1490_v9 }
 0x161   :  { %v1495_v12 = vsel %vm1494_vm7, %v2421_v0, %v1491_v11 }
 0x162   :  { %v1500_v13 = vsel %vm1497_vm8, %v1499_v46, %v1495_v12 }
 0x163   :  { %v1503_v14 = vmul.f32 %v1500_v13, %v1461_v54 }
 0x165   :  { %v1504_v15 = vpack.c.bf16 %v1503_v14, %v1502_v41 }
 0x167   :  { %1505 = vst [vmem:[%s3611_s3] sm:$0xff] %v1504_v15 }

// kernel: just_efficientnet_forward.14
= control target key start
LH: loop header
LB: loop body
LE: loop exit
PB: predicated region body
PF: predicated region fallthrough
CT: control target
= control target key end

     0   :  { %s1515_s1 = inlined_call_operand.vmem [shape: bf16[1280,128], index: 1, kind: input, shape index: {}]   ;;  %s1516_s2 = inlined_call_operand.vmem [shape: f32[1,128], index: 2, kind: input, shape index: {}]   ;;  %s1517_s0 = inlined_call_operand.vmem [shape: bf16[8,1280], index: 0, kind: input, shape index: {}]   ;;  %s1518_s3 = inlined_call_operand.vmem [shape: f32[8,128], index: 3, kind: output, shape index: {}]  }
   0x1   :  { %v1160_v0 = vld [vmem:[%s1515_s1 + $0x38] sm:$0xff]  ;;  %v1159_v4 = vld [vmem:[%s1515_s1 + $0x30] sm:$0xff]  ;;  %v1158_v8 = vld [vmem:[%s1515_s1 + $0x28] sm:$0xff] }
   0x2   :  { %v1168_v1 = vld [vmem:[%s1515_s1 + $0x78] sm:$0xff]  ;;  %698 = vmatpush.bf16.msra.mxu0 %v1160_v0  ;;  %v1167_v5 = vld [vmem:[%s1515_s1 + $0x70] sm:$0xff]  ;;  %v1166_v9 = vld [vmem:[%s1515_s1 + $0x68] sm:$0xff] }
   0x3   :  { %v1176_v2 = vld [vmem:[%s1515_s1 + $0xb8] sm:$0xff]  ;;  %711 = vmatpush.bf16.msra.mxu1 %v1168_v1  ;;  %v1175_v6 = vld [vmem:[%s1515_s1 + $0xb0] sm:$0xff]  ;;  %v1174_v10 = vld [vmem:[%s1515_s1 + $0xa8] sm:$0xff] }
   0x4   :  { %v1184_v3 = vld [vmem:[%s1515_s1 + $0xf8] sm:$0xff]  ;;  %724 = vmatpush.bf16.msra.mxu2 %v1176_v2  ;;  %v1183_v7 = vld [vmem:[%s1515_s1 + $0xf0] sm:$0xff]  ;;  %v1182_v11 = vld [vmem:[%s1515_s1 + $0xe8] sm:$0xff] }
   0x5   :  { %737 = vmatpush.bf16.msra.mxu3 %v1184_v3  ;;  %v1157_v12 = vld [vmem:[%s1515_s1 + $0x20] sm:$0xff]  ;;  %v1156_v16 = vld [vmem:[%s1515_s1 + $0x18] sm:$0xff]  ;;  %v1155_v20 = vld [vmem:[%s1515_s1 + $0x10] sm:$0xff] }
   0x6   :  { %699 = vmatpush.bf16.msra.mxu0 %v1159_v4  ;;  %v1165_v13 = vld [vmem:[%s1515_s1 + $0x60] sm:$0xff]  ;;  %v1164_v17 = vld [vmem:[%s1515_s1 + $0x58] sm:$0xff]  ;;  %v1163_v21 = vld [vmem:[%s1515_s1 + $0x50] sm:$0xff] }
   0x7   :  { %712 = vmatpush.bf16.msra.mxu1 %v1167_v5  ;;  %v1173_v14 = vld [vmem:[%s1515_s1 + $0xa0] sm:$0xff]  ;;  %v1172_v18 = vld [vmem:[%s1515_s1 + $0x98] sm:$0xff]  ;;  %v1171_v22 = vld [vmem:[%s1515_s1 + $0x90] sm:$0xff] }
   0x8   :  { %725 = vmatpush.bf16.msra.mxu2 %v1175_v6  ;;  %v1181_v15 = vld [vmem:[%s1515_s1 + $0xe0] sm:$0xff]  ;;  %v1180_v19 = vld [vmem:[%s1515_s1 + $0xd8] sm:$0xff]  ;;  %v1179_v23 = vld [vmem:[%s1515_s1 + $0xd0] sm:$0xff] }
   0x9   :  { %738 = vmatpush.bf16.msra.mxu3 %v1183_v7  ;;  %v1154_v24 = vld [vmem:[%s1515_s1 + $0x8] sm:$0xff]  ;;  %v14_v26 = vld [vmem:[%s1517_s0] sm:$0xff]  ;;  %v1192_v35 = vld [vmem:[%s1515_s1 + $0x138] sm:$0xff] }
   0xa   :  { %700 = vmatpush.bf16.msra.mxu0 %v1158_v8  ;;  %v1162_v25 = vld [vmem:[%s1515_s1 + $0x48] sm:$0xff]  ;;  %v188_v30 = vunpack.c.l.b16 %v14_v26  ;;  %v1153_v31 = vld [vmem:[%s1515_s1] sm:$0xff]  ;;  %v189_v36 = vunpack.c.h.b16 %v14_v26  ;;  %v1200_v37 = vld [vmem:[%s1515_s1 + $0x178] sm:$0xff] }
   0xb   :  { %713 = vmatpush.bf16.msra.mxu1 %v1166_v9  ;;  %v1170_v27 = vld [vmem:[%s1515_s1 + $0x88] sm:$0xff]  ;;  %v1161_v32 = vld [vmem:[%s1515_s1 + $0x40] sm:$0xff]  ;;  %v1208_v38 = vld [vmem:[%s1515_s1 + $0x1b8] sm:$0xff] }
   0xc   :  { %726 = vmatpush.bf16.msra.mxu2 %v1174_v10  ;;  %v1178_v28 = vld [vmem:[%s1515_s1 + $0xc8] sm:$0xff]  ;;  %v1169_v34 = vld [vmem:[%s1515_s1 + $0x80] sm:$0xff]  ;;  %v198_v40 = vpack.c.b16 %v188_v30, %v188_v30  ;;  %v1216_v42 = vld [vmem:[%s1515_s1 + $0x1f8] sm:$0xff]  ;;  %v199_v45 = vpack.c.b16 %v189_v36, %v189_v36 }
   0xd   :  { %739 = vmatpush.bf16.msra.mxu3 %v1182_v11  ;;  %v15_v29 = vld [vmem:[%s1517_s0 + $0x8] sm:$0xff]  ;;  %v1177_v39 = vld [vmem:[%s1515_s1 + $0xc0] sm:$0xff]  ;;  %v1191_v44 = vld [vmem:[%s1515_s1 + $0x130] sm:$0xff] }
   0xe   :  { %701 = vmatpush.bf16.msra.mxu0 %v1157_v12  ;;  %v190_v33 = vunpack.c.l.b16 %v15_v29  ;;  %v191_v41 = vunpack.c.h.b16 %v15_v29  ;;  %v1199_v46 = vld [vmem:[%s1515_s1 + $0x170] sm:$0xff]  ;;  %v1190_v50 = vld [vmem:[%s1515_s1 + $0x128] sm:$0xff]  ;;  %v1189_v54 = vld [vmem:[%s1515_s1 + $0x120] sm:$0xff] }
   0xf   :  { %714 = vmatpush.bf16.msra.mxu1 %v1165_v13  ;;  %v1207_v47 = vld [vmem:[%s1515_s1 + $0x1b0] sm:$0xff]  ;;  %v1198_v51 = vld [vmem:[%s1515_s1 + $0x168] sm:$0xff]  ;;  %v1197_v55 = vld [vmem:[%s1515_s1 + $0x160] sm:$0xff] }
  0x10   :  { %727 = vmatpush.bf16.msra.mxu2 %v1173_v14  ;;  %v200_v43 = vpack.c.b16 %v190_v33, %v190_v33  ;;  %v201_v48 = vpack.c.b16 %v191_v41, %v191_v41  ;;  %v1215_v49 = vld [vmem:[%s1515_s1 + $0x1f0] sm:$0xff]  ;;  %v1206_v52 = vld [vmem:[%s1515_s1 + $0x1a8] sm:$0xff]  ;;  %v1205_v56 = vld [vmem:[%s1515_s1 + $0x1a0] sm:$0xff] }
  0x11   :  { %740 = vmatpush.bf16.msra.mxu3 %v1181_v15  ;;  %v1214_v53 = vld [vmem:[%s1515_s1 + $0x1e8] sm:$0xff]  ;;  %v1213_v57 = vld [vmem:[%s1515_s1 + $0x1e0] sm:$0xff]  ;;  %v1188_v58 = vld [vmem:[%s1515_s1 + $0x118] sm:$0xff] }
  0x12   :  { %702 = vmatpush.bf16.msra.mxu0 %v1156_v16  ;;  %v1196_v59 = vld [vmem:[%s1515_s1 + $0x158] sm:$0xff]  ;;  %v1187_v62 = vld [vmem:[%s1515_s1 + $0x110] sm:$0xff]  ;;  %v1186_v2 = vld [vmem:[%s1515_s1 + $0x108] sm:$0xff] }
  0x13   :  { %715 = vmatpush.bf16.msra.mxu1 %v1164_v17  ;;  %v1204_v60 = vld [vmem:[%s1515_s1 + $0x198] sm:$0xff]  ;;  %v1195_v63 = vld [vmem:[%s1515_s1 + $0x150] sm:$0xff]  ;;  %v1194_v4 = vld [vmem:[%s1515_s1 + $0x148] sm:$0xff] }
  0x14   :  { %728 = vmatpush.bf16.msra.mxu2 %v1172_v18  ;;  %v1212_v61 = vld [vmem:[%s1515_s1 + $0x1d8] sm:$0xff]  ;;  %v1203_v0 = vld [vmem:[%s1515_s1 + $0x190] sm:$0xff]  ;;  %v1202_v5 = vld [vmem:[%s1515_s1 + $0x188] sm:$0xff] }
  0x15   :  { %741 = vmatpush.bf16.msra.mxu3 %v1180_v19  ;;  %v1211_v1 = vld [vmem:[%s1515_s1 + $0x1d0] sm:$0xff]  ;;  %v17_v6 = vld [vmem:[%s1517_s0 + $0x18] sm:$0xff]  ;;  %v1210_v7 = vld [vmem:[%s1515_s1 + $0x1c8] sm:$0xff] }
  0x16   :  { %703 = vmatpush.bf16.msra.mxu0 %v1155_v20  ;;  %v16_v3 = vld [vmem:[%s1517_s0 + $0x10] sm:$0xff]  ;;  %v1185_v9 = vld [vmem:[%s1515_s1 + $0x100] sm:$0xff]  ;;  %v194_v10 = vunpack.c.l.b16 %v17_v6  ;;  %v1224_v14 = vld [vmem:[%s1515_s1 + $0x238] sm:$0xff]  ;;  %v195_v18 = vunpack.c.h.b16 %v17_v6 }
  0x17   :  { %716 = vmatpush.bf16.msra.mxu1 %v1163_v21  ;;  %v192_v8 = vunpack.c.l.b16 %v16_v3  ;;  %v193_v11 = vunpack.c.h.b16 %v16_v3  ;;  %v1193_v12 = vld [vmem:[%s1515_s1 + $0x140] sm:$0xff]  ;;  %v1232_v15 = vld [vmem:[%s1515_s1 + $0x278] sm:$0xff]  ;;  %v1223_v21 = vld [vmem:[%s1515_s1 + $0x230] sm:$0xff] }
  0x18   :  { %729 = vmatpush.bf16.msra.mxu2 %v1171_v22  ;;  %v1201_v13 = vld [vmem:[%s1515_s1 + $0x180] sm:$0xff]  ;;  %v204_v19 = vpack.c.b16 %v194_v10, %v194_v10  ;;  %v1231_v22 = vld [vmem:[%s1515_s1 + $0x270] sm:$0xff]  ;;  %v1228_v29 = vld [vmem:[%s1515_s1 + $0x258] sm:$0xff] }
  0x19   :  { %742 = vmatpush.bf16.msra.mxu3 %v1179_v23  ;;  %v1209_v16 = vld [vmem:[%s1515_s1 + $0x1c0] sm:$0xff]  ;;  %v202_v17 = vpack.c.b16 %v192_v8, %v192_v8  ;;  %v203_v20 = vpack.c.b16 %v193_v11, %v193_v11  ;;  %v205_v23 = vpack.c.b16 %v195_v18, %v195_v18  ;;  %v1219_v30 = vld [vmem:[%s1515_s1 + $0x210] sm:$0xff]  ;;  %v1226_v33 = vld [vmem:[%s1515_s1 + $0x248] sm:$0xff] }
  0x1a   :  { %704 = vmatpush.bf16.msra.mxu0 %v1154_v24  ;;  %v1222_v24 = vld [vmem:[%s1515_s1 + $0x228] sm:$0xff]  ;;  %v1221_v26 = vld [vmem:[%s1515_s1 + $0x220] sm:$0xff] }
  0x1b   :  { %717 = vmatpush.bf16.msra.mxu1 %v1162_v25  ;;  %v1230_v25 = vld [vmem:[%s1515_s1 + $0x268] sm:$0xff] }
  0x1c   :  { %730 = vmatpush.bf16.msra.mxu2 %v1170_v27  ;;  %v1229_v27 = vld [vmem:[%s1515_s1 + $0x260] sm:$0xff] }
  0x1d   :  { %743 = vmatpush.bf16.msra.mxu3 %v1178_v28  ;;  %v1220_v28 = vld [vmem:[%s1515_s1 + $0x218] sm:$0xff] }
  0x1e   :  { %705 = vmatpush.bf16.msra.mxu0 %v1153_v31  ;;  %v1227_v31 = vld [vmem:[%s1515_s1 + $0x250] sm:$0xff] }
  0x1f   :  { %718 = vmatpush.bf16.msra.mxu1 %v1161_v32  ;;  %v1218_v32 = vld [vmem:[%s1515_s1 + $0x208] sm:$0xff] }
  0x20   :  { %731 = vmatpush.bf16.msra.mxu2 %v1169_v34  ;;  %v18_v34 = vld [vmem:[%s1517_s0 + $0x20] sm:$0xff] }
  0x21   :  { %744 = vmatpush.bf16.msra.mxu3 %v1177_v39  ;;  %706 = vmatmul.bf16.vlgmr.msra.gmra.mxu0 %v198_v40  ;;  %v197_v36 = vunpack.c.h.b16 %v18_v34 }
  0x22   :  { %750 = vmatpush.bf16.msrb.mxu0 %v1192_v35  ;;  %719 = vmatmul.bf16.vlgmr.msra.gmra.mxu1 %v199_v45  ;;  %v196_v35 = vunpack.c.l.b16 %v18_v34 }
  0x23   :  { %763 = vmatpush.bf16.msrb.mxu1 %v1200_v37  ;;  %732 = vmatmul.bf16.vlgmr.msra.gmra.mxu2 %v200_v43  ;;  %v1217_v37 = vld [vmem:[%s1515_s1 + $0x200] sm:$0xff]  ;;  %v207_v40 = vpack.c.b16 %v197_v36, %v197_v36 }
  0x24   :  { %776 = vmatpush.bf16.msrb.mxu2 %v1208_v38  ;;  %745 = vmatmul.bf16.vlgmr.msra.gmra.mxu3 %v201_v48  ;;  %v1225_v38 = vld [vmem:[%s1515_s1 + $0x240] sm:$0xff]  ;;  %v206_v39 = vpack.c.b16 %v196_v35, %v196_v35 }
  0x25   :  { %789 = vmatpush.bf16.msrb.mxu3 %v1216_v42 }
  0x26   :  { %751 = vmatpush.bf16.msrb.mxu0 %v1191_v44 }
  0x27   :  { %764 = vmatpush.bf16.msrb.mxu1 %v1199_v46 }
  0x28   :  { %777 = vmatpush.bf16.msrb.mxu2 %v1207_v47 }
  0x29   :  { %790 = vmatpush.bf16.msrb.mxu3 %v1215_v49  ;;  %v1233_v49 = vld [vmem:[%s1516_s2] ss:$0 sm:$0xff] }
  0x2a   :  { %752 = vmatpush.bf16.msrb.mxu0 %v1190_v50 }
  0x2b   :  { %765 = vmatpush.bf16.msrb.mxu1 %v1198_v51 }
  0x2c   :  { %778 = vmatpush.bf16.msrb.mxu2 %v1206_v52 }
  0x2d   :  { %791 = vmatpush.bf16.msrb.mxu3 %v1214_v53 }
  0x2e   :  { %753 = vmatpush.bf16.msrb.mxu0 %v1189_v54 }
  0x2f   :  { %766 = vmatpush.bf16.msrb.mxu1 %v1197_v55 }
  0x30   :  { %779 = vmatpush.bf16.msrb.mxu2 %v1205_v56 }
  0x31   :  { %792 = vmatpush.bf16.msrb.mxu3 %v1213_v57 }
  0x32   :  { %754 = vmatpush.bf16.msrb.mxu0 %v1188_v58 }
  0x33   :  { %767 = vmatpush.bf16.msrb.mxu1 %v1196_v59 }
  0x34   :  { %780 = vmatpush.bf16.msrb.mxu2 %v1204_v60 }
  0x35   :  { %793 = vmatpush.bf16.msrb.mxu3 %v1212_v61 }
  0x36   :  { %755 = vmatpush.bf16.msrb.mxu0 %v1187_v62 }
  0x37   :  { %768 = vmatpush.bf16.msrb.mxu1 %v1195_v63 }
  0x38   :  { %781 = vmatpush.bf16.msrb.mxu2 %v1203_v0 }
  0x39   :  { %794 = vmatpush.bf16.msrb.mxu3 %v1211_v1 }
  0x3a   :  { %756 = vmatpush.bf16.msrb.mxu0 %v1186_v2 }
  0x3b   :  { %769 = vmatpush.bf16.msrb.mxu1 %v1194_v4 }
  0x3c   :  { %782 = vmatpush.bf16.msrb.mxu2 %v1202_v5 }
  0x3d   :  { %795 = vmatpush.bf16.msrb.mxu3 %v1210_v7 }
  0x3e   :  { %757 = vmatpush.bf16.msrb.mxu0 %v1185_v9 }
  0x3f   :  { %770 = vmatpush.bf16.msrb.mxu1 %v1193_v12 }
  0x40   :  { %783 = vmatpush.bf16.msrb.mxu2 %v1201_v13 }
  0x41   :  { %796 = vmatpush.bf16.msrb.mxu3 %v1209_v16  ;;  %758 = vmatmul.bf16.vlgmr.msrb.gmra.mxu0 %v202_v17 }
  0x42   :  { %802 = vmatpush.bf16.msra.mxu0 %v1224_v14  ;;  %771 = vmatmul.bf16.vlgmr.msrb.gmra.mxu1 %v203_v20 }
  0x43   :  { %815 = vmatpush.bf16.msra.mxu1 %v1232_v15  ;;  %784 = vmatmul.bf16.vlgmr.msrb.gmra.mxu2 %v204_v19 }
  0x44   :  { %797 = vmatmul.bf16.vlgmr.msrb.gmra.mxu3 %v205_v23 }
  0x46   :  { %803 = vmatpush.bf16.msra.mxu0 %v1223_v21 }
  0x47   :  { %816 = vmatpush.bf16.msra.mxu1 %v1231_v22 }
  0x4a   :  { %804 = vmatpush.bf16.msra.mxu0 %v1222_v24 }
  0x4b   :  { %817 = vmatpush.bf16.msra.mxu1 %v1230_v25 }
  0x4e   :  { %805 = vmatpush.bf16.msra.mxu0 %v1221_v26 }
  0x4f   :  { %818 = vmatpush.bf16.msra.mxu1 %v1229_v27 }
  0x52   :  { %806 = vmatpush.bf16.msra.mxu0 %v1220_v28 }
  0x53   :  { %819 = vmatpush.bf16.msra.mxu1 %v1228_v29 }
  0x56   :  { %807 = vmatpush.bf16.msra.mxu0 %v1219_v30 }
  0x57   :  { %820 = vmatpush.bf16.msra.mxu1 %v1227_v31 }
  0x5a   :  { %808 = vmatpush.bf16.msra.mxu0 %v1218_v32 }
  0x5b   :  { %821 = vmatpush.bf16.msra.mxu1 %v1226_v33 }
  0x5e   :  { %809 = vmatpush.bf16.msra.mxu0 %v1217_v37 }
  0x5f   :  { %822 = vmatpush.bf16.msra.mxu1 %v1225_v38 }
  0x61   :  { %810 = vmatmul.bf16.vlgmr.msra.gmra.mxu0 %v206_v39 }
  0x62   :  { %823 = vmatmul.bf16.vlgmr.msra.gmra.mxu1 %v207_v40 }
  0x9e   :  { %v707_v41 = vpop.f32.mrf.mxu0 }
  0x9f   :  { %v720_v42 = vpop.f32.mrf.mxu1  ;;  %v708_v51 = vadd.f32 %v1233_v49, %v707_v41 }
  0xa1   :  { %v721_v53 = vadd.f32 %v720_v42, %v708_v51 }
  0xa6   :  { %v733_v43 = vpop.f32.mrf.mxu2  ;;  %v709_v44 = vpop.f32.mrf.mxu0 }
  0xa7   :  { %v746_v45 = vpop.f32.mrf.mxu3  ;;  %v722_v46 = vpop.f32.mrf.mxu1  ;;  %v734_v56 = vadd.f32 %v733_v43, %v721_v53 }
  0xa9   :  { %v747_v59 = vadd.f32 %v746_v45, %v734_v56 }
  0xae   :  { %v735_v47 = vpop.f32.mrf.mxu2 }
  0xaf   :  { %v748_v48 = vpop.f32.mrf.mxu3 }
  0xbe   :  { %v759_v50 = vpop.f32.mrf.mxu0 }
  0xbf   :  { %v772_v52 = vpop.f32.mrf.mxu1  ;;  %v760_v61 = vadd.f32 %v759_v50, %v747_v59 }
  0xc1   :  { %v773_v63 = vadd.f32 %v772_v52, %v760_v61 }
  0xc6   :  { %v785_v54 = vpop.f32.mrf.mxu2  ;;  %v761_v55 = vpop.f32.mrf.mxu0 }
  0xc7   :  { %v774_v57 = vpop.f32.mrf.mxu1  ;;  %v798_v58 = vpop.f32.mrf.mxu3  ;;  %v786_v0 = vadd.f32 %v785_v54, %v773_v63 }
  0xc9   :  { %v799_v1 = vadd.f32 %v798_v58, %v786_v0 }
  0xce   :  { %v787_v60 = vpop.f32.mrf.mxu2 }
  0xcf   :  { %v800_v62 = vpop.f32.mrf.mxu3 }
  0xde   :  { %v811_v2 = vpop.f32.mrf.mxu0 }
  0xdf   :  { %v824_v3 = vpop.f32.mrf.mxu1  ;;  %v812_v4 = vadd.f32 %v811_v2, %v799_v1 }
  0xe1   :  { %v825_v5 = vadd.f32 %v824_v3, %v812_v4 }
  0xe3   :  { %828 = vst [vmem:[%s1518_s3] sm:$0xff] %v825_v5 }
  0xe6   :  { %v813_v6 = vpop.f32.mrf.mxu0 }
  0xe7   :  { %v826_v7 = vpop.f32.mrf.mxu1 }

// kernel: just_efficientnet_forward.15
= control target key start
LH: loop header
LB: loop body
LE: loop exit
PB: predicated region body
PF: predicated region fallthrough
CT: control target
= control target key end

     0   :  { %8 = vsyncpa [#allocation3], 0  ;;  %s1888_s0 = inlined_call_operand.vmem [shape: bf16[2,13,8,8], index: 0, kind: input, shape index: {}]   ;;  %s1889_s1 = inlined_call_operand.vmem [shape: bf16[64,8], index: 1, kind: input, shape index: {}]   ;;  %s1890_s2 = inlined_call_operand.vmem [shape: bf16[8,64], index: 2, kind: input, shape index: {}]   ;;  %s1891_s3 = inlined_call_operand.hbm [shape: f32[2,13,64,64], index: 3, kind: output, shape index: {}]  }
   0x1   :  { %10 = vsyncpa [#allocation3 + $0x1], 0  ;;  %s1404_s12 = smov 0   ;;  %s1406_s13 = smov 0  }
   0x2   :  { %s1408_s14 = smov 0   ;;  %s1410_s15 = smov 0  }
   0x3 LB: > { %s1425_s16 = sadd.s32 4294967295, %s1380_s15   ;;  %s1073_s17 = sadd.s32 4294967294, %s1380_s15   ;;  %s1380_s15 = sphi %s1410_s15, %s1897_s15   ;;  %s1376_s14 = sphi %s1408_s14, %s1896_s14   ;;  %s1372_s13 = sphi %s1406_s13, %s1895_s13   ;;  %s1368_s12 = sphi %s1404_s12, %s1894_s12  }
   0x4   : > { %s1429_s18 = sadd.s32 1, %s1380_s15   ;;  %s91_s19 = sadd.s32 1, %s1376_s14 }
   0x5   : > { %s88_s20 = ssub.s32 %s1380_s15, %s1429_s18  ;;  %p101_p0 = scmp.ne.s32.totalorder %s1376_s14, %s1372_s13 }
   0x6   : > { %p89_p1 = scmp.eq.s32.totalorder %s88_s20, 0  ;;  %p102_p2 = scmp.eq.s32.totalorder %s1425_s16, 1 }
   0x7   : > { %p107_p3 = scmp.ne.s32.totalorder %s1372_s13, %s1368_s12  ;;  %p108_p4 = scmp.eq.s32.totalorder %s1073_s17, 1 }
   0x8   : > { %s1440_s21 = scalar_select %p89_p1, %s1376_s14, %s91_s19  }
   0x9   : > { %p1442_p5 = por %p102_p2, %p101_p0  ;;  %p1446_p6 = por %p108_p4, %p107_p3 }
   0xa   : > { %p1076_p7 = scmp.ge.s32.totalorder %s1380_s15, 1  ;;  %p140_p8 = scmp.lt.s32.totalorder %s1380_s15, 3 }
   0xc   : > { %p141_p9 = pnand %p1076_p7, %p140_p8 }
   0xd   : > { %p164_p10 = scmp.lt.s32.totalorder (!%p141_p9), %s1425_s16, 1  ;;  %s161_s17 = sand.u32 (!%p141_p9), 1, %s1372_s13  }
   0xe   : > { %144 = sbr.rel (%p141_p9) target bundleno = 961 (0x3c1), region = 32  ;;  %s1338_s7 = scalar_lea.hbm (!%p141_p9), %s1891_s3, 1664 }
   0xf   : > { %s1274_s19 = smul.u32 (!%p141_p9), 832, %s161_s17 }
  0x10   : > { %s1276_s24 = smul.u32 (!%p141_p9), 832, %s1425_s16 }
  0x11   : > { %s1517_s20 = scalar_lea.vmem (!%p141_p9), [#allocation2], %s1274_s19 }
  0x12   : > { %s1008_s28 = sshll.u32 (!%p141_p9), %s1517_s20, 4  ;;  %s1009_s28 = int_to_ptr.vmem [resolvable:$true] %s1008_s28 }
  0x13   : > { %v178_v0 = vld [vmem:[%s1890_s2] sm:$0xf]  ;;  %vm184_vm0 = vcmask 1043456   ;;  %s165_s26 = scalar_select %p164_p10, %s1425_s16, 1  ;;  %vm180_vm1 = vcmask 64512   ;;  %v1485_v9 = vld [vmem:[%s1889_s1 + $0x8] sm:$0xff] }
  0x14   : > { %v1457_v1 = vsel %vm184_vm0, %v178_v0, 0  ;;  %v1477_v7 = vld [vmem:[%s1889_s1] sm:$0xff]  ;;  %v1492_v10 = vld [vmem:[%s1889_s1 + $0x10] sm:$0xff]  ;;  %v1499_v11 = vld [vmem:[%s1889_s1 + $0x18] sm:$0xff]  ;;  %vm266_vm2 = vcmask 523264  }
  0x15   : > { %287 = vmatpush.bf16.msra.mxu3 %v1457_v1  ;;  %195 = vmatpush.bf16.msra.mxu0 %v1457_v1  ;;  %s1275_s27 = smul.u32 52, %s165_s26 }
  0x17   : > { %s1466_s30 = scalar_lea.vmem %s1888_s0, %s1275_s27  ;;  %s1007_s27 = scalar_lea.hbm %s1891_s3, %s1276_s24 }
  0x18   : > { %v1099_v2 = vld [vmem:[%s1466_s30 + $0x4] sm:$0xf]  ;;  %v179_v3 = vld [vmem:[%s1466_s30] sm:$0xf]  ;;  %v1141_v12 = vld [vmem:[%s1466_s30 + $0x10] sm:$0xf] }
  0x19   : > { %347 = vmatpush.bf16.msrb.mxu0 %v1457_v1  ;;  %1100 = vmatmul.msk.bf16.vlgmr.msra.gmra.mxu3 %vm180_vm1, %v1099_v2  ;;  %v1113_v17 = vld [vmem:[%s1466_s30 + $0x8] sm:$0xf]  ;;  %v1155_v23 = vld [vmem:[%s1466_s30 + $0x14] sm:$0xf]  ;;  %v1127_v26 = vld [vmem:[%s1466_s30 + $0xc] sm:$0xf] }
  0x1a   : > { %1078 = vmatmul.msk.bf16.vlgmr.msra.gmra.mxu0 %vm180_vm1, %v179_v3  ;;  %v1169_v32 = vld [vmem:[%s1466_s30 + $0x18] sm:$0xf]  ;;  %v1183_v39 = vld [vmem:[%s1466_s30 + $0x1c] sm:$0xf]  ;;  %v1197_v43 = vld [vmem:[%s1466_s30 + $0x20] sm:$0xf] }
  0x1b   : > { %s1010_s29 = sshll.u32 %s1007_s27, 4  ;;  %s1011_s29 = int_to_ptr.hbm [resolvable:$true] %s1010_s29 }
  0x1c   : > { %s1332_s4 = sshra.s32 %s1011_s29, 4  ;;  %s1333_s4 = int_to_ptr.hbm [resolvable:$true] %s1332_s4 }
  0x1d   : > { %407 = vmatpush.bf16.msra.mxu0 %v1457_v1  ;;  %s1334_s5 = scalar_lea.hbm %s1333_s4, 832  ;;  %p1339_p0 = scmp.lt.s32.totalorder %s1333_s4, %s1891_s3 }
  0x1e   : > { %p1335_p11 = scmp.ne.s32.totalorder %s1333_s4, %s1334_s5  ;;  %p1340_p1 = scmp.lt.s32.totalorder %s1338_s7, %s1334_s5 }
  0x20   : > { %p1336_p12 = pnand %p1335_p11, %p1442_p5  ;;  %p1341_p2 = por %p1340_p1, %p1339_p0 }
  0x22   : > { %p1337_p13 = pneg %p1336_p12 }
  0x24   : > { %p1342_p3 = pnand %p1341_p2, %p1337_p13 }
  0x2a   : > { %1114 = vmatmul.msk.bf16.vlgmr.msrb.gmra.mxu0 %vm180_vm1, %v1113_v17 }
  0x3a   : > { %1128 = vmatmul.msk.bf16.vlgmr.msra.gmra.mxu0 %vm180_vm1, %v1127_v26  ;;  %v1225_v26 = vld [vmem:[%s1466_s30 + $0x28] sm:$0xf] }
  0x97   : > { %v197_v13 = vpop.f32.mrf.mxu0 }
  0x98   : > { %v201_v14 = vpack.c.bf16 %v197_v13, %v197_v13 }
  0x9a   : > { %v235_v15 = vsel %vm184_vm0, %v201_v14, 0 }
  0x9b   : > { %244 = vmatpush.bf16.msra.mxu1 %v235_v15 }
  0x9c   : > { %v289_v4 = vpop.f32.mrf.mxu3 }
  0x9d   : > { %v293_v5 = vpack.c.bf16 %v289_v4, %v289_v4 }
  0x9e   : > { %1095 = vmatmul.msk.bf16.vlgmr.msra.gmra.mxu1 %vm180_vm1, %v1477_v7 }
  0x9f   : > { %v295_v6 = vsel %vm184_vm0, %v293_v5, 0  ;;  %527 = vmatpush.bf16.msrb.mxu1 %v1457_v1  ;;  %v199_v16 = vpop.f32.mrf.mxu0 }
  0xa0   : > { %304 = vmatpush.bf16.msrb.mxu3 %v295_v6 }
  0xa3   : > { %1101 = vmatmul.msk.bf16.vlgmr.msrb.gmra.mxu3 %vm180_vm1, %v1477_v7  ;;  %587 = vmatpush.bf16.msra.mxu1 %v1457_v1 }
  0xa4   : > { %467 = vmatpush.bf16.msra.mxu3 %v1457_v1  ;;  %v291_v8 = vpop.f32.mrf.mxu3 }
  0xa7   : > { %v349_v34 = vpop.f32.mrf.mxu0 }
  0xa8   : > { %v353_v35 = vpack.c.bf16 %v349_v34, %v349_v34 }
  0xaa   : > { %v355_v36 = vsel %vm184_vm0, %v353_v35, 0  ;;  %v1253_v35 = vld [vmem:[%s1466_s30 + $0x30] sm:$0xf] }
  0xab   : > { %364 = vmatpush.bf16.msra.mxu2 %v355_v36 }
  0xae   : > { %1096 = vmatmul.msk.bf16.gmra.mxu1 %vm180_vm1, %v1485_v9  ;;  %1115 = vmatmul.msk.bf16.vlgmr.msra.gmra.mxu2 %vm180_vm1, %v1477_v7 }
  0xaf   : > { %v351_v38 = vpop.f32.mrf.mxu0 }
  0xb3   : > { %1102 = vmatmul.msk.bf16.gmra.mxu3 %vm180_vm1, %v1485_v9 }
  0xb7   : > { %v409_v51 = vpop.f32.mrf.mxu0 }
  0xb8   : > { %v413_v52 = vpack.c.bf16 %v409_v51, %v409_v51 }
  0xba   : > { %v415_v53 = vsel %vm184_vm0, %v413_v52, 0 }
  0xbb   : > { %424 = vmatpush.bf16.msrb.mxu0 %v415_v53 }
  0xbe   : > { %1097 = vmatmul.msk.bf16.gmra.mxu1 %vm180_vm1, %v1492_v10  ;;  %1116 = vmatmul.msk.bf16.gmra.mxu2 %vm180_vm1, %v1485_v9 }
  0xbf   : > { %1129 = vmatmul.msk.bf16.vlgmr.msrb.gmra.mxu0 %vm180_vm1, %v1477_v7  ;;  %v411_v54 = vpop.f32.mrf.mxu0 }
  0xc3   : > { %1103 = vmatmul.msk.bf16.gmra.mxu3 %vm180_vm1, %v1492_v10 }
  0xce   : > { %1098 = vmatmul.msk.bf16.gmra.mxu1 %vm180_vm1, %v1499_v11  ;;  %1117 = vmatmul.msk.bf16.gmra.mxu2 %vm180_vm1, %v1492_v10 }
  0xcf   : > { %1130 = vmatmul.msk.bf16.gmra.mxu0 %vm180_vm1, %v1485_v9 }
  0xd3   : > { %1104 = vmatmul.msk.bf16.gmra.mxu3 %vm180_vm1, %v1499_v11 }
  0xde   : > { %1156 = vmatmul.msk.bf16.vlgmr.msrb.gmra.mxu1 %vm180_vm1, %v1155_v23  ;;  %1118 = vmatmul.msk.bf16.gmra.mxu2 %vm180_vm1, %v1499_v11 }
  0xdf   : > { %647 = vmatpush.bf16.msrb.mxu1 %v1457_v1  ;;  %1131 = vmatmul.msk.bf16.gmra.mxu0 %vm180_vm1, %v1492_v10 }
  0xe3   : > { %1142 = vmatmul.msk.bf16.vlgmr.msra.gmra.mxu3 %vm180_vm1, %v1141_v12 }
  0xee   : > { %1170 = vmatmul.msk.bf16.vlgmr.msra.gmra.mxu1 %vm180_vm1, %v1169_v32 }
  0xef   : > { %1132 = vmatmul.msk.bf16.gmra.mxu0 %vm180_vm1, %v1499_v11 }
  0xfe   : > { %1184 = vmatmul.msk.bf16.vlgmr.msrb.gmra.mxu1 %vm180_vm1, %v1183_v39 }
 0x11b   : > { %v246_v33 = vpop.f32.mrf.mxu1 }
 0x11c   : > { %267 = vst.msk [vmem:[%s1517_s20] sm:$0xff] %vm266_vm2, %v246_v33 }
 0x123   : > { %v248_v37 = vpop.f32.mrf.mxu1 }
 0x124   : > { %268 = vst.msk [vmem:[%s1517_s20 + $0x8] sm:$0xff] %vm266_vm2, %v248_v37 }
 0x126   : > { %v306_v18 = vpop.f32.mrf.mxu3 }
 0x127   : > { %1105 = vst.msk [vmem:[%s1517_s20 + $0x40] sm:$0xff] %vm266_vm2, %v306_v18 }
 0x12b   : > { %v251_v40 = vpop.f32.mrf.mxu1 }
 0x12c   : > { %269 = vst.msk [vmem:[%s1517_s20 + $0x10] sm:$0xff] %vm266_vm2, %v251_v40 }
 0x12e   : > { %v308_v19 = vpop.f32.mrf.mxu3 }
 0x12f   : > { %1106 = vst.msk [vmem:[%s1517_s20 + $0x48] sm:$0xff] %vm266_vm2, %v308_v19 }
 0x131   : > { %v366_v0 = vpop.f32.mrf.mxu2 }
 0x132   : > { %1119 = vst.msk [vmem:[%s1517_s20 + $0x80] sm:$0xff] %vm266_vm2, %v366_v0 }
 0x133   : > { %v253_v41 = vpop.f32.mrf.mxu1 }
 0x134   : > { %270 = vst.msk [vmem:[%s1517_s20 + $0x18] sm:$0xff] %vm266_vm2, %v253_v41 }
 0x136   : > { %v311_v20 = vpop.f32.mrf.mxu3 }
 0x137   : > { %1107 = vst.msk [vmem:[%s1517_s20 + $0x50] sm:$0xff] %vm266_vm2, %v311_v20 }
 0x139   : > { %v368_v6 = vpop.f32.mrf.mxu2 }
 0x13a   : > { %1120 = vst.msk [vmem:[%s1517_s20 + $0x88] sm:$0xff] %vm266_vm2, %v368_v6 }
 0x13b   : > { %v256_v42 = vpop.f32.mrf.mxu1 }
 0x13c   : > { %271 = vst.msk [vmem:[%s1517_s20 + $0x20] sm:$0xff] %vm266_vm2, %v256_v42 }
 0x13e   : > { %v313_v21 = vpop.f32.mrf.mxu3 }
 0x13f   : > { %1108 = vst.msk [vmem:[%s1517_s20 + $0x58] sm:$0xff] %vm266_vm2, %v313_v21 }
 0x141   : > { %v371_v13 = vpop.f32.mrf.mxu2 }
 0x142   : > { %1121 = vst.msk [vmem:[%s1517_s20 + $0x90] sm:$0xff] %vm266_vm2, %v371_v13 }
 0x143   : > { %v258_v44 = vpop.f32.mrf.mxu1 }
 0x144   : > { %272 = vst.msk [vmem:[%s1517_s20 + $0x28] sm:$0xff] %vm266_vm2, %v258_v44 }
 0x146   : > { %v316_v22 = vpop.f32.mrf.mxu3 }
 0x147   : > { %1109 = vst.msk [vmem:[%s1517_s20 + $0x60] sm:$0xff] %vm266_vm2, %v316_v22 }
 0x149   : > { %v373_v15 = vpop.f32.mrf.mxu2 }
 0x14a   : > { %1122 = vst.msk [vmem:[%s1517_s20 + $0x98] sm:$0xff] %vm266_vm2, %v373_v15 }
 0x14b   : > { %v261_v45 = vpop.f32.mrf.mxu1 }
 0x14c   : > { %273 = vst.msk [vmem:[%s1517_s20 + $0x30] sm:$0xff] %vm266_vm2, %v261_v45 }
 0x14e   : > { %v318_v24 = vpop.f32.mrf.mxu3 }
 0x14f   : > { %1110 = vst.msk [vmem:[%s1517_s20 + $0x68] sm:$0xff] %vm266_vm2, %v318_v24 }
 0x151   : > { %v376_v18 = vpop.f32.mrf.mxu2 }
 0x152   : > { %1123 = vst.msk [vmem:[%s1517_s20 + $0xa0] sm:$0xff] %vm266_vm2, %v376_v18 }
 0x153   : > { %v263_v46 = vpop.f32.mrf.mxu1 }
 0x154   : > { %274 = vst.msk [vmem:[%s1517_s20 + $0x38] sm:$0xff] %vm266_vm2, %v263_v46 }
 0x156   : > { %v321_v25 = vpop.f32.mrf.mxu3 }
 0x157   : > { %1111 = vst.msk [vmem:[%s1517_s20 + $0x70] sm:$0xff] %vm266_vm2, %v321_v25  ;;  %v426_v25 = vpop.f32.mrf.mxu0 }
 0x158   : > { %1133 = vst.msk [vmem:[%s1517_s20 + $0xc0] sm:$0xff] %vm266_vm2, %v426_v25 }
 0x159   : > { %v378_v21 = vpop.f32.mrf.mxu2 }
 0x15a   : > { %1124 = vst.msk [vmem:[%s1517_s20 + $0xa8] sm:$0xff] %vm266_vm2, %v378_v21 }
 0x15b   : > { %v529_v47 = vpop.f32.mrf.mxu1 }
 0x15c   : > { %v533_v48 = vpack.c.bf16 %v529_v47, %v529_v47 }
 0x15e   : > { %v323_v27 = vpop.f32.mrf.mxu3  ;;  %v535_v49 = vsel %vm184_vm0, %v533_v48, 0 }
 0x15f   : > { %1112 = vst.msk [vmem:[%s1517_s20 + $0x78] sm:$0xff] %vm266_vm2, %v323_v27  ;;  %544 = vmatpush.bf16.msrb.mxu2 %v535_v49  ;;  %v1239_v27 = vld [vmem:[%s1466_s30 + $0x2c] sm:$0xf] }
 0x161   : > { %v381_v22 = vpop.f32.mrf.mxu2 }
 0x162   : > { %1157 = vmatmul.msk.bf16.vlgmr.msrb.gmra.mxu2 %vm180_vm1, %v1477_v7  ;;  %1125 = vst.msk [vmem:[%s1517_s20 + $0xb0] sm:$0xff] %vm266_vm2, %v381_v22 }
 0x163   : > { %v531_v50 = vpop.f32.mrf.mxu1 }
 0x166   : > { %v469_v28 = vpop.f32.mrf.mxu3 }
 0x167   : > { %v473_v29 = vpack.c.bf16 %v469_v28, %v469_v28 }
 0x169   : > { %v475_v30 = vsel %vm184_vm0, %v473_v29, 0  ;;  %v383_v23 = vpop.f32.mrf.mxu2  ;;  %v428_v29 = vpop.f32.mrf.mxu0 }
 0x16a   : > { %484 = vmatpush.bf16.msrb.mxu3 %v475_v30  ;;  %1126 = vst.msk [vmem:[%s1517_s20 + $0xb8] sm:$0xff] %vm266_vm2, %v383_v23 }
 0x16b   : > { %v589_v58 = vpop.f32.mrf.mxu1  ;;  %1134 = vst.msk [vmem:[%s1517_s20 + $0xc8] sm:$0xff] %vm266_vm2, %v428_v29 }
 0x16c   : > { %v593_v61 = vpack.c.bf16 %v589_v58, %v589_v58 }
 0x16d   : > { %1143 = vmatmul.msk.bf16.vlgmr.msrb.gmra.mxu3 %vm180_vm1, %v1477_v7 }
 0x16e   : > { %707 = vmatpush.bf16.msra.mxu3 %v1457_v1  ;;  %v471_v31 = vpop.f32.mrf.mxu3  ;;  %v595_v62 = vsel %vm184_vm0, %v593_v61, 0 }
 0x16f   : > { %604 = vmatpush.bf16.msra.mxu0 %v595_v62 }
 0x171   : > { %v431_v31 = vpop.f32.mrf.mxu0 }
 0x172   : > { %767 = vmatpush.bf16.msrb.mxu3 %v1457_v1  ;;  %1158 = vmatmul.msk.bf16.gmra.mxu2 %vm180_vm1, %v1485_v9  ;;  %1135 = vst.msk [vmem:[%s1517_s20 + $0xd0] sm:$0xff] %vm266_vm2, %v431_v31 }
 0x173   : > { %v591_v60 = vpop.f32.mrf.mxu1  ;;  %827 = vmatpush.bf16.msrb.mxu0 %v1457_v1 }
 0x174   : > { %1171 = vmatmul.msk.bf16.vlgmr.msra.gmra.mxu0 %vm180_vm1, %v1477_v7 }
 0x179   : > { %v433_v33 = vpop.f32.mrf.mxu0 }
 0x17a   : > { %1136 = vst.msk [vmem:[%s1517_s20 + $0xd8] sm:$0xff] %vm266_vm2, %v433_v33 }
 0x17b   : > { %v649_v2 = vpop.f32.mrf.mxu1 }
 0x17c   : > { %v653_v3 = vpack.c.bf16 %v649_v2, %v649_v2 }
 0x17d   : > { %1144 = vmatmul.msk.bf16.gmra.mxu3 %vm180_vm1, %v1485_v9 }
 0x17e   : > { %v655_v4 = vsel %vm184_vm0, %v653_v3, 0 }
 0x17f   : > { %664 = vmatpush.bf16.msra.mxu1 %v655_v4 }
 0x181   : > { %v436_v36 = vpop.f32.mrf.mxu0 }
 0x182   : > { %1159 = vmatmul.msk.bf16.gmra.mxu2 %vm180_vm1, %v1492_v10  ;;  %1185 = vmatmul.msk.bf16.vlgmr.msra.gmra.mxu1 %vm180_vm1, %v1477_v7  ;;  %1137 = vst.msk [vmem:[%s1517_s20 + $0xe0] sm:$0xff] %vm266_vm2, %v436_v36 }
 0x183   : > { %887 = vmatpush.bf16.msrb.mxu1 %v1457_v1  ;;  %v651_v8 = vpop.f32.mrf.mxu1 }
 0x184   : > { %1172 = vmatmul.msk.bf16.gmra.mxu0 %vm180_vm1, %v1485_v9 }
 0x189   : > { %v438_v38 = vpop.f32.mrf.mxu0 }
 0x18a   : > { %1138 = vst.msk [vmem:[%s1517_s20 + $0xe8] sm:$0xff] %vm266_vm2, %v438_v38 }
 0x18d   : > { %1145 = vmatmul.msk.bf16.gmra.mxu3 %vm180_vm1, %v1492_v10 }
 0x191   : > { %v441_v40 = vpop.f32.mrf.mxu0 }
 0x192   : > { %1160 = vmatmul.msk.bf16.gmra.mxu2 %vm180_vm1, %v1499_v11  ;;  %1186 = vmatmul.msk.bf16.gmra.mxu1 %vm180_vm1, %v1485_v9  ;;  %1139 = vst.msk [vmem:[%s1517_s20 + $0xf0] sm:$0xff] %vm266_vm2, %v441_v40 }
 0x194   : > { %1173 = vmatmul.msk.bf16.gmra.mxu0 %vm180_vm1, %v1492_v10 }
 0x199   : > { %v443_v42 = vpop.f32.mrf.mxu0 }
 0x19a   : > { %1140 = vst.msk [vmem:[%s1517_s20 + $0xf8] sm:$0xff] %vm266_vm2, %v443_v42 }
 0x19d   : > { %1146 = vmatmul.msk.bf16.gmra.mxu3 %vm180_vm1, %v1499_v11 }
 0x1a2   : > { %1187 = vmatmul.msk.bf16.gmra.mxu1 %vm180_vm1, %v1492_v10 }
 0x1a4   : > { %1174 = vmatmul.msk.bf16.gmra.mxu0 %vm180_vm1, %v1499_v11 }
 0x1ad   : > { %1198 = vmatmul.msk.bf16.vlgmr.msra.gmra.mxu3 %vm180_vm1, %v1197_v43 }
 0x1b2   : > { %1188 = vmatmul.msk.bf16.gmra.mxu1 %vm180_vm1, %v1499_v11 }
 0x1b4   : > { %1226 = vmatmul.msk.bf16.vlgmr.msrb.gmra.mxu0 %vm180_vm1, %v1225_v26 }
 0x1c2   : > { %1240 = vmatmul.msk.bf16.vlgmr.msrb.gmra.mxu1 %vm180_vm1, %v1239_v27 }
 0x1e5   : > { %v546_v24 = vpop.f32.mrf.mxu2 }
 0x1e6   : > { %1161 = vst.msk [vmem:[%s1517_s20 + $0x140] sm:$0xff] %vm266_vm2, %v546_v24 }
 0x1ed   : > { %v548_v28 = vpop.f32.mrf.mxu2 }
 0x1ee   : > { %1162 = vst.msk [vmem:[%s1517_s20 + $0x148] sm:$0xff] %vm266_vm2, %v548_v28 }
 0x1f0   : > { %v486_v55 = vpop.f32.mrf.mxu3 }
 0x1f1   : > { %1147 = vst.msk [vmem:[%s1517_s20 + $0x100] sm:$0xff] %vm266_vm2, %v486_v55  ;;  %v606_v43 = vpop.f32.mrf.mxu0 }
 0x1f2   : > { %1175 = vst.msk [vmem:[%s1517_s20 + $0x180] sm:$0xff] %vm266_vm2, %v606_v43 }
 0x1f5   : > { %v551_v30 = vpop.f32.mrf.mxu2 }
 0x1f6   : > { %1163 = vst.msk [vmem:[%s1517_s20 + $0x150] sm:$0xff] %vm266_vm2, %v551_v30 }
 0x1f8   : > { %v488_v56 = vpop.f32.mrf.mxu3 }
 0x1f9   : > { %1148 = vst.msk [vmem:[%s1517_s20 + $0x108] sm:$0xff] %vm266_vm2, %v488_v56  ;;  %v608_v45 = vpop.f32.mrf.mxu0 }
 0x1fa   : > { %1176 = vst.msk [vmem:[%s1517_s20 + $0x188] sm:$0xff] %vm266_vm2, %v608_v45 }
 0x1fd   : > { %v553_v32 = vpop.f32.mrf.mxu2 }
 0x1fe   : > { %1164 = vst.msk [vmem:[%s1517_s20 + $0x158] sm:$0xff] %vm266_vm2, %v553_v32 }
 0x1ff   : > { %v666_v44 = vpop.f32.mrf.mxu1 }
 0x200   : > { %v491_v57 = vpop.f32.mrf.mxu3  ;;  %1189 = vst.msk [vmem:[%s1517_s20 + $0x1c0] sm:$0xff] %vm266_vm2, %v666_v44 }
 0x201   : > { %1149 = vst.msk [vmem:[%s1517_s20 + $0x110] sm:$0xff] %vm266_vm2, %v491_v57  ;;  %v611_v47 = vpop.f32.mrf.mxu0 }
 0x202   : > { %1177 = vst.msk [vmem:[%s1517_s20 + $0x190] sm:$0xff] %vm266_vm2, %v611_v47 }
 0x205   : > { %v556_v34 = vpop.f32.mrf.mxu2 }
 0x206   : > { %1165 = vst.msk [vmem:[%s1517_s20 + $0x160] sm:$0xff] %vm266_vm2, %v556_v34 }
 0x207   : > { %v668_v46 = vpop.f32.mrf.mxu1 }
 0x208   : > { %v493_v59 = vpop.f32.mrf.mxu3  ;;  %1190 = vst.msk [vmem:[%s1517_s20 + $0x1c8] sm:$0xff] %vm266_vm2, %v668_v46 }
 0x209   : > { %1150 = vst.msk [vmem:[%s1517_s20 + $0x118] sm:$0xff] %vm266_vm2, %v493_v59  ;;  %v613_v49 = vpop.f32.mrf.mxu0 }
 0x20a   : > { %1178 = vst.msk [vmem:[%s1517_s20 + $0x198] sm:$0xff] %vm266_vm2, %v613_v49 }
 0x20d   : > { %v558_v37 = vpop.f32.mrf.mxu2 }
 0x20e   : > { %1166 = vst.msk [vmem:[%s1517_s20 + $0x168] sm:$0xff] %vm266_vm2, %v558_v37 }
 0x20f   : > { %v671_v48 = vpop.f32.mrf.mxu1 }
 0x210   : > { %v496_v63 = vpop.f32.mrf.mxu3  ;;  %1191 = vst.msk [vmem:[%s1517_s20 + $0x1d0] sm:$0xff] %vm266_vm2, %v671_v48 }
 0x211   : > { %1151 = vst.msk [vmem:[%s1517_s20 + $0x120] sm:$0xff] %vm266_vm2, %v496_v63  ;;  %v616_v51 = vpop.f32.mrf.mxu0 }
 0x212   : > { %1179 = vst.msk [vmem:[%s1517_s20 + $0x1a0] sm:$0xff] %vm266_vm2, %v616_v51 }
 0x215   : > { %v561_v39 = vpop.f32.mrf.mxu2 }
 0x216   : > { %1167 = vst.msk [vmem:[%s1517_s20 + $0x170] sm:$0xff] %vm266_vm2, %v561_v39 }
 0x217   : > { %v673_v50 = vpop.f32.mrf.mxu1 }
 0x218   : > { %v498_v5 = vpop.f32.mrf.mxu3  ;;  %1192 = vst.msk [vmem:[%s1517_s20 + $0x1d8] sm:$0xff] %vm266_vm2, %v673_v50 }
 0x219   : > { %1152 = vst.msk [vmem:[%s1517_s20 + $0x128] sm:$0xff] %vm266_vm2, %v498_v5  ;;  %v618_v54 = vpop.f32.mrf.mxu0 }
 0x21a   : > { %1180 = vst.msk [vmem:[%s1517_s20 + $0x1a8] sm:$0xff] %vm266_vm2, %v618_v54 }
 0x21d   : > { %v563_v41 = vpop.f32.mrf.mxu2 }
 0x21e   : > { %1168 = vst.msk [vmem:[%s1517_s20 + $0x178] sm:$0xff] %vm266_vm2, %v563_v41 }
 0x21f   : > { %v676_v52 = vpop.f32.mrf.mxu1 }
 0x220   : > { %v501_v12 = vpop.f32.mrf.mxu3  ;;  %1193 = vst.msk [vmem:[%s1517_s20 + $0x1e0] sm:$0xff] %vm266_vm2, %v676_v52 }
 0x221   : > { %1153 = vst.msk [vmem:[%s1517_s20 + $0x130] sm:$0xff] %vm266_vm2, %v501_v12  ;;  %v621_v57 = vpop.f32.mrf.mxu0 }
 0x222   : > { %1181 = vst.msk [vmem:[%s1517_s20 + $0x1b0] sm:$0xff] %vm266_vm2, %v621_v57 }
 0x227   : > { %v678_v55 = vpop.f32.mrf.mxu1 }
 0x228   : > { %v503_v14 = vpop.f32.mrf.mxu3  ;;  %1194 = vst.msk [vmem:[%s1517_s20 + $0x1e8] sm:$0xff] %vm266_vm2, %v678_v55 }
 0x229   : > { %1154 = vst.msk [vmem:[%s1517_s20 + $0x138] sm:$0xff] %vm266_vm2, %v503_v14  ;;  %v623_v60 = vpop.f32.mrf.mxu0 }
 0x22a   : > { %1182 = vst.msk [vmem:[%s1517_s20 + $0x1b8] sm:$0xff] %vm266_vm2, %v623_v60 }
 0x22f   : > { %v681_v58 = vpop.f32.mrf.mxu1 }
 0x230   : > { %v709_v16 = vpop.f32.mrf.mxu3  ;;  %1195 = vst.msk [vmem:[%s1517_s20 + $0x1f0] sm:$0xff] %vm266_vm2, %v681_v58 }
 0x231   : > { %v713_v17 = vpack.c.bf16 %v709_v16, %v709_v16  ;;  %v829_v3 = vpop.f32.mrf.mxu0 }
 0x232   : > { %v833_v5 = vpack.c.bf16 %v829_v3, %v829_v3 }
 0x233   : > { %v715_v19 = vsel %vm184_vm0, %v713_v17, 0 }
 0x234   : > { %724 = vmatpush.bf16.msra.mxu2 %v715_v19  ;;  %v835_v13 = vsel %vm184_vm0, %v833_v5, 0 }
 0x235   : > { %844 = vmatpush.bf16.msra.mxu0 %v835_v13 }
 0x237   : > { %1199 = vmatmul.msk.bf16.vlgmr.msra.gmra.mxu2 %vm180_vm1, %v1477_v7  ;;  %v683_v61 = vpop.f32.mrf.mxu1 }
 0x238   : > { %947 = vmatpush.bf16.msrb.mxu2 %v1457_v1  ;;  %v711_v20 = vpop.f32.mrf.mxu3  ;;  %v1211_v1 = vld [vmem:[%s1466_s30 + $0x24] sm:$0xf]  ;;  %1196 = vst.msk [vmem:[%s1517_s20 + $0x1f8] sm:$0xff] %vm266_vm2, %v683_v61  ;;  %1227 = vmatmul.msk.bf16.vlgmr.msra.gmra.mxu0 %vm180_vm1, %v1477_v7  ;;  %s996_s30 = scalar_lea.sflag [#allocation3], %s161_s17 }
 0x239   : > { %1212 = vmatmul.msk.bf16.vlgmr.msrb.gmra.mxu3 %vm180_vm1, %v1211_v1  ;;  %v831_v15 = vpop.f32.mrf.mxu0 }
 0x23f   : > { %v889_v4 = vpop.f32.mrf.mxu1 }
 0x240   : > { %v893_v6 = vpack.c.bf16 %v889_v4, %v889_v4 }
 0x242   : > { %v895_v14 = vsel %vm184_vm0, %v893_v6, 0 }
 0x243   : > { %904 = vmatpush.bf16.msra.mxu1 %v895_v14 }
 0x246   : > { %1241 = vmatmul.msk.bf16.vlgmr.msra.gmra.mxu1 %vm180_vm1, %v1477_v7 }
 0x247   : > { %1200 = vmatmul.msk.bf16.gmra.mxu2 %vm180_vm1, %v1485_v9  ;;  %v891_v16 = vpop.f32.mrf.mxu1 }
 0x248   : > { %1228 = vmatmul.msk.bf16.gmra.mxu0 %vm180_vm1, %v1485_v9 }
 0x256   : > { %1242 = vmatmul.msk.bf16.gmra.mxu1 %vm180_vm1, %v1485_v9 }
 0x257   : > { %1201 = vmatmul.msk.bf16.gmra.mxu2 %vm180_vm1, %v1492_v10 }
 0x258   : > { %1229 = vmatmul.msk.bf16.gmra.mxu0 %vm180_vm1, %v1492_v10 }
 0x266   : > { %1243 = vmatmul.msk.bf16.gmra.mxu1 %vm180_vm1, %v1492_v10 }
 0x267   : > { %1202 = vmatmul.msk.bf16.gmra.mxu2 %vm180_vm1, %v1499_v11 }
 0x268   : > { %1230 = vmatmul.msk.bf16.gmra.mxu0 %vm180_vm1, %v1499_v11 }
 0x276   : > { %1244 = vmatmul.msk.bf16.gmra.mxu1 %vm180_vm1, %v1499_v11 }
 0x277   : > { %1254 = vmatmul.msk.bf16.vlgmr.msrb.gmra.mxu2 %vm180_vm1, %v1253_v35 }
 0x2b5   : > { %v846_v23 = vpop.f32.mrf.mxu0 }
 0x2b6   : > { %1231 = vst.msk [vmem:[%s1517_s20 + $0x280] sm:$0xff] %vm266_vm2, %v846_v23 }
 0x2ba   : > { %v726_v53 = vpop.f32.mrf.mxu2 }
 0x2bb   : > { %1203 = vst.msk [vmem:[%s1517_s20 + $0x200] sm:$0xff] %vm266_vm2, %v726_v53 }
 0x2bc   : > { %v769_v63 = vpop.f32.mrf.mxu3 }
 0x2bd   : > { %v773_v0 = vpack.c.bf16 %v769_v63, %v769_v63  ;;  %v848_v25 = vpop.f32.mrf.mxu0 }
 0x2be   : > { %1232 = vst.msk [vmem:[%s1517_s20 + $0x288] sm:$0xff] %vm266_vm2, %v848_v25 }
 0x2bf   : > { %v775_v2 = vsel %vm184_vm0, %v773_v0, 0 }
 0x2c0   : > { %784 = vmatpush.bf16.msra.mxu3 %v775_v2 }
 0x2c2   : > { %v728_v56 = vpop.f32.mrf.mxu2 }
 0x2c3   : > { %1204 = vst.msk [vmem:[%s1517_s20 + $0x208] sm:$0xff] %vm266_vm2, %v728_v56  ;;  %1213 = vmatmul.msk.bf16.vlgmr.msra.gmra.mxu3 %vm180_vm1, %v1477_v7  ;;  %v906_v24 = vpop.f32.mrf.mxu1 }
 0x2c4   : > { %v771_v12 = vpop.f32.mrf.mxu3  ;;  %1245 = vst.msk [vmem:[%s1517_s20 + $0x2c0] sm:$0xff] %vm266_vm2, %v906_v24 }
 0x2c5   : > { %v851_v26 = vpop.f32.mrf.mxu0 }
 0x2c6   : > { %1233 = vst.msk [vmem:[%s1517_s20 + $0x290] sm:$0xff] %vm266_vm2, %v851_v26 }
 0x2ca   : > { %v731_v59 = vpop.f32.mrf.mxu2 }
 0x2cb   : > { %1205 = vst.msk [vmem:[%s1517_s20 + $0x210] sm:$0xff] %vm266_vm2, %v731_v59 }
 0x2cd   : > { %v853_v29 = vpop.f32.mrf.mxu0 }
 0x2ce   : > { %1234 = vst.msk [vmem:[%s1517_s20 + $0x298] sm:$0xff] %vm266_vm2, %v853_v29 }
 0x2d2   : > { %v733_v62 = vpop.f32.mrf.mxu2 }
 0x2d3   : > { %1206 = vst.msk [vmem:[%s1517_s20 + $0x218] sm:$0xff] %vm266_vm2, %v733_v62  ;;  %1214 = vmatmul.msk.bf16.gmra.mxu3 %vm180_vm1, %v1485_v9 }
 0x2d5   : > { %v856_v32 = vpop.f32.mrf.mxu0 }
 0x2d6   : > { %1235 = vst.msk [vmem:[%s1517_s20 + $0x2a0] sm:$0xff] %vm266_vm2, %v856_v32 }
 0x2da   : > { %v736_v8 = vpop.f32.mrf.mxu2 }
 0x2db   : > { %1207 = vst.msk [vmem:[%s1517_s20 + $0x220] sm:$0xff] %vm266_vm2, %v736_v8 }
 0x2dd   : > { %v858_v36 = vpop.f32.mrf.mxu0 }
 0x2de   : > { %1236 = vst.msk [vmem:[%s1517_s20 + $0x2a8] sm:$0xff] %vm266_vm2, %v858_v36 }
 0x2e2   : > { %v738_v17 = vpop.f32.mrf.mxu2 }
 0x2e3   : > { %1208 = vst.msk [vmem:[%s1517_s20 + $0x228] sm:$0xff] %vm266_vm2, %v738_v17  ;;  %1215 = vmatmul.msk.bf16.gmra.mxu3 %vm180_vm1, %v1492_v10 }
 0x2e5   : > { %v861_v40 = vpop.f32.mrf.mxu0 }
 0x2e6   : > { %1237 = vst.msk [vmem:[%s1517_s20 + $0x2b0] sm:$0xff] %vm266_vm2, %v861_v40 }
 0x2ea   : > { %v741_v18 = vpop.f32.mrf.mxu2 }
 0x2eb   : > { %1209 = vst.msk [vmem:[%s1517_s20 + $0x230] sm:$0xff] %vm266_vm2, %v741_v18 }
 0x2ed   : > { %v863_v44 = vpop.f32.mrf.mxu0 }
 0x2ee   : > { %1238 = vst.msk [vmem:[%s1517_s20 + $0x2b8] sm:$0xff] %vm266_vm2, %v863_v44 }
 0x2f2   : > { %v743_v19 = vpop.f32.mrf.mxu2 }
 0x2f3   : > { %1210 = vst.msk [vmem:[%s1517_s20 + $0x238] sm:$0xff] %vm266_vm2, %v743_v19  ;;  %1216 = vmatmul.msk.bf16.gmra.mxu3 %vm180_vm1, %v1499_v11 }
 0x2fa   : > { %v949_v20 = vpop.f32.mrf.mxu2 }
 0x2fb   : > { %v953_v21 = vpack.c.bf16 %v949_v20, %v949_v20 }
 0x2fd   : > { %v955_v22 = vsel %vm184_vm0, %v953_v21, 0 }
 0x2fe   : > { %964 = vmatpush.bf16.msra.mxu2 %v955_v22 }
 0x301   : > { %1255 = vmatmul.msk.bf16.vlgmr.msra.gmra.mxu2 %vm180_vm1, %v1477_v7 }
 0x302   : > { %v951_v1 = vpop.f32.mrf.mxu2 }
 0x311   : > { %1256 = vmatmul.msk.bf16.gmra.mxu2 %vm180_vm1, %v1485_v9 }
 0x321   : > { %1257 = vmatmul.msk.bf16.gmra.mxu2 %vm180_vm1, %v1492_v10  ;;  %v908_v10 = vpop.f32.mrf.mxu1 }
 0x322   : > { %1246 = vst.msk [vmem:[%s1517_s20 + $0x2c8] sm:$0xff] %vm266_vm2, %v908_v10 }
 0x329   : > { %v911_v27 = vpop.f32.mrf.mxu1 }
 0x32a   : > { %1247 = vst.msk [vmem:[%s1517_s20 + $0x2d0] sm:$0xff] %vm266_vm2, %v911_v27 }
 0x331   : > { %1258 = vmatmul.msk.bf16.gmra.mxu2 %vm180_vm1, %v1499_v11  ;;  %v913_v30 = vpop.f32.mrf.mxu1 }
 0x332   : > { %1248 = vst.msk [vmem:[%s1517_s20 + $0x2d8] sm:$0xff] %vm266_vm2, %v913_v30 }
 0x339   : > { %v916_v33 = vpop.f32.mrf.mxu1 }
 0x33a   : > { %1249 = vst.msk [vmem:[%s1517_s20 + $0x2e0] sm:$0xff] %vm266_vm2, %v916_v33 }
 0x341   : > { %v918_v37 = vpop.f32.mrf.mxu1 }
 0x342   : > { %1250 = vst.msk [vmem:[%s1517_s20 + $0x2e8] sm:$0xff] %vm266_vm2, %v918_v37 }
 0x346   : > { %v786_v7 = vpop.f32.mrf.mxu3 }
 0x347   : > { %1217 = vst.msk [vmem:[%s1517_s20 + $0x240] sm:$0xff] %vm266_vm2, %v786_v7 }
 0x349   : > { %v921_v41 = vpop.f32.mrf.mxu1 }
 0x34a   : > { %1251 = vst.msk [vmem:[%s1517_s20 + $0x2f0] sm:$0xff] %vm266_vm2, %v921_v41 }
 0x34e   : > { %v788_v9 = vpop.f32.mrf.mxu3 }
 0x34f   : > { %1218 = vst.msk [vmem:[%s1517_s20 + $0x248] sm:$0xff] %vm266_vm2, %v788_v9 }
 0x351   : > { %v923_v45 = vpop.f32.mrf.mxu1 }
 0x352   : > { %1252 = vst.msk [vmem:[%s1517_s20 + $0x2f8] sm:$0xff] %vm266_vm2, %v923_v45 }
 0x356   : > { %v791_v11 = vpop.f32.mrf.mxu3 }
 0x357   : > { %1219 = vst.msk [vmem:[%s1517_s20 + $0x250] sm:$0xff] %vm266_vm2, %v791_v11 }
 0x35e   : > { %v793_v28 = vpop.f32.mrf.mxu3 }
 0x35f   : > { %1220 = vst.msk [vmem:[%s1517_s20 + $0x258] sm:$0xff] %vm266_vm2, %v793_v28 }
 0x366   : > { %v796_v31 = vpop.f32.mrf.mxu3 }
 0x367   : > { %1221 = vst.msk [vmem:[%s1517_s20 + $0x260] sm:$0xff] %vm266_vm2, %v796_v31 }
 0x36e   : > { %v798_v35 = vpop.f32.mrf.mxu3 }
 0x36f   : > { %1222 = vst.msk [vmem:[%s1517_s20 + $0x268] sm:$0xff] %vm266_vm2, %v798_v35 }
 0x376   : > { %v801_v39 = vpop.f32.mrf.mxu3 }
 0x377   : > { %1223 = vst.msk [vmem:[%s1517_s20 + $0x270] sm:$0xff] %vm266_vm2, %v801_v39 }
 0x37e   : > { %v803_v43 = vpop.f32.mrf.mxu3 }
 0x37f   : > { %1224 = vst.msk [vmem:[%s1517_s20 + $0x278] sm:$0xff] %vm266_vm2, %v803_v43 }
 0x384   : > { %v966_v34 = vpop.f32.mrf.mxu2 }
 0x385   : > { %1259 = vst.msk [vmem:[%s1517_s20 + $0x300] sm:$0xff] %vm266_vm2, %v966_v34 }
 0x38c   : > { %v968_v38 = vpop.f32.mrf.mxu2 }
 0x38d   : > { %1260 = vst.msk [vmem:[%s1517_s20 + $0x308] sm:$0xff] %vm266_vm2, %v968_v38 }
 0x394   : > { %v971_v42 = vpop.f32.mrf.mxu2 }
 0x395   : > { %1261 = vst.msk [vmem:[%s1517_s20 + $0x310] sm:$0xff] %vm266_vm2, %v971_v42 }
 0x39c   : > { %v973_v46 = vpop.f32.mrf.mxu2 }
 0x39d   : > { %1262 = vst.msk [vmem:[%s1517_s20 + $0x318] sm:$0xff] %vm266_vm2, %v973_v46 }
 0x3a4   : > { %v976_v47 = vpop.f32.mrf.mxu2 }
 0x3a5   : > { %1263 = vst.msk [vmem:[%s1517_s20 + $0x320] sm:$0xff] %vm266_vm2, %v976_v47 }
 0x3ac   : > { %v978_v48 = vpop.f32.mrf.mxu2 }
 0x3ad   : > { %1264 = vst.msk [vmem:[%s1517_s20 + $0x328] sm:$0xff] %vm266_vm2, %v978_v48 }
 0x3b4   : > { %v981_v49 = vpop.f32.mrf.mxu2 }
 0x3b5   : > { %1265 = vst.msk [vmem:[%s1517_s20 + $0x330] sm:$0xff] %vm266_vm2, %v981_v49 }
 0x3bc   : > { %v983_v50 = vpop.f32.mrf.mxu2 }
 0x3bd   : > { %1266 = vst.msk [vmem:[%s1517_s20 + $0x338] sm:$0xff] %vm266_vm2, %v983_v50 }
 0x3be   : > { %1345 = shalt.err (!%p1342_p3)
}
 0x3bf   : > { %s1382_s10 = smov 128   ;;  %s1383_s11 = smov 8  }
 0x3c0   : > { %1277 = dma.vmem_to_hbm [thread:$0]  (%p1442_p5), %s1009_s28, 13312, %s1011_s29, %s996_s30, %s1382_s10, %s1382_s10, %s1383_s11  }
 0x3c1 PF: > { %p1283_p4 = scmp.ge.s32.totalorder %s1380_s15, 2  ;;  %s1025_s17 = sand.u32 1, %s1368_s12  }
 0x3c2   : > { %s1026_s19 = scalar_lea.sflag [#allocation3], %s1025_s17 }
 0x3c3   : > { %p1280_p7 = pnand %p1283_p4, %p1446_p6 }
 0x3c5   : > { %p1281_p8 = pneg %p1280_p7 }
 0x3c7   : > { %1363 = dma.done.wait (%p1281_p8), %s1026_s19, 13312  }
 0x3c8   : > { %1365 = vsyncadd (%p1281_p8), %s1026_s19, 4294953984  ;;  %p13_p9 = scmp.ge.s32.totalorder %s1429_s18, 4   ;;  %s1894_s12 = smov %s1372_s13 }
 0x3c9   : > { %s1895_s13 = smov %s1376_s14  ;;  %s1896_s14 = smov %s1440_s21 }
 0x3ca   : > { %s1897_s15 = smov %s1429_s18  ;;  %15 = sbr.rel (!%p13_p9) target bundleno = 3 (0x3), region = 91 }
 0x3cf   :  { %1032 = vsyncpa [#allocation3], 1 }
 0x3d0   :  { %1034 = vsyncpa [#allocation3 + $0x1], 1 }

</bundles_post_ra>
